<compile_context>
chip_gen: v5e
topology: v5e:2x2
jax: 0.10.0
libtpu: 0.0.40
codegen_flags: <defaults>
</compile_context>

<pallas_src>
import functools

import jax
import jax.numpy as jnp
from jax.experimental import pallas as pl
from jax.experimental.pallas import tpu as pltpu


def sa_kernel(x_ref, wax_ref, wah_ref, was_ref, ab_ref, wcat_ref, bg_ref,
              xt_out_ref, enc_out_ref, *, n_sub):
    bb, T, I = x_ref.shape            # batch-block, time steps, input series
    H = wah_ref.shape[1]
    sb = bb // n_sub                  # rows per independent sub-tile

    # ---- hoist everything loop-invariant out of the recurrence ------------
    xf = x_ref[...]                                        # (bb, T, I), read once
    wax = wax_ref[...]                                     # (T, 1)
    # logit_x[b, i] = sum_t wa_x[t] * X[b, t, i]   (does NOT depend on t)
    # attention bias is folded in once instead of being added every step.
    logit_x = jnp.sum(xf * wax[None, :, :], axis=1) + ab_ref[...]   # (bb, I)
    wcat = wcat_ref[...]                                   # (I+H, 4H) fused weights

    # pre-broadcast once (loop is unrolled; broadcasts are not CSE'd)
    wah_b = jnp.broadcast_to(wah_ref[...], (sb, H))
    was_b = jnp.broadcast_to(was_ref[...], (sb, H))
    bg_b = jnp.broadcast_to(bg_ref[...], (sb, 4 * H))

    # independent per-sub-tile recurrent state (chains interleave in the VLIW)
    hs = [jnp.zeros((sb, H), jnp.float32) for _ in range(n_sub)]
    cs = [jnp.zeros((sb, H), jnp.float32) for _ in range(n_sub)]
    lx = [logit_x[k * sb:(k + 1) * sb, :] for k in range(n_sub)]
    xts = [[] for _ in range(n_sub)]
    encs = [[] for _ in range(n_sub)]

    for t in range(T):
        for k in range(n_sub):
            h, c = hs[k], cs[k]
            # ---- input attention (VPU multiply + lane reduce, no MXU) -----
            logit_hs = jnp.sum(h * wah_b + c * was_b, axis=1, keepdims=True)
            logits = lx[k] + logit_hs                      # (sb, I)
            m = jnp.max(logits, axis=1, keepdims=True)
            e = jnp.exp(logits - m)
            denom = jnp.sum(e, axis=1, keepdims=True)
            alpha = e / denom                              # exact softmax
            x_tilde = alpha * xf[k * sb:(k + 1) * sb, t, :]  # (sb, I)

            # ---- one LSTM cell step: single fused (I+H, 4H) matmul --------
            xin = jnp.concatenate([x_tilde, h], axis=1)    # (sb, I+H)
            gates = jnp.dot(xin, wcat,
                            preferred_element_type=jnp.float32) + bg_b
            i_g = jax.nn.sigmoid(gates[:, 0 * H:1 * H])
            f_g = jax.nn.sigmoid(gates[:, 1 * H:2 * H])
            g_g = jnp.tanh(gates[:, 2 * H:3 * H])
            o_g = jax.nn.sigmoid(gates[:, 3 * H:4 * H])
            c = f_g * c + i_g * g_g
            h = o_g * jnp.tanh(c)
            hs[k], cs[k] = h, c
            xts[k].append(x_tilde)
            encs[k].append(h)

    # ---- single lane-dense store per output (T*I and T*H lanes) -----------
    xt_full = jnp.concatenate(
        [jnp.concatenate(xts[k], axis=1) for k in range(n_sub)], axis=0)
    enc_full = jnp.concatenate(
        [jnp.concatenate(encs[k], axis=1) for k in range(n_sub)], axis=0)
    xt_out_ref[...] = xt_full.astype(xt_out_ref.dtype)
    enc_out_ref[...] = enc_full.astype(enc_out_ref.dtype)


@functools.partial(jax.jit, static_argnames=("batch_block",))
def sa_pallas(X, wax, wah, was, ab, wih, whh, bg, *, batch_block=None):
    B, T, I = X.shape
    H = wah.shape[1]
    bb = B if batch_block is None else batch_block
    assert B % bb == 0, "batch must divide evenly into batch blocks"

    # Interleave independent 8-row sub-tiles inside each time step when the
    # block is big enough (fills VLIW slots on the latency-bound chain).
    n_sub = 1
    for cand in (4, 2):
        if bb % cand == 0 and (bb // cand) % 8 == 0:
            n_sub = cand
            break

    # Loop-invariant fusion of the two LSTM weight matrices (done once, in HLO).
    wcat = jnp.concatenate([wih, whh], axis=0)             # (I+H, 4H)

    xt, enc = pl.pallas_call(
        functools.partial(sa_kernel, n_sub=n_sub),
        out_shape=(jax.ShapeDtypeStruct((B, T * I), jnp.float32),
                   jax.ShapeDtypeStruct((B, T * H), jnp.float32)),
        grid=(B // bb,),
        in_specs=[
            pl.BlockSpec((bb, T, I), lambda b: (b, 0, 0)),   # X (batch-major)
            pl.BlockSpec((T, 1), lambda b: (0, 0)),          # attn weight, X part
            pl.BlockSpec((1, H), lambda b: (0, 0)),          # attn weight, h part
            pl.BlockSpec((1, H), lambda b: (0, 0)),          # attn weight, s part
            pl.BlockSpec((1, 1), lambda b: (0, 0)),          # attn bias
            pl.BlockSpec((I + H, 4 * H), lambda b: (0, 0)),  # fused [W_ih^T; W_hh^T]
            pl.BlockSpec((1, 4 * H), lambda b: (0, 0)),      # fused b_ih + b_hh
        ],
        out_specs=(
            pl.BlockSpec((bb, T * I), lambda b: (b, 0)),     # lane-dense X_tilde slab
            pl.BlockSpec((bb, T * H), lambda b: (b, 0)),     # lane-dense X_encoded slab
        ),
        compiler_params=pltpu.CompilerParams(
            dimension_semantics=("parallel",)),              # batch blocks independent
    )(X, wax, wah, was, ab, wcat, bg)
    # Free reshapes back to the module's (B, T, I) / (B, T, H) layout.
    return xt.reshape(B, T, I), enc.reshape(B, T, H)


def sa_reference(X, wax, wah, was, ab, wih, whh, bg):
    """Pure-JAX reference mirroring the PyTorch forward exactly."""
    B, T, I = X.shape
    H = wah.shape[1]
    h = jnp.zeros((B, H), jnp.float32)
    c = jnp.zeros((B, H), jnp.float32)
    # PyTorch recomputes this every step; it is loop-invariant.
    logit_x = jnp.einsum('bti,t->bi', X, wax[:, 0])
    xts, encs = [], []
    for t in range(T):
        logit_hs = jnp.sum(h * wah + c * was, axis=1, keepdims=True) + ab
        alpha = jax.nn.softmax(logit_x + logit_hs, axis=1)
        x_tilde = alpha * X[:, t, :]
        gates = x_tilde @ wih + h @ whh + bg
        i_g = jax.nn.sigmoid(gates[:, 0 * H:1 * H])
        f_g = jax.nn.sigmoid(gates[:, 1 * H:2 * H])
        g_g = jnp.tanh(gates[:, 2 * H:3 * H])
        o_g = jax.nn.sigmoid(gates[:, 3 * H:4 * H])
        c = f_g * c + i_g * g_g
        h = o_g * jnp.tanh(c)
        xts.append(x_tilde)
        encs.append(h)
    return jnp.stack(xts, axis=1), jnp.stack(encs, axis=1)


def init_params(key, T, input_size, hidden):
    """Deterministic synthetic parameters (PyTorch-default-style uniform init)."""
    k_attn, k_ab, k_wih, k_whh, k_bih, k_bhh = jax.random.split(key, 6)
    attn_in = 2 * hidden + T
    ka = 1.0 / jnp.sqrt(attn_in)
    attn_w = jax.random.uniform(k_attn, (attn_in,), jnp.float32, -ka, ka)
    attn_b = jax.random.uniform(k_ab, (1, 1), jnp.float32, -ka, ka)
    kl = 1.0 / jnp.sqrt(hidden)
    W_ih = jax.random.uniform(k_wih, (4 * hidden, input_size), jnp.float32, -kl, kl)
    W_hh = jax.random.uniform(k_whh, (4 * hidden, hidden), jnp.float32, -kl, kl)
    b_ih = jax.random.uniform(k_bih, (4 * hidden,), jnp.float32, -kl, kl)
    b_hh = jax.random.uniform(k_bhh, (4 * hidden,), jnp.float32, -kl, kl)

    # split attention weight: [h-part (H), s-part (H), X-part (T)]
    wah = attn_w[:hidden].reshape(1, hidden)
    was = attn_w[hidden:2 * hidden].reshape(1, hidden)
    wax = attn_w[2 * hidden:].reshape(T, 1)
    # transposed LSTM weights: columns are gate blocks (i, f, g, o)
    wih = W_ih.T                                   # (I, 4H)
    whh = W_hh.T                                   # (H, 4H)
    bg = (b_ih + b_hh).reshape(1, 4 * hidden)      # (1, 4H)
    return wax, wah, was, attn_b, wih, whh, bg


if __name__ == "__main__":
    # batch, time steps, input_size (driving series), hidden
    B, T, I, H = 32, 8, 16, 32

    key = jax.random.PRNGKey(0)
    k_x, k_p = jax.random.split(key)
    X = jax.random.normal(k_x, (B, T, I), jnp.float32)
    params = init_params(k_p, T, I, H)

    # batch_block=16 -> grid=(2,): fills f32 sublanes per block and gives
    # v7x's two TensorCores one block each; 2x 8-row sub-tiles interleave.
    X_tilde, X_encoded = sa_pallas(X, *params, batch_block=16)
    jax.block_until_ready((X_tilde, X_encoded))

    ref_xt, ref_enc = sa_reference(X, *params)
    assert X_tilde.shape == (B, T, I) and X_encoded.shape == (B, T, H)
    assert jnp.allclose(X_tilde, ref_xt, atol=1e-3, rtol=1e-3), \
        float(jnp.max(jnp.abs(X_tilde - ref_xt)))
    assert jnp.allclose(X_encoded, ref_enc, atol=1e-3, rtol=1e-3), \
        float(jnp.max(jnp.abs(X_encoded - ref_enc)))

    print("KERNEL_OK")
</pallas_src>

<mosaic_0001>
module attributes {stable_mosaic.version = 11 : i64} {
  func.func @sa_kernel(%arg0: i32, %arg1: memref<16x8x16xf32, #tpu.memory_space<vmem>>, %arg2: memref<8x1xf32, #tpu.memory_space<vmem>>, %arg3: memref<1x32xf32, #tpu.memory_space<vmem>>, %arg4: memref<1x32xf32, #tpu.memory_space<vmem>>, %arg5: memref<1x1xf32, #tpu.memory_space<vmem>>, %arg6: memref<48x128xf32, #tpu.memory_space<vmem>>, %arg7: memref<1x128xf32, #tpu.memory_space<vmem>>, %arg8: memref<16x128xf32, #tpu.memory_space<vmem>>, %arg9: memref<16x256xf32, #tpu.memory_space<vmem>>) attributes {dimension_semantics = [#tpu.dimension_semantics<parallel>], iteration_bounds = array<i64: 2>, scalar_prefetch = 0 : i64, scratch_operands = 0 : i64, tpu.core_type = #tpu.core_type<tc>, window_params = [{transform_indices = @transform_0, window_bounds = array<i64: 16, 8, 16>}, {pipeline_mode = #tpu.pipeline_mode<synchronous>, transform_indices = @transform_1, window_bounds = array<i64: 8, 1>}, {pipeline_mode = #tpu.pipeline_mode<synchronous>, transform_indices = @transform_2, window_bounds = array<i64: 1, 32>}, {pipeline_mode = #tpu.pipeline_mode<synchronous>, transform_indices = @transform_3, window_bounds = array<i64: 1, 32>}, {pipeline_mode = #tpu.pipeline_mode<synchronous>, transform_indices = @transform_4, window_bounds = array<i64: 1, 1>}, {pipeline_mode = #tpu.pipeline_mode<synchronous>, transform_indices = @transform_5, window_bounds = array<i64: 48, 128>}, {pipeline_mode = #tpu.pipeline_mode<synchronous>, transform_indices = @transform_6, window_bounds = array<i64: 1, 128>}, {transform_indices = @transform_7, window_bounds = array<i64: 16, 128>}, {transform_indices = @transform_8, window_bounds = array<i64: 16, 256>}]} {
    %c0 = arith.constant 0 : index
    %c0_0 = arith.constant 0 : index
    %c0_1 = arith.constant 0 : index
    %0 = vector.load %arg1[%c0, %c0_0, %c0_1] : memref<16x8x16xf32, #tpu.memory_space<vmem>>, vector<16x8x16xf32>
    %c0_2 = arith.constant 0 : index
    %c0_3 = arith.constant 0 : index
    %1 = vector.load %arg2[%c0_2, %c0_3] : memref<8x1xf32, #tpu.memory_space<vmem>>, vector<8x1xf32>
    %2 = vector.shape_cast %1 : vector<8x1xf32> to vector<1x8x1xf32>
    %3 = vector.broadcast %2 : vector<1x8x1xf32> to vector<16x8x16xf32>
    %4 = arith.mulf %0, %3 : vector<16x8x16xf32>
    %cst = arith.constant dense<0.000000e+00> : vector<16x16xf32>
    %5 = vector.multi_reduction <add>, %4, %cst [1] : vector<16x8x16xf32> to vector<16x16xf32>
    %c0_4 = arith.constant 0 : index
    %c0_5 = arith.constant 0 : index
    %6 = vector.load %arg5[%c0_4, %c0_5] : memref<1x1xf32, #tpu.memory_space<vmem>>, vector<1x1xf32>
    %7 = vector.broadcast %6 : vector<1x1xf32> to vector<16x16xf32>
    %8 = arith.addf %5, %7 : vector<16x16xf32>
    %c0_6 = arith.constant 0 : index
    %c0_7 = arith.constant 0 : index
    %9 = vector.load %arg6[%c0_6, %c0_7] : memref<48x128xf32, #tpu.memory_space<vmem>>, vector<48x128xf32>
    %c0_8 = arith.constant 0 : index
    %c0_9 = arith.constant 0 : index
    %10 = vector.load %arg3[%c0_8, %c0_9] : memref<1x32xf32, #tpu.memory_space<vmem>>, vector<1x32xf32>
    %11 = vector.shape_cast %10 : vector<1x32xf32> to vector<1x32xf32>
    %12 = vector.broadcast %11 : vector<1x32xf32> to vector<8x32xf32>
    %c0_10 = arith.constant 0 : index
    %c0_11 = arith.constant 0 : index
    %13 = vector.load %arg4[%c0_10, %c0_11] : memref<1x32xf32, #tpu.memory_space<vmem>>, vector<1x32xf32>
    %14 = vector.shape_cast %13 : vector<1x32xf32> to vector<1x32xf32>
    %15 = vector.broadcast %14 : vector<1x32xf32> to vector<8x32xf32>
    %c0_12 = arith.constant 0 : index
    %c0_13 = arith.constant 0 : index
    %16 = vector.load %arg7[%c0_12, %c0_13] : memref<1x128xf32, #tpu.memory_space<vmem>>, vector<1x128xf32>
    %17 = vector.shape_cast %16 : vector<1x128xf32> to vector<1x128xf32>
    %18 = vector.broadcast %17 : vector<1x128xf32> to vector<8x128xf32>
    %cst_14 = arith.constant 0.000000e+00 : f32
    %19 = vector.broadcast %cst_14 : f32 to vector<8x32xf32>
    %cst_15 = arith.constant 0.000000e+00 : f32
    %20 = vector.broadcast %cst_15 : f32 to vector<8x32xf32>
    %cst_16 = arith.constant 0.000000e+00 : f32
    %21 = vector.broadcast %cst_16 : f32 to vector<8x32xf32>
    %cst_17 = arith.constant 0.000000e+00 : f32
    %22 = vector.broadcast %cst_17 : f32 to vector<8x32xf32>
    %23 = vector.extract_strided_slice %8 {offsets = [0, 0], sizes = [8, 16], strides = [1, 1]} : vector<16x16xf32> to vector<8x16xf32>
    %24 = vector.extract_strided_slice %8 {offsets = [8, 0], sizes = [8, 16], strides = [1, 1]} : vector<16x16xf32> to vector<8x16xf32>
    %25 = arith.mulf %19, %12 : vector<8x32xf32>
    %26 = arith.mulf %21, %15 : vector<8x32xf32>
    %27 = arith.addf %25, %26 : vector<8x32xf32>
    %cst_18 = arith.constant dense<0.000000e+00> : vector<8xf32>
    %28 = vector.multi_reduction <add>, %27, %cst_18 [1] : vector<8x32xf32> to vector<8xf32>
    %29 = vector.shape_cast %28 : vector<8xf32> to vector<8x1xf32>
    %30 = vector.broadcast %29 : vector<8x1xf32> to vector<8x16xf32>
    %31 = arith.addf %23, %30 : vector<8x16xf32>
    %cst_19 = arith.constant dense<0xFF800000> : vector<8xf32>
    %32 = vector.multi_reduction <maximumf>, %31, %cst_19 [1] : vector<8x16xf32> to vector<8xf32>
    %33 = vector.shape_cast %32 : vector<8xf32> to vector<8x1xf32>
    %34 = vector.broadcast %33 : vector<8x1xf32> to vector<8x16xf32>
    %35 = arith.subf %31, %34 : vector<8x16xf32>
    %36 = math.exp %35 : vector<8x16xf32>
    %cst_20 = arith.constant dense<0.000000e+00> : vector<8xf32>
    %37 = vector.multi_reduction <add>, %36, %cst_20 [1] : vector<8x16xf32> to vector<8xf32>
    %38 = vector.shape_cast %37 : vector<8xf32> to vector<8x1xf32>
    %39 = vector.broadcast %38 : vector<8x1xf32> to vector<8x16xf32>
    %40 = arith.divf %36, %39 : vector<8x16xf32>
    %41 = vector.extract_strided_slice %0 {offsets = [0, 0, 0], sizes = [8, 1, 16], strides = [1, 1, 1]} : vector<16x8x16xf32> to vector<8x1x16xf32>
    %42 = vector.shape_cast %41 : vector<8x1x16xf32> to vector<8x16xf32>
    %43 = arith.mulf %40, %42 : vector<8x16xf32>
    %44 = tpu.concatenate %43, %19 in 1 : vector<8x16xf32>, vector<8x32xf32> -> vector<8x48xf32>
    %cst_21 = arith.constant dense<0.000000e+00> : vector<8x128xf32>
    %45 = tpu.matmul %44, %9, %cst_21 {dimension_numbers = #tpu.dot_dimension_numbers<[1], [0], [0], [1], [0, 0, 1, 1], [], []>} : vector<8x48xf32>, vector<48x128xf32>, vector<8x128xf32> -> vector<8x128xf32>
    %46 = arith.addf %45, %18 : vector<8x128xf32>
    %47 = vector.extract_strided_slice %46 {offsets = [0, 0], sizes = [8, 32], strides = [1, 1]} : vector<8x128xf32> to vector<8x32xf32>
    %48 = arith.negf %47 : vector<8x32xf32>
    %49 = math.exp %48 : vector<8x32xf32>
    %cst_22 = arith.constant 1.000000e+00 : f32
    %50 = vector.broadcast %cst_22 : f32 to vector<8x32xf32>
    %51 = arith.addf %50, %49 : vector<8x32xf32>
    %52 = arith.divf %50, %51 : vector<8x32xf32>
    %53 = vector.extract_strided_slice %46 {offsets = [0, 32], sizes = [8, 32], strides = [1, 1]} : vector<8x128xf32> to vector<8x32xf32>
    %54 = arith.negf %53 : vector<8x32xf32>
    %55 = math.exp %54 : vector<8x32xf32>
    %cst_23 = arith.constant 1.000000e+00 : f32
    %56 = vector.broadcast %cst_23 : f32 to vector<8x32xf32>
    %57 = arith.addf %56, %55 : vector<8x32xf32>
    %58 = arith.divf %56, %57 : vector<8x32xf32>
    %59 = vector.extract_strided_slice %46 {offsets = [0, 64], sizes = [8, 32], strides = [1, 1]} : vector<8x128xf32> to vector<8x32xf32>
    %60 = math.tanh %59 : vector<8x32xf32>
    %61 = vector.extract_strided_slice %46 {offsets = [0, 96], sizes = [8, 32], strides = [1, 1]} : vector<8x128xf32> to vector<8x32xf32>
    %62 = arith.negf %61 : vector<8x32xf32>
    %63 = math.exp %62 : vector<8x32xf32>
    %cst_24 = arith.constant 1.000000e+00 : f32
    %64 = vector.broadcast %cst_24 : f32 to vector<8x32xf32>
    %65 = arith.addf %64, %63 : vector<8x32xf32>
    %66 = arith.divf %64, %65 : vector<8x32xf32>
    %67 = arith.mulf %58, %21 : vector<8x32xf32>
    %68 = arith.mulf %52, %60 : vector<8x32xf32>
    %69 = arith.addf %67, %68 : vector<8x32xf32>
    %70 = math.tanh %69 : vector<8x32xf32>
    %71 = arith.mulf %66, %70 : vector<8x32xf32>
    %72 = arith.mulf %20, %12 : vector<8x32xf32>
    %73 = arith.mulf %22, %15 : vector<8x32xf32>
    %74 = arith.addf %72, %73 : vector<8x32xf32>
    %cst_25 = arith.constant dense<0.000000e+00> : vector<8xf32>
    %75 = vector.multi_reduction <add>, %74, %cst_25 [1] : vector<8x32xf32> to vector<8xf32>
    %76 = vector.shape_cast %75 : vector<8xf32> to vector<8x1xf32>
    %77 = vector.broadcast %76 : vector<8x1xf32> to vector<8x16xf32>
    %78 = arith.addf %24, %77 : vector<8x16xf32>
    %cst_26 = arith.constant dense<0xFF800000> : vector<8xf32>
    %79 = vector.multi_reduction <maximumf>, %78, %cst_26 [1] : vector<8x16xf32> to vector<8xf32>
    %80 = vector.shape_cast %79 : vector<8xf32> to vector<8x1xf32>
    %81 = vector.broadcast %80 : vector<8x1xf32> to vector<8x16xf32>
    %82 = arith.subf %78, %81 : vector<8x16xf32>
    %83 = math.exp %82 : vector<8x16xf32>
    %cst_27 = arith.constant dense<0.000000e+00> : vector<8xf32>
    %84 = vector.multi_reduction <add>, %83, %cst_27 [1] : vector<8x16xf32> to vector<8xf32>
    %85 = vector.shape_cast %84 : vector<8xf32> to vector<8x1xf32>
    %86 = vector.broadcast %85 : vector<8x1xf32> to vector<8x16xf32>
    %87 = arith.divf %83, %86 : vector<8x16xf32>
    %88 = vector.extract_strided_slice %0 {offsets = [8, 0, 0], sizes = [8, 1, 16], strides = [1, 1, 1]} : vector<16x8x16xf32> to vector<8x1x16xf32>
    %89 = vector.shape_cast %88 : vector<8x1x16xf32> to vector<8x16xf32>
    %90 = arith.mulf %87, %89 : vector<8x16xf32>
    %91 = tpu.concatenate %90, %20 in 1 : vector<8x16xf32>, vector<8x32xf32> -> vector<8x48xf32>
    %cst_28 = arith.constant dense<0.000000e+00> : vector<8x128xf32>
    %92 = tpu.matmul %91, %9, %cst_28 {dimension_numbers = #tpu.dot_dimension_numbers<[1], [0], [0], [1], [0, 0, 1, 1], [], []>} : vector<8x48xf32>, vector<48x128xf32>, vector<8x128xf32> -> vector<8x128xf32>
    %93 = arith.addf %92, %18 : vector<8x128xf32>
    %94 = vector.extract_strided_slice %93 {offsets = [0, 0], sizes = [8, 32], strides = [1, 1]} : vector<8x128xf32> to vector<8x32xf32>
    %95 = arith.negf %94 : vector<8x32xf32>
    %96 = math.exp %95 : vector<8x32xf32>
    %cst_29 = arith.constant 1.000000e+00 : f32
    %97 = vector.broadcast %cst_29 : f32 to vector<8x32xf32>
    %98 = arith.addf %97, %96 : vector<8x32xf32>
    %99 = arith.divf %97, %98 : vector<8x32xf32>
    %100 = vector.extract_strided_slice %93 {offsets = [0, 32], sizes = [8, 32], strides = [1, 1]} : vector<8x128xf32> to vector<8x32xf32>
    %101 = arith.negf %100 : vector<8x32xf32>
    %102 = math.exp %101 : vector<8x32xf32>
    %cst_30 = arith.constant 1.000000e+00 : f32
    %103 = vector.broadcast %cst_30 : f32 to vector<8x32xf32>
    %104 = arith.addf %103, %102 : vector<8x32xf32>
    %105 = arith.divf %103, %104 : vector<8x32xf32>
    %106 = vector.extract_strided_slice %93 {offsets = [0, 64], sizes = [8, 32], strides = [1, 1]} : vector<8x128xf32> to vector<8x32xf32>
    %107 = math.tanh %106 : vector<8x32xf32>
    %108 = vector.extract_strided_slice %93 {offsets = [0, 96], sizes = [8, 32], strides = [1, 1]} : vector<8x128xf32> to vector<8x32xf32>
    %109 = arith.negf %108 : vector<8x32xf32>
    %110 = math.exp %109 : vector<8x32xf32>
    %cst_31 = arith.constant 1.000000e+00 : f32
    %111 = vector.broadcast %cst_31 : f32 to vector<8x32xf32>
    %112 = arith.addf %111, %110 : vector<8x32xf32>
    %113 = arith.divf %111, %112 : vector<8x32xf32>
    %114 = arith.mulf %105, %22 : vector<8x32xf32>
    %115 = arith.mulf %99, %107 : vector<8x32xf32>
    %116 = arith.addf %114, %115 : vector<8x32xf32>
    %117 = math.tanh %116 : vector<8x32xf32>
    %118 = arith.mulf %113, %117 : vector<8x32xf32>
    %119 = arith.mulf %71, %12 : vector<8x32xf32>
    %120 = arith.mulf %69, %15 : vector<8x32xf32>
    %121 = arith.addf %119, %120 : vector<8x32xf32>
    %cst_32 = arith.constant dense<0.000000e+00> : vector<8xf32>
    %122 = vector.multi_reduction <add>, %121, %cst_32 [1] : vector<8x32xf32> to vector<8xf32>
    %123 = vector.shape_cast %122 : vector<8xf32> to vector<8x1xf32>
    %124 = vector.broadcast %123 : vector<8x1xf32> to vector<8x16xf32>
    %125 = arith.addf %23, %124 : vector<8x16xf32>
    %cst_33 = arith.constant dense<0xFF800000> : vector<8xf32>
    %126 = vector.multi_reduction <maximumf>, %125, %cst_33 [1] : vector<8x16xf32> to vector<8xf32>
    %127 = vector.shape_cast %126 : vector<8xf32> to vector<8x1xf32>
    %128 = vector.broadcast %127 : vector<8x1xf32> to vector<8x16xf32>
    %129 = arith.subf %125, %128 : vector<8x16xf32>
    %130 = math.exp %129 : vector<8x16xf32>
    %cst_34 = arith.constant dense<0.000000e+00> : vector<8xf32>
    %131 = vector.multi_reduction <add>, %130, %cst_34 [1] : vector<8x16xf32> to vector<8xf32>
    %132 = vector.shape_cast %131 : vector<8xf32> to vector<8x1xf32>
    %133 = vector.broadcast %132 : vector<8x1xf32> to vector<8x16xf32>
    %134 = arith.divf %130, %133 : vector<8x16xf32>
    %135 = vector.extract_strided_slice %0 {offsets = [0, 1, 0], sizes = [8, 1, 16], strides = [1, 1, 1]} : vector<16x8x16xf32> to vector<8x1x16xf32>
    %136 = vector.shape_cast %135 : vector<8x1x16xf32> to vector<8x16xf32>
    %137 = arith.mulf %134, %136 : vector<8x16xf32>
    %138 = tpu.concatenate %137, %71 in 1 : vector<8x16xf32>, vector<8x32xf32> -> vector<8x48xf32>
    %cst_35 = arith.constant dense<0.000000e+00> : vector<8x128xf32>
    %139 = tpu.matmul %138, %9, %cst_35 {dimension_numbers = #tpu.dot_dimension_numbers<[1], [0], [0], [1], [0, 0, 1, 1], [], []>} : vector<8x48xf32>, vector<48x128xf32>, vector<8x128xf32> -> vector<8x128xf32>
    %140 = arith.addf %139, %18 : vector<8x128xf32>
    %141 = vector.extract_strided_slice %140 {offsets = [0, 0], sizes = [8, 32], strides = [1, 1]} : vector<8x128xf32> to vector<8x32xf32>
    %142 = arith.negf %141 : vector<8x32xf32>
    %143 = math.exp %142 : vector<8x32xf32>
    %cst_36 = arith.constant 1.000000e+00 : f32
    %144 = vector.broadcast %cst_36 : f32 to vector<8x32xf32>
    %145 = arith.addf %144, %143 : vector<8x32xf32>
    %146 = arith.divf %144, %145 : vector<8x32xf32>
    %147 = vector.extract_strided_slice %140 {offsets = [0, 32], sizes = [8, 32], strides = [1, 1]} : vector<8x128xf32> to vector<8x32xf32>
    %148 = arith.negf %147 : vector<8x32xf32>
    %149 = math.exp %148 : vector<8x32xf32>
    %cst_37 = arith.constant 1.000000e+00 : f32
    %150 = vector.broadcast %cst_37 : f32 to vector<8x32xf32>
    %151 = arith.addf %150, %149 : vector<8x32xf32>
    %152 = arith.divf %150, %151 : vector<8x32xf32>
    %153 = vector.extract_strided_slice %140 {offsets = [0, 64], sizes = [8, 32], strides = [1, 1]} : vector<8x128xf32> to vector<8x32xf32>
    %154 = math.tanh %153 : vector<8x32xf32>
    %155 = vector.extract_strided_slice %140 {offsets = [0, 96], sizes = [8, 32], strides = [1, 1]} : vector<8x128xf32> to vector<8x32xf32>
    %156 = arith.negf %155 : vector<8x32xf32>
    %157 = math.exp %156 : vector<8x32xf32>
    %cst_38 = arith.constant 1.000000e+00 : f32
    %158 = vector.broadcast %cst_38 : f32 to vector<8x32xf32>
    %159 = arith.addf %158, %157 : vector<8x32xf32>
    %160 = arith.divf %158, %159 : vector<8x32xf32>
    %161 = arith.mulf %152, %69 : vector<8x32xf32>
    %162 = arith.mulf %146, %154 : vector<8x32xf32>
    %163 = arith.addf %161, %162 : vector<8x32xf32>
    %164 = math.tanh %163 : vector<8x32xf32>
    %165 = arith.mulf %160, %164 : vector<8x32xf32>
    %166 = arith.mulf %118, %12 : vector<8x32xf32>
    %167 = arith.mulf %116, %15 : vector<8x32xf32>
    %168 = arith.addf %166, %167 : vector<8x32xf32>
    %cst_39 = arith.constant dense<0.000000e+00> : vector<8xf32>
    %169 = vector.multi_reduction <add>, %168, %cst_39 [1] : vector<8x32xf32> to vector<8xf32>
    %170 = vector.shape_cast %169 : vector<8xf32> to vector<8x1xf32>
    %171 = vector.broadcast %170 : vector<8x1xf32> to vector<8x16xf32>
    %172 = arith.addf %24, %171 : vector<8x16xf32>
    %cst_40 = arith.constant dense<0xFF800000> : vector<8xf32>
    %173 = vector.multi_reduction <maximumf>, %172, %cst_40 [1] : vector<8x16xf32> to vector<8xf32>
    %174 = vector.shape_cast %173 : vector<8xf32> to vector<8x1xf32>
    %175 = vector.broadcast %174 : vector<8x1xf32> to vector<8x16xf32>
    %176 = arith.subf %172, %175 : vector<8x16xf32>
    %177 = math.exp %176 : vector<8x16xf32>
    %cst_41 = arith.constant dense<0.000000e+00> : vector<8xf32>
    %178 = vector.multi_reduction <add>, %177, %cst_41 [1] : vector<8x16xf32> to vector<8xf32>
    %179 = vector.shape_cast %178 : vector<8xf32> to vector<8x1xf32>
    %180 = vector.broadcast %179 : vector<8x1xf32> to vector<8x16xf32>
    %181 = arith.divf %177, %180 : vector<8x16xf32>
    %182 = vector.extract_strided_slice %0 {offsets = [8, 1, 0], sizes = [8, 1, 16], strides = [1, 1, 1]} : vector<16x8x16xf32> to vector<8x1x16xf32>
    %183 = vector.shape_cast %182 : vector<8x1x16xf32> to vector<8x16xf32>
    %184 = arith.mulf %181, %183 : vector<8x16xf32>
    %185 = tpu.concatenate %184, %118 in 1 : vector<8x16xf32>, vector<8x32xf32> -> vector<8x48xf32>
    %cst_42 = arith.constant dense<0.000000e+00> : vector<8x128xf32>
    %186 = tpu.matmul %185, %9, %cst_42 {dimension_numbers = #tpu.dot_dimension_numbers<[1], [0], [0], [1], [0, 0, 1, 1], [], []>} : vector<8x48xf32>, vector<48x128xf32>, vector<8x128xf32> -> vector<8x128xf32>
    %187 = arith.addf %186, %18 : vector<8x128xf32>
    %188 = vector.extract_strided_slice %187 {offsets = [0, 0], sizes = [8, 32], strides = [1, 1]} : vector<8x128xf32> to vector<8x32xf32>
    %189 = arith.negf %188 : vector<8x32xf32>
    %190 = math.exp %189 : vector<8x32xf32>
    %cst_43 = arith.constant 1.000000e+00 : f32
    %191 = vector.broadcast %cst_43 : f32 to vector<8x32xf32>
    %192 = arith.addf %191, %190 : vector<8x32xf32>
    %193 = arith.divf %191, %192 : vector<8x32xf32>
    %194 = vector.extract_strided_slice %187 {offsets = [0, 32], sizes = [8, 32], strides = [1, 1]} : vector<8x128xf32> to vector<8x32xf32>
    %195 = arith.negf %194 : vector<8x32xf32>
    %196 = math.exp %195 : vector<8x32xf32>
    %cst_44 = arith.constant 1.000000e+00 : f32
    %197 = vector.broadcast %cst_44 : f32 to vector<8x32xf32>
    %198 = arith.addf %197, %196 : vector<8x32xf32>
    %199 = arith.divf %197, %198 : vector<8x32xf32>
    %200 = vector.extract_strided_slice %187 {offsets = [0, 64], sizes = [8, 32], strides = [1, 1]} : vector<8x128xf32> to vector<8x32xf32>
    %201 = math.tanh %200 : vector<8x32xf32>
    %202 = vector.extract_strided_slice %187 {offsets = [0, 96], sizes = [8, 32], strides = [1, 1]} : vector<8x128xf32> to vector<8x32xf32>
    %203 = arith.negf %202 : vector<8x32xf32>
    %204 = math.exp %203 : vector<8x32xf32>
    %cst_45 = arith.constant 1.000000e+00 : f32
    %205 = vector.broadcast %cst_45 : f32 to vector<8x32xf32>
    %206 = arith.addf %205, %204 : vector<8x32xf32>
    %207 = arith.divf %205, %206 : vector<8x32xf32>
    %208 = arith.mulf %199, %116 : vector<8x32xf32>
    %209 = arith.mulf %193, %201 : vector<8x32xf32>
    %210 = arith.addf %208, %209 : vector<8x32xf32>
    %211 = math.tanh %210 : vector<8x32xf32>
    %212 = arith.mulf %207, %211 : vector<8x32xf32>
    %213 = arith.mulf %165, %12 : vector<8x32xf32>
    %214 = arith.mulf %163, %15 : vector<8x32xf32>
    %215 = arith.addf %213, %214 : vector<8x32xf32>
    %cst_46 = arith.constant dense<0.000000e+00> : vector<8xf32>
    %216 = vector.multi_reduction <add>, %215, %cst_46 [1] : vector<8x32xf32> to vector<8xf32>
    %217 = vector.shape_cast %216 : vector<8xf32> to vector<8x1xf32>
    %218 = vector.broadcast %217 : vector<8x1xf32> to vector<8x16xf32>
    %219 = arith.addf %23, %218 : vector<8x16xf32>
    %cst_47 = arith.constant dense<0xFF800000> : vector<8xf32>
    %220 = vector.multi_reduction <maximumf>, %219, %cst_47 [1] : vector<8x16xf32> to vector<8xf32>
    %221 = vector.shape_cast %220 : vector<8xf32> to vector<8x1xf32>
    %222 = vector.broadcast %221 : vector<8x1xf32> to vector<8x16xf32>
    %223 = arith.subf %219, %222 : vector<8x16xf32>
    %224 = math.exp %223 : vector<8x16xf32>
    %cst_48 = arith.constant dense<0.000000e+00> : vector<8xf32>
    %225 = vector.multi_reduction <add>, %224, %cst_48 [1] : vector<8x16xf32> to vector<8xf32>
    %226 = vector.shape_cast %225 : vector<8xf32> to vector<8x1xf32>
    %227 = vector.broadcast %226 : vector<8x1xf32> to vector<8x16xf32>
    %228 = arith.divf %224, %227 : vector<8x16xf32>
    %229 = vector.extract_strided_slice %0 {offsets = [0, 2, 0], sizes = [8, 1, 16], strides = [1, 1, 1]} : vector<16x8x16xf32> to vector<8x1x16xf32>
    %230 = vector.shape_cast %229 : vector<8x1x16xf32> to vector<8x16xf32>
    %231 = arith.mulf %228, %230 : vector<8x16xf32>
    %232 = tpu.concatenate %231, %165 in 1 : vector<8x16xf32>, vector<8x32xf32> -> vector<8x48xf32>
    %cst_49 = arith.constant dense<0.000000e+00> : vector<8x128xf32>
    %233 = tpu.matmul %232, %9, %cst_49 {dimension_numbers = #tpu.dot_dimension_numbers<[1], [0], [0], [1], [0, 0, 1, 1], [], []>} : vector<8x48xf32>, vector<48x128xf32>, vector<8x128xf32> -> vector<8x128xf32>
    %234 = arith.addf %233, %18 : vector<8x128xf32>
    %235 = vector.extract_strided_slice %234 {offsets = [0, 0], sizes = [8, 32], strides = [1, 1]} : vector<8x128xf32> to vector<8x32xf32>
    %236 = arith.negf %235 : vector<8x32xf32>
    %237 = math.exp %236 : vector<8x32xf32>
    %cst_50 = arith.constant 1.000000e+00 : f32
    %238 = vector.broadcast %cst_50 : f32 to vector<8x32xf32>
    %239 = arith.addf %238, %237 : vector<8x32xf32>
    %240 = arith.divf %238, %239 : vector<8x32xf32>
    %241 = vector.extract_strided_slice %234 {offsets = [0, 32], sizes = [8, 32], strides = [1, 1]} : vector<8x128xf32> to vector<8x32xf32>
    %242 = arith.negf %241 : vector<8x32xf32>
    %243 = math.exp %242 : vector<8x32xf32>
    %cst_51 = arith.constant 1.000000e+00 : f32
    %244 = vector.broadcast %cst_51 : f32 to vector<8x32xf32>
    %245 = arith.addf %244, %243 : vector<8x32xf32>
    %246 = arith.divf %244, %245 : vector<8x32xf32>
    %247 = vector.extract_strided_slice %234 {offsets = [0, 64], sizes = [8, 32], strides = [1, 1]} : vector<8x128xf32> to vector<8x32xf32>
    %248 = math.tanh %247 : vector<8x32xf32>
    %249 = vector.extract_strided_slice %234 {offsets = [0, 96], sizes = [8, 32], strides = [1, 1]} : vector<8x128xf32> to vector<8x32xf32>
    %250 = arith.negf %249 : vector<8x32xf32>
    %251 = math.exp %250 : vector<8x32xf32>
    %cst_52 = arith.constant 1.000000e+00 : f32
    %252 = vector.broadcast %cst_52 : f32 to vector<8x32xf32>
    %253 = arith.addf %252, %251 : vector<8x32xf32>
    %254 = arith.divf %252, %253 : vector<8x32xf32>
    %255 = arith.mulf %246, %163 : vector<8x32xf32>
    %256 = arith.mulf %240, %248 : vector<8x32xf32>
    %257 = arith.addf %255, %256 : vector<8x32xf32>
    %258 = math.tanh %257 : vector<8x32xf32>
    %259 = arith.mulf %254, %258 : vector<8x32xf32>
    %260 = arith.mulf %212, %12 : vector<8x32xf32>
    %261 = arith.mulf %210, %15 : vector<8x32xf32>
    %262 = arith.addf %260, %261 : vector<8x32xf32>
    %cst_53 = arith.constant dense<0.000000e+00> : vector<8xf32>
    %263 = vector.multi_reduction <add>, %262, %cst_53 [1] : vector<8x32xf32> to vector<8xf32>
    %264 = vector.shape_cast %263 : vector<8xf32> to vector<8x1xf32>
    %265 = vector.broadcast %264 : vector<8x1xf32> to vector<8x16xf32>
    %266 = arith.addf %24, %265 : vector<8x16xf32>
    %cst_54 = arith.constant dense<0xFF800000> : vector<8xf32>
    %267 = vector.multi_reduction <maximumf>, %266, %cst_54 [1] : vector<8x16xf32> to vector<8xf32>
    %268 = vector.shape_cast %267 : vector<8xf32> to vector<8x1xf32>
    %269 = vector.broadcast %268 : vector<8x1xf32> to vector<8x16xf32>
    %270 = arith.subf %266, %269 : vector<8x16xf32>
    %271 = math.exp %270 : vector<8x16xf32>
    %cst_55 = arith.constant dense<0.000000e+00> : vector<8xf32>
    %272 = vector.multi_reduction <add>, %271, %cst_55 [1] : vector<8x16xf32> to vector<8xf32>
    %273 = vector.shape_cast %272 : vector<8xf32> to vector<8x1xf32>
    %274 = vector.broadcast %273 : vector<8x1xf32> to vector<8x16xf32>
    %275 = arith.divf %271, %274 : vector<8x16xf32>
    %276 = vector.extract_strided_slice %0 {offsets = [8, 2, 0], sizes = [8, 1, 16], strides = [1, 1, 1]} : vector<16x8x16xf32> to vector<8x1x16xf32>
    %277 = vector.shape_cast %276 : vector<8x1x16xf32> to vector<8x16xf32>
    %278 = arith.mulf %275, %277 : vector<8x16xf32>
    %279 = tpu.concatenate %278, %212 in 1 : vector<8x16xf32>, vector<8x32xf32> -> vector<8x48xf32>
    %cst_56 = arith.constant dense<0.000000e+00> : vector<8x128xf32>
    %280 = tpu.matmul %279, %9, %cst_56 {dimension_numbers = #tpu.dot_dimension_numbers<[1], [0], [0], [1], [0, 0, 1, 1], [], []>} : vector<8x48xf32>, vector<48x128xf32>, vector<8x128xf32> -> vector<8x128xf32>
    %281 = arith.addf %280, %18 : vector<8x128xf32>
    %282 = vector.extract_strided_slice %281 {offsets = [0, 0], sizes = [8, 32], strides = [1, 1]} : vector<8x128xf32> to vector<8x32xf32>
    %283 = arith.negf %282 : vector<8x32xf32>
    %284 = math.exp %283 : vector<8x32xf32>
    %cst_57 = arith.constant 1.000000e+00 : f32
    %285 = vector.broadcast %cst_57 : f32 to vector<8x32xf32>
    %286 = arith.addf %285, %284 : vector<8x32xf32>
    %287 = arith.divf %285, %286 : vector<8x32xf32>
    %288 = vector.extract_strided_slice %281 {offsets = [0, 32], sizes = [8, 32], strides = [1, 1]} : vector<8x128xf32> to vector<8x32xf32>
    %289 = arith.negf %288 : vector<8x32xf32>
    %290 = math.exp %289 : vector<8x32xf32>
    %cst_58 = arith.constant 1.000000e+00 : f32
    %291 = vector.broadcast %cst_58 : f32 to vector<8x32xf32>
    %292 = arith.addf %291, %290 : vector<8x32xf32>
    %293 = arith.divf %291, %292 : vector<8x32xf32>
    %294 = vector.extract_strided_slice %281 {offsets = [0, 64], sizes = [8, 32], strides = [1, 1]} : vector<8x128xf32> to vector<8x32xf32>
    %295 = math.tanh %294 : vector<8x32xf32>
    %296 = vector.extract_strided_slice %281 {offsets = [0, 96], sizes = [8, 32], strides = [1, 1]} : vector<8x128xf32> to vector<8x32xf32>
    %297 = arith.negf %296 : vector<8x32xf32>
    %298 = math.exp %297 : vector<8x32xf32>
    %cst_59 = arith.constant 1.000000e+00 : f32
    %299 = vector.broadcast %cst_59 : f32 to vector<8x32xf32>
    %300 = arith.addf %299, %298 : vector<8x32xf32>
    %301 = arith.divf %299, %300 : vector<8x32xf32>
    %302 = arith.mulf %293, %210 : vector<8x32xf32>
    %303 = arith.mulf %287, %295 : vector<8x32xf32>
    %304 = arith.addf %302, %303 : vector<8x32xf32>
    %305 = math.tanh %304 : vector<8x32xf32>
    %306 = arith.mulf %301, %305 : vector<8x32xf32>
    %307 = arith.mulf %259, %12 : vector<8x32xf32>
    %308 = arith.mulf %257, %15 : vector<8x32xf32>
    %309 = arith.addf %307, %308 : vector<8x32xf32>
    %cst_60 = arith.constant dense<0.000000e+00> : vector<8xf32>
    %310 = vector.multi_reduction <add>, %309, %cst_60 [1] : vector<8x32xf32> to vector<8xf32>
    %311 = vector.shape_cast %310 : vector<8xf32> to vector<8x1xf32>
    %312 = vector.broadcast %311 : vector<8x1xf32> to vector<8x16xf32>
    %313 = arith.addf %23, %312 : vector<8x16xf32>
    %cst_61 = arith.constant dense<0xFF800000> : vector<8xf32>
    %314 = vector.multi_reduction <maximumf>, %313, %cst_61 [1] : vector<8x16xf32> to vector<8xf32>
    %315 = vector.shape_cast %314 : vector<8xf32> to vector<8x1xf32>
    %316 = vector.broadcast %315 : vector<8x1xf32> to vector<8x16xf32>
    %317 = arith.subf %313, %316 : vector<8x16xf32>
    %318 = math.exp %317 : vector<8x16xf32>
    %cst_62 = arith.constant dense<0.000000e+00> : vector<8xf32>
    %319 = vector.multi_reduction <add>, %318, %cst_62 [1] : vector<8x16xf32> to vector<8xf32>
    %320 = vector.shape_cast %319 : vector<8xf32> to vector<8x1xf32>
    %321 = vector.broadcast %320 : vector<8x1xf32> to vector<8x16xf32>
    %322 = arith.divf %318, %321 : vector<8x16xf32>
    %323 = vector.extract_strided_slice %0 {offsets = [0, 3, 0], sizes = [8, 1, 16], strides = [1, 1, 1]} : vector<16x8x16xf32> to vector<8x1x16xf32>
    %324 = vector.shape_cast %323 : vector<8x1x16xf32> to vector<8x16xf32>
    %325 = arith.mulf %322, %324 : vector<8x16xf32>
    %326 = tpu.concatenate %325, %259 in 1 : vector<8x16xf32>, vector<8x32xf32> -> vector<8x48xf32>
    %cst_63 = arith.constant dense<0.000000e+00> : vector<8x128xf32>
    %327 = tpu.matmul %326, %9, %cst_63 {dimension_numbers = #tpu.dot_dimension_numbers<[1], [0], [0], [1], [0, 0, 1, 1], [], []>} : vector<8x48xf32>, vector<48x128xf32>, vector<8x128xf32> -> vector<8x128xf32>
    %328 = arith.addf %327, %18 : vector<8x128xf32>
    %329 = vector.extract_strided_slice %328 {offsets = [0, 0], sizes = [8, 32], strides = [1, 1]} : vector<8x128xf32> to vector<8x32xf32>
    %330 = arith.negf %329 : vector<8x32xf32>
    %331 = math.exp %330 : vector<8x32xf32>
    %cst_64 = arith.constant 1.000000e+00 : f32
    %332 = vector.broadcast %cst_64 : f32 to vector<8x32xf32>
    %333 = arith.addf %332, %331 : vector<8x32xf32>
    %334 = arith.divf %332, %333 : vector<8x32xf32>
    %335 = vector.extract_strided_slice %328 {offsets = [0, 32], sizes = [8, 32], strides = [1, 1]} : vector<8x128xf32> to vector<8x32xf32>
    %336 = arith.negf %335 : vector<8x32xf32>
    %337 = math.exp %336 : vector<8x32xf32>
    %cst_65 = arith.constant 1.000000e+00 : f32
    %338 = vector.broadcast %cst_65 : f32 to vector<8x32xf32>
    %339 = arith.addf %338, %337 : vector<8x32xf32>
    %340 = arith.divf %338, %339 : vector<8x32xf32>
    %341 = vector.extract_strided_slice %328 {offsets = [0, 64], sizes = [8, 32], strides = [1, 1]} : vector<8x128xf32> to vector<8x32xf32>
    %342 = math.tanh %341 : vector<8x32xf32>
    %343 = vector.extract_strided_slice %328 {offsets = [0, 96], sizes = [8, 32], strides = [1, 1]} : vector<8x128xf32> to vector<8x32xf32>
    %344 = arith.negf %343 : vector<8x32xf32>
    %345 = math.exp %344 : vector<8x32xf32>
    %cst_66 = arith.constant 1.000000e+00 : f32
    %346 = vector.broadcast %cst_66 : f32 to vector<8x32xf32>
    %347 = arith.addf %346, %345 : vector<8x32xf32>
    %348 = arith.divf %346, %347 : vector<8x32xf32>
    %349 = arith.mulf %340, %257 : vector<8x32xf32>
    %350 = arith.mulf %334, %342 : vector<8x32xf32>
    %351 = arith.addf %349, %350 : vector<8x32xf32>
    %352 = math.tanh %351 : vector<8x32xf32>
    %353 = arith.mulf %348, %352 : vector<8x32xf32>
    %354 = arith.mulf %306, %12 : vector<8x32xf32>
    %355 = arith.mulf %304, %15 : vector<8x32xf32>
    %356 = arith.addf %354, %355 : vector<8x32xf32>
    %cst_67 = arith.constant dense<0.000000e+00> : vector<8xf32>
    %357 = vector.multi_reduction <add>, %356, %cst_67 [1] : vector<8x32xf32> to vector<8xf32>
    %358 = vector.shape_cast %357 : vector<8xf32> to vector<8x1xf32>
    %359 = vector.broadcast %358 : vector<8x1xf32> to vector<8x16xf32>
    %360 = arith.addf %24, %359 : vector<8x16xf32>
    %cst_68 = arith.constant dense<0xFF800000> : vector<8xf32>
    %361 = vector.multi_reduction <maximumf>, %360, %cst_68 [1] : vector<8x16xf32> to vector<8xf32>
    %362 = vector.shape_cast %361 : vector<8xf32> to vector<8x1xf32>
    %363 = vector.broadcast %362 : vector<8x1xf32> to vector<8x16xf32>
    %364 = arith.subf %360, %363 : vector<8x16xf32>
    %365 = math.exp %364 : vector<8x16xf32>
    %cst_69 = arith.constant dense<0.000000e+00> : vector<8xf32>
    %366 = vector.multi_reduction <add>, %365, %cst_69 [1] : vector<8x16xf32> to vector<8xf32>
    %367 = vector.shape_cast %366 : vector<8xf32> to vector<8x1xf32>
    %368 = vector.broadcast %367 : vector<8x1xf32> to vector<8x16xf32>
    %369 = arith.divf %365, %368 : vector<8x16xf32>
    %370 = vector.extract_strided_slice %0 {offsets = [8, 3, 0], sizes = [8, 1, 16], strides = [1, 1, 1]} : vector<16x8x16xf32> to vector<8x1x16xf32>
    %371 = vector.shape_cast %370 : vector<8x1x16xf32> to vector<8x16xf32>
    %372 = arith.mulf %369, %371 : vector<8x16xf32>
    %373 = tpu.concatenate %372, %306 in 1 : vector<8x16xf32>, vector<8x32xf32> -> vector<8x48xf32>
    %cst_70 = arith.constant dense<0.000000e+00> : vector<8x128xf32>
    %374 = tpu.matmul %373, %9, %cst_70 {dimension_numbers = #tpu.dot_dimension_numbers<[1], [0], [0], [1], [0, 0, 1, 1], [], []>} : vector<8x48xf32>, vector<48x128xf32>, vector<8x128xf32> -> vector<8x128xf32>
    %375 = arith.addf %374, %18 : vector<8x128xf32>
    %376 = vector.extract_strided_slice %375 {offsets = [0, 0], sizes = [8, 32], strides = [1, 1]} : vector<8x128xf32> to vector<8x32xf32>
    %377 = arith.negf %376 : vector<8x32xf32>
    %378 = math.exp %377 : vector<8x32xf32>
    %cst_71 = arith.constant 1.000000e+00 : f32
    %379 = vector.broadcast %cst_71 : f32 to vector<8x32xf32>
    %380 = arith.addf %379, %378 : vector<8x32xf32>
    %381 = arith.divf %379, %380 : vector<8x32xf32>
    %382 = vector.extract_strided_slice %375 {offsets = [0, 32], sizes = [8, 32], strides = [1, 1]} : vector<8x128xf32> to vector<8x32xf32>
    %383 = arith.negf %382 : vector<8x32xf32>
    %384 = math.exp %383 : vector<8x32xf32>
    %cst_72 = arith.constant 1.000000e+00 : f32
    %385 = vector.broadcast %cst_72 : f32 to vector<8x32xf32>
    %386 = arith.addf %385, %384 : vector<8x32xf32>
    %387 = arith.divf %385, %386 : vector<8x32xf32>
    %388 = vector.extract_strided_slice %375 {offsets = [0, 64], sizes = [8, 32], strides = [1, 1]} : vector<8x128xf32> to vector<8x32xf32>
    %389 = math.tanh %388 : vector<8x32xf32>
    %390 = vector.extract_strided_slice %375 {offsets = [0, 96], sizes = [8, 32], strides = [1, 1]} : vector<8x128xf32> to vector<8x32xf32>
    %391 = arith.negf %390 : vector<8x32xf32>
    %392 = math.exp %391 : vector<8x32xf32>
    %cst_73 = arith.constant 1.000000e+00 : f32
    %393 = vector.broadcast %cst_73 : f32 to vector<8x32xf32>
    %394 = arith.addf %393, %392 : vector<8x32xf32>
    %395 = arith.divf %393, %394 : vector<8x32xf32>
    %396 = arith.mulf %387, %304 : vector<8x32xf32>
    %397 = arith.mulf %381, %389 : vector<8x32xf32>
    %398 = arith.addf %396, %397 : vector<8x32xf32>
    %399 = math.tanh %398 : vector<8x32xf32>
    %400 = arith.mulf %395, %399 : vector<8x32xf32>
    %401 = arith.mulf %353, %12 : vector<8x32xf32>
    %402 = arith.mulf %351, %15 : vector<8x32xf32>
    %403 = arith.addf %401, %402 : vector<8x32xf32>
    %cst_74 = arith.constant dense<0.000000e+00> : vector<8xf32>
    %404 = vector.multi_reduction <add>, %403, %cst_74 [1] : vector<8x32xf32> to vector<8xf32>
    %405 = vector.shape_cast %404 : vector<8xf32> to vector<8x1xf32>
    %406 = vector.broadcast %405 : vector<8x1xf32> to vector<8x16xf32>
    %407 = arith.addf %23, %406 : vector<8x16xf32>
    %cst_75 = arith.constant dense<0xFF800000> : vector<8xf32>
    %408 = vector.multi_reduction <maximumf>, %407, %cst_75 [1] : vector<8x16xf32> to vector<8xf32>
    %409 = vector.shape_cast %408 : vector<8xf32> to vector<8x1xf32>
    %410 = vector.broadcast %409 : vector<8x1xf32> to vector<8x16xf32>
    %411 = arith.subf %407, %410 : vector<8x16xf32>
    %412 = math.exp %411 : vector<8x16xf32>
    %cst_76 = arith.constant dense<0.000000e+00> : vector<8xf32>
    %413 = vector.multi_reduction <add>, %412, %cst_76 [1] : vector<8x16xf32> to vector<8xf32>
    %414 = vector.shape_cast %413 : vector<8xf32> to vector<8x1xf32>
    %415 = vector.broadcast %414 : vector<8x1xf32> to vector<8x16xf32>
    %416 = arith.divf %412, %415 : vector<8x16xf32>
    %417 = vector.extract_strided_slice %0 {offsets = [0, 4, 0], sizes = [8, 1, 16], strides = [1, 1, 1]} : vector<16x8x16xf32> to vector<8x1x16xf32>
    %418 = vector.shape_cast %417 : vector<8x1x16xf32> to vector<8x16xf32>
    %419 = arith.mulf %416, %418 : vector<8x16xf32>
    %420 = tpu.concatenate %419, %353 in 1 : vector<8x16xf32>, vector<8x32xf32> -> vector<8x48xf32>
    %cst_77 = arith.constant dense<0.000000e+00> : vector<8x128xf32>
    %421 = tpu.matmul %420, %9, %cst_77 {dimension_numbers = #tpu.dot_dimension_numbers<[1], [0], [0], [1], [0, 0, 1, 1], [], []>} : vector<8x48xf32>, vector<48x128xf32>, vector<8x128xf32> -> vector<8x128xf32>
    %422 = arith.addf %421, %18 : vector<8x128xf32>
    %423 = vector.extract_strided_slice %422 {offsets = [0, 0], sizes = [8, 32], strides = [1, 1]} : vector<8x128xf32> to vector<8x32xf32>
    %424 = arith.negf %423 : vector<8x32xf32>
    %425 = math.exp %424 : vector<8x32xf32>
    %cst_78 = arith.constant 1.000000e+00 : f32
    %426 = vector.broadcast %cst_78 : f32 to vector<8x32xf32>
    %427 = arith.addf %426, %425 : vector<8x32xf32>
    %428 = arith.divf %426, %427 : vector<8x32xf32>
    %429 = vector.extract_strided_slice %422 {offsets = [0, 32], sizes = [8, 32], strides = [1, 1]} : vector<8x128xf32> to vector<8x32xf32>
    %430 = arith.negf %429 : vector<8x32xf32>
    %431 = math.exp %430 : vector<8x32xf32>
    %cst_79 = arith.constant 1.000000e+00 : f32
    %432 = vector.broadcast %cst_79 : f32 to vector<8x32xf32>
    %433 = arith.addf %432, %431 : vector<8x32xf32>
    %434 = arith.divf %432, %433 : vector<8x32xf32>
    %435 = vector.extract_strided_slice %422 {offsets = [0, 64], sizes = [8, 32], strides = [1, 1]} : vector<8x128xf32> to vector<8x32xf32>
    %436 = math.tanh %435 : vector<8x32xf32>
    %437 = vector.extract_strided_slice %422 {offsets = [0, 96], sizes = [8, 32], strides = [1, 1]} : vector<8x128xf32> to vector<8x32xf32>
    %438 = arith.negf %437 : vector<8x32xf32>
    %439 = math.exp %438 : vector<8x32xf32>
    %cst_80 = arith.constant 1.000000e+00 : f32
    %440 = vector.broadcast %cst_80 : f32 to vector<8x32xf32>
    %441 = arith.addf %440, %439 : vector<8x32xf32>
    %442 = arith.divf %440, %441 : vector<8x32xf32>
    %443 = arith.mulf %434, %351 : vector<8x32xf32>
    %444 = arith.mulf %428, %436 : vector<8x32xf32>
    %445 = arith.addf %443, %444 : vector<8x32xf32>
    %446 = math.tanh %445 : vector<8x32xf32>
    %447 = arith.mulf %442, %446 : vector<8x32xf32>
    %448 = arith.mulf %400, %12 : vector<8x32xf32>
    %449 = arith.mulf %398, %15 : vector<8x32xf32>
    %450 = arith.addf %448, %449 : vector<8x32xf32>
    %cst_81 = arith.constant dense<0.000000e+00> : vector<8xf32>
    %451 = vector.multi_reduction <add>, %450, %cst_81 [1] : vector<8x32xf32> to vector<8xf32>
    %452 = vector.shape_cast %451 : vector<8xf32> to vector<8x1xf32>
    %453 = vector.broadcast %452 : vector<8x1xf32> to vector<8x16xf32>
    %454 = arith.addf %24, %453 : vector<8x16xf32>
    %cst_82 = arith.constant dense<0xFF800000> : vector<8xf32>
    %455 = vector.multi_reduction <maximumf>, %454, %cst_82 [1] : vector<8x16xf32> to vector<8xf32>
    %456 = vector.shape_cast %455 : vector<8xf32> to vector<8x1xf32>
    %457 = vector.broadcast %456 : vector<8x1xf32> to vector<8x16xf32>
    %458 = arith.subf %454, %457 : vector<8x16xf32>
    %459 = math.exp %458 : vector<8x16xf32>
    %cst_83 = arith.constant dense<0.000000e+00> : vector<8xf32>
    %460 = vector.multi_reduction <add>, %459, %cst_83 [1] : vector<8x16xf32> to vector<8xf32>
    %461 = vector.shape_cast %460 : vector<8xf32> to vector<8x1xf32>
    %462 = vector.broadcast %461 : vector<8x1xf32> to vector<8x16xf32>
    %463 = arith.divf %459, %462 : vector<8x16xf32>
    %464 = vector.extract_strided_slice %0 {offsets = [8, 4, 0], sizes = [8, 1, 16], strides = [1, 1, 1]} : vector<16x8x16xf32> to vector<8x1x16xf32>
    %465 = vector.shape_cast %464 : vector<8x1x16xf32> to vector<8x16xf32>
    %466 = arith.mulf %463, %465 : vector<8x16xf32>
    %467 = tpu.concatenate %466, %400 in 1 : vector<8x16xf32>, vector<8x32xf32> -> vector<8x48xf32>
    %cst_84 = arith.constant dense<0.000000e+00> : vector<8x128xf32>
    %468 = tpu.matmul %467, %9, %cst_84 {dimension_numbers = #tpu.dot_dimension_numbers<[1], [0], [0], [1], [0, 0, 1, 1], [], []>} : vector<8x48xf32>, vector<48x128xf32>, vector<8x128xf32> -> vector<8x128xf32>
    %469 = arith.addf %468, %18 : vector<8x128xf32>
    %470 = vector.extract_strided_slice %469 {offsets = [0, 0], sizes = [8, 32], strides = [1, 1]} : vector<8x128xf32> to vector<8x32xf32>
    %471 = arith.negf %470 : vector<8x32xf32>
    %472 = math.exp %471 : vector<8x32xf32>
    %cst_85 = arith.constant 1.000000e+00 : f32
    %473 = vector.broadcast %cst_85 : f32 to vector<8x32xf32>
    %474 = arith.addf %473, %472 : vector<8x32xf32>
    %475 = arith.divf %473, %474 : vector<8x32xf32>
    %476 = vector.extract_strided_slice %469 {offsets = [0, 32], sizes = [8, 32], strides = [1, 1]} : vector<8x128xf32> to vector<8x32xf32>
    %477 = arith.negf %476 : vector<8x32xf32>
    %478 = math.exp %477 : vector<8x32xf32>
    %cst_86 = arith.constant 1.000000e+00 : f32
    %479 = vector.broadcast %cst_86 : f32 to vector<8x32xf32>
    %480 = arith.addf %479, %478 : vector<8x32xf32>
    %481 = arith.divf %479, %480 : vector<8x32xf32>
    %482 = vector.extract_strided_slice %469 {offsets = [0, 64], sizes = [8, 32], strides = [1, 1]} : vector<8x128xf32> to vector<8x32xf32>
    %483 = math.tanh %482 : vector<8x32xf32>
    %484 = vector.extract_strided_slice %469 {offsets = [0, 96], sizes = [8, 32], strides = [1, 1]} : vector<8x128xf32> to vector<8x32xf32>
    %485 = arith.negf %484 : vector<8x32xf32>
    %486 = math.exp %485 : vector<8x32xf32>
    %cst_87 = arith.constant 1.000000e+00 : f32
    %487 = vector.broadcast %cst_87 : f32 to vector<8x32xf32>
    %488 = arith.addf %487, %486 : vector<8x32xf32>
    %489 = arith.divf %487, %488 : vector<8x32xf32>
    %490 = arith.mulf %481, %398 : vector<8x32xf32>
    %491 = arith.mulf %475, %483 : vector<8x32xf32>
    %492 = arith.addf %490, %491 : vector<8x32xf32>
    %493 = math.tanh %492 : vector<8x32xf32>
    %494 = arith.mulf %489, %493 : vector<8x32xf32>
    %495 = arith.mulf %447, %12 : vector<8x32xf32>
    %496 = arith.mulf %445, %15 : vector<8x32xf32>
    %497 = arith.addf %495, %496 : vector<8x32xf32>
    %cst_88 = arith.constant dense<0.000000e+00> : vector<8xf32>
    %498 = vector.multi_reduction <add>, %497, %cst_88 [1] : vector<8x32xf32> to vector<8xf32>
    %499 = vector.shape_cast %498 : vector<8xf32> to vector<8x1xf32>
    %500 = vector.broadcast %499 : vector<8x1xf32> to vector<8x16xf32>
    %501 = arith.addf %23, %500 : vector<8x16xf32>
    %cst_89 = arith.constant dense<0xFF800000> : vector<8xf32>
    %502 = vector.multi_reduction <maximumf>, %501, %cst_89 [1] : vector<8x16xf32> to vector<8xf32>
    %503 = vector.shape_cast %502 : vector<8xf32> to vector<8x1xf32>
    %504 = vector.broadcast %503 : vector<8x1xf32> to vector<8x16xf32>
    %505 = arith.subf %501, %504 : vector<8x16xf32>
    %506 = math.exp %505 : vector<8x16xf32>
    %cst_90 = arith.constant dense<0.000000e+00> : vector<8xf32>
    %507 = vector.multi_reduction <add>, %506, %cst_90 [1] : vector<8x16xf32> to vector<8xf32>
    %508 = vector.shape_cast %507 : vector<8xf32> to vector<8x1xf32>
    %509 = vector.broadcast %508 : vector<8x1xf32> to vector<8x16xf32>
    %510 = arith.divf %506, %509 : vector<8x16xf32>
    %511 = vector.extract_strided_slice %0 {offsets = [0, 5, 0], sizes = [8, 1, 16], strides = [1, 1, 1]} : vector<16x8x16xf32> to vector<8x1x16xf32>
    %512 = vector.shape_cast %511 : vector<8x1x16xf32> to vector<8x16xf32>
    %513 = arith.mulf %510, %512 : vector<8x16xf32>
    %514 = tpu.concatenate %513, %447 in 1 : vector<8x16xf32>, vector<8x32xf32> -> vector<8x48xf32>
    %cst_91 = arith.constant dense<0.000000e+00> : vector<8x128xf32>
    %515 = tpu.matmul %514, %9, %cst_91 {dimension_numbers = #tpu.dot_dimension_numbers<[1], [0], [0], [1], [0, 0, 1, 1], [], []>} : vector<8x48xf32>, vector<48x128xf32>, vector<8x128xf32> -> vector<8x128xf32>
    %516 = arith.addf %515, %18 : vector<8x128xf32>
    %517 = vector.extract_strided_slice %516 {offsets = [0, 0], sizes = [8, 32], strides = [1, 1]} : vector<8x128xf32> to vector<8x32xf32>
    %518 = arith.negf %517 : vector<8x32xf32>
    %519 = math.exp %518 : vector<8x32xf32>
    %cst_92 = arith.constant 1.000000e+00 : f32
    %520 = vector.broadcast %cst_92 : f32 to vector<8x32xf32>
    %521 = arith.addf %520, %519 : vector<8x32xf32>
    %522 = arith.divf %520, %521 : vector<8x32xf32>
    %523 = vector.extract_strided_slice %516 {offsets = [0, 32], sizes = [8, 32], strides = [1, 1]} : vector<8x128xf32> to vector<8x32xf32>
    %524 = arith.negf %523 : vector<8x32xf32>
    %525 = math.exp %524 : vector<8x32xf32>
    %cst_93 = arith.constant 1.000000e+00 : f32
    %526 = vector.broadcast %cst_93 : f32 to vector<8x32xf32>
    %527 = arith.addf %526, %525 : vector<8x32xf32>
    %528 = arith.divf %526, %527 : vector<8x32xf32>
    %529 = vector.extract_strided_slice %516 {offsets = [0, 64], sizes = [8, 32], strides = [1, 1]} : vector<8x128xf32> to vector<8x32xf32>
    %530 = math.tanh %529 : vector<8x32xf32>
    %531 = vector.extract_strided_slice %516 {offsets = [0, 96], sizes = [8, 32], strides = [1, 1]} : vector<8x128xf32> to vector<8x32xf32>
    %532 = arith.negf %531 : vector<8x32xf32>
    %533 = math.exp %532 : vector<8x32xf32>
    %cst_94 = arith.constant 1.000000e+00 : f32
    %534 = vector.broadcast %cst_94 : f32 to vector<8x32xf32>
    %535 = arith.addf %534, %533 : vector<8x32xf32>
    %536 = arith.divf %534, %535 : vector<8x32xf32>
    %537 = arith.mulf %528, %445 : vector<8x32xf32>
    %538 = arith.mulf %522, %530 : vector<8x32xf32>
    %539 = arith.addf %537, %538 : vector<8x32xf32>
    %540 = math.tanh %539 : vector<8x32xf32>
    %541 = arith.mulf %536, %540 : vector<8x32xf32>
    %542 = arith.mulf %494, %12 : vector<8x32xf32>
    %543 = arith.mulf %492, %15 : vector<8x32xf32>
    %544 = arith.addf %542, %543 : vector<8x32xf32>
    %cst_95 = arith.constant dense<0.000000e+00> : vector<8xf32>
    %545 = vector.multi_reduction <add>, %544, %cst_95 [1] : vector<8x32xf32> to vector<8xf32>
    %546 = vector.shape_cast %545 : vector<8xf32> to vector<8x1xf32>
    %547 = vector.broadcast %546 : vector<8x1xf32> to vector<8x16xf32>
    %548 = arith.addf %24, %547 : vector<8x16xf32>
    %cst_96 = arith.constant dense<0xFF800000> : vector<8xf32>
    %549 = vector.multi_reduction <maximumf>, %548, %cst_96 [1] : vector<8x16xf32> to vector<8xf32>
    %550 = vector.shape_cast %549 : vector<8xf32> to vector<8x1xf32>
    %551 = vector.broadcast %550 : vector<8x1xf32> to vector<8x16xf32>
    %552 = arith.subf %548, %551 : vector<8x16xf32>
    %553 = math.exp %552 : vector<8x16xf32>
    %cst_97 = arith.constant dense<0.000000e+00> : vector<8xf32>
    %554 = vector.multi_reduction <add>, %553, %cst_97 [1] : vector<8x16xf32> to vector<8xf32>
    %555 = vector.shape_cast %554 : vector<8xf32> to vector<8x1xf32>
    %556 = vector.broadcast %555 : vector<8x1xf32> to vector<8x16xf32>
    %557 = arith.divf %553, %556 : vector<8x16xf32>
    %558 = vector.extract_strided_slice %0 {offsets = [8, 5, 0], sizes = [8, 1, 16], strides = [1, 1, 1]} : vector<16x8x16xf32> to vector<8x1x16xf32>
    %559 = vector.shape_cast %558 : vector<8x1x16xf32> to vector<8x16xf32>
    %560 = arith.mulf %557, %559 : vector<8x16xf32>
    %561 = tpu.concatenate %560, %494 in 1 : vector<8x16xf32>, vector<8x32xf32> -> vector<8x48xf32>
    %cst_98 = arith.constant dense<0.000000e+00> : vector<8x128xf32>
    %562 = tpu.matmul %561, %9, %cst_98 {dimension_numbers = #tpu.dot_dimension_numbers<[1], [0], [0], [1], [0, 0, 1, 1], [], []>} : vector<8x48xf32>, vector<48x128xf32>, vector<8x128xf32> -> vector<8x128xf32>
    %563 = arith.addf %562, %18 : vector<8x128xf32>
    %564 = vector.extract_strided_slice %563 {offsets = [0, 0], sizes = [8, 32], strides = [1, 1]} : vector<8x128xf32> to vector<8x32xf32>
    %565 = arith.negf %564 : vector<8x32xf32>
    %566 = math.exp %565 : vector<8x32xf32>
    %cst_99 = arith.constant 1.000000e+00 : f32
    %567 = vector.broadcast %cst_99 : f32 to vector<8x32xf32>
    %568 = arith.addf %567, %566 : vector<8x32xf32>
    %569 = arith.divf %567, %568 : vector<8x32xf32>
    %570 = vector.extract_strided_slice %563 {offsets = [0, 32], sizes = [8, 32], strides = [1, 1]} : vector<8x128xf32> to vector<8x32xf32>
    %571 = arith.negf %570 : vector<8x32xf32>
    %572 = math.exp %571 : vector<8x32xf32>
    %cst_100 = arith.constant 1.000000e+00 : f32
    %573 = vector.broadcast %cst_100 : f32 to vector<8x32xf32>
    %574 = arith.addf %573, %572 : vector<8x32xf32>
    %575 = arith.divf %573, %574 : vector<8x32xf32>
    %576 = vector.extract_strided_slice %563 {offsets = [0, 64], sizes = [8, 32], strides = [1, 1]} : vector<8x128xf32> to vector<8x32xf32>
    %577 = math.tanh %576 : vector<8x32xf32>
    %578 = vector.extract_strided_slice %563 {offsets = [0, 96], sizes = [8, 32], strides = [1, 1]} : vector<8x128xf32> to vector<8x32xf32>
    %579 = arith.negf %578 : vector<8x32xf32>
    %580 = math.exp %579 : vector<8x32xf32>
    %cst_101 = arith.constant 1.000000e+00 : f32
    %581 = vector.broadcast %cst_101 : f32 to vector<8x32xf32>
    %582 = arith.addf %581, %580 : vector<8x32xf32>
    %583 = arith.divf %581, %582 : vector<8x32xf32>
    %584 = arith.mulf %575, %492 : vector<8x32xf32>
    %585 = arith.mulf %569, %577 : vector<8x32xf32>
    %586 = arith.addf %584, %585 : vector<8x32xf32>
    %587 = math.tanh %586 : vector<8x32xf32>
    %588 = arith.mulf %583, %587 : vector<8x32xf32>
    %589 = arith.mulf %541, %12 : vector<8x32xf32>
    %590 = arith.mulf %539, %15 : vector<8x32xf32>
    %591 = arith.addf %589, %590 : vector<8x32xf32>
    %cst_102 = arith.constant dense<0.000000e+00> : vector<8xf32>
    %592 = vector.multi_reduction <add>, %591, %cst_102 [1] : vector<8x32xf32> to vector<8xf32>
    %593 = vector.shape_cast %592 : vector<8xf32> to vector<8x1xf32>
    %594 = vector.broadcast %593 : vector<8x1xf32> to vector<8x16xf32>
    %595 = arith.addf %23, %594 : vector<8x16xf32>
    %cst_103 = arith.constant dense<0xFF800000> : vector<8xf32>
    %596 = vector.multi_reduction <maximumf>, %595, %cst_103 [1] : vector<8x16xf32> to vector<8xf32>
    %597 = vector.shape_cast %596 : vector<8xf32> to vector<8x1xf32>
    %598 = vector.broadcast %597 : vector<8x1xf32> to vector<8x16xf32>
    %599 = arith.subf %595, %598 : vector<8x16xf32>
    %600 = math.exp %599 : vector<8x16xf32>
    %cst_104 = arith.constant dense<0.000000e+00> : vector<8xf32>
    %601 = vector.multi_reduction <add>, %600, %cst_104 [1] : vector<8x16xf32> to vector<8xf32>
    %602 = vector.shape_cast %601 : vector<8xf32> to vector<8x1xf32>
    %603 = vector.broadcast %602 : vector<8x1xf32> to vector<8x16xf32>
    %604 = arith.divf %600, %603 : vector<8x16xf32>
    %605 = vector.extract_strided_slice %0 {offsets = [0, 6, 0], sizes = [8, 1, 16], strides = [1, 1, 1]} : vector<16x8x16xf32> to vector<8x1x16xf32>
    %606 = vector.shape_cast %605 : vector<8x1x16xf32> to vector<8x16xf32>
    %607 = arith.mulf %604, %606 : vector<8x16xf32>
    %608 = tpu.concatenate %607, %541 in 1 : vector<8x16xf32>, vector<8x32xf32> -> vector<8x48xf32>
    %cst_105 = arith.constant dense<0.000000e+00> : vector<8x128xf32>
    %609 = tpu.matmul %608, %9, %cst_105 {dimension_numbers = #tpu.dot_dimension_numbers<[1], [0], [0], [1], [0, 0, 1, 1], [], []>} : vector<8x48xf32>, vector<48x128xf32>, vector<8x128xf32> -> vector<8x128xf32>
    %610 = arith.addf %609, %18 : vector<8x128xf32>
    %611 = vector.extract_strided_slice %610 {offsets = [0, 0], sizes = [8, 32], strides = [1, 1]} : vector<8x128xf32> to vector<8x32xf32>
    %612 = arith.negf %611 : vector<8x32xf32>
    %613 = math.exp %612 : vector<8x32xf32>
    %cst_106 = arith.constant 1.000000e+00 : f32
    %614 = vector.broadcast %cst_106 : f32 to vector<8x32xf32>
    %615 = arith.addf %614, %613 : vector<8x32xf32>
    %616 = arith.divf %614, %615 : vector<8x32xf32>
    %617 = vector.extract_strided_slice %610 {offsets = [0, 32], sizes = [8, 32], strides = [1, 1]} : vector<8x128xf32> to vector<8x32xf32>
    %618 = arith.negf %617 : vector<8x32xf32>
    %619 = math.exp %618 : vector<8x32xf32>
    %cst_107 = arith.constant 1.000000e+00 : f32
    %620 = vector.broadcast %cst_107 : f32 to vector<8x32xf32>
    %621 = arith.addf %620, %619 : vector<8x32xf32>
    %622 = arith.divf %620, %621 : vector<8x32xf32>
    %623 = vector.extract_strided_slice %610 {offsets = [0, 64], sizes = [8, 32], strides = [1, 1]} : vector<8x128xf32> to vector<8x32xf32>
    %624 = math.tanh %623 : vector<8x32xf32>
    %625 = vector.extract_strided_slice %610 {offsets = [0, 96], sizes = [8, 32], strides = [1, 1]} : vector<8x128xf32> to vector<8x32xf32>
    %626 = arith.negf %625 : vector<8x32xf32>
    %627 = math.exp %626 : vector<8x32xf32>
    %cst_108 = arith.constant 1.000000e+00 : f32
    %628 = vector.broadcast %cst_108 : f32 to vector<8x32xf32>
    %629 = arith.addf %628, %627 : vector<8x32xf32>
    %630 = arith.divf %628, %629 : vector<8x32xf32>
    %631 = arith.mulf %622, %539 : vector<8x32xf32>
    %632 = arith.mulf %616, %624 : vector<8x32xf32>
    %633 = arith.addf %631, %632 : vector<8x32xf32>
    %634 = math.tanh %633 : vector<8x32xf32>
    %635 = arith.mulf %630, %634 : vector<8x32xf32>
    %636 = arith.mulf %588, %12 : vector<8x32xf32>
    %637 = arith.mulf %586, %15 : vector<8x32xf32>
    %638 = arith.addf %636, %637 : vector<8x32xf32>
    %cst_109 = arith.constant dense<0.000000e+00> : vector<8xf32>
    %639 = vector.multi_reduction <add>, %638, %cst_109 [1] : vector<8x32xf32> to vector<8xf32>
    %640 = vector.shape_cast %639 : vector<8xf32> to vector<8x1xf32>
    %641 = vector.broadcast %640 : vector<8x1xf32> to vector<8x16xf32>
    %642 = arith.addf %24, %641 : vector<8x16xf32>
    %cst_110 = arith.constant dense<0xFF800000> : vector<8xf32>
    %643 = vector.multi_reduction <maximumf>, %642, %cst_110 [1] : vector<8x16xf32> to vector<8xf32>
    %644 = vector.shape_cast %643 : vector<8xf32> to vector<8x1xf32>
    %645 = vector.broadcast %644 : vector<8x1xf32> to vector<8x16xf32>
    %646 = arith.subf %642, %645 : vector<8x16xf32>
    %647 = math.exp %646 : vector<8x16xf32>
    %cst_111 = arith.constant dense<0.000000e+00> : vector<8xf32>
    %648 = vector.multi_reduction <add>, %647, %cst_111 [1] : vector<8x16xf32> to vector<8xf32>
    %649 = vector.shape_cast %648 : vector<8xf32> to vector<8x1xf32>
    %650 = vector.broadcast %649 : vector<8x1xf32> to vector<8x16xf32>
    %651 = arith.divf %647, %650 : vector<8x16xf32>
    %652 = vector.extract_strided_slice %0 {offsets = [8, 6, 0], sizes = [8, 1, 16], strides = [1, 1, 1]} : vector<16x8x16xf32> to vector<8x1x16xf32>
    %653 = vector.shape_cast %652 : vector<8x1x16xf32> to vector<8x16xf32>
    %654 = arith.mulf %651, %653 : vector<8x16xf32>
    %655 = tpu.concatenate %654, %588 in 1 : vector<8x16xf32>, vector<8x32xf32> -> vector<8x48xf32>
    %cst_112 = arith.constant dense<0.000000e+00> : vector<8x128xf32>
    %656 = tpu.matmul %655, %9, %cst_112 {dimension_numbers = #tpu.dot_dimension_numbers<[1], [0], [0], [1], [0, 0, 1, 1], [], []>} : vector<8x48xf32>, vector<48x128xf32>, vector<8x128xf32> -> vector<8x128xf32>
    %657 = arith.addf %656, %18 : vector<8x128xf32>
    %658 = vector.extract_strided_slice %657 {offsets = [0, 0], sizes = [8, 32], strides = [1, 1]} : vector<8x128xf32> to vector<8x32xf32>
    %659 = arith.negf %658 : vector<8x32xf32>
    %660 = math.exp %659 : vector<8x32xf32>
    %cst_113 = arith.constant 1.000000e+00 : f32
    %661 = vector.broadcast %cst_113 : f32 to vector<8x32xf32>
    %662 = arith.addf %661, %660 : vector<8x32xf32>
    %663 = arith.divf %661, %662 : vector<8x32xf32>
    %664 = vector.extract_strided_slice %657 {offsets = [0, 32], sizes = [8, 32], strides = [1, 1]} : vector<8x128xf32> to vector<8x32xf32>
    %665 = arith.negf %664 : vector<8x32xf32>
    %666 = math.exp %665 : vector<8x32xf32>
    %cst_114 = arith.constant 1.000000e+00 : f32
    %667 = vector.broadcast %cst_114 : f32 to vector<8x32xf32>
    %668 = arith.addf %667, %666 : vector<8x32xf32>
    %669 = arith.divf %667, %668 : vector<8x32xf32>
    %670 = vector.extract_strided_slice %657 {offsets = [0, 64], sizes = [8, 32], strides = [1, 1]} : vector<8x128xf32> to vector<8x32xf32>
    %671 = math.tanh %670 : vector<8x32xf32>
    %672 = vector.extract_strided_slice %657 {offsets = [0, 96], sizes = [8, 32], strides = [1, 1]} : vector<8x128xf32> to vector<8x32xf32>
    %673 = arith.negf %672 : vector<8x32xf32>
    %674 = math.exp %673 : vector<8x32xf32>
    %cst_115 = arith.constant 1.000000e+00 : f32
    %675 = vector.broadcast %cst_115 : f32 to vector<8x32xf32>
    %676 = arith.addf %675, %674 : vector<8x32xf32>
    %677 = arith.divf %675, %676 : vector<8x32xf32>
    %678 = arith.mulf %669, %586 : vector<8x32xf32>
    %679 = arith.mulf %663, %671 : vector<8x32xf32>
    %680 = arith.addf %678, %679 : vector<8x32xf32>
    %681 = math.tanh %680 : vector<8x32xf32>
    %682 = arith.mulf %677, %681 : vector<8x32xf32>
    %683 = arith.mulf %635, %12 : vector<8x32xf32>
    %684 = arith.mulf %633, %15 : vector<8x32xf32>
    %685 = arith.addf %683, %684 : vector<8x32xf32>
    %cst_116 = arith.constant dense<0.000000e+00> : vector<8xf32>
    %686 = vector.multi_reduction <add>, %685, %cst_116 [1] : vector<8x32xf32> to vector<8xf32>
    %687 = vector.shape_cast %686 : vector<8xf32> to vector<8x1xf32>
    %688 = vector.broadcast %687 : vector<8x1xf32> to vector<8x16xf32>
    %689 = arith.addf %23, %688 : vector<8x16xf32>
    %cst_117 = arith.constant dense<0xFF800000> : vector<8xf32>
    %690 = vector.multi_reduction <maximumf>, %689, %cst_117 [1] : vector<8x16xf32> to vector<8xf32>
    %691 = vector.shape_cast %690 : vector<8xf32> to vector<8x1xf32>
    %692 = vector.broadcast %691 : vector<8x1xf32> to vector<8x16xf32>
    %693 = arith.subf %689, %692 : vector<8x16xf32>
    %694 = math.exp %693 : vector<8x16xf32>
    %cst_118 = arith.constant dense<0.000000e+00> : vector<8xf32>
    %695 = vector.multi_reduction <add>, %694, %cst_118 [1] : vector<8x16xf32> to vector<8xf32>
    %696 = vector.shape_cast %695 : vector<8xf32> to vector<8x1xf32>
    %697 = vector.broadcast %696 : vector<8x1xf32> to vector<8x16xf32>
    %698 = arith.divf %694, %697 : vector<8x16xf32>
    %699 = vector.extract_strided_slice %0 {offsets = [0, 7, 0], sizes = [8, 1, 16], strides = [1, 1, 1]} : vector<16x8x16xf32> to vector<8x1x16xf32>
    %700 = vector.shape_cast %699 : vector<8x1x16xf32> to vector<8x16xf32>
    %701 = arith.mulf %698, %700 : vector<8x16xf32>
    %702 = tpu.concatenate %701, %635 in 1 : vector<8x16xf32>, vector<8x32xf32> -> vector<8x48xf32>
    %cst_119 = arith.constant dense<0.000000e+00> : vector<8x128xf32>
    %703 = tpu.matmul %702, %9, %cst_119 {dimension_numbers = #tpu.dot_dimension_numbers<[1], [0], [0], [1], [0, 0, 1, 1], [], []>} : vector<8x48xf32>, vector<48x128xf32>, vector<8x128xf32> -> vector<8x128xf32>
    %704 = arith.addf %703, %18 : vector<8x128xf32>
    %705 = vector.extract_strided_slice %704 {offsets = [0, 0], sizes = [8, 32], strides = [1, 1]} : vector<8x128xf32> to vector<8x32xf32>
    %706 = arith.negf %705 : vector<8x32xf32>
    %707 = math.exp %706 : vector<8x32xf32>
    %cst_120 = arith.constant 1.000000e+00 : f32
    %708 = vector.broadcast %cst_120 : f32 to vector<8x32xf32>
    %709 = arith.addf %708, %707 : vector<8x32xf32>
    %710 = arith.divf %708, %709 : vector<8x32xf32>
    %711 = vector.extract_strided_slice %704 {offsets = [0, 32], sizes = [8, 32], strides = [1, 1]} : vector<8x128xf32> to vector<8x32xf32>
    %712 = arith.negf %711 : vector<8x32xf32>
    %713 = math.exp %712 : vector<8x32xf32>
    %cst_121 = arith.constant 1.000000e+00 : f32
    %714 = vector.broadcast %cst_121 : f32 to vector<8x32xf32>
    %715 = arith.addf %714, %713 : vector<8x32xf32>
    %716 = arith.divf %714, %715 : vector<8x32xf32>
    %717 = vector.extract_strided_slice %704 {offsets = [0, 64], sizes = [8, 32], strides = [1, 1]} : vector<8x128xf32> to vector<8x32xf32>
    %718 = math.tanh %717 : vector<8x32xf32>
    %719 = vector.extract_strided_slice %704 {offsets = [0, 96], sizes = [8, 32], strides = [1, 1]} : vector<8x128xf32> to vector<8x32xf32>
    %720 = arith.negf %719 : vector<8x32xf32>
    %721 = math.exp %720 : vector<8x32xf32>
    %cst_122 = arith.constant 1.000000e+00 : f32
    %722 = vector.broadcast %cst_122 : f32 to vector<8x32xf32>
    %723 = arith.addf %722, %721 : vector<8x32xf32>
    %724 = arith.divf %722, %723 : vector<8x32xf32>
    %725 = arith.mulf %716, %633 : vector<8x32xf32>
    %726 = arith.mulf %710, %718 : vector<8x32xf32>
    %727 = arith.addf %725, %726 : vector<8x32xf32>
    %728 = math.tanh %727 : vector<8x32xf32>
    %729 = arith.mulf %724, %728 : vector<8x32xf32>
    %730 = arith.mulf %682, %12 : vector<8x32xf32>
    %731 = arith.mulf %680, %15 : vector<8x32xf32>
    %732 = arith.addf %730, %731 : vector<8x32xf32>
    %cst_123 = arith.constant dense<0.000000e+00> : vector<8xf32>
    %733 = vector.multi_reduction <add>, %732, %cst_123 [1] : vector<8x32xf32> to vector<8xf32>
    %734 = vector.shape_cast %733 : vector<8xf32> to vector<8x1xf32>
    %735 = vector.broadcast %734 : vector<8x1xf32> to vector<8x16xf32>
    %736 = arith.addf %24, %735 : vector<8x16xf32>
    %cst_124 = arith.constant dense<0xFF800000> : vector<8xf32>
    %737 = vector.multi_reduction <maximumf>, %736, %cst_124 [1] : vector<8x16xf32> to vector<8xf32>
    %738 = vector.shape_cast %737 : vector<8xf32> to vector<8x1xf32>
    %739 = vector.broadcast %738 : vector<8x1xf32> to vector<8x16xf32>
    %740 = arith.subf %736, %739 : vector<8x16xf32>
    %741 = math.exp %740 : vector<8x16xf32>
    %cst_125 = arith.constant dense<0.000000e+00> : vector<8xf32>
    %742 = vector.multi_reduction <add>, %741, %cst_125 [1] : vector<8x16xf32> to vector<8xf32>
    %743 = vector.shape_cast %742 : vector<8xf32> to vector<8x1xf32>
    %744 = vector.broadcast %743 : vector<8x1xf32> to vector<8x16xf32>
    %745 = arith.divf %741, %744 : vector<8x16xf32>
    %746 = vector.extract_strided_slice %0 {offsets = [8, 7, 0], sizes = [8, 1, 16], strides = [1, 1, 1]} : vector<16x8x16xf32> to vector<8x1x16xf32>
    %747 = vector.shape_cast %746 : vector<8x1x16xf32> to vector<8x16xf32>
    %748 = arith.mulf %745, %747 : vector<8x16xf32>
    %749 = tpu.concatenate %748, %682 in 1 : vector<8x16xf32>, vector<8x32xf32> -> vector<8x48xf32>
    %cst_126 = arith.constant dense<0.000000e+00> : vector<8x128xf32>
    %750 = tpu.matmul %749, %9, %cst_126 {dimension_numbers = #tpu.dot_dimension_numbers<[1], [0], [0], [1], [0, 0, 1, 1], [], []>} : vector<8x48xf32>, vector<48x128xf32>, vector<8x128xf32> -> vector<8x128xf32>
    %751 = arith.addf %750, %18 : vector<8x128xf32>
    %752 = vector.extract_strided_slice %751 {offsets = [0, 0], sizes = [8, 32], strides = [1, 1]} : vector<8x128xf32> to vector<8x32xf32>
    %753 = arith.negf %752 : vector<8x32xf32>
    %754 = math.exp %753 : vector<8x32xf32>
    %cst_127 = arith.constant 1.000000e+00 : f32
    %755 = vector.broadcast %cst_127 : f32 to vector<8x32xf32>
    %756 = arith.addf %755, %754 : vector<8x32xf32>
    %757 = arith.divf %755, %756 : vector<8x32xf32>
    %758 = vector.extract_strided_slice %751 {offsets = [0, 32], sizes = [8, 32], strides = [1, 1]} : vector<8x128xf32> to vector<8x32xf32>
    %759 = arith.negf %758 : vector<8x32xf32>
    %760 = math.exp %759 : vector<8x32xf32>
    %cst_128 = arith.constant 1.000000e+00 : f32
    %761 = vector.broadcast %cst_128 : f32 to vector<8x32xf32>
    %762 = arith.addf %761, %760 : vector<8x32xf32>
    %763 = arith.divf %761, %762 : vector<8x32xf32>
    %764 = vector.extract_strided_slice %751 {offsets = [0, 64], sizes = [8, 32], strides = [1, 1]} : vector<8x128xf32> to vector<8x32xf32>
    %765 = math.tanh %764 : vector<8x32xf32>
    %766 = vector.extract_strided_slice %751 {offsets = [0, 96], sizes = [8, 32], strides = [1, 1]} : vector<8x128xf32> to vector<8x32xf32>
    %767 = arith.negf %766 : vector<8x32xf32>
    %768 = math.exp %767 : vector<8x32xf32>
    %cst_129 = arith.constant 1.000000e+00 : f32
    %769 = vector.broadcast %cst_129 : f32 to vector<8x32xf32>
    %770 = arith.addf %769, %768 : vector<8x32xf32>
    %771 = arith.divf %769, %770 : vector<8x32xf32>
    %772 = arith.mulf %763, %680 : vector<8x32xf32>
    %773 = arith.mulf %757, %765 : vector<8x32xf32>
    %774 = arith.addf %772, %773 : vector<8x32xf32>
    %775 = math.tanh %774 : vector<8x32xf32>
    %776 = arith.mulf %771, %775 : vector<8x32xf32>
    %777 = tpu.concatenate %43, %137, %231, %325, %419, %513, %607, %701 in 1 : vector<8x16xf32>, vector<8x16xf32>, vector<8x16xf32>, vector<8x16xf32>, vector<8x16xf32>, vector<8x16xf32>, vector<8x16xf32>, vector<8x16xf32> -> vector<8x128xf32>
    %778 = tpu.concatenate %90, %184, %278, %372, %466, %560, %654, %748 in 1 : vector<8x16xf32>, vector<8x16xf32>, vector<8x16xf32>, vector<8x16xf32>, vector<8x16xf32>, vector<8x16xf32>, vector<8x16xf32>, vector<8x16xf32> -> vector<8x128xf32>
    %779 = tpu.concatenate %777, %778 in 0 : vector<8x128xf32>, vector<8x128xf32> -> vector<16x128xf32>
    %780 = tpu.concatenate %71, %165, %259, %353, %447, %541, %635, %729 in 1 : vector<8x32xf32>, vector<8x32xf32>, vector<8x32xf32>, vector<8x32xf32>, vector<8x32xf32>, vector<8x32xf32>, vector<8x32xf32>, vector<8x32xf32> -> vector<8x256xf32>
    %781 = tpu.concatenate %118, %212, %306, %400, %494, %588, %682, %776 in 1 : vector<8x32xf32>, vector<8x32xf32>, vector<8x32xf32>, vector<8x32xf32>, vector<8x32xf32>, vector<8x32xf32>, vector<8x32xf32>, vector<8x32xf32> -> vector<8x256xf32>
    %782 = tpu.concatenate %780, %781 in 0 : vector<8x256xf32>, vector<8x256xf32> -> vector<16x256xf32>
    %c0_130 = arith.constant 0 : index
    %c0_131 = arith.constant 0 : index
    %783 = vector.load %arg8[%c0_130, %c0_131] : memref<16x128xf32, #tpu.memory_space<vmem>>, vector<16x128xf32>
    tpu.vector_store %arg8[%c0_130, %c0_131], %779 {strides = array<i32>} : memref<16x128xf32, #tpu.memory_space<vmem>>, vector<16x128xf32>,
    %c0_132 = arith.constant 0 : index
    %c0_133 = arith.constant 0 : index
    %784 = vector.load %arg9[%c0_132, %c0_133] : memref<16x256xf32, #tpu.memory_space<vmem>>, vector<16x256xf32>
    tpu.vector_store %arg9[%c0_132, %c0_133], %782 {strides = array<i32>} : memref<16x256xf32, #tpu.memory_space<vmem>>, vector<16x256xf32>,
    return
  }
  func.func @transform_0(%arg0: i32) -> (i32, i32, i32) {
    %c0_i32 = arith.constant 0 : i32
    %c0_i32_0 = arith.constant 0 : i32
    %c0_i32_1 = arith.constant 0 : i32
    return %arg0, %c0_i32, %c0_i32_0 : i32, i32, i32
  }
  func.func @transform_1(%arg0: i32) -> (i32, i32) {
    %c0_i32 = arith.constant 0 : i32
    %c0_i32_0 = arith.constant 0 : i32
    %c0_i32_1 = arith.constant 0 : i32
    return %c0_i32, %c0_i32_0 : i32, i32
  }
  func.func @transform_2(%arg0: i32) -> (i32, i32) {
    %c0_i32 = arith.constant 0 : i32
    %c0_i32_0 = arith.constant 0 : i32
    %c0_i32_1 = arith.constant 0 : i32
    return %c0_i32, %c0_i32_0 : i32, i32
  }
  func.func @transform_3(%arg0: i32) -> (i32, i32) {
    %c0_i32 = arith.constant 0 : i32
    %c0_i32_0 = arith.constant 0 : i32
    %c0_i32_1 = arith.constant 0 : i32
    return %c0_i32, %c0_i32_0 : i32, i32
  }
  func.func @transform_4(%arg0: i32) -> (i32, i32) {
    %c0_i32 = arith.constant 0 : i32
    %c0_i32_0 = arith.constant 0 : i32
    %c0_i32_1 = arith.constant 0 : i32
    return %c0_i32, %c0_i32_0 : i32, i32
  }
  func.func @transform_5(%arg0: i32) -> (i32, i32) {
    %c0_i32 = arith.constant 0 : i32
    %c0_i32_0 = arith.constant 0 : i32
    %c0_i32_1 = arith.constant 0 : i32
    return %c0_i32, %c0_i32_0 : i32, i32
  }
  func.func @transform_6(%arg0: i32) -> (i32, i32) {
    %c0_i32 = arith.constant 0 : i32
    %c0_i32_0 = arith.constant 0 : i32
    %c0_i32_1 = arith.constant 0 : i32
    return %c0_i32, %c0_i32_0 : i32, i32
  }
  func.func @transform_7(%arg0: i32) -> (i32, i32) {
    %c0_i32 = arith.constant 0 : i32
    %c0_i32_0 = arith.constant 0 : i32
    return %arg0, %c0_i32 : i32, i32
  }
  func.func @transform_8(%arg0: i32) -> (i32, i32) {
    %c0_i32 = arith.constant 0 : i32
    %c0_i32_0 = arith.constant 0 : i32
    return %arg0, %c0_i32 : i32, i32
  }
}

</mosaic_0001>

<bundles_post_ra>
// kernel: sa_pallas.1
= control target key start
LH: loop header
LB: loop body
LE: loop exit
PB: predicated region body
PF: predicated region fallthrough
CT: control target
= control target key end

     0   :  { %s7591_s29 = smov 0   ;;  %s12739_s0 = inlined_call_operand.vmem [shape: f32[32,8,16], index: 0, kind: input, shape index: {}]   ;;  %s12740_s1 = inlined_call_operand.vmem [shape: f32[8,1], index: 1, kind: input, shape index: {}]   ;;  %s12741_s2 = inlined_call_operand.vmem [shape: f32[1,32], index: 2, kind: input, shape index: {}]   ;;  %s12742_s3 = inlined_call_operand.vmem [shape: f32[1,32], index: 3, kind: input, shape index: {}]   ;;  %s12743_s4 = inlined_call_operand.<no memory space> [shape: f32[1,1], index: 4, kind: input, shape index: {}]   ;;  %s12744_s5 = inlined_call_operand.vmem [shape: f32[48,128], index: 5, kind: input, shape index: {}]   ;;  %s12745_s6 = inlined_call_operand.vmem [shape: f32[1,128], index: 6, kind: input, shape index: {}]   ;;  %s12746_s7 = inlined_call_operand.vmem [shape: f32[32,128], index: 7, kind: output, shape index: {0}]   ;;  %s12747_s8 = inlined_call_operand.vmem [shape: f32[32,256], index: 8, kind: output, shape index: {1}]  }
   0x1   :  { %v14_v0 = vstv %s12743_s4 }
   0x2   :  { %15 = vst [vmem:[#allocation2] sm:$0x1] %v14_v0 }
   0x3 LB: > { %s6696_s30 = sadd.s32 4294967295, %s7533_s29   ;;  %p6700_p0 = scmp.ge.s32.totalorder %s7533_s29, 1  ;;  %s7533_s29 = sphi %s7591_s29, %s21_s29  }
   0x4   : > { %p268_p1 = scmp.lt.s32.totalorder %s7533_s29, 3 }
   0x6   : > { %p269_p2 = pnand %p6700_p0, %p268_p1 }
   0x8   : > { %272 = sbr.rel (%p269_p2) target bundleno = 8309 (0x2075), region = 48 }
   0xd   : > { %v343_v1 = vld [vmem:[%s12740_s1] sm:$0xff]  ;;  %v7535_v2 = vmov 0   ;;  %vm12794_vm0 = vcmask 261120   ;;  %s6701_s14 = sshll.u32 %s6696_s30, 4  ;;  %vm12799_vm1 = vcmask 130048   ;;  %vm12810_vm2 = vcmask 1041409  }
   0xe   : > { %6759 = vset.pattern.permute.xlu0 %v7535_v2  ;;  %v6761_v3 = vld [vmem:[%s12741_s2] ss:$0 sm:$0xff]  ;;  %p309_p3 = scmp.lt.s32.totalorder %s6701_s14, 31  ;;  %vm12809_vm3 = vcmask 1042434   ;;  %vm12808_vm4 = vcmask 1043459   ;;  %vm12807_vm5 = vcmask 1044484  }
   0xf   : > { %346 = vperm.xlu0 %6759, %v343_v1   ;;  %v6762_v4 = vld [vmem:[%s12742_s3] ss:$0 sm:$0xff]  ;;  %v519_v5 = vmul.f32 0.0, %v6761_v3  ;;  %vm12806_vm6 = vcmask 1045509   ;;  %vm12803_vm7 = vcmask 1046534   ;;  %vm12801_vm8 = vcmask 1047559  }
  0x10   : > { %v520_v6 = vmul.f32 0.0, %v6762_v4  ;;  %v6760_v7 = vld [vmem:[#allocation2] ss:$0 sm:$0xff]  ;;  %s13742_s14 = smov (!%p309_p3, %s6701_s14), 31  ;;  %s7536_s12 = smov 64  }
  0x11   : > { %s6702_s15 = sshll.u32 %s13742_s14, 3  ;;  %s7537_s13 = smov 32  }
  0x12   : > { %v521_v8 = vadd.f32 %v520_v6, %v519_v5  ;;  %s7614_s18 = scalar_lea.vmem %s12739_s0, %s6702_s15  ;;  %s7538_s19 = smov 96  }
  0x13   : > { %v335_v10 = vld [vmem:[%s7614_s18 + $0x40] sm:$0xff]  ;;  %v336_v11 = vld [vmem:[%s7614_s18 + $0x48] sm:$0xff]  ;;  %v337_v12 = vld [vmem:[%s7614_s18 + $0x50] sm:$0xff]  ;;  %s7539_s20 = smov 48   ;;  %s7540_s21 = smov 80  }
  0x14   : > { %v523_v9 = vsel %vm12794_vm0, %v521_v8, 0.0  ;;  %v338_v13 = vld [vmem:[%s7614_s18 + $0x58] sm:$0xff]  ;;  %v339_v14 = vld [vmem:[%s7614_s18 + $0x60] sm:$0xff]  ;;  %v340_v15 = vld [vmem:[%s7614_s18 + $0x68] sm:$0xff]  ;;  %s7541_s23 = smov 16   ;;  %s7542_s24 = smov 112  }
  0x15   : > { %524 = vadd.xlane.f32.xlu1 %v523_v9  ;;  %v341_v16 = vld [vmem:[%s7614_s18 + $0x70] sm:$0xff]  ;;  %v342_v17 = vld [vmem:[%s7614_s18 + $0x78] sm:$0xff] }
  0x17   : > { %482 = vperm.xlu0 %6759, %v6760_v7  }
  0x81   : > { %v7624_v18 = vpop.permute.xlu0 %346 }
  0x82   : > { %v357_v19 = vmul.f32 %v7624_v18, %v335_v10  ;;  %v358_v20 = vmul.f32 %v7624_v18, %v336_v11  ;;  %v359_v21 = vmul.f32 %v7624_v18, %v337_v12  ;;  %v360_v22 = vmul.f32 %v7624_v18, %v338_v13 }
  0x83   : > { %v361_v23 = vmul.f32 %v7624_v18, %v339_v14  ;;  %v362_v24 = vmul.f32 %v7624_v18, %v340_v15  ;;  %v363_v25 = vmul.f32 %v7624_v18, %v341_v16  ;;  %v364_v26 = vmul.f32 %v7624_v18, %v342_v17 }
  0x84   : > { %v422_v27 = vsel %vm12799_vm1, %v357_v19, 0.0  ;;  %v429_v28 = vsel %vm12799_vm1, %v358_v20, 0.0  ;;  %v436_v29 = vsel %vm12799_vm1, %v359_v21, 0.0  ;;  %v443_v30 = vsel %vm12799_vm1, %v360_v22, 0.0 }
  0x85   : > { %v423_v31 = vrot.slane %v422_v27, 4  ;;  %v430_v32 = vrot.slane %v429_v28, 4  ;;  %v437_v33 = vrot.slane %v436_v29, 4  ;;  %v444_v34 = vrot.slane %v443_v30, 4 }
  0x86   : > { %v450_v35 = vsel %vm12799_vm1, %v361_v23, 0.0  ;;  %v457_v36 = vsel %vm12799_vm1, %v362_v24, 0.0  ;;  %v464_v37 = vsel %vm12799_vm1, %v363_v25, 0.0  ;;  %v471_v38 = vsel %vm12799_vm1, %v364_v26, 0.0  ;;  %v7659_v26 = vld [vmem:[%s7614_s18] sm:$0xff] }
  0x87   : > { %v424_v39 = vadd.f32 %v423_v31, %v422_v27  ;;  %v431_v40 = vadd.f32 %v430_v32, %v429_v28  ;;  %v438_v41 = vadd.f32 %v437_v33, %v436_v29  ;;  %v445_v42 = vadd.f32 %v444_v34, %v443_v30  ;;  %v7662_v27 = vld [vmem:[%s7614_s18 + $0x8] sm:$0xff]  ;;  %v7665_v28 = vld [vmem:[%s7614_s18 + $0x10] sm:$0xff] }
  0x88   : > { %v451_v43 = vrot.slane %v450_v35, 4  ;;  %v458_v44 = vrot.slane %v457_v36, 4  ;;  %v465_v45 = vrot.slane %v464_v37, 4  ;;  %v472_v46 = vrot.slane %v471_v38, 4  ;;  %v7644_v12 = vpop.xlane.xlu1 %524 }
  0x89   : > { %v425_v47 = vrot.slane %v424_v39, 2  ;;  %v432_v48 = vrot.slane %v431_v40, 2  ;;  %v439_v49 = vrot.slane %v438_v41, 2  ;;  %v446_v50 = vrot.slane %v445_v42, 2  ;;  %v7642_v11 = vpop.permute.xlu0 %482 }
  0x8a   : > { %v452_v51 = vadd.f32 %v451_v43, %v450_v35  ;;  %v459_v52 = vadd.f32 %v458_v44, %v457_v36  ;;  %v466_v53 = vadd.f32 %v465_v45, %v464_v37  ;;  %v473_v54 = vadd.f32 %v472_v46, %v471_v38  ;;  %v7696_v37 = vld [vmem:[%s7614_s18 + $0x18] sm:$0xff]  ;;  %v7699_v38 = vld [vmem:[%s7614_s18 + $0x20] sm:$0xff] }
  0x8b   : > { %v426_v55 = vadd.f32 %v425_v47, %v424_v39  ;;  %v433_v56 = vadd.f32 %v432_v48, %v431_v40  ;;  %v440_v57 = vadd.f32 %v439_v49, %v438_v41  ;;  %v447_v58 = vadd.f32 %v446_v50, %v445_v42  ;;  %v7702_v39 = vld [vmem:[%s7614_s18 + $0x28] sm:$0xff]  ;;  %v7708_v41 = vld [vmem:[%s7614_s18 + $0x30] sm:$0xff]  ;;  %v7711_v42 = vld [vmem:[%s7614_s18 + $0x38] sm:$0xff] }
  0x8c   : > { %v453_v59 = vrot.slane %v452_v51, 2  ;;  %v460_v60 = vrot.slane %v459_v52, 2  ;;  %v467_v61 = vrot.slane %v466_v53, 2  ;;  %v474_v62 = vrot.slane %v473_v54, 2 }
  0x8d   : > { %v427_v63 = vrot.slane %v426_v55, 1  ;;  %v434_v0 = vrot.slane %v433_v56, 1  ;;  %v441_v1 = vrot.slane %v440_v57, 1  ;;  %v448_v2 = vrot.slane %v447_v58, 1 }
  0x8e   : > { %v454_v3 = vadd.f32 %v453_v59, %v452_v51  ;;  %v461_v4 = vadd.f32 %v460_v60, %v459_v52  ;;  %v468_v5 = vadd.f32 %v467_v61, %v466_v53  ;;  %v475_v6 = vadd.f32 %v474_v62, %v473_v54 }
  0x8f   : > { %v428_v7 = vadd.f32 %v427_v63, %v426_v55  ;;  %v435_v8 = vadd.f32 %v434_v0, %v433_v56  ;;  %v442_v9 = vadd.f32 %v441_v1, %v440_v57  ;;  %v449_v10 = vadd.f32 %v448_v2, %v447_v58 }
  0x90   : > { %v455_v13 = vrot.slane %v454_v3, 1  ;;  %v462_v14 = vrot.slane %v461_v4, 1  ;;  %v469_v15 = vrot.slane %v468_v5, 1  ;;  %v476_v16 = vrot.slane %v475_v6, 1 }
  0x91   : > { %v7647_v17 = vadd.f32 %v7642_v11, %v428_v7  ;;  %v7650_v19 = vadd.f32 %v7642_v11, %v435_v8  ;;  %v7653_v20 = vadd.f32 %v7642_v11, %v442_v9  ;;  %v7656_v21 = vadd.f32 %v7642_v11, %v449_v10 }
  0x92   : > { %v456_v22 = vadd.f32 %v455_v13, %v454_v3  ;;  %v463_v23 = vadd.f32 %v462_v14, %v461_v4  ;;  %v470_v24 = vadd.f32 %v469_v15, %v468_v5  ;;  %v477_v25 = vadd.f32 %v476_v16, %v475_v6 }
  0x93   : > { %12859 = vst [vmem:[#allocation3_spill] sm:$0xff] %v7647_v17  ;;  %v7669_v29 = vadd.f32 %v7644_v12, %v7647_v17  ;;  %v7673_v30 = vadd.f32 %v7644_v12, %v7650_v19  ;;  %v7677_v31 = vadd.f32 %v7644_v12, %v7653_v20  ;;  %v7681_v32 = vadd.f32 %v7644_v12, %v7656_v21 }
  0x94   : > { %12860 = vst [vmem:[#allocation4_spill] sm:$0xff] %v7650_v19  ;;  %v7684_v33 = vadd.f32 %v7642_v11, %v456_v22  ;;  %v7687_v34 = vadd.f32 %v7642_v11, %v463_v23  ;;  %v7690_v35 = vadd.f32 %v7642_v11, %v470_v24  ;;  %v7693_v36 = vadd.f32 %v7642_v11, %v477_v25 }
  0x95   : > { %12861 = vst [vmem:[#allocation5_spill] sm:$0xff] %v7653_v20  ;;  %v871_v40 = vsel %vm12810_vm2, %v7673_v30, %v7669_v29  ;;  %v349_v43 = vmul.f32 %v7624_v18, %v7659_v26  ;;  %v350_v44 = vmul.f32 %v7624_v18, %v7662_v27  ;;  %v351_v45 = vmul.f32 %v7624_v18, %v7665_v28 }
  0x96   : > { %12862 = vst [vmem:[#allocation6_spill] sm:$0xff] %v7656_v21  ;;  %v7721_v46 = vadd.f32 %v7644_v12, %v7684_v33  ;;  %v7725_v47 = vadd.f32 %v7644_v12, %v7687_v34  ;;  %v7729_v48 = vadd.f32 %v7644_v12, %v7690_v35  ;;  %v7733_v49 = vadd.f32 %v7644_v12, %v7693_v36 }
  0x97   : > { %12863 = vst [vmem:[#allocation7_spill] sm:$0xff] %v7684_v33  ;;  %v872_v50 = vsel %vm12809_vm3, %v7677_v31, %v871_v40  ;;  %v352_v51 = vmul.f32 %v7624_v18, %v7696_v37  ;;  %v353_v52 = vmul.f32 %v7624_v18, %v7699_v38  ;;  %v354_v53 = vmul.f32 %v7624_v18, %v7702_v39 }
  0x98   : > { %12864 = vst [vmem:[#allocation8_spill] sm:$0xff] %v7687_v34  ;;  %v873_v54 = vsel %vm12808_vm4, %v7681_v32, %v872_v50  ;;  %v355_v55 = vmul.f32 %v7624_v18, %v7708_v41  ;;  %v356_v56 = vmul.f32 %v7624_v18, %v7711_v42  ;;  %v366_v57 = vsel %vm12799_vm1, %v349_v43, 0.0 }
  0x99   : > { %12865 = vst [vmem:[#allocation9_spill] sm:$0xff] %v7690_v35  ;;  %v874_v58 = vsel %vm12807_vm5, %v7721_v46, %v873_v54  ;;  %v367_v59 = vrot.slane %v366_v57, 4  ;;  %v373_v60 = vsel %vm12799_vm1, %v350_v44, 0.0  ;;  %v380_v61 = vsel %vm12799_vm1, %v351_v45, 0.0 }
  0x9a   : > { %12866 = vst [vmem:[#allocation10_spill] sm:$0xff] %v7693_v36  ;;  %v875_v62 = vsel %vm12806_vm6, %v7725_v47, %v874_v58  ;;  %v374_v63 = vrot.slane %v373_v60, 4  ;;  %v381_v0 = vrot.slane %v380_v61, 4  ;;  %v387_v1 = vsel %vm12799_vm1, %v352_v51, 0.0 }
  0x9b   : > { %v876_v18 = vsel %vm12803_vm7, %v7729_v48, %v875_v62  ;;  %v368_v2 = vadd.f32 %v367_v59, %v366_v57  ;;  %v388_v3 = vrot.slane %v387_v1, 4  ;;  %v394_v4 = vsel %vm12799_vm1, %v353_v52, 0.0 }
  0x9c   : > { %v877_v5 = vsel %vm12801_vm8, %v7733_v49, %v876_v18  ;;  %v375_v6 = vadd.f32 %v374_v63, %v373_v60  ;;  %v382_v7 = vadd.f32 %v381_v0, %v380_v61  ;;  %v395_v8 = vrot.slane %v394_v4, 4 }
  0x9d   : > { %v879_v9 = vsel %vm12799_vm1, %v877_v5, -inf  ;;  %v369_v10 = vrot.slane %v368_v2, 2  ;;  %v389_v13 = vadd.f32 %v388_v3, %v387_v1  ;;  %v401_v14 = vsel %vm12799_vm1, %v354_v53, 0.0 }
  0x9e   : > { %880 = vmax.xlane.f32.xlu2 %v879_v9  ;;  %v376_v15 = vrot.slane %v375_v6, 2  ;;  %v383_v16 = vrot.slane %v382_v7, 2  ;;  %v396_v22 = vadd.f32 %v395_v8, %v394_v4  ;;  %v402_v23 = vrot.slane %v401_v14, 4 }
  0x9f   : > { %v370_v24 = vadd.f32 %v369_v10, %v368_v2  ;;  %v390_v25 = vrot.slane %v389_v13, 2  ;;  %v408_v40 = vsel %vm12799_vm1, %v355_v55, 0.0  ;;  %v415_v43 = vsel %vm12799_vm1, %v356_v56, 0.0 }
  0xa0   : > { %v377_v44 = vadd.f32 %v376_v15, %v375_v6  ;;  %v384_v45 = vadd.f32 %v383_v16, %v382_v7  ;;  %v397_v50 = vrot.slane %v396_v22, 2  ;;  %v403_v51 = vadd.f32 %v402_v23, %v401_v14 }
  0xa1   : > { %v371_v52 = vrot.slane %v370_v24, 1  ;;  %v391_v54 = vadd.f32 %v390_v25, %v389_v13  ;;  %v409_v57 = vrot.slane %v408_v40, 4  ;;  %v416_v58 = vrot.slane %v415_v43, 4 }
  0xa2   : > { %v378_v53 = vrot.slane %v377_v44, 1  ;;  %v385_v59 = vrot.slane %v384_v45, 1  ;;  %v398_v60 = vadd.f32 %v397_v50, %v396_v22  ;;  %v404_v61 = vrot.slane %v403_v51, 2 }
  0xa3   : > { %v372_v62 = vadd.f32 %v371_v52, %v370_v24  ;;  %v392_v63 = vrot.slane %v391_v54, 1  ;;  %v410_v0 = vadd.f32 %v409_v57, %v408_v40  ;;  %v417_v1 = vadd.f32 %v416_v58, %v415_v43 }
  0xa4   : > { %v379_v18 = vadd.f32 %v378_v53, %v377_v44  ;;  %v386_v55 = vadd.f32 %v385_v59, %v384_v45  ;;  %v399_v2 = vrot.slane %v398_v60, 1  ;;  %v405_v56 = vadd.f32 %v404_v61, %v403_v51 }
  0xa5   : > { %v393_v3 = vadd.f32 %v392_v63, %v391_v54  ;;  %v411_v4 = vrot.slane %v410_v0, 2  ;;  %v418_v5 = vrot.slane %v417_v1, 2  ;;  %v7767_v6 = vadd.f32 %v7642_v11, %v372_v62 }
  0xa6   : > { %v400_v7 = vadd.f32 %v399_v2, %v398_v60  ;;  %v406_v8 = vrot.slane %v405_v56, 1  ;;  %v7770_v9 = vadd.f32 %v7642_v11, %v379_v18  ;;  %v7773_v10 = vadd.f32 %v7642_v11, %v386_v55 }
  0xa7   : > { %12867 = vst [vmem:[#allocation11_spill] sm:$0xff] %v7767_v6  ;;  %v412_v13 = vadd.f32 %v411_v4, %v410_v0  ;;  %v419_v14 = vadd.f32 %v418_v5, %v417_v1  ;;  %v7776_v15 = vadd.f32 %v7642_v11, %v393_v3  ;;  %v7780_v16 = vadd.f32 %v7644_v12, %v7767_v6 }
  0xa8   : > { %12868 = vst [vmem:[#allocation12_spill] sm:$0xff] %v7770_v9  ;;  %v407_v22 = vadd.f32 %v406_v8, %v405_v56  ;;  %v7783_v23 = vadd.f32 %v7642_v11, %v400_v7  ;;  %v7787_v24 = vadd.f32 %v7644_v12, %v7770_v9  ;;  %v7791_v25 = vadd.f32 %v7644_v12, %v7773_v10 }
  0xa9   : > { %12869 = vst [vmem:[#allocation13_spill] sm:$0xff] %v7773_v10  ;;  %v413_v40 = vrot.slane %v412_v13, 1  ;;  %v420_v43 = vrot.slane %v419_v14, 1  ;;  %v7798_v45 = vadd.f32 %v7644_v12, %v7776_v15 }
  0xaa   : > { %12870 = vst [vmem:[#allocation14_spill] sm:$0xff] %v7776_v15  ;;  %v7794_v44 = vadd.f32 %v7642_v11, %v407_v22  ;;  %v543_v50 = vsel %vm12810_vm2, %v7787_v24, %v7780_v16  ;;  %v7805_v54 = vadd.f32 %v7644_v12, %v7783_v23 }
  0xab   : > { %12871 = vst [vmem:[#allocation15_spill] sm:$0xff] %v7783_v23  ;;  %v414_v51 = vadd.f32 %v413_v40, %v412_v13  ;;  %v421_v52 = vadd.f32 %v420_v43, %v419_v14  ;;  %v545_v57 = vsel %vm12809_vm3, %v7791_v25, %v543_v50 }
  0xac   : > { %12872 = vst [vmem:[#allocation16_spill] sm:$0xff] %v7794_v44  ;;  %v7811_v58 = vadd.f32 %v7644_v12, %v7794_v44  ;;  %v547_v53 = vsel %vm12808_vm4, %v7798_v45, %v545_v57 }
  0xad   : > { %v7816_v59 = vadd.f32 %v7642_v11, %v414_v51  ;;  %v7819_v60 = vadd.f32 %v7642_v11, %v421_v52  ;;  %v549_v61 = vsel %vm12807_vm5, %v7805_v54, %v547_v53 }
  0xae   : > { %v551_v62 = vsel %vm12806_vm6, %v7811_v58, %v549_v61 }
  0xaf   : > { %12873 = vst [vmem:[#allocation17_spill] sm:$0xff] %v7816_v59  ;;  %v7827_v63 = vadd.f32 %v7644_v12, %v7816_v59  ;;  %v7831_v0 = vadd.f32 %v7644_v12, %v7819_v60 }
  0xb0   : > { %12874 = vst [vmem:[#allocation18_spill] sm:$0xff] %v7819_v60 }
  0xb1   : > { %v553_v1 = vsel %vm12803_vm7, %v7827_v63, %v551_v62 }
  0xb2   : > { %v555_v11 = vsel %vm12801_vm8, %v7831_v0, %v553_v1 }
  0xb3   : > { %v557_v18 = vsel %vm12799_vm1, %v555_v11, -inf }
  0xb4   : > { %558 = vmax.xlane.f32.xlu1 %v557_v18 }
 0x111   : > { %v881_v55 = vpop.xlane.xlu2 %880 }
 0x112   : > { %v883_v2 = vrot.slane %v881_v55, 1  ;;  %v884_v56 = vrot.slane %v881_v55, 2  ;;  %v885_v3 = vrot.slane %v881_v55, 3  ;;  %v898_v4 = vsub.f32 %v7669_v29, %v881_v55 }
 0x113   : > { %v886_v5 = vrot.slane %v881_v55, 4  ;;  %v887_v7 = vrot.slane %v881_v55, 5  ;;  %v888_v8 = vrot.slane %v881_v55, 6  ;;  %v889_v12 = vrot.slane %v881_v55, 7 }
 0x114   : > { %v899_v13 = vsub.f32 %v7673_v30, %v883_v2  ;;  %v906_v14 = vmul.f32 1.442695, %v898_v4  ;;  %v900_v22 = vsub.f32 %v7677_v31, %v884_v56  ;;  %v901_v40 = vsub.f32 %v7681_v32, %v885_v3 }
 0x115   : > { %v902_v43 = vsub.f32 %v7721_v46, %v886_v5  ;;  %v903_v50 = vsub.f32 %v7725_v47, %v887_v7  ;;  %v904_v51 = vsub.f32 %v7729_v48, %v888_v8  ;;  %v905_v52 = vsub.f32 %v7733_v49, %v889_v12 }
 0x116   : > { %v908_v29 = vmul.f32 1.442695, %v899_v13  ;;  %v910_v57 = vmul.f32 1.442695, %v900_v22  ;;  %v912_v53 = vmul.f32 1.442695, %v901_v40  ;;  %6764 = vpow2.f32 %v906_v14 }
 0x117   : > { %v914_v61 = vmul.f32 1.442695, %v902_v43  ;;  %v916_v30 = vmul.f32 1.442695, %v903_v50  ;;  %v918_v62 = vmul.f32 1.442695, %v904_v51 }
 0x118   : > { %6766 = vpow2.f32 %v908_v29  ;;  %v920_v31 = vmul.f32 1.442695, %v905_v52 }
 0x119   : > { %6768 = vpow2.f32 %v910_v57 }
 0x11a   : > { %6770 = vpow2.f32 %v912_v53 }
 0x11b   : > { %6772 = vpow2.f32 %v914_v61 }
 0x11c   : > { %6774 = vpow2.f32 %v916_v30  ;;  %v7846_v32 = vpop.eup %6764 }
 0x11d   : > { %12875 = vst [vmem:[#allocation19_spill] sm:$0xff] %v7846_v32  ;;  %6776 = vpow2.f32 %v918_v62 }
 0x11e   : > { %v7848_v46 = vpop.eup %6766  ;;  %6778 = vpow2.f32 %v920_v31 }
 0x11f   : > { %12876 = vst [vmem:[#allocation20_spill] sm:$0xff] %v7848_v46  ;;  %v7850_v47 = vpop.eup %6768  ;;  %v930_v48 = vrot.slane %v7848_v46, 7 }
 0x120   : > { %12877 = vst [vmem:[#allocation21_spill] sm:$0xff] %v7850_v47  ;;  %v7853_v49 = vpop.eup %6770  ;;  %v932_v1 = vrot.slane %v7850_v47, 6 }
 0x121   : > { %12878 = vst [vmem:[#allocation22_spill] sm:$0xff] %v7853_v49  ;;  %v7856_v11 = vpop.eup %6772  ;;  %v931_v18 = vsel %vm12810_vm2, %v930_v48, %v7846_v32  ;;  %v934_v55 = vrot.slane %v7853_v49, 5 }
 0x122   : > { %12879 = vst [vmem:[#allocation23_spill] sm:$0xff] %v7856_v11  ;;  %v7861_v2 = vpop.eup %6774  ;;  %v933_v56 = vsel %vm12809_vm3, %v932_v1, %v931_v18  ;;  %v936_v3 = vrot.slane %v7856_v11, 4 }
 0x123   : > { %12880 = vst [vmem:[#allocation24_spill] sm:$0xff] %v7861_v2  ;;  %v7865_v4 = vpop.eup %6776  ;;  %v935_v5 = vsel %vm12808_vm4, %v934_v55, %v933_v56  ;;  %v938_v7 = vrot.slane %v7861_v2, 3 }
 0x124   : > { %12881 = vst [vmem:[#allocation25_spill] sm:$0xff] %v7865_v4  ;;  %v7869_v8 = vpop.eup %6778  ;;  %v937_v12 = vsel %vm12807_vm5, %v936_v3, %v935_v5  ;;  %v940_v13 = vrot.slane %v7865_v4, 2 }
 0x125   : > { %12882 = vst [vmem:[#allocation26_spill] sm:$0xff] %v7869_v8  ;;  %v939_v14 = vsel %vm12806_vm6, %v938_v7, %v937_v12  ;;  %v942_v22 = vrot.slane %v7869_v8, 1 }
 0x126   : > { %v941_v40 = vsel %vm12803_vm7, %v940_v13, %v939_v14 }
 0x127   : > { %v559_v43 = vpop.xlane.xlu1 %558  ;;  %v943_v50 = vsel %vm12801_vm8, %v942_v22, %v941_v40 }
 0x128   : > { %v561_v51 = vrot.slane %v559_v43, 1  ;;  %v562_v52 = vrot.slane %v559_v43, 2  ;;  %v563_v29 = vrot.slane %v559_v43, 3  ;;  %v576_v57 = vsub.f32 %v7780_v16, %v559_v43 }
 0x129   : > { %v945_v53 = vsel %vm12799_vm1, %v943_v50, 0.0  ;;  %v564_v61 = vrot.slane %v559_v43, 4  ;;  %v565_v30 = vrot.slane %v559_v43, 5  ;;  %v566_v62 = vrot.slane %v559_v43, 6 }
 0x12a   : > { %v577_v31 = vsub.f32 %v7787_v24, %v561_v51  ;;  %v584_v48 = vmul.f32 1.442695, %v576_v57  ;;  %946 = vadd.xlane.f32.xlu0 %v945_v53  ;;  %v567_v1 = vrot.slane %v559_v43, 7  ;;  %v578_v18 = vsub.f32 %v7791_v25, %v562_v52 }
 0x12b   : > { %v579_v55 = vsub.f32 %v7798_v45, %v563_v29  ;;  %v580_v56 = vsub.f32 %v7805_v54, %v564_v61  ;;  %v581_v3 = vsub.f32 %v7811_v58, %v565_v30  ;;  %v582_v16 = vsub.f32 %v7827_v63, %v566_v62 }
 0x12c   : > { %v583_v5 = vsub.f32 %v7831_v0, %v567_v1  ;;  %v586_v7 = vmul.f32 1.442695, %v577_v31  ;;  %v588_v12 = vmul.f32 1.442695, %v578_v18  ;;  %6780 = vpow2.f32 %v584_v48 }
 0x12d   : > { %v590_v13 = vmul.f32 1.442695, %v579_v55  ;;  %v592_v24 = vmul.f32 1.442695, %v580_v56  ;;  %v594_v14 = vmul.f32 1.442695, %v581_v3 }
 0x12e   : > { %6782 = vpow2.f32 %v586_v7  ;;  %v596_v22 = vmul.f32 1.442695, %v582_v16  ;;  %v598_v25 = vmul.f32 1.442695, %v583_v5  ;;  %v7921_v16 = vld [vmem:[%s12744_s5 + $0x28] sm:$0xff]  ;;  %v7926_v5 = vld [vmem:[%s12744_s5 + $0x20] sm:$0xff] }
 0x12f   : > { %6784 = vpow2.f32 %v588_v12  ;;  %12883 = vst [vmem:[#allocation27_spill] sm:$0xff] %v7921_v16  ;;  %808 = vmatpush.msra.mxu0 %v7921_v16  ;;  %1129 = vmatpush.msra.mxu1 %v7921_v16  ;;  %v7933_v7 = vld [vmem:[%s12744_s5 + $0x18] sm:$0xff]  ;;  %v7942_v12 = vld [vmem:[%s12744_s5 + $0x10] sm:$0xff] }
 0x130   : > { %6786 = vpow2.f32 %v590_v13  ;;  %12884 = vst [vmem:[#allocation28_spill] sm:$0xff] %v7926_v5  ;;  %1907 = vmatpush.msra.mxu3 %v7921_v16  ;;  %1521 = vmatpush.msra.mxu2 %v7921_v16  ;;  %v7951_v13 = vld [vmem:[%s12744_s5 + $0x8] sm:$0xff] }
 0x131   : > { %6788 = vpow2.f32 %v592_v24  ;;  %12885 = vst [vmem:[#allocation29_spill] sm:$0xff] %v7933_v7  ;;  %809 = vmatpush.msra.mxu0 %v7926_v5  ;;  %1130 = vmatpush.msra.mxu1 %v7926_v5  ;;  %v7960_v24 = vld [vmem:[%s12744_s5] sm:$0xff] }
 0x132   : > { %6790 = vpow2.f32 %v594_v14  ;;  %v7886_v45 = vpop.eup %6780  ;;  %12886 = vst [vmem:[#allocation30_spill] sm:$0xff] %v7942_v12  ;;  %1908 = vmatpush.msra.mxu3 %v7926_v5  ;;  %1522 = vmatpush.msra.mxu2 %v7926_v5 }
 0x133   : > { %6792 = vpow2.f32 %v596_v22  ;;  %810 = vmatpush.msra.mxu0 %v7933_v7  ;;  %1131 = vmatpush.msra.mxu1 %v7933_v7  ;;  %12887 = vst [vmem:[#allocation31_spill] sm:$0xff] %v7951_v13 }
 0x134   : > { %v7888_v54 = vpop.eup %6782  ;;  %6794 = vpow2.f32 %v598_v25  ;;  %1909 = vmatpush.msra.mxu3 %v7933_v7  ;;  %1523 = vmatpush.msra.mxu2 %v7933_v7  ;;  %12888 = vst [vmem:[#allocation32_spill] sm:$0xff] %v7960_v24 }
 0x135   : > { %v7890_v58 = vpop.eup %6784  ;;  %v608_v63 = vrot.slane %v7888_v54, 7  ;;  %811 = vmatpush.msra.mxu0 %v7942_v12  ;;  %1132 = vmatpush.msra.mxu1 %v7942_v12 }
 0x136   : > { %v7893_v0 = vpop.eup %6786  ;;  %v610_v40 = vrot.slane %v7890_v58, 6  ;;  %1910 = vmatpush.msra.mxu3 %v7942_v12  ;;  %1524 = vmatpush.msra.mxu2 %v7942_v12 }
 0x137   : > { %v7896_v43 = vpop.eup %6788  ;;  %v609_v50 = vsel %vm12810_vm2, %v608_v63, %v7886_v45  ;;  %v612_v51 = vrot.slane %v7893_v0, 5  ;;  %812 = vmatpush.msra.mxu0 %v7951_v13  ;;  %1133 = vmatpush.msra.mxu1 %v7951_v13 }
 0x138   : > { %v7901_v52 = vpop.eup %6790  ;;  %v611_v29 = vsel %vm12809_vm3, %v610_v40, %v609_v50  ;;  %v614_v57 = vrot.slane %v7896_v43, 4  ;;  %1911 = vmatpush.msra.mxu3 %v7951_v13  ;;  %1525 = vmatpush.msra.mxu2 %v7951_v13 }
 0x139   : > { %v7905_v53 = vpop.eup %6792  ;;  %v613_v61 = vsel %vm12808_vm4, %v612_v51, %v611_v29  ;;  %v616_v30 = vrot.slane %v7901_v52, 3  ;;  %813 = vmatpush.msra.mxu0 %v7960_v24  ;;  %1134 = vmatpush.msra.mxu1 %v7960_v24 }
 0x13a   : > { %v7909_v62 = vpop.eup %6794  ;;  %v615_v31 = vsel %vm12807_vm5, %v614_v57, %v613_v61  ;;  %v618_v48 = vrot.slane %v7905_v53, 2  ;;  %1912 = vmatpush.msra.mxu3 %v7960_v24  ;;  %1526 = vmatpush.msra.mxu2 %v7960_v24 }
 0x13b   : > { %v617_v1 = vsel %vm12806_vm6, %v616_v30, %v615_v31  ;;  %v620_v18 = vrot.slane %v7909_v62, 1  ;;  %2663 = vmatpush.msrb.mxu1 %v7921_v16  ;;  %2285 = vmatpush.msrb.mxu0 %v7921_v16 }
 0x13c   : > { %v619_v55 = vsel %vm12803_vm7, %v618_v48, %v617_v1  ;;  %3041 = vmatpush.msrb.mxu2 %v7921_v16  ;;  %3419 = vmatpush.msrb.mxu3 %v7921_v16 }
 0x13d   : > { %v621_v56 = vsel %vm12801_vm8, %v620_v18, %v619_v55  ;;  %2664 = vmatpush.msrb.mxu1 %v7926_v5  ;;  %2286 = vmatpush.msrb.mxu0 %v7926_v5 }
 0x13e   : > { %v623_v3 = vsel %vm12799_vm1, %v621_v56, 0.0  ;;  %3042 = vmatpush.msrb.mxu2 %v7926_v5  ;;  %3420 = vmatpush.msrb.mxu3 %v7926_v5 }
 0x13f   : > { %624 = vadd.xlane.f32.xlu2 %v623_v3  ;;  %2665 = vmatpush.msrb.mxu1 %v7933_v7 }
 0x140   : > { %2287 = vmatpush.msrb.mxu0 %v7933_v7  ;;  %3043 = vmatpush.msrb.mxu2 %v7933_v7 }
 0x141   : > { %3421 = vmatpush.msrb.mxu3 %v7933_v7  ;;  %2666 = vmatpush.msrb.mxu1 %v7942_v12 }
 0x142   : > { %2288 = vmatpush.msrb.mxu0 %v7942_v12  ;;  %3044 = vmatpush.msrb.mxu2 %v7942_v12 }
 0x143   : > { %3422 = vmatpush.msrb.mxu3 %v7942_v12  ;;  %2667 = vmatpush.msrb.mxu1 %v7951_v13 }
 0x144   : > { %2289 = vmatpush.msrb.mxu0 %v7951_v13  ;;  %3045 = vmatpush.msrb.mxu2 %v7951_v13 }
 0x145   : > { %3423 = vmatpush.msrb.mxu3 %v7951_v13  ;;  %2668 = vmatpush.msrb.mxu1 %v7960_v24 }
 0x146   : > { %2290 = vmatpush.msrb.mxu0 %v7960_v24  ;;  %3046 = vmatpush.msrb.mxu2 %v7960_v24 }
 0x147   : > { %3424 = vmatpush.msrb.mxu3 %v7960_v24 }
 0x19d   : > { %v7992_v14 = vpop.xlane.xlu0 %946 }
 0x19e   : > { %v7999_v22 = vrot.slane %v7992_v14, 1  ;;  %6796 = vrcp.f32 %v7992_v14  ;;  %v8003_v25 = vrot.slane %v7992_v14, 2  ;;  %v8006_v63 = vrot.slane %v7992_v14, 3 }
 0x19f   : > { %v975_v40 = vand.u32 2147483648, %v7992_v14  ;;  %v8014_v29 = vrot.slane %v7992_v14, 4  ;;  %v8017_v57 = vrot.slane %v7992_v14, 5  ;;  %v8020_v61 = vrot.slane %v7992_v14, 6 }
 0x1a0   : > { %6798 = vrcp.f32 %v7999_v22  ;;  %v990_v50 = vand.u32 2147483648, %v7999_v22  ;;  %v8031_v48 = vrot.slane %v7992_v14, 7 }
 0x1a1   : > { %12889 = vst [vmem:[#allocation33_spill] sm:$0xff] %v8017_v57  ;;  %6800 = vrcp.f32 %v8003_v25  ;;  %v8042_v3 = vor.u32 1.1754944e-38, %v975_v40 }
 0x1a2   : > { %12890 = vst [vmem:[#allocation34_spill] sm:$0xff] %v8020_v61  ;;  %v8044_v60 = vor.u32 1.1754944e-38, %v990_v50 }
 0x1a3   : > { %12891 = vst [vmem:[#allocation35_spill] sm:$0xff] %v8031_v48 }
 0x1a4   : > { %v8033_v1 = vpop.eup %6796  ;;  %12892 = vst [vmem:[#allocation36_spill] sm:$0xff] %v8042_v3 }
 0x1a5   : > { %12893 = vst [vmem:[#allocation37_spill] sm:$0xff] %v8044_v60  ;;  %v8061_v50 = vmul.f32 %v8033_v1, %v7992_v14 }
 0x1a6   : > { %v8053_v56 = vpop.eup %6798 }
 0x1a7   : > { %v8064_v59 = vpop.eup %6800 }
 0x1b2   : > { %v8011_v51 = vpop.xlane.xlu2 %624 }
 0x1b3   : > { %6802 = vrcp.f32 %v8011_v51  ;;  %v8025_v30 = vrot.slane %v8011_v51, 1  ;;  %v8028_v31 = vrot.slane %v8011_v51, 2  ;;  %v8036_v18 = vrot.slane %v8011_v51, 3 }
 0x1b4   : > { %6804 = vrcp.f32 %v8006_v63  ;;  %v8048_v44 = vrot.slane %v8011_v51, 4  ;;  %v8056_v23 = vrot.slane %v8011_v51, 5  ;;  %v653_v40 = vand.u32 2147483648, %v8011_v51 }
 0x1b5   : > { %6806 = vrcp.f32 %v8025_v30  ;;  %v8067_v15 = vrot.slane %v8011_v51, 6  ;;  %v666_v55 = vand.u32 2147483647, %v8025_v30  ;;  %v668_v6 = vand.u32 2147483648, %v8025_v30 }
 0x1b6   : > { %6808 = vrcp.f32 %v8028_v31  ;;  %v8075_v9 = vrot.slane %v8011_v51, 7  ;;  %v651_v36 = vand.u32 2147483647, %v8011_v51  ;;  %v681_v35 = vand.u32 2147483647, %v8028_v31 }
 0x1b7   : > { %6810 = vrcp.f32 %v8014_v29  ;;  %v683_v34 = vand.u32 2147483648, %v8028_v31  ;;  %vm647_vm9 = vweird.f32 %v8011_v51  ;;  %v698_v21 = vand.u32 2147483648, %v8036_v18 }
 0x1b8   : > { %6812 = vrcp.f32 %v8036_v18  ;;  %v654_v19 = vor.u32 1.1754944e-38, %v653_v40  ;;  %vm662_vm10 = vweird.f32 %v8025_v30  ;;  %vm677_vm11 = vweird.f32 %v8028_v31 }
 0x1b9   : > { %v8072_v10 = vpop.eup %6802  ;;  %6814 = vrcp.f32 %v8048_v44  ;;  %v696_v8 = vand.u32 2147483647, %v8036_v18  ;;  %vm8092_vm13 = vcmp.eq.f32.partialorder %v666_v55, 8.507059e+37  ;;  %v669_v12 = vor.u32 1.1754944e-38, %v668_v6 }
 0x1ba   : > { %v8080_v17 = vpop.eup %6804  ;;  %v643_v33 = vmul.f32 %v8072_v10, %v8011_v51  ;;  %vm648_vm12 = vweird.f32 %v8072_v10  ;;  %vm8098_vm14 = vcmp.eq.f32.partialorder %v651_v36, 8.507059e+37  ;;  %vm8103_vm15 = vcmp.eq.f32.partialorder %v681_v35, 8.507059e+37 }
 0x1bb   : > { %v6807_v20 = vpop.eup %6806  ;;  %vm692_vm0 = vweird.f32 %v8036_v18  ;;  %v711_v55 = vand.u32 2147483647, %v8048_v44  ;;  %6816 = vrcp.f32 %v8056_v23  ;;  %v699_v16 = vor.u32 1.1754944e-38, %v698_v21  ;;  %vm8129_vm4 = vmor %vm647_vm9, %vm648_vm12 }
 0x1bc   : > { %v6809_v4 = vpop.eup %6808  ;;  %v644_v2 = vsub.f32 1.0, %v643_v33  ;;  %v658_v24 = vmul.f32 %v6807_v20, %v8025_v30  ;;  %v684_v33 = vor.u32 1.1754944e-38, %v683_v34  ;;  %v713_v32 = vand.u32 2147483648, %v8048_v44 }
 0x1bd   : > { %v8096_v11 = vpop.eup %6810  ;;  %v673_v7 = vmul.f32 %v6809_v4, %v8028_v31  ;;  %vm663_vm1 = vweird.f32 %v6807_v20  ;;  %vm8113_vm8 = vcmp.eq.f32.partialorder %v696_v8, 8.507059e+37  ;;  %vm678_vm6 = vweird.f32 %v6809_v4 }
 0x1be   : > { %v6813_v6 = vpop.eup %6812  ;;  %v645_v49 = vmul.f32 %v8072_v10, %v644_v2  ;;  %v659_v36 = vsub.f32 1.0, %v658_v24  ;;  %6818 = vrcp.f32 %v8067_v15  ;;  %vm8121_vm5 = vcmp.eq.f32.partialorder %v711_v55, 8.507059e+37  ;;  %vm664_vm7 = vmor %vm662_vm10, %vm663_vm1 }
 0x1bf   : > { %v674_v48 = vsub.f32 1.0, %v673_v7  ;;  %v688_v35 = vmul.f32 %v6813_v6, %v8036_v18  ;;  %v6815_v34 = vpop.eup %6814  ;;  %vm693_vm3 = vweird.f32 %v6813_v6  ;;  %vm722_vm2 = vweird.f32 %v8056_v23  ;;  %vm679_vm9 = vmor %vm677_vm11, %vm678_vm6 }
 0x1c0   : > { %v646_v47 = vadd.f32 %v8072_v10, %v645_v49  ;;  %v660_v46 = vmul.f32 %v6807_v20, %v659_v36  ;;  %v703_v24 = vmul.f32 %v6815_v34, %v8048_v44  ;;  %v714_v36 = vor.u32 1.1754944e-38, %v713_v32  ;;  %vm694_vm1 = vmor %vm692_vm0, %vm693_vm3 }
 0x1c1   : > { %v675_v21 = vmul.f32 %v6809_v4, %v674_v48  ;;  %v689_v2 = vsub.f32 1.0, %v688_v35  ;;  %v6817_v48 = vpop.eup %6816  ;;  %vm708_vm12 = vweird.f32 %v6815_v34  ;;  %vm12906_vm6 = vweird.f32 %v8048_v44 }
 0x1c2   : > { %v661_v49 = vadd.f32 %v6807_v20, %v660_v46  ;;  %v650_v55 = vsel %vm8129_vm4, %v8072_v10, %v646_v47  ;;  %v704_v3 = vsub.f32 1.0, %v703_v24  ;;  %v718_v32 = vmul.f32 %v6817_v48, %v8056_v23 }
 0x1c3   : > { %v676_v35 = vadd.f32 %v6809_v4, %v675_v21  ;;  %v690_v51 = vmul.f32 %v6813_v6, %v689_v2  ;;  %v726_v46 = vand.u32 2147483647, %v8056_v23  ;;  %v655_v21 = vsel %vm8098_vm14, %v654_v19, %v650_v55 }
 0x1c4   : > { %v665_v57 = vsel %vm664_vm7, %v6807_v20, %v661_v49  ;;  %v705_v30 = vmul.f32 %v6815_v34, %v704_v3  ;;  %v6819_v60 = vpop.eup %6818  ;;  %v719_v31 = vsub.f32 1.0, %v718_v32  ;;  %v728_v2 = vand.u32 2147483648, %v8056_v23  ;;  %vm709_vm7 = vmor %vm12906_vm6, %vm708_vm12 }
 0x1c5   : > { %v670_v10 = vsel %vm8092_vm13, %v669_v12, %v665_v57  ;;  %v680_v47 = vsel %vm679_vm9, %v6809_v4, %v676_v35  ;;  %v691_v8 = vadd.f32 %v6813_v6, %v690_v51  ;;  %vm723_vm4 = vweird.f32 %v6817_v48 }
 0x1c6   : > { %v685_v20 = vsel %vm8103_vm15, %v684_v33, %v680_v47  ;;  %v706_v13 = vadd.f32 %v6815_v34, %v705_v30  ;;  %v733_v4 = vmul.f32 %v6819_v60, %v8067_v15  ;;  %v671_v12 = vmul.f32 %v7888_v54, %v670_v10  ;;  %vm724_vm0 = vmor %vm722_vm2, %vm723_vm4 }
 0x1c7   : > { %v695_v24 = vsel %vm694_vm1, %v6813_v6, %v691_v8  ;;  %v686_v57 = vmul.f32 %v7890_v58, %v685_v20  ;;  %v720_v5 = vmul.f32 %v6817_v48, %v719_v31  ;;  %v741_v33 = vand.u32 2147483647, %v8067_v15 }
 0x1c8   : > { %v700_v19 = vsel %vm8113_vm8, %v699_v16, %v695_v24  ;;  %v710_v3 = vsel %vm709_vm7, %v6815_v34, %v706_v13  ;;  %v734_v40 = vsub.f32 1.0, %v733_v4  ;;  %v743_v58 = vand.u32 2147483648, %v8067_v15 }
 0x1c9   : > { %v701_v18 = vmul.f32 %v7893_v0, %v700_v19  ;;  %v715_v6 = vsel %vm8121_vm5, %v714_v36, %v710_v3  ;;  %v721_v54 = vadd.f32 %v6817_v48, %v720_v5  ;;  %6820 = vrcp.f32 %v8075_v9 }
 0x1ca   : > { %v656_v16 = vmul.f32 %v7886_v45, %v655_v21  ;;  %v729_v44 = vor.u32 1.1754944e-38, %v728_v2  ;;  %v735_v0 = vmul.f32 %v6819_v60, %v734_v40  ;;  %vm738_vm3 = vweird.f32 %v6819_v60 }
 0x1cb   : > { %v716_v61 = vmul.f32 %v7896_v43, %v715_v6  ;;  %v725_v34 = vsel %vm724_vm0, %v6817_v48, %v721_v54  ;;  %vm727_vm8 = vcmp.eq.f32.partialorder %v726_v46, 8.507059e+37  ;;  %vm737_vm5 = vweird.f32 %v8067_v15 }
 0x1cc   : > { %v730_v7 = vsel %vm727_vm8, %v729_v44, %v725_v34  ;;  %v736_v49 = vadd.f32 %v6819_v60, %v735_v0  ;;  %v763_v36 = vmul.f32 %v671_v12, %v7662_v27  ;;  %v764_v55 = vmul.f32 %v686_v57, %v7665_v28  ;;  %vm739_vm10 = vmor %vm737_vm5, %vm738_vm3  ;;  %v12947_v44 = vld [vmem:[#allocation28_spill] sm:$0xff] }
 0x1cd   : > { %v731_v45 = vmul.f32 %v7901_v52, %v730_v7  ;;  %vm742_vm11 = vcmp.eq.f32.partialorder %v741_v33, 8.507059e+37  ;;  %v744_v23 = vor.u32 1.1754944e-38, %v743_v58  ;;  %v765_v35 = vmul.f32 %v701_v18, %v7696_v37  ;;  %v12945_v18 = vld [vmem:[#allocation27_spill] sm:$0xff] }
 0x1ce   : > { %v740_v51 = vsel %vm739_vm10, %v6819_v60, %v736_v49  ;;  %v762_v43 = vmul.f32 %v656_v16, %v7659_v26  ;;  %v778_v48 = vrot.slane %v763_v36, 7  ;;  %v780_v32 = vrot.slane %v764_v55, 6 }
 0x1cf   : > { %v6821_v46 = vpop.eup %6820  ;;  %v745_v15 = vsel %vm742_vm11, %v744_v23, %v740_v51  ;;  %v758_v10 = vand.u32 2147483648, %v8075_v9  ;;  %v12907_v27 = vand.u32 2147483648, %v8003_v25  ;;  %v1020_v28 = vand.u32 2147483648, %v8006_v63 }
 0x1d0   : > { %v748_v52 = vmul.f32 %v6821_v46, %v8075_v9  ;;  %v766_v8 = vmul.f32 %v716_v61, %v7699_v38  ;;  %v767_v37 = vmul.f32 %v731_v45, %v7702_v39  ;;  %vm12908_vm2 = vcmask 1041409   ;;  %v12950_v45 = vld [vmem:[#allocation29_spill] sm:$0xff] }
 0x1d1   : > { %v8183_v47 = vor.u32 1.1754944e-38, %v12907_v27  ;;  %v779_v26 = vsel %vm12908_vm2, %v778_v48, %v762_v43  ;;  %vm970_vm13 = vweird.f32 %v8033_v1  ;;  %vm984_vm14 = vweird.f32 %v7999_v22 }
 0x1d2   : > { %v746_v60 = vmul.f32 %v7905_v53, %v745_v15  ;;  %vm12909_vm15 = vcmask 1042434   ;;  %v782_v21 = vrot.slane %v765_v35, 5  ;;  %v966_v20 = vsub.f32 1.0, %v8061_v50 }
 0x1d3   : > { %v781_v30 = vsel %vm12909_vm15, %v780_v32, %v779_v26  ;;  %vm999_vm9 = vweird.f32 %v8003_v25  ;;  %v749_v31 = vsub.f32 1.0, %v748_v52  ;;  %vm752_vm12 = vweird.f32 %v8075_v9 }
 0x1d4   : > { %v756_v38 = vand.u32 2147483647, %v8075_v9  ;;  %vm969_vm1 = vweird.f32 %v7992_v14  ;;  %v980_v39 = vmul.f32 %v8053_v56, %v7999_v22  ;;  %vm753_vm4 = vweird.f32 %v6821_v46 }
 0x1d5   : > { %v759_v2 = vor.u32 1.1754944e-38, %v758_v10  ;;  %vm12910_vm6 = vcmask 1043459   ;;  %v995_v24 = vmul.f32 %v8064_v59, %v8003_v25  ;;  %v750_v50 = vmul.f32 %v6821_v46, %v749_v31  ;;  %vm754_vm11 = vmor %vm752_vm12, %vm753_vm4  ;;  %v12937_v31 = vld [vmem:[#allocation20_spill] sm:$0xff] }
 0x1d6   : > { %v783_v53 = vsel %vm12910_vm6, %v782_v21, %v781_v30  ;;  %v784_v13 = vrot.slane %v766_v8, 4  ;;  %v967_v4 = vmul.f32 %v8033_v1, %v966_v20  ;;  %v981_v12 = vsub.f32 1.0, %v980_v39  ;;  %v12930_v8 = vld [vmem:[#allocation37_spill] sm:$0xff]  ;;  %v12934_v30 = vld [vmem:[#allocation36_spill] sm:$0xff] }
 0x1d7   : > { %v12911_v57 = vand.u32 2147483647, %v7999_v22  ;;  %v12914_v5 = vand.u32 2147483647, %v8003_v25  ;;  %vm1014_vm3 = vweird.f32 %v8006_v63  ;;  %v768_v3 = vmul.f32 %v746_v60, %v7708_v41  ;;  %v12933_v60 = vld [vmem:[#allocation33_spill] sm:$0xff] }
 0x1d8   : > { %v786_v40 = vrot.slane %v767_v37, 3  ;;  %v996_v33 = vsub.f32 1.0, %v995_v24  ;;  %v1010_v6 = vmul.f32 %v8080_v17, %v8006_v63  ;;  %v751_v54 = vadd.f32 %v6821_v46, %v750_v50  ;;  %v12938_v39 = vld [vmem:[#allocation21_spill] sm:$0xff] }
 0x1d9   : > { %vm8207_vm7 = vcmp.eq.f32.partialorder %v12911_v57, 8.507059e+37  ;;  %vm8213_vm0 = vcmp.eq.f32.partialorder %v12914_v5, 8.507059e+37  ;;  %vm12917_vm8 = vcmask 1044484   ;;  %v12918_v16 = vand.u32 2147483647, %v7992_v14 }
 0x1da   : > { %v785_v58 = vsel %vm12917_vm8, %v784_v13, %v783_v53  ;;  %v982_v0 = vmul.f32 %v8053_v56, %v981_v12  ;;  %vm985_vm10 = vweird.f32 %v8053_v56  ;;  %v997_v41 = vmul.f32 %v8064_v59, %v996_v33  ;;  %v12944_v12 = vld [vmem:[#allocation19_spill] sm:$0xff] }
 0x1db   : > { %vm8224_vm5 = vcmp.eq.f32.partialorder %v12918_v16, 8.507059e+37  ;;  %vm1000_vm2 = vweird.f32 %v8064_v59  ;;  %v1011_v61 = vsub.f32 1.0, %v1010_v6  ;;  %v1025_v34 = vmul.f32 %v8096_v11, %v8014_v29  ;;  %vm8248_vm4 = vmor %vm984_vm14, %vm985_vm10  ;;  %v8331_v33 = vld [vmem:[%s7614_s18 + $0x48] sm:$0xff] }
 0x1dc   : > { %v755_v7 = vsel %vm754_vm11, %v6821_v46, %v751_v54  ;;  %vm757_vm15 = vcmp.eq.f32.partialorder %v756_v38, 8.507059e+37  ;;  %v968_v49 = vadd.f32 %v8033_v1, %v967_v4  ;;  %v983_v36 = vadd.f32 %v8053_v56, %v982_v0  ;;  %vm1001_vm8 = vmor %vm999_vm9, %vm1000_vm2  ;;  %v12943_v4 = vld [vmem:[#allocation35_spill] sm:$0xff]  ;;  %v8335_v54 = vld [vmem:[%s7614_s18 + $0x50] sm:$0xff] }
 0x1dd   : > { %v12921_v55 = vand.u32 2147483647, %v8006_v63  ;;  %v760_v9 = vsel %vm757_vm15, %v759_v2, %v755_v7  ;;  %vm12924_vm12 = vcmask 1045509   ;;  %v998_v51 = vadd.f32 %v8064_v59, %v997_v41  ;;  %vm8267_vm10 = vmor %vm969_vm1, %vm970_vm13  ;;  %v12939_v2 = vld [vmem:[#allocation34_spill] sm:$0xff] }
 0x1de   : > { %v787_v23 = vsel %vm12924_vm12, %v786_v40, %v785_v58  ;;  %v1012_v43 = vmul.f32 %v8080_v17, %v1011_v61  ;;  %v761_v48 = vmul.f32 %v7909_v62, %v760_v9  ;;  %v987_v32 = vsel %vm8248_vm4, %v8053_v56, %v983_v36  ;;  %v8349_v36 = vld [vmem:[%s7614_s18 + $0x40] sm:$0xff] }
 0x1df   : > { %vm8241_vm6 = vcmp.eq.f32.partialorder %v12921_v55, 8.507059e+37  ;;  %vm1015_vm14 = vweird.f32 %v8080_v17  ;;  %v1026_v22 = vsub.f32 1.0, %v1025_v34  ;;  %v788_v46 = vrot.slane %v768_v3, 2  ;;  %v12946_v3 = vld [vmem:[#allocation22_spill] sm:$0xff] }
 0x1e0   : > { %v1002_v62 = vsel %vm1001_vm8, %v8064_v59, %v998_v51  ;;  %v1013_v56 = vadd.f32 %v8080_v17, %v1012_v43  ;;  %v1021_v10 = vor.u32 1.1754944e-38, %v1020_v28  ;;  %v769_v25 = vmul.f32 %v761_v48, %v7711_v42  ;;  %vm8288_vm13 = vmor %vm1014_vm3, %vm1015_vm14  ;;  %v8355_v51 = vld [vmem:[%s7614_s18 + $0x58] sm:$0xff]  ;;  %v8370_v42 = vld [vmem:[%s7614_s18 + $0x60] sm:$0xff] }
 0x1e1   : > { %v972_v27 = vsel %vm8267_vm10, %v8033_v1, %v968_v49  ;;  %v1027_v52 = vmul.f32 %v8096_v11, %v1026_v22  ;;  %vm1029_vm9 = vweird.f32 %v8014_v29  ;;  %vm12929_vm11 = vcmask 1046534  }
 0x1e2   : > { %v789_v14 = vsel %vm12929_vm11, %v788_v46, %v787_v23  ;;  %v992_v37 = vsel %vm8207_vm7, %v12930_v8, %v987_v32  ;;  %v1007_v59 = vsel %vm8213_vm0, %v8183_v47, %v1002_v62  ;;  %vm1030_vm1 = vweird.f32 %v8096_v11  ;;  %v12951_v23 = vld [vmem:[#allocation23_spill] sm:$0xff]  ;;  %v12953_v62 = vld [vmem:[#allocation30_spill] sm:$0xff] }
 0x1e3   : > { %v790_v1 = vrot.slane %v769_v25, 1  ;;  %v1017_v28 = vsel %vm8288_vm13, %v8080_v17, %v1013_v56  ;;  %v1028_v26 = vadd.f32 %v8096_v11, %v1027_v52  ;;  %6822 = vrcp.f32 %v12933_v60 }
 0x1e4   : > { %vm12824_vm7 = vcmask 392192   ;;  %v977_v63 = vsel %vm8224_vm5, %v12934_v30, %v972_v27  ;;  %v1033_v47 = vand.u32 2147483647, %v8014_v29  ;;  %v1035_v21 = vand.u32 2147483648, %v8014_v29  ;;  %vm8317_vm5 = vmor %vm1029_vm9, %vm1030_vm1 }
 0x1e5   : > { %vm12935_vm0 = vcmask 1047559   ;;  %v993_v38 = vmul.f32 %v12937_v31, %v992_v37  ;;  %v1008_v17 = vmul.f32 %v12938_v39, %v1007_v59  ;;  %6824 = vrcp.f32 %v12939_v2  ;;  %v12954_v37 = vld [vmem:[#allocation31_spill] sm:$0xff] }
 0x1e6   : > { %v8304_v20 = vsel %vm12935_vm0, %v790_v1, %v789_v14  ;;  %vm12940_vm3 = vcmask 130048   ;;  %v1022_v24 = vsel %vm8241_vm6, %v1021_v10, %v1017_v28  ;;  %v1032_v13 = vsel %vm8317_vm5, %v8096_v11, %v1028_v26 }
 0x1e7   : > { %12936 = vst [vmem:[#allocation37_spill] sm:$0xff] %v8304_v20  ;;  %v793_v53 = vsel %vm12940_vm3, %v8304_v20, 0.0  ;;  %6826 = vrcp.f32 %v12943_v4  ;;  %v978_v57 = vmul.f32 %v12944_v12, %v977_v63  ;;  %v1036_v19 = vor.u32 1.1754944e-38, %v1035_v21  ;;  %v12956_v21 = vld [vmem:[#allocation32_spill] sm:$0xff] }
 0x1e8   : > { %6708 = vmatmul.msk.f32.vlgmr.msra.gmra.mxu0 %vm12824_vm7, %v793_v53  ;;  %v1048_v5 = vand.u32 2147483647, %v12933_v60  ;;  %v1023_v40 = vmul.f32 %v12946_v3, %v1022_v24  ;;  %vm1034_vm2 = vcmp.eq.f32.partialorder %v1033_v47, 8.507059e+37  ;;  %v1085_v6 = vmul.f32 %v8331_v33, %v993_v38  ;;  %v12957_v38 = vld [vmem:[#allocation24_spill] sm:$0xff] }
 0x1e9   : > { %3797 = vmatpush.msra.mxu0 %v12945_v18  ;;  %v6823_v29 = vpop.eup %6822  ;;  %v1086_v11 = vmul.f32 %v8335_v54, %v1008_v17  ;;  %v1037_v58 = vsel %vm1034_vm2, %v1036_v19, %v1032_v13  ;;  %vm1044_vm15 = vweird.f32 %v12933_v60  ;;  %v1050_v41 = vand.u32 2147483648, %v12933_v60 }
 0x1ea   : > { %v1040_v16 = vmul.f32 %v6823_v29, %v12933_v60  ;;  %vm1059_vm6 = vweird.f32 %v12939_v2  ;;  %v1100_v61 = vrot.slane %v1085_v6, 7  ;;  %vm8343_vm12 = vcmp.eq.f32.partialorder %v1048_v5, 8.507059e+37  ;;  %v8385_v5 = vld [vmem:[%s7614_s18 + $0x68] sm:$0xff] }
 0x1eb   : > { %3798 = vmatpush.msra.mxu0 %v12947_v44  ;;  %v6825_v0 = vpop.eup %6824  ;;  %v1084_v55 = vmul.f32 %v8349_v36, %v978_v57  ;;  %v1038_v35 = vmul.f32 %v12951_v23, %v1037_v58  ;;  %vm1045_vm4 = vweird.f32 %v6823_v29  ;;  %v1087_v43 = vmul.f32 %v8355_v51, %v1023_v40  ;;  %v12959_v57 = vld [vmem:[#allocation25_spill] sm:$0xff]  ;;  %v12961_v40 = vld [vmem:[#allocation26_spill] sm:$0xff] }
 0x1ec   : > { %v1041_v34 = vsub.f32 1.0, %v1040_v16  ;;  %v1055_v49 = vmul.f32 %v6825_v0, %v12939_v2  ;;  %v1102_v48 = vrot.slane %v1086_v11, 6  ;;  %vm12952_vm8 = vcmask 1041409   ;;  %vm1046_vm10 = vmor %vm1044_vm15, %vm1045_vm4  ;;  %v8391_v11 = vld [vmem:[%s7614_s18 + $0x70] sm:$0xff]  ;;  %v6763_v23 = vld [vmem:[%s12745_s6] ss:$0 sm:$0xff] }
 0x1ed   : > { %3799 = vmatpush.msra.mxu0 %v12950_v45  ;;  %v6827_v9 = vpop.eup %6826  ;;  %v1101_v15 = vsel %vm12952_vm8, %v1100_v61, %v1084_v55  ;;  %v1051_v56 = vor.u32 1.1754944e-38, %v1050_v41  ;;  %v1063_v10 = vand.u32 2147483647, %v12939_v2  ;;  %v1065_v25 = vand.u32 2147483648, %v12939_v2 }
 0x1ee   : > { %v1042_v32 = vmul.f32 %v6823_v29, %v1041_v34  ;;  %v1056_v22 = vsub.f32 1.0, %v1055_v49  ;;  %v1070_v46 = vmul.f32 %v6827_v9, %v12943_v4  ;;  %v1078_v27 = vand.u32 2147483647, %v12943_v4 }
 0x1ef   : > { %3800 = vmatpush.msra.mxu0 %v12953_v62  ;;  %vm1060_vm14 = vweird.f32 %v6825_v0  ;;  %v1080_v59 = vand.u32 2147483648, %v12943_v4  ;;  %v1088_v1 = vmul.f32 %v8370_v42, %v1038_v35  ;;  %vm12955_vm9 = vcmask 1042434  }
 0x1f0   : > { %v1043_v52 = vadd.f32 %v6823_v29, %v1042_v32  ;;  %v1057_v14 = vmul.f32 %v6825_v0, %v1056_v22  ;;  %v1071_v8 = vsub.f32 1.0, %v1070_v46  ;;  %v1103_v28 = vsel %vm12955_vm9, %v1102_v48, %v1101_v15  ;;  %vm1061_vm13 = vmor %vm1059_vm6, %vm1060_vm14 }
 0x1f1   : > { %3801 = vmatpush.msra.mxu0 %v12954_v37  ;;  %v1104_v26 = vrot.slane %v1087_v43, 5  ;;  %vm1075_vm11 = vweird.f32 %v6827_v9  ;;  %vm1064_vm1 = vcmp.eq.f32.partialorder %v1063_v10, 8.507059e+37  ;;  %v1066_v60 = vor.u32 1.1754944e-38, %v1065_v25 }
 0x1f2   : > { %v1047_v30 = vsel %vm1046_vm10, %v6823_v29, %v1043_v52  ;;  %v1058_v63 = vadd.f32 %v6825_v0, %v1057_v14  ;;  %v1072_v47 = vmul.f32 %v6827_v9, %v1071_v8  ;;  %vm1074_vm0 = vweird.f32 %v12943_v4 }
 0x1f3   : > { %3802 = vmatpush.msra.mxu0 %v12956_v21  ;;  %v1052_v31 = vsel %vm8343_vm12, %v1051_v56, %v1047_v30  ;;  %vm12958_vm3 = vcmask 1043459   ;;  %vm1076_vm5 = vmor %vm1074_vm0, %vm1075_vm11  ;;  %v1081_v13 = vor.u32 1.1754944e-38, %v1080_v59  ;;  %v1106_v12 = vrot.slane %v1088_v1, 4 }
 0x1f4   : > { %v1053_v39 = vmul.f32 %v12957_v38, %v1052_v31  ;;  %v1062_v17 = vsel %vm1061_vm13, %v6825_v0, %v1058_v63  ;;  %v1073_v53 = vadd.f32 %v6827_v9, %v1072_v47  ;;  %v1105_v24 = vsel %vm12958_vm3, %v1104_v26, %v1103_v28  ;;  %v8395_v0 = vld [vmem:[%s7614_s18 + $0x78] sm:$0xff] }
 0x1f5   : > { %v1067_v50 = vsel %vm1064_vm1, %v1066_v60, %v1062_v17  ;;  %vm1079_vm2 = vcmp.eq.f32.partialorder %v1078_v27, 8.507059e+37  ;;  %vm12960_vm15 = vcmask 1044484   ;;  %vm12962_vm6 = vcmask 1045509  }
 0x1f6   : > { %v1068_v2 = vmul.f32 %v12959_v57, %v1067_v50  ;;  %v1077_v19 = vsel %vm1076_vm5, %v6827_v9, %v1073_v53  ;;  %v1089_v4 = vmul.f32 %v8385_v5, %v1053_v39  ;;  %v1107_v3 = vsel %vm12960_vm15, %v1106_v12, %v1105_v24  ;;  %v7412_v12 = vld [vmem:[%s12742_s3] ss:$0 sm:$0xff] }
 0x1f7   : > { %v1082_v29 = vsel %vm1079_vm2, %v1081_v13, %v1077_v19  ;;  %vm12963_vm12 = vcmask 1046534   ;;  %vm12964_vm4 = vcmask 1047559   ;;  %vm12966_vm8 = vcmask 130048  }
 0x1f8   : > { %v1083_v6 = vmul.f32 %v12961_v40, %v1082_v29  ;;  %v1090_v58 = vmul.f32 %v8391_v11, %v1068_v2  ;;  %v1108_v16 = vrot.slane %v1089_v4, 3  ;;  %v7413_v40 = vld [vmem:[%s12741_s2] ss:$0 sm:$0xff]  ;;  %vm12971_vm5 = vcmask 261120  }
 0x1f9   : > { %vm12972_vm2 = vmmov %vm12971_vm5  ;;  %vm12981_vm15 = vcmask 1041409  }
 0x1fa   : > { %v1091_v41 = vmul.f32 %v8395_v0, %v1083_v6  ;;  %v1109_v61 = vsel %vm12962_vm6, %v1108_v16, %v1107_v3  ;;  %v1110_v34 = vrot.slane %v1090_v58, 2  ;;  %vm12982_vm6 = vcmask 1042434  }
 0x1fc   : > { %v1111_v7 = vsel %vm12963_vm12, %v1110_v34, %v1109_v61  ;;  %v1112_v49 = vrot.slane %v1091_v41, 1  ;;  %vm12983_vm12 = vcmask 1043459  }
 0x1fe   : > { %v8401_v55 = vsel %vm12964_vm4, %v1112_v49, %v1111_v7  ;;  %vm12984_vm4 = vcmask 1044484  }
 0x1ff   : > { %12965 = vst [vmem:[#allocation33_spill] sm:$0xff] %v8401_v55  ;;  %v1115_v9 = vsel %vm12966_vm8, %v8401_v55, 0.0  ;;  %vm12985_vm8 = vcmask 1045509  }
 0x200   : > { %6710 = vmatmul.msk.f32.vlgmr.msra.gmra.mxu1 %vm12824_vm7, %v1115_v9 }
 0x201   : > { %4175 = vmatpush.msra.mxu1 %v12945_v18 }
 0x203   : > { %4176 = vmatpush.msra.mxu1 %v12947_v44 }
 0x205   : > { %4177 = vmatpush.msra.mxu1 %v12950_v45 }
 0x207   : > { %4178 = vmatpush.msra.mxu1 %v12953_v62 }
 0x209   : > { %4179 = vmatpush.msra.mxu1 %v12954_v37 }
 0x20b   : > { %4180 = vmatpush.msra.mxu1 %v12956_v21 }
 0x265   : > { %v815_v35 = vpop.f32.mrf.mxu0 }
 0x266   : > { %v816_v43 = vadd.f32 %v6763_v23, %v815_v35 }
 0x268   : > { %6828 = vtanh.f32 %v816_v43  ;;  %v6709_v32 = vmul.f32 -1.442695, %v816_v43 }
 0x26e   : > { %v6829_v48 = vpop.eup %6828 }
 0x26f   : > { %840 = vrot.lane.b32.xlu1 %v6829_v48, %s7536_s12 }
 0x27d   : > { %v1136_v18 = vpop.f32.mrf.mxu1 }
 0x27e   : > { %v1137_v44 = vadd.f32 %v6763_v23, %v1136_v18 }
 0x280   : > { %6830 = vtanh.f32 %v1137_v44  ;;  %v6711_v22 = vmul.f32 -1.442695, %v1137_v44 }
 0x281   : > { %6832 = vpow2.f32 %v6709_v32 }
 0x282   : > { %6834 = vpow2.f32 %v6711_v22 }
 0x286   : > { %v6831_v45 = vpop.eup %6830 }
 0x287   : > { %1161 = vrot.lane.b32.xlu2 %v6831_v45, %s7536_s12  ;;  %v6833_v46 = vpop.eup %6832 }
 0x288   : > { %v6835_v15 = vpop.eup %6834  ;;  %v821_v62 = vadd.f32 1.0, %v6833_v46 }
 0x289   : > { %v1142_v56 = vadd.f32 1.0, %v6835_v15 }
 0x28a   : > { %6836 = vrcp.f32 %v821_v62  ;;  %v833_v26 = vand.u32 2147483648, %v821_v62  ;;  %vm827_vm9 = vweird.f32 %v821_v62  ;;  %v831_v63 = vand.u32 2147483647, %v821_v62 }
 0x28b   : > { %6838 = vrcp.f32 %v1142_v56  ;;  %v1154_v30 = vand.u32 2147483648, %v1142_v56  ;;  %vm1148_vm11 = vweird.f32 %v1142_v56  ;;  %v1152_v47 = vand.u32 2147483647, %v1142_v56 }
 0x28c   : > { %v834_v60 = vor.u32 1.1754944e-38, %v833_v26  ;;  %vm832_vm0 = vcmp.eq.f32.partialorder %v831_v63, 8.507059e+37  ;;  %v12975_v26 = vld [vmem:[#allocation6_spill] sm:$0xff]  ;;  %v12976_v63 = vld [vmem:[#allocation7_spill] sm:$0xff] }
 0x28d   : > { %v1155_v38 = vor.u32 1.1754944e-38, %v1154_v30  ;;  %vm1153_vm3 = vcmp.eq.f32.partialorder %v1152_v47, 8.507059e+37 }
 0x290   : > { %v6837_v10 = vpop.eup %6836 }
 0x291   : > { %v6839_v25 = vpop.eup %6838  ;;  %v823_v27 = vmul.f32 %v6837_v10, %v821_v62  ;;  %vm828_vm14 = vweird.f32 %v6837_v10 }
 0x292   : > { %v1144_v52 = vmul.f32 %v6839_v25, %v1142_v56  ;;  %vm1149_vm10 = vweird.f32 %v6839_v25  ;;  %vm829_vm13 = vmor %vm827_vm9, %vm828_vm14  ;;  %vm12986_vm14 = vcmask 1046534   ;;  %vm12988_vm9 = vcmask 130048  }
 0x293   : > { %v824_v14 = vsub.f32 1.0, %v823_v27  ;;  %vm1150_vm1 = vmor %vm1148_vm11, %vm1149_vm10  ;;  %vm12987_vm10 = vcmask 1047559  }
 0x294   : > { %v1145_v8 = vsub.f32 1.0, %v1144_v52  ;;  %vm12997_vm11 = vmmov %vm12981_vm15 }
 0x295   : > { %v825_v37 = vmul.f32 %v6837_v10, %v824_v14 }
 0x296   : > { %v1146_v59 = vmul.f32 %v6839_v25, %v1145_v8 }
 0x297   : > { %v826_v1 = vadd.f32 %v6837_v10, %v825_v37  ;;  %v12973_v37 = vld [vmem:[#allocation4_spill] sm:$0xff] }
 0x298   : > { %v1147_v28 = vadd.f32 %v6839_v25, %v1146_v59 }
 0x299   : > { %v830_v21 = vsel %vm829_vm13, %v6837_v10, %v826_v1  ;;  %v12974_v1 = vld [vmem:[#allocation5_spill] sm:$0xff]  ;;  %vm12998_vm13 = vmmov %vm12982_vm6 }
 0x29a   : > { %v1151_v31 = vsel %vm1150_vm1, %v6839_v25, %v1147_v28  ;;  %v835_v17 = vsel %vm832_vm0, %v834_v60, %v830_v21  ;;  %v12977_v21 = vld [vmem:[#allocation3_spill] sm:$0xff]  ;;  %v12978_v60 = vld [vmem:[#allocation8_spill] sm:$0xff]  ;;  %vm12999_vm1 = vmmov %vm12983_vm12 }
 0x29b   : > { %v1156_v53 = vsel %vm1153_vm3, %v1155_v38, %v1151_v31  ;;  %v838_v57 = vmul.f32 0.0, %v835_v17  ;;  %vm13000_vm0 = vmmov %vm12984_vm4 }
 0x29c   : > { %v1159_v6 = vmul.f32 0.0, %v1156_v53  ;;  %vm13001_vm3 = vmmov %vm12985_vm8 }
 0x2e1   : > { %v841_v39 = vpop.permute.xlu1 %840  ;;  %v1162_v24 = vpop.permute.xlu2 %1161 }
 0x2e2   : > { %v843_v50 = vmul.f32 %v841_v39, %v835_v17  ;;  %v1164_v13 = vmul.f32 %v1162_v24, %v1156_v53 }
 0x2e4   : > { %845 = vrot.lane.b32.xlu2 %v843_v50, %s7537_s13  ;;  %1166 = vrot.lane.b32.xlu1 %v1164_v13, %s7537_s13  ;;  %v12980_v50 = vld [vmem:[#allocation10_spill] sm:$0xff] }
 0x2ec   : > { %1180 = vrot.lane.b32.xlu2 %v7412_v12, %s7537_s13 }
 0x33e   : > { %v846_v2 = vpop.permute.xlu2 %845 }
 0x33f   : > { %v8423_v19 = vadd.f32 %v846_v2, %v838_v57 }
 0x341   : > { %6840 = vtanh.f32 %v8423_v19 }
 0x346   : > { %v8426_v4 = vpop.permute.xlu2 %1180 }
 0x347   : > { %12967 = vst [vmem:[#allocation36_spill] sm:$0xff] %v8426_v4  ;;  %v6841_v29 = vpop.eup %6840  ;;  %v1183_v3 = vmul.f32 %v8426_v4, %v8423_v19 }
 0x348   : > { %851 = vrot.lane.b32.xlu1 %v6841_v29, %s7536_s12 }
 0x349   : > { %1185 = vrot.lane.b32.xlu0 %v1183_v3, %s7536_s12 }
 0x350   : > { %1176 = vrot.lane.b32.xlu1 %v7413_v40, %s7538_s19 }
 0x356   : > { %v1167_v58 = vpop.permute.xlu1 %1166 }
 0x357   : > { %v8436_v16 = vadd.f32 %v1167_v58, %v1159_v6 }
 0x359   : > { %6842 = vtanh.f32 %v8436_v16  ;;  %v1569_v61 = vmul.f32 %v8426_v4, %v8436_v16 }
 0x35f   : > { %v6843_v41 = vpop.eup %6842 }
 0x360   : > { %1172 = vrot.lane.b32.xlu2 %v6843_v41, %s7536_s12 }
 0x368   : > { %1571 = vrot.lane.b32.xlu2 %v1569_v61, %s7536_s12 }
 0x3ba   : > { %v852_v34 = vpop.permute.xlu1 %851  ;;  %v1173_v7 = vpop.permute.xlu2 %1172 }
 0x3bb   : > { %v8443_v49 = vmul.f32 %v1173_v7, %v1156_v53  ;;  %v8445_v9 = vmul.f32 %v852_v34, %v835_v17  ;;  %v1186_v18 = vpop.permute.xlu0 %1185  ;;  %v12979_v53 = vld [vmem:[#allocation9_spill] sm:$0xff] }
 0x3bd   : > { %12968 = vst [vmem:[#allocation20_spill] sm:$0xff] %v8443_v49 }
 0x3be   : > { %12969 = vst [vmem:[#allocation21_spill] sm:$0xff] %v8445_v9 }
 0x3c2   : > { %v8447_v23 = vpop.permute.xlu1 %1176  ;;  %v1572_v48 = vpop.permute.xlu2 %1571 }
 0x3c3   : > { %12970 = vst [vmem:[#allocation34_spill] sm:$0xff] %v8447_v23  ;;  %v1179_v35 = vmul.f32 %v8447_v23, %v8445_v9  ;;  %v1568_v43 = vmul.f32 %v8447_v23, %v8443_v49 }
 0x3c5   : > { %v1188_v44 = vadd.f32 %v1186_v18, %v1179_v35  ;;  %v1574_v45 = vadd.f32 %v1572_v48, %v1568_v43 }
 0x3c7   : > { %1190 = vrot.lane.b32.xlu1 %v1188_v44, %s7537_s13  ;;  %1576 = vrot.lane.b32.xlu2 %v1574_v45, %s7537_s13 }
 0x421   : > { %v1577_v32 = vpop.permute.xlu2 %1576 }
 0x422   : > { %v1579_v22 = vsel %vm12971_vm5, %v1577_v32, 0.0  ;;  %vm13002_vm5 = vmmov %vm12986_vm14 }
 0x423   : > { %1580 = vadd.xlane.f32.xlu0 %v1579_v22 }
 0x439   : > { %v1191_v46 = vpop.permute.xlu1 %1190 }
 0x43a   : > { %v1193_v15 = vsel %vm12972_vm2, %v1191_v46, 0.0  ;;  %vm13003_vm2 = vmmov %vm12987_vm10 }
 0x43b   : > { %1194 = vadd.xlane.f32.xlu1 %v1193_v15  ;;  %v12989_v15 = vld [vmem:[#allocation12_spill] sm:$0xff] }
 0x496   : > { %v1581_v62 = vpop.xlane.xlu0 %1580 }
 0x497   : > { %v1583_v56 = vrot.slane %v1581_v62, 1  ;;  %v1584_v10 = vrot.slane %v1581_v62, 2  ;;  %v1585_v25 = vrot.slane %v1581_v62, 3  ;;  %v1586_v27 = vrot.slane %v1581_v62, 4 }
 0x498   : > { %v1587_v52 = vrot.slane %v1581_v62, 5  ;;  %v1588_v14 = vrot.slane %v1581_v62, 6  ;;  %v1589_v8 = vrot.slane %v1581_v62, 7  ;;  %v8470_v31 = vadd.f32 %v1581_v62, %v12977_v21 }
 0x499   : > { %v8458_v59 = vadd.f32 %v1583_v56, %v12973_v37  ;;  %v8461_v28 = vadd.f32 %v1584_v10, %v12974_v1  ;;  %v8464_v30 = vadd.f32 %v1585_v25, %v12975_v26  ;;  %v8467_v47 = vadd.f32 %v1586_v27, %v12976_v63  ;;  %v12990_v56 = vld [vmem:[#allocation13_spill] sm:$0xff]  ;;  %v12991_v25 = vld [vmem:[#allocation14_spill] sm:$0xff] }
 0x49a   : > { %v8473_v38 = vadd.f32 %v1587_v52, %v12978_v60  ;;  %v8478_v24 = vadd.f32 %v1588_v14, %v12979_v53  ;;  %v8481_v13 = vadd.f32 %v1589_v8, %v12980_v50  ;;  %v12992_v52 = vld [vmem:[#allocation15_spill] sm:$0xff] }
 0x49b   : > { %v1614_v39 = vrot.slane %v8458_v59, 7  ;;  %v1616_v17 = vrot.slane %v8461_v28, 6  ;;  %v1618_v57 = vrot.slane %v8464_v30, 5  ;;  %v1620_v29 = vrot.slane %v8467_v47, 4  ;;  %v12993_v8 = vld [vmem:[#allocation11_spill] sm:$0xff] }
 0x49c   : > { %v1622_v40 = vrot.slane %v8473_v38, 3  ;;  %v1624_v58 = vrot.slane %v8478_v24, 2  ;;  %v1626_v61 = vrot.slane %v8481_v13, 1 }
 0x49d   : > { %v1615_v12 = vsel %vm12981_vm15, %v1614_v39, %v8470_v31  ;;  %vm13004_vm15 = vmmov %vm12988_vm9 }
 0x49e   : > { %v1617_v2 = vsel %vm12982_vm6, %v1616_v17, %v1615_v12  ;;  %v12994_v17 = vld [vmem:[#allocation16_spill] sm:$0xff]  ;;  %vm13005_vm6 = vmmov %vm12997_vm11 }
 0x49f   : > { %v1619_v3 = vsel %vm12983_vm12, %v1618_v57, %v1617_v2  ;;  %vm13006_vm12 = vmmov %vm12998_vm13 }
 0x4a0   : > { %v1621_v6 = vsel %vm12984_vm4, %v1620_v29, %v1619_v3  ;;  %v12995_v29 = vld [vmem:[#allocation17_spill] sm:$0xff]  ;;  %vm13007_vm4 = vmmov %vm12999_vm1 }
 0x4a1   : > { %v1623_v41 = vsel %vm12985_vm8, %v1622_v40, %v1621_v6  ;;  %v12996_v40 = vld [vmem:[#allocation18_spill] sm:$0xff]  ;;  %vm13008_vm8 = vmmov %vm13000_vm0 }
 0x4a2   : > { %v1625_v34 = vsel %vm12986_vm14, %v1624_v58, %v1623_v41  ;;  %vm13009_vm14 = vmmov %vm13001_vm3 }
 0x4a3   : > { %v1627_v7 = vsel %vm12987_vm10, %v1626_v61, %v1625_v34  ;;  %vm13010_vm10 = vmmov %vm13002_vm5 }
 0x4a4   : > { %v1629_v35 = vsel %vm12988_vm9, %v1627_v7, -inf  ;;  %vm13011_vm9 = vmmov %vm13003_vm2 }
 0x4a5   : > { %1630 = vmax.xlane.f32.xlu1 %v1629_v35 }
 0x4ae   : > { %v1195_v43 = vpop.xlane.xlu1 %1194 }
 0x4af   : > { %v1197_v48 = vrot.slane %v1195_v43, 1  ;;  %v1198_v18 = vrot.slane %v1195_v43, 2  ;;  %v1199_v44 = vrot.slane %v1195_v43, 3  ;;  %v1200_v45 = vrot.slane %v1195_v43, 4 }
 0x4b0   : > { %v1201_v32 = vrot.slane %v1195_v43, 5  ;;  %v1202_v22 = vrot.slane %v1195_v43, 6  ;;  %v1203_v46 = vrot.slane %v1195_v43, 7  ;;  %v8510_v39 = vadd.f32 %v1195_v43, %v12993_v8 }
 0x4b1   : > { %v8498_v62 = vadd.f32 %v1197_v48, %v12989_v15  ;;  %v8501_v10 = vadd.f32 %v1198_v18, %v12990_v56  ;;  %v8504_v27 = vadd.f32 %v1199_v44, %v12991_v25  ;;  %v8507_v14 = vadd.f32 %v1200_v45, %v12992_v52 }
 0x4b2   : > { %v8513_v12 = vadd.f32 %v1201_v32, %v12994_v17  ;;  %v8518_v3 = vadd.f32 %v1202_v22, %v12995_v29  ;;  %v8521_v6 = vadd.f32 %v1203_v46, %v12996_v40 }
 0x4b3   : > { %v1228_v57 = vrot.slane %v8498_v62, 7  ;;  %v1230_v2 = vrot.slane %v8501_v10, 6  ;;  %v1232_v41 = vrot.slane %v8504_v27, 5  ;;  %v1234_v34 = vrot.slane %v8507_v14, 4 }
 0x4b4   : > { %v1236_v35 = vrot.slane %v8513_v12, 3  ;;  %v1238_v48 = vrot.slane %v8518_v3, 2  ;;  %v1240_v44 = vrot.slane %v8521_v6, 1 }
 0x4b5   : > { %v1229_v58 = vsel %vm12997_vm11, %v1228_v57, %v8510_v39  ;;  %vm13012_vm11 = vmmov %vm13004_vm15 }
 0x4b6   : > { %v1231_v61 = vsel %vm12998_vm13, %v1230_v2, %v1229_v58  ;;  %vm13013_vm13 = vmmov %vm13005_vm6 }
 0x4b7   : > { %v1233_v7 = vsel %vm12999_vm1, %v1232_v41, %v1231_v61  ;;  %vm13014_vm1 = vmmov %vm13006_vm12 }
 0x4b8   : > { %v1235_v43 = vsel %vm13000_vm0, %v1234_v34, %v1233_v7  ;;  %vm13015_vm0 = vmmov %vm13007_vm4 }
 0x4b9   : > { %v1237_v18 = vsel %vm13001_vm3, %v1236_v35, %v1235_v43  ;;  %vm13016_vm3 = vmmov %vm13008_vm8 }
 0x4ba   : > { %v1239_v45 = vsel %vm13002_vm5, %v1238_v48, %v1237_v18  ;;  %vm13017_vm5 = vmmov %vm13009_vm14 }
 0x4bb   : > { %v1241_v32 = vsel %vm13003_vm2, %v1240_v44, %v1239_v45  ;;  %vm13018_vm2 = vmmov %vm13010_vm10 }
 0x4bc   : > { %v1243_v22 = vsel %vm13004_vm15, %v1241_v32, -inf  ;;  %vm13019_vm15 = vmmov %vm13011_vm9 }
 0x4bd   : > { %1244 = vmax.xlane.f32.xlu2 %v1243_v22 }
 0x4be   : > { %1504 = vrot.lane.b32.xlu1 %v8445_v9, %s7539_s20 }
 0x518   : > { %v1631_v46 = vpop.xlane.xlu1 %1630 }
 0x519   : > { %v1633_v57 = vrot.slane %v1631_v46, 1  ;;  %v1634_v2 = vrot.slane %v1631_v46, 2  ;;  %v1635_v58 = vrot.slane %v1631_v46, 3  ;;  %v1636_v41 = vrot.slane %v1631_v46, 4 }
 0x51a   : > { %v1637_v61 = vrot.slane %v1631_v46, 5  ;;  %v1648_v34 = vsub.f32 %v8470_v31, %v1631_v46  ;;  %v1638_v7 = vrot.slane %v1631_v46, 6  ;;  %v1639_v35 = vrot.slane %v1631_v46, 7 }
 0x51b   : > { %v1649_v43 = vsub.f32 %v8458_v59, %v1633_v57  ;;  %v1650_v48 = vsub.f32 %v8461_v28, %v1634_v2  ;;  %v1651_v18 = vsub.f32 %v8464_v30, %v1635_v58  ;;  %v1652_v44 = vsub.f32 %v8467_v47, %v1636_v41 }
 0x51c   : > { %v1656_v45 = vmul.f32 1.442695, %v1648_v34  ;;  %v1653_v32 = vsub.f32 %v8473_v38, %v1637_v61  ;;  %v1654_v22 = vsub.f32 %v8478_v24, %v1638_v7  ;;  %v1655_v31 = vsub.f32 %v8481_v13, %v1639_v35 }
 0x51d   : > { %v1658_v55 = vmul.f32 1.442695, %v1649_v43  ;;  %v1660_v20 = vmul.f32 1.442695, %v1650_v48  ;;  %v1662_v9 = vmul.f32 1.442695, %v1651_v18 }
 0x51e   : > { %6844 = vpow2.f32 %v1656_v45  ;;  %v1664_v46 = vmul.f32 1.442695, %v1652_v44  ;;  %v1666_v59 = vmul.f32 1.442695, %v1653_v32  ;;  %v1668_v28 = vmul.f32 1.442695, %v1654_v22 }
 0x51f   : > { %6846 = vpow2.f32 %v1658_v55  ;;  %v1670_v30 = vmul.f32 1.442695, %v1655_v31 }
 0x520   : > { %6848 = vpow2.f32 %v1660_v20 }
 0x521   : > { %6850 = vpow2.f32 %v1662_v9 }
 0x522   : > { %6852 = vpow2.f32 %v1664_v46 }
 0x523   : > { %6854 = vpow2.f32 %v1666_v59 }
 0x524   : > { %v8547_v47 = vpop.eup %6844  ;;  %6856 = vpow2.f32 %v1668_v28 }
 0x525   : > { %v8549_v38 = vpop.eup %6846  ;;  %6858 = vpow2.f32 %v1670_v30 }
 0x526   : > { %v8551_v24 = vpop.eup %6848  ;;  %v1680_v13 = vrot.slane %v8549_v38, 7 }
 0x527   : > { %v8554_v57 = vpop.eup %6850  ;;  %v1682_v55 = vrot.slane %v8551_v24, 6 }
 0x528   : > { %v8557_v20 = vpop.eup %6852  ;;  %v1681_v9 = vsel %vm13005_vm6, %v1680_v13, %v8547_v47  ;;  %v1684_v2 = vrot.slane %v8554_v57, 5  ;;  %vm13020_vm6 = vmmov %vm13012_vm11 }
 0x529   : > { %v8562_v58 = vpop.eup %6854  ;;  %v1683_v41 = vsel %vm13006_vm12, %v1682_v55, %v1681_v9  ;;  %v1686_v61 = vrot.slane %v8557_v20, 4 }
 0x52a   : > { %v8566_v34 = vpop.eup %6856  ;;  %v1685_v7 = vsel %vm13007_vm4, %v1684_v2, %v1683_v41  ;;  %v1688_v35 = vrot.slane %v8562_v58, 3 }
 0x52b   : > { %v8570_v43 = vpop.eup %6858  ;;  %v1687_v48 = vsel %vm13008_vm8, %v1686_v61, %v1685_v7  ;;  %v1690_v18 = vrot.slane %v8566_v34, 2 }
 0x52c   : > { %v1689_v44 = vsel %vm13009_vm14, %v1688_v35, %v1687_v48  ;;  %v1692_v45 = vrot.slane %v8570_v43, 1 }
 0x52d   : > { %v1691_v32 = vsel %vm13010_vm10, %v1690_v18, %v1689_v44 }
 0x52e   : > { %v1693_v22 = vsel %vm13011_vm9, %v1692_v45, %v1691_v32 }
 0x52f   : > { %v1695_v31 = vsel %vm13012_vm11, %v1693_v22, 0.0 }
 0x530   : > { %1696 = vadd.xlane.f32.xlu2 %v1695_v31  ;;  %v1245_v46 = vpop.xlane.xlu2 %1244 }
 0x531   : > { %v1247_v59 = vrot.slane %v1245_v46, 1  ;;  %v1248_v28 = vrot.slane %v1245_v46, 2  ;;  %v1249_v30 = vrot.slane %v1245_v46, 3  ;;  %v1250_v13 = vrot.slane %v1245_v46, 4 }
 0x532   : > { %v1251_v55 = vrot.slane %v1245_v46, 5  ;;  %v1262_v9 = vsub.f32 %v8510_v39, %v1245_v46  ;;  %v1252_v2 = vrot.slane %v1245_v46, 6  ;;  %v1253_v41 = vrot.slane %v1245_v46, 7 }
 0x533   : > { %v1263_v61 = vsub.f32 %v8498_v62, %v1247_v59  ;;  %v1264_v7 = vsub.f32 %v8501_v10, %v1248_v28  ;;  %v1265_v35 = vsub.f32 %v8504_v27, %v1249_v30  ;;  %v1266_v48 = vsub.f32 %v8507_v14, %v1250_v13 }
 0x534   : > { %v1270_v18 = vmul.f32 1.442695, %v1262_v9  ;;  %v1267_v44 = vsub.f32 %v8513_v12, %v1251_v55  ;;  %v1268_v45 = vsub.f32 %v8518_v3, %v1252_v2  ;;  %v1269_v39 = vsub.f32 %v8521_v6, %v1253_v41 }
 0x535   : > { %v1272_v32 = vmul.f32 1.442695, %v1263_v61  ;;  %v1274_v22 = vmul.f32 1.442695, %v1264_v7  ;;  %v1276_v31 = vmul.f32 1.442695, %v1265_v35 }
 0x536   : > { %6860 = vpow2.f32 %v1270_v18  ;;  %v1278_v46 = vmul.f32 1.442695, %v1266_v48  ;;  %v1280_v62 = vmul.f32 1.442695, %v1267_v44  ;;  %v1282_v10 = vmul.f32 1.442695, %v1268_v45 }
 0x537   : > { %6862 = vpow2.f32 %v1272_v32  ;;  %v1284_v27 = vmul.f32 1.442695, %v1269_v39 }
 0x538   : > { %6864 = vpow2.f32 %v1274_v22 }
 0x539   : > { %6866 = vpow2.f32 %v1276_v31 }
 0x53a   : > { %6868 = vpow2.f32 %v1278_v46 }
 0x53b   : > { %6870 = vpow2.f32 %v1280_v62 }
 0x53c   : > { %v8587_v14 = vpop.eup %6860  ;;  %6872 = vpow2.f32 %v1282_v10 }
 0x53d   : > { %v8589_v12 = vpop.eup %6862  ;;  %6874 = vpow2.f32 %v1284_v27 }
 0x53e   : > { %v8591_v3 = vpop.eup %6864  ;;  %v1294_v6 = vrot.slane %v8589_v12, 7 }
 0x53f   : > { %v8594_v59 = vpop.eup %6866  ;;  %v1296_v28 = vrot.slane %v8591_v3, 6 }
 0x540   : > { %v8597_v30 = vpop.eup %6868  ;;  %v1295_v13 = vsel %vm13013_vm13, %v1294_v6, %v8587_v14  ;;  %v1298_v55 = vrot.slane %v8594_v59, 5 }
 0x541   : > { %v8602_v9 = vpop.eup %6870  ;;  %v1297_v2 = vsel %vm13014_vm1, %v1296_v28, %v1295_v13  ;;  %v1300_v41 = vrot.slane %v8597_v30, 4 }
 0x542   : > { %v8606_v61 = vpop.eup %6872  ;;  %v1299_v7 = vsel %vm13015_vm0, %v1298_v55, %v1297_v2  ;;  %v1302_v35 = vrot.slane %v8602_v9, 3 }
 0x543   : > { %v8610_v48 = vpop.eup %6874  ;;  %v1301_v18 = vsel %vm13016_vm3, %v1300_v41, %v1299_v7  ;;  %v1304_v44 = vrot.slane %v8606_v61, 2 }
 0x544   : > { %v1303_v45 = vsel %vm13017_vm5, %v1302_v35, %v1301_v18  ;;  %v1306_v32 = vrot.slane %v8610_v48, 1 }
 0x545   : > { %v1305_v22 = vsel %vm13018_vm2, %v1304_v44, %v1303_v45 }
 0x546   : > { %v1307_v31 = vsel %vm13019_vm15, %v1306_v32, %v1305_v22 }
 0x547   : > { %v1309_v39 = vsel %vm13020_vm6, %v1307_v31, 0.0 }
 0x548   : > { %1310 = vadd.xlane.f32.xlu0 %v1309_v39 }
 0x55c   : > { %1890 = vrot.lane.b32.xlu0 %v8443_v49, %s7539_s20 }
 0x5a3   : > { %v1697_v46 = vpop.xlane.xlu2 %1696 }
 0x5a4   : > { %6876 = vrcp.f32 %v1697_v46  ;;  %v8621_v62 = vrot.slane %v1697_v46, 1  ;;  %v8623_v10 = vrot.slane %v1697_v46, 2  ;;  %v8625_v27 = vrot.slane %v1697_v46, 3 }
 0x5a5   : > { %v8628_v6 = vrot.slane %v1697_v46, 4  ;;  %v1725_v28 = vand.u32 2147483648, %v1697_v46  ;;  %v8631_v13 = vrot.slane %v1697_v46, 5  ;;  %v8633_v55 = vrot.slane %v1697_v46, 6 }
 0x5a6   : > { %6878 = vrcp.f32 %v8621_v62  ;;  %v1740_v2 = vand.u32 2147483648, %v8621_v62  ;;  %v8639_v7 = vrot.slane %v1697_v46, 7  ;;  %vm1719_vm12 = vweird.f32 %v1697_v46 }
 0x5a7   : > { %6880 = vrcp.f32 %v8623_v10  ;;  %v1723_v35 = vand.u32 2147483647, %v1697_v46  ;;  %v1755_v18 = vand.u32 2147483648, %v8623_v10  ;;  %vm1734_vm4 = vweird.f32 %v8621_v62 }
 0x5a8   : > { %6882 = vrcp.f32 %v8625_v27  ;;  %v1770_v45 = vand.u32 2147483648, %v8625_v27  ;;  %v8648_v22 = vor.u32 1.1754944e-38, %v1725_v28  ;;  %v1738_v31 = vand.u32 2147483647, %v8621_v62 }
 0x5a9   : > { %6884 = vrcp.f32 %v8628_v6  ;;  %vm1749_vm8 = vweird.f32 %v8623_v10  ;;  %v1753_v39 = vand.u32 2147483647, %v8623_v10  ;;  %v1741_v17 = vor.u32 1.1754944e-38, %v1740_v2 }
 0x5aa   : > { %v8637_v41 = vpop.eup %6876  ;;  %v1768_v8 = vand.u32 2147483647, %v8625_v27  ;;  %v1756_v52 = vor.u32 1.1754944e-38, %v1755_v18  ;;  %vm1764_vm10 = vweird.f32 %v8625_v27  ;;  %6886 = vrcp.f32 %v8631_v13 }
 0x5ab   : > { %v1715_v44 = vmul.f32 %v8637_v41, %v1697_v46  ;;  %vm1720_vm14 = vweird.f32 %v8637_v41  ;;  %vm8664_vm9 = vcmp.eq.f32.partialorder %v1723_v35, 8.507059e+37  ;;  %v1771_v15 = vor.u32 1.1754944e-38, %v1770_v45 }
 0x5ac   : > { %v8646_v32 = vpop.eup %6878  ;;  %v1783_v50 = vand.u32 2147483647, %v8628_v6  ;;  %vm8670_vm13 = vcmp.eq.f32.partialorder %v1738_v31, 8.507059e+37  ;;  %vm8674_vm1 = vcmp.eq.f32.partialorder %v1753_v39, 8.507059e+37  ;;  %vm1779_vm0 = vweird.f32 %v8628_v6  ;;  %vm8694_vm2 = vmor %vm1719_vm12, %vm1720_vm14 }
 0x5ad   : > { %v8653_v49 = vpop.eup %6880  ;;  %v1716_v40 = vsub.f32 1.0, %v1715_v44  ;;  %v1730_v29 = vmul.f32 %v8646_v32, %v8621_v62  ;;  %vm1735_vm11 = vweird.f32 %v8646_v32  ;;  %vm8682_vm3 = vcmp.eq.f32.partialorder %v1768_v8, 8.507059e+37 }
 0x5ae   : > { %v1745_v28 = vmul.f32 %v8653_v49, %v8623_v10  ;;  %v6883_v25 = vpop.eup %6882  ;;  %v1785_v31 = vand.u32 2147483648, %v8628_v6  ;;  %6888 = vrcp.f32 %v8633_v55  ;;  %vm1750_vm5 = vweird.f32 %v8653_v49  ;;  %vm8709_vm6 = vmor %vm1734_vm4, %vm1735_vm11 }
 0x5af   : > { %v1717_v56 = vmul.f32 %v8637_v41, %v1716_v40  ;;  %v1731_v2 = vsub.f32 1.0, %v1730_v29  ;;  %v1760_v40 = vmul.f32 %v6883_v25, %v8625_v27  ;;  %v6885_v35 = vpop.eup %6884  ;;  %vm8699_vm15 = vcmp.eq.f32.partialorder %v1783_v50, 8.507059e+37  ;;  %vm8721_vm14 = vmor %vm1749_vm8, %vm1750_vm5 }
 0x5b0   : > { %v1746_v18 = vsub.f32 1.0, %v1745_v28  ;;  %v1775_v63 = vmul.f32 %v6885_v35, %v8628_v6  ;;  %v1800_v26 = vand.u32 2147483648, %v8631_v13  ;;  %vm1765_vm12 = vweird.f32 %v6883_v25 }
 0x5b1   : > { %v1718_v29 = vadd.f32 %v8637_v41, %v1717_v56  ;;  %v1732_v45 = vmul.f32 %v8646_v32, %v1731_v2  ;;  %v1761_v28 = vsub.f32 1.0, %v1760_v40  ;;  %v6887_v40 = vpop.eup %6886  ;;  %vm1780_vm4 = vweird.f32 %v6885_v35  ;;  %vm1766_vm8 = vmor %vm1764_vm10, %vm1765_vm12 }
 0x5b2   : > { %v1747_v39 = vmul.f32 %v8653_v49, %v1746_v18  ;;  %v1798_v18 = vand.u32 2147483647, %v8631_v13  ;;  %v1776_v50 = vsub.f32 1.0, %v1775_v63  ;;  %v1786_v62 = vor.u32 1.1754944e-38, %v1785_v31  ;;  %vm1781_vm10 = vmor %vm1779_vm0, %vm1780_vm4 }
 0x5b3   : > { %v1733_v8 = vadd.f32 %v8646_v32, %v1732_v45  ;;  %v1762_v45 = vmul.f32 %v6883_v25, %v1761_v28  ;;  %v1722_v37 = vsel %vm8694_vm2, %v8637_v41, %v1718_v29  ;;  %v1790_v4 = vmul.f32 %v6887_v40, %v8631_v13 }
 0x5b4   : > { %v1748_v1 = vadd.f32 %v8653_v49, %v1747_v39  ;;  %v1777_v39 = vmul.f32 %v6885_v35, %v1776_v50  ;;  %v6889_v28 = vpop.eup %6888  ;;  %vm1794_vm11 = vweird.f32 %v8631_v13  ;;  %vm8735_vm5 = vcmp.eq.f32.partialorder %v1798_v18, 8.507059e+37 }
 0x5b5   : > { %v1737_v63 = vsel %vm8709_vm6, %v8646_v32, %v1733_v8  ;;  %v1763_v29 = vadd.f32 %v6883_v25, %v1762_v45  ;;  %v1791_v10 = vsub.f32 1.0, %v1790_v4  ;;  %v1801_v56 = vor.u32 1.1754944e-38, %v1800_v26 }
 0x5b6   : > { %v1752_v41 = vsel %vm8721_vm14, %v8653_v49, %v1748_v1  ;;  %v1727_v32 = vsel %vm8664_vm9, %v8648_v22, %v1722_v37  ;;  %v1778_v49 = vadd.f32 %v6885_v35, %v1777_v39  ;;  %v1805_v1 = vmul.f32 %v6889_v28, %v8633_v55 }
 0x5b7   : > { %v1767_v23 = vsel %vm1766_vm8, %v6883_v25, %v1763_v29  ;;  %v1742_v27 = vsel %vm8670_vm13, %v1741_v17, %v1737_v63  ;;  %v1757_v4 = vsel %vm8674_vm1, %v1756_v52, %v1752_v41  ;;  %v1792_v8 = vmul.f32 %v6887_v40, %v1791_v10 }
 0x5b8   : > { %vm1795_vm2 = vweird.f32 %v6887_v40  ;;  %v1772_v26 = vsel %vm8682_vm3, %v1771_v15, %v1767_v23  ;;  %v1782_v37 = vsel %vm1781_vm10, %v6885_v35, %v1778_v49  ;;  %v1806_v25 = vsub.f32 1.0, %v1805_v1 }
 0x5b9   : > { %v1813_v22 = vand.u32 2147483647, %v8633_v55  ;;  %v1728_v44 = vmul.f32 %v8547_v47, %v1727_v32  ;;  %v1793_v53 = vadd.f32 %v6887_v40, %v1792_v8  ;;  %v1815_v17 = vand.u32 2147483648, %v8633_v55  ;;  %vm1796_vm9 = vmor %vm1794_vm11, %vm1795_vm2 }
 0x5ba   : > { %6890 = vrcp.f32 %v8639_v7  ;;  %v1743_v52 = vmul.f32 %v8549_v38, %v1742_v27  ;;  %v1787_v6 = vsel %vm8699_vm15, %v1786_v62, %v1782_v37  ;;  %v1807_v21 = vmul.f32 %v6889_v28, %v1806_v25 }
 0x5bb   : > { %v8756_v60 = vpop.xlane.xlu0 %1310  ;;  %vm1810_vm13 = vweird.f32 %v6889_v28  ;;  %v1758_v15 = vmul.f32 %v8551_v24, %v1757_v4  ;;  %v1773_v47 = vmul.f32 %v8554_v57, %v1772_v26  ;;  %v1797_v35 = vsel %vm1796_vm9, %v6887_v40, %v1793_v53 }
 0x5bc   : > { %vm1809_vm1 = vweird.f32 %v8633_v55  ;;  %v1802_v18 = vsel %vm8735_vm5, %v1801_v56, %v1797_v35  ;;  %v1808_v46 = vadd.f32 %v6889_v28, %v1807_v21  ;;  %vm1814_vm0 = vcmp.eq.f32.partialorder %v1813_v22, 8.507059e+37 }
 0x5bd   : > { %v1843_v38 = vrot.slane %v8331_v33, 1  ;;  %6892 = vrcp.f32 %v8756_v60  ;;  %v1788_v13 = vmul.f32 %v8557_v20, %v1787_v6  ;;  %vm1811_vm3 = vmor %vm1809_vm1, %vm1810_vm13  ;;  %v1816_v2 = vor.u32 1.1754944e-38, %v1815_v17 }
 0x5be   : > { %v1844_v24 = vrot.slane %v8335_v54, 1  ;;  %v1812_v45 = vsel %vm1811_vm3, %v6889_v28, %v1808_v46  ;;  %v1842_v57 = vrot.slane %v8349_v36, 1  ;;  %v1845_v55 = vrot.slane %v8355_v51, 1 }
 0x5bf   : > { %v1846_v40 = vrot.slane %v8370_v42, 1  ;;  %v1803_v62 = vmul.f32 %v8562_v58, %v1802_v18  ;;  %v1817_v63 = vsel %vm1814_vm0, %v1816_v2, %v1812_v45  ;;  %v1847_v33 = vrot.slane %v8385_v5, 1 }
 0x5c0   : > { %v6891_v50 = vpop.eup %6890  ;;  %v1818_v41 = vmul.f32 %v8566_v34, %v1817_v63  ;;  %v1848_v29 = vrot.slane %v8391_v11, 1  ;;  %v1859_v54 = vmul.f32 %v1843_v38, %v1743_v52  ;;  %v1828_v39 = vand.u32 2147483647, %v8639_v7 }
 0x5c1   : > { %v1820_v20 = vmul.f32 %v6891_v50, %v8639_v7  ;;  %v1860_v36 = vmul.f32 %v1844_v24, %v1758_v15  ;;  %v1861_v28 = vmul.f32 %v1845_v55, %v1773_v47  ;;  %v1862_v51 = vmul.f32 %v1846_v40, %v1788_v13 }
 0x5c2   : > { %v1830_v42 = vand.u32 2147483648, %v8639_v7  ;;  %v1858_v31 = vmul.f32 %v1842_v57, %v1728_v44  ;;  %v1874_v58 = vrot.slane %v1859_v54, 7  ;;  %vm1825_vm15 = vweird.f32 %v6891_v50 }
 0x5c3   : > { %v1821_v10 = vsub.f32 1.0, %v1820_v20  ;;  %v6893_v56 = vpop.eup %6892  ;;  %v1863_v5 = vmul.f32 %v1847_v33, %v1803_v62  ;;  %v1876_v32 = vrot.slane %v1860_v36, 6  ;;  %v1864_v23 = vmul.f32 %v1848_v29, %v1818_v41 }
 0x5c4   : > { %vm13039_vm6 = vcmask 1041409   ;;  %v1878_v11 = vrot.slane %v1861_v28, 5  ;;  %vm1824_vm12 = vweird.f32 %v8639_v7  ;;  %vm13040_vm14 = vcmask 1042434  }
 0x5c5   : > { %v1822_v34 = vmul.f32 %v6891_v50, %v1821_v10  ;;  %v1875_v49 = vsel %vm13039_vm6, %v1874_v58, %v1858_v31  ;;  %v1880_v27 = vrot.slane %v1862_v51, 4  ;;  %v8786_v4 = vrot.slane %v8756_v60, 1  ;;  %vm1826_vm11 = vmor %vm1824_vm12, %vm1825_vm15  ;;  %v8957_v31 = vld [vmem:[%s12744_s5] sm:$0xff] }
 0x5c6   : > { %v1877_v1 = vsel %vm13040_vm14, %v1876_v32, %v1875_v49  ;;  %vm1829_vm4 = vcmp.eq.f32.partialorder %v1828_v39, 8.507059e+37  ;;  %v1831_v26 = vor.u32 1.1754944e-38, %v1830_v42  ;;  %vm13041_vm8 = vcmask 1043459  }
 0x5c7   : > { %v1823_v8 = vadd.f32 %v6891_v50, %v1822_v34  ;;  %v1879_v37 = vsel %vm13041_vm8, %v1878_v11, %v1877_v1  ;;  %v1849_v25 = vrot.slane %v8395_v0, 1  ;;  %vm13042_vm5 = vcmask 1044484  }
 0x5c8   : > { %v1881_v22 = vsel %vm13042_vm5, %v1880_v27, %v1879_v37  ;;  %v8793_v44 = vrot.slane %v8756_v60, 2  ;;  %v1329_v7 = vmul.f32 %v6893_v56, %v8756_v60  ;;  %v1882_v17 = vrot.slane %v1863_v5, 3 }
 0x5c9   : > { %v1827_v53 = vsel %vm1826_vm11, %v6891_v50, %v1823_v8  ;;  %v1884_v52 = vrot.slane %v1864_v23, 2  ;;  %v8797_v6 = vrot.slane %v8756_v60, 3  ;;  %v1339_v47 = vand.u32 2147483648, %v8756_v60  ;;  %v8856_v23 = vld [vmem:[%s12744_s5 + $0x28] sm:$0xff] }
 0x5ca   : > { %v1832_v21 = vsel %vm1829_vm4, %v1831_v26, %v1827_v53  ;;  %v1330_v15 = vsub.f32 1.0, %v1329_v7  ;;  %6894 = vrcp.f32 %v8786_v4  ;;  %vm13043_vm10 = vcmask 1045509  }
 0x5cb   : > { %v1833_v0 = vmul.f32 %v8570_v43, %v1832_v21  ;;  %v1883_v35 = vsel %vm13043_vm10, %v1882_v17, %v1881_v22  ;;  %v8804_v18 = vrot.slane %v8756_v60, 4  ;;  %v8807_v46 = vrot.slane %v8756_v60, 5  ;;  %v8875_v22 = vld [vmem:[%s12744_s5 + $0x20] sm:$0xff] }
 0x5cc   : > { %v1331_v38 = vmul.f32 %v6893_v56, %v1330_v15  ;;  %vm1334_vm2 = vweird.f32 %v6893_v56  ;;  %v1337_v13 = vand.u32 2147483647, %v8756_v60  ;;  %6896 = vrcp.f32 %v8793_v44 }
 0x5cd   : > { %v1865_v2 = vmul.f32 %v1849_v25, %v1833_v0  ;;  %v8812_v24 = vrot.slane %v8756_v60, 6  ;;  %v8815_v43 = vrot.slane %v8756_v60, 7  ;;  %vm1333_vm9 = vweird.f32 %v8756_v60  ;;  %v8895_v0 = vld [vmem:[%s12744_s5 + $0x18] sm:$0xff] }
 0x5ce   : > { %vm13044_vm13 = vcmask 1046534   ;;  %v1332_v57 = vadd.f32 %v6893_v56, %v1331_v38  ;;  %v1340_v55 = vor.u32 1.1754944e-38, %v1339_v47  ;;  %6898 = vrcp.f32 %v8797_v6  ;;  %v1891_v40 = vpop.permute.xlu0 %1890  ;;  %vm1335_vm1 = vmor %vm1333_vm9, %vm1334_vm2 }
 0x5cf   : > { %v1885_v45 = vsel %vm13044_vm13, %v1884_v52, %v1883_v35  ;;  %v1886_v50 = vrot.slane %v1865_v2, 1  ;;  %v1352_v62 = vand.u32 2147483647, %v8786_v4  ;;  %v1354_v63 = vand.u32 2147483648, %v8786_v4 }
 0x5d0   : > { %v1369_v33 = vand.u32 2147483648, %v8793_v44  ;;  %v8823_v41 = vpop.eup %6894  ;;  %v1336_v20 = vsel %vm1335_vm1, %v6893_v56, %v1332_v57  ;;  %vm1338_vm0 = vcmp.eq.f32.partialorder %v1337_v13, 8.507059e+37  ;;  %v1367_v60 = vand.u32 2147483647, %v8793_v44 }
 0x5d1   : > { %6900 = vrcp.f32 %v8804_v18  ;;  %vm13045_vm3 = vcmask 1047559   ;;  %v1341_v54 = vsel %vm1338_vm0, %v1340_v55, %v1336_v20  ;;  %v1344_v39 = vmul.f32 %v8823_v41, %v8786_v4 }
 0x5d2   : > { %v8828_v29 = vsel %vm13045_vm3, %v1886_v50, %v1885_v45  ;;  %v1382_v36 = vand.u32 2147483647, %v8797_v6  ;;  %v8833_v28 = vpop.eup %6896  ;;  %vm13047_vm15 = vcmask 130048   ;;  %vm1348_vm6 = vweird.f32 %v8786_v4  ;;  %v7425_v45 = vld [vmem:[%s7614_s18 + $0x28] sm:$0xff] }
 0x5d3   : > { %13046 = vst [vmem:[#allocation35_spill] sm:$0xff] %v8828_v29  ;;  %v1893_v51 = vsel %vm13047_vm15, %v8828_v29, %v1891_v40  ;;  %vm1363_vm12 = vweird.f32 %v8793_v44  ;;  %v1384_v10 = vand.u32 2147483648, %v8797_v6  ;;  %v1345_v42 = vsub.f32 1.0, %v1344_v39  ;;  %v8921_v40 = vld [vmem:[%s12744_s5 + $0x10] sm:$0xff] }
 0x5d4   : > { %6714 = vmatmul.msk.f32.vlgmr.msra.gmra.mxu3 %vm12824_vm7, %v1893_v51  ;;  %vm8841_vm14 = vcmp.eq.f32.partialorder %v1352_v62, 8.507059e+37  ;;  %v1355_v58 = vor.u32 1.1754944e-38, %v1354_v63  ;;  %v1359_v56 = vmul.f32 %v8833_v28, %v8793_v44  ;;  %v1370_v5 = vor.u32 1.1754944e-38, %v1369_v33  ;;  %v6899_v32 = vpop.eup %6898 }
 0x5d5   : > { %v8848_v34 = vmul.f32 %v8587_v14, %v1341_v54  ;;  %vm1349_vm4 = vweird.f32 %v8823_v41  ;;  %vm1378_vm8 = vweird.f32 %v8797_v6  ;;  %6902 = vrcp.f32 %v8807_v46  ;;  %4931 = vmatpush.msra.mxu3 %v8856_v23 }
 0x5d6   : > { %v1346_v49 = vmul.f32 %v8823_v41, %v1345_v42  ;;  %v1360_v11 = vsub.f32 1.0, %v1359_v56  ;;  %vm8860_vm11 = vcmp.eq.f32.partialorder %v1367_v60, 8.507059e+37  ;;  %v1374_v14 = vmul.f32 %v6899_v32, %v8797_v6  ;;  %vm8885_vm2 = vmor %vm1348_vm6, %vm1349_vm4  ;;  %v8942_v60 = vld [vmem:[%s12744_s5 + $0x8] sm:$0xff] }
 0x5d7   : > { %vm8865_vm5 = vcmp.eq.f32.partialorder %v1382_v36, 8.507059e+37  ;;  %v6901_v8 = vpop.eup %6900  ;;  %vm1364_vm10 = vweird.f32 %v8833_v28  ;;  %v1385_v26 = vor.u32 1.1754944e-38, %v1384_v10  ;;  %v1397_v37 = vand.u32 2147483647, %v8804_v18  ;;  %4932 = vmatpush.msra.mxu3 %v8875_v22 }
 0x5d8   : > { %v1399_v25 = vand.u32 2147483648, %v8804_v18  ;;  %v1347_v7 = vadd.f32 %v8823_v41, %v1346_v49  ;;  %v1361_v53 = vmul.f32 %v8833_v28, %v1360_v11  ;;  %v1375_v17 = vsub.f32 1.0, %v1374_v14  ;;  %vm8908_vm13 = vmor %vm1363_vm12, %vm1364_vm10 }
 0x5d9   : > { %v1389_v52 = vmul.f32 %v6901_v8, %v8804_v18  ;;  %vm1379_vm9 = vweird.f32 %v6899_v32  ;;  %v1412_v15 = vand.u32 2147483647, %v8807_v46  ;;  %v1414_v47 = vand.u32 2147483648, %v8807_v46  ;;  %4933 = vmatpush.msra.mxu3 %v8895_v0 }
 0x5da   : > { %6904 = vrcp.f32 %v8812_v24  ;;  %v1351_v4 = vsel %vm8885_vm2, %v8823_v41, %v1347_v7  ;;  %v1362_v35 = vadd.f32 %v8833_v28, %v1361_v53  ;;  %v1376_v38 = vmul.f32 %v6899_v32, %v1375_v17  ;;  %vm1380_vm6 = vmor %vm1378_vm8, %vm1379_vm9 }
 0x5db   : > { %v1390_v13 = vsub.f32 1.0, %v1389_v52  ;;  %v8902_v2 = vpop.eup %6902  ;;  %vm1393_vm1 = vweird.f32 %v8804_v18  ;;  %vm8913_vm0 = vcmp.eq.f32.partialorder %v1397_v37, 8.507059e+37  ;;  %v1400_v55 = vor.u32 1.1754944e-38, %v1399_v25  ;;  %4934 = vmatpush.msra.mxu3 %v8921_v40  ;;  %v7421_v37 = vld [vmem:[%s7614_s18 + $0x10] sm:$0xff] }
 0x5dc   : > { %vm1408_vm3 = vweird.f32 %v8807_v46  ;;  %v1366_v44 = vsel %vm8908_vm13, %v8833_v28, %v1362_v35  ;;  %v1377_v50 = vadd.f32 %v6899_v32, %v1376_v38  ;;  %vm1394_vm15 = vweird.f32 %v6901_v8  ;;  %v7424_v35 = vld [vmem:[%s7614_s18] sm:$0xff] }
 0x5dd   : > { %v1391_v62 = vmul.f32 %v6901_v8, %v1390_v13  ;;  %v1356_v63 = vsel %vm8841_vm14, %v1355_v58, %v1351_v4  ;;  %v1404_v33 = vmul.f32 %v8902_v2, %v8807_v46  ;;  %vm8934_vm12 = vcmp.eq.f32.partialorder %v1412_v15, 8.507059e+37  ;;  %4935 = vmatpush.msra.mxu3 %v8942_v60  ;;  %vm1395_vm14 = vmor %vm1393_vm1, %vm1394_vm15 }
 0x5de   : > { %v1427_v20 = vand.u32 2147483647, %v8812_v24  ;;  %v1381_v54 = vsel %vm1380_vm6, %v6899_v32, %v1377_v50  ;;  %v1415_v6 = vor.u32 1.1754944e-38, %v1414_v47  ;;  %v1429_v36 = vand.u32 2147483648, %v8812_v24 }
 0x5df   : > { %v1392_v39 = vadd.f32 %v6901_v8, %v1391_v62  ;;  %v1371_v51 = vsel %vm8860_vm11, %v1370_v5, %v1366_v44  ;;  %v1386_v10 = vsel %vm8865_vm5, %v1385_v26, %v1381_v54  ;;  %v1405_v42 = vsub.f32 1.0, %v1404_v33  ;;  %4936 = vmatpush.msra.mxu3 %v8957_v31  ;;  %v7426_v33 = vld [vmem:[%s7614_s18 + $0x30] sm:$0xff] }
 0x5e0   : > { %v6905_v28 = vpop.eup %6904  ;;  %6906 = vrcp.f32 %v8815_v43  ;;  %v1357_v58 = vmul.f32 %v8589_v12, %v1356_v63  ;;  %vm1423_vm4 = vweird.f32 %v8812_v24  ;;  %vm1409_vm8 = vweird.f32 %v8902_v2 }
 0x5e1   : > { %v1396_v56 = vsel %vm1395_vm14, %v6901_v8, %v1392_v39  ;;  %v1419_v5 = vmul.f32 %v6905_v28, %v8812_v24  ;;  %v1406_v32 = vmul.f32 %v8902_v2, %v1405_v42  ;;  %vm8967_vm11 = vcmp.eq.f32.partialorder %v1427_v20, 8.507059e+37  ;;  %v7420_v8 = vld [vmem:[%s7614_s18 + $0x8] sm:$0xff]  ;;  %vm1410_vm10 = vmor %vm1408_vm3, %vm1409_vm8 }
 0x5e2   : > { %v1401_v18 = vsel %vm8913_vm0, %v1400_v55, %v1396_v56  ;;  %v1372_v12 = vmul.f32 %v8591_v3, %v1371_v51  ;;  %v1387_v11 = vmul.f32 %v8594_v59, %v1386_v10  ;;  %v1430_v14 = vor.u32 1.1754944e-38, %v1429_v36  ;;  %v7422_v3 = vld [vmem:[%s7614_s18 + $0x18] sm:$0xff]  ;;  %v7423_v59 = vld [vmem:[%s7614_s18 + $0x20] sm:$0xff] }
 0x5e3   : > { %v1420_v1 = vsub.f32 1.0, %v1419_v5  ;;  %v1407_v27 = vadd.f32 %v8902_v2, %v1406_v32  ;;  %vm1424_vm5 = vweird.f32 %v6905_v28  ;;  %v1457_v26 = vrot.slane %v7420_v8, 1  ;;  %v7427_v32 = vld [vmem:[%s7614_s18 + $0x38] sm:$0xff] }
 0x5e4   : > { %v1458_v25 = vrot.slane %v7421_v37, 1  ;;  %v1402_v7 = vmul.f32 %v8597_v30, %v1401_v18  ;;  %v1459_v17 = vrot.slane %v7422_v3, 1  ;;  %v1460_v52 = vrot.slane %v7423_v59, 1  ;;  %vm1425_vm2 = vmor %vm1423_vm4, %vm1424_vm5  ;;  %v7428_v3 = vld [vmem:[%s12745_s6] ss:$0 sm:$0xff] }
 0x5e5   : > { %v1421_v53 = vmul.f32 %v6905_v28, %v1420_v1  ;;  %v1411_v15 = vsel %vm1410_vm10, %v8902_v2, %v1407_v27  ;;  %v1442_v47 = vand.u32 2147483647, %v8815_v43  ;;  %v1444_v4 = vand.u32 2147483648, %v8815_v43 }
 0x5e6   : > { %v6907_v21 = vpop.eup %6906  ;;  %v1456_v38 = vrot.slane %v7424_v35, 1  ;;  %v1416_v30 = vsel %vm8934_vm12, %v1415_v6, %v1411_v15  ;;  %v1461_v57 = vrot.slane %v7425_v45, 1  ;;  %v1473_v2 = vmul.f32 %v1457_v26, %v1357_v58 }
 0x5e7   : > { %v1422_v46 = vadd.f32 %v6905_v28, %v1421_v53  ;;  %v1434_v13 = vmul.f32 %v6907_v21, %v8815_v43  ;;  %v1417_v55 = vmul.f32 %v8602_v9, %v1416_v30  ;;  %v1474_v44 = vmul.f32 %v1458_v25, %v1372_v12  ;;  %v1505_v25 = vpop.permute.xlu1 %1504 }
 0x5e8   : > { %v1475_v50 = vmul.f32 %v1459_v17, %v1387_v11  ;;  %v1462_v20 = vrot.slane %v7426_v33, 1  ;;  %v1476_v41 = vmul.f32 %v1460_v52, %v1402_v7  ;;  %v1472_v39 = vmul.f32 %v1456_v38, %v8848_v34 }
 0x5e9   : > { %v1426_v62 = vsel %vm1425_vm2, %v6905_v28, %v1422_v46  ;;  %v1435_v63 = vsub.f32 1.0, %v1434_v13  ;;  %v1488_v6 = vrot.slane %v1473_v2, 7  ;;  %v1490_v36 = vrot.slane %v1474_v44, 6 }
 0x5ea   : > { %v1431_v54 = vsel %vm8967_vm11, %v1430_v14, %v1426_v62  ;;  %vm1439_vm9 = vweird.f32 %v6907_v21  ;;  %v1477_v51 = vmul.f32 %v1461_v57, %v1417_v55  ;;  %vm13064_vm13 = vcmask 1041409  }
 0x5eb   : > { %v1432_v9 = vmul.f32 %v8606_v61, %v1431_v54  ;;  %v1436_v24 = vmul.f32 %v6907_v21, %v1435_v63  ;;  %v1489_v10 = vsel %vm13064_vm13, %v1488_v6, %v1472_v39  ;;  %v1492_v28 = vrot.slane %v1475_v50, 5 }
 0x5ec   : > { %vm1438_vm1 = vweird.f32 %v8815_v43  ;;  %vm13065_vm0 = vcmask 1042434   ;;  %v1494_v56 = vrot.slane %v1476_v41, 4  ;;  %vm1443_vm15 = vcmp.eq.f32.partialorder %v1442_v47, 8.507059e+37 }
 0x5ed   : > { %v1437_v42 = vadd.f32 %v6907_v21, %v1436_v24  ;;  %v1491_v58 = vsel %vm13065_vm0, %v1490_v36, %v1489_v10  ;;  %vm1440_vm3 = vmor %vm1438_vm1, %vm1439_vm9  ;;  %v1445_v34 = vor.u32 1.1754944e-38, %v1444_v4  ;;  %v1478_v5 = vmul.f32 %v1462_v20, %v1432_v9 }
 0x5ee   : > { %vm13066_vm6 = vcmask 1043459   ;;  %v1463_v49 = vrot.slane %v7427_v32, 1  ;;  %vm13067_vm12 = vcmask 1044484   ;;  %v1496_v11 = vrot.slane %v1477_v51, 3 }
 0x5ef   : > { %v1493_v18 = vsel %vm13066_vm6, %v1492_v28, %v1491_v58  ;;  %v1441_v61 = vsel %vm1440_vm3, %v6907_v21, %v1437_v42  ;;  %vm13068_vm14 = vcmask 1045509   ;;  %v1498_v27 = vrot.slane %v1478_v5, 2  ;;  %v13073_v5 = vld [vmem:[#allocation36_spill] sm:$0xff] }
 0x5f0   : > { %v1495_v12 = vsel %vm13067_vm12, %v1494_v56, %v1493_v18  ;;  %v1446_v1 = vsel %vm1443_vm15, %v1445_v34, %v1441_v61  ;;  %vm13069_vm4 = vcmask 1046534   ;;  %vm13070_vm8 = vcmask 1047559  }
 0x5f1   : > { %v1447_v14 = vmul.f32 %v8610_v48, %v1446_v1  ;;  %v1497_v43 = vsel %vm13068_vm14, %v1496_v11, %v1495_v12  ;;  %vm13072_vm11 = vcmask 130048   ;;  %v13076_v11 = vld [vmem:[#allocation34_spill] sm:$0xff]  ;;  %vm13077_vm15 = vcmask 261120  }
 0x5f2   : > { %v1499_v26 = vsel %vm13069_vm4, %v1498_v27, %v1497_v43  ;;  %vm13078_vm6 = vmmov %vm13077_vm15  ;;  %vm13087_vm12 = vcmask 1041409   ;;  %vm13088_vm14 = vcmask 1042434   ;;  %vm13089_vm4 = vcmask 1043459  }
 0x5f3   : > { %v1479_v8 = vmul.f32 %v1463_v49, %v1447_v14 }
 0x5f5   : > { %v1500_v37 = vrot.slane %v1479_v8, 1 }
 0x5f7   : > { %v9008_v7 = vsel %vm13070_vm8, %v1500_v37, %v1499_v26  ;;  %vm13090_vm8 = vcmask 1044484  }
 0x5f8   : > { %13071 = vst [vmem:[#allocation19_spill] sm:$0xff] %v9008_v7  ;;  %v1507_v53 = vsel %vm13072_vm11, %v9008_v7, %v1505_v25  ;;  %vm13091_vm11 = vcmask 1045509  }
 0x5f9   : > { %6712 = vmatmul.msk.f32.vlgmr.msra.gmra.mxu2 %vm12824_vm7, %v1507_v53 }
 0x5fa   : > { %4553 = vmatpush.msra.mxu2 %v8856_v23 }
 0x5fc   : > { %4554 = vmatpush.msra.mxu2 %v8875_v22 }
 0x5fe   : > { %4555 = vmatpush.msra.mxu2 %v8895_v0 }
 0x600   : > { %4556 = vmatpush.msra.mxu2 %v8921_v40 }
 0x602   : > { %4557 = vmatpush.msra.mxu2 %v8942_v60 }
 0x604   : > { %4558 = vmatpush.msra.mxu2 %v8957_v31 }
 0x657   : > { %v1914_v48 = vpop.f32.mrf.mxu3 }
 0x658   : > { %v1915_v17 = vadd.f32 %v7428_v3, %v1914_v48 }
 0x65a   : > { %6908 = vtanh.f32 %v1915_v17  ;;  %v6715_v40 = vmul.f32 -1.442695, %v1915_v17 }
 0x660   : > { %v6909_v59 = vpop.eup %6908 }
 0x661   : > { %1939 = vrot.lane.b32.xlu0 %v6909_v59, %s7536_s12 }
 0x67c   : > { %v1528_v23 = vpop.f32.mrf.mxu2 }
 0x67d   : > { %v1529_v22 = vadd.f32 %v7428_v3, %v1528_v23 }
 0x67f   : > { %6910 = vtanh.f32 %v1529_v22  ;;  %v6713_v31 = vmul.f32 -1.442695, %v1529_v22 }
 0x680   : > { %6912 = vpow2.f32 %v6715_v40 }
 0x681   : > { %6914 = vpow2.f32 %v6713_v31  ;;  %v13079_v31 = vld [vmem:[#allocation4_spill] sm:$0xff] }
 0x685   : > { %v6911_v0 = vpop.eup %6910 }
 0x686   : > { %1553 = vrot.lane.b32.xlu2 %v6911_v0, %s7536_s12  ;;  %v6913_v60 = vpop.eup %6912 }
 0x687   : > { %v1920_v52 = vadd.f32 1.0, %v6913_v60  ;;  %v6915_v21 = vpop.eup %6914 }
 0x688   : > { %v1534_v47 = vadd.f32 1.0, %v6915_v21  ;;  %v13080_v21 = vld [vmem:[#allocation5_spill] sm:$0xff] }
 0x689   : > { %6916 = vrcp.f32 %v1920_v52  ;;  %v1932_v45 = vand.u32 2147483648, %v1920_v52  ;;  %vm1926_vm10 = vweird.f32 %v1920_v52  ;;  %v1930_v57 = vand.u32 2147483647, %v1920_v52 }
 0x68a   : > { %6918 = vrcp.f32 %v1534_v47  ;;  %v1546_v41 = vand.u32 2147483648, %v1534_v47  ;;  %vm1540_vm1 = vweird.f32 %v1534_v47  ;;  %v1544_v54 = vand.u32 2147483647, %v1534_v47 }
 0x68b   : > { %v1933_v44 = vor.u32 1.1754944e-38, %v1932_v45  ;;  %vm1931_vm9 = vcmp.eq.f32.partialorder %v1930_v57, 8.507059e+37 }
 0x68c   : > { %v1547_v6 = vor.u32 1.1754944e-38, %v1546_v41  ;;  %vm1545_vm3 = vcmp.eq.f32.partialorder %v1544_v54, 8.507059e+37 }
 0x68f   : > { %v6917_v15 = vpop.eup %6916 }
 0x690   : > { %v1922_v4 = vmul.f32 %v6917_v15, %v1920_v52  ;;  %v6919_v30 = vpop.eup %6918  ;;  %vm1927_vm5 = vweird.f32 %v6917_v15 }
 0x691   : > { %v1536_v46 = vmul.f32 %v6919_v30, %v1534_v47  ;;  %vm1928_vm2 = vmor %vm1926_vm10, %vm1927_vm5  ;;  %vm1541_vm13 = vweird.f32 %v6919_v30  ;;  %v13081_v47 = vld [vmem:[#allocation6_spill] sm:$0xff]  ;;  %vm13092_vm5 = vcmask 1046534   ;;  %vm13093_vm10 = vcmask 1047559  }
 0x692   : > { %v1923_v35 = vsub.f32 1.0, %v1922_v4  ;;  %vm1542_vm0 = vmor %vm1540_vm1, %vm1541_vm13 }
 0x693   : > { %v1537_v55 = vsub.f32 1.0, %v1536_v46  ;;  %vm13104_vm13 = vmmov %vm13088_vm14 }
 0x694   : > { %v1924_v38 = vmul.f32 %v6917_v15, %v1923_v35  ;;  %v13082_v35 = vld [vmem:[#allocation7_spill] sm:$0xff]  ;;  %vm13105_vm1 = vmmov %vm13089_vm4 }
 0x695   : > { %v1538_v63 = vmul.f32 %v6919_v30, %v1537_v55 }
 0x696   : > { %v1925_v13 = vadd.f32 %v6917_v15, %v1924_v38 }
 0x697   : > { %v1539_v20 = vadd.f32 %v6919_v30, %v1538_v63 }
 0x698   : > { %v1929_v2 = vsel %vm1928_vm2, %v6917_v15, %v1925_v13  ;;  %v13084_v13 = vld [vmem:[#allocation8_spill] sm:$0xff]  ;;  %vm13094_vm2 = vcmask 130048  }
 0x699   : > { %v1934_v62 = vsel %vm1931_vm9, %v1933_v44, %v1929_v2  ;;  %v1543_v39 = vsel %vm1542_vm0, %v6919_v30, %v1539_v20  ;;  %v13083_v30 = vld [vmem:[#allocation3_spill] sm:$0xff]  ;;  %v13085_v2 = vld [vmem:[#allocation9_spill] sm:$0xff]  ;;  %vm13103_vm9 = vmmov %vm13087_vm12 }
 0x69a   : > { %v1548_v36 = vsel %vm1545_vm3, %v1547_v6, %v1543_v39  ;;  %v1937_v51 = vmul.f32 %v1934_v62, %v8436_v16  ;;  %vm13106_vm0 = vmmov %vm13090_vm8 }
 0x69b   : > { %v1551_v58 = vmul.f32 %v1548_v36, %v8423_v19  ;;  %vm13107_vm3 = vmmov %vm13091_vm11 }
 0x6d3   : > { %v1940_v50 = vpop.permute.xlu0 %1939 }
 0x6d4   : > { %v1942_v33 = vmul.f32 %v1940_v50, %v1934_v62  ;;  %v13086_v50 = vld [vmem:[#allocation10_spill] sm:$0xff] }
 0x6d6   : > { %1944 = vrot.lane.b32.xlu2 %v1942_v33, %s7537_s13 }
 0x6e0   : > { %v1554_v9 = vpop.permute.xlu2 %1553 }
 0x6e1   : > { %v1556_v24 = vmul.f32 %v1554_v9, %v1548_v36 }
 0x6e3   : > { %1558 = vrot.lane.b32.xlu1 %v1556_v24, %s7537_s13 }
 0x730   : > { %v1945_v10 = vpop.permute.xlu2 %1944 }
 0x731   : > { %v9027_v28 = vadd.f32 %v1945_v10, %v1937_v51 }
 0x733   : > { %6920 = vtanh.f32 %v9027_v28  ;;  %v2333_v61 = vmul.f32 %v9027_v28, %v13073_v5 }
 0x739   : > { %v6921_v42 = vpop.eup %6920 }
 0x73a   : > { %1950 = vrot.lane.b32.xlu1 %v6921_v42, %s7536_s12 }
 0x755   : > { %v1559_v56 = vpop.permute.xlu1 %1558 }
 0x756   : > { %v9032_v34 = vadd.f32 %v1559_v56, %v1551_v58 }
 0x758   : > { %6922 = vtanh.f32 %v9032_v34  ;;  %v1955_v18 = vmul.f32 %v9032_v34, %v13073_v5 }
 0x75a   : > { %1957 = vrot.lane.b32.xlu2 %v1955_v18, %s7536_s12 }
 0x75e   : > { %v6923_v16 = vpop.eup %6922 }
 0x75f   : > { %1564 = vrot.lane.b32.xlu0 %v6923_v16, %s7536_s12 }
 0x767   : > { %2335 = vrot.lane.b32.xlu0 %v2333_v61, %s7536_s12 }
 0x7ac   : > { %v1951_v32 = vpop.permute.xlu1 %1950 }
 0x7ad   : > { %v9044_v12 = vmul.f32 %v1951_v32, %v1934_v62 }
 0x7af   : > { %13075 = vst [vmem:[#allocation22_spill] sm:$0xff] %v9044_v12  ;;  %v2332_v27 = vmul.f32 %v9044_v12, %v13076_v11 }
 0x7b4   : > { %v1958_v14 = vpop.permute.xlu2 %1957 }
 0x7d1   : > { %v1565_v19 = vpop.permute.xlu0 %1564 }
 0x7d2   : > { %v9042_v49 = vmul.f32 %v1565_v19, %v1548_v36 }
 0x7d4   : > { %13074 = vst [vmem:[#allocation27_spill] sm:$0xff] %v9042_v49  ;;  %v1954_v1 = vmul.f32 %v9042_v49, %v13076_v11 }
 0x7d6   : > { %v1960_v43 = vadd.f32 %v1958_v14, %v1954_v1  ;;  %v13095_v14 = vld [vmem:[#allocation12_spill] sm:$0xff] }
 0x7d8   : > { %1962 = vrot.lane.b32.xlu1 %v1960_v43, %s7537_s13 }
 0x7d9   : > { %v2336_v8 = vpop.permute.xlu0 %2335 }
 0x7da   : > { %v2338_v26 = vadd.f32 %v2336_v8, %v2332_v27  ;;  %v13096_v27 = vld [vmem:[#allocation13_spill] sm:$0xff] }
 0x7dc   : > { %2340 = vrot.lane.b32.xlu2 %v2338_v26, %s7537_s13  ;;  %v13097_v26 = vld [vmem:[#allocation14_spill] sm:$0xff] }
 0x836   : > { %v2341_v37 = vpop.permute.xlu2 %2340 }
 0x837   : > { %v2343_v25 = vsel %vm13077_vm15, %v2341_v37, 0.0  ;;  %vm13108_vm15 = vmmov %vm13092_vm5 }
 0x838   : > { %2344 = vadd.xlane.f32.xlu1 %v2343_v25  ;;  %v13098_v25 = vld [vmem:[#allocation15_spill] sm:$0xff] }
 0x84a   : > { %v1963_v53 = vpop.permute.xlu1 %1962 }
 0x84b   : > { %v1965_v48 = vsel %vm13078_vm6, %v1963_v53, 0.0  ;;  %vm13109_vm6 = vmmov %vm13093_vm10 }
 0x84c   : > { %1966 = vadd.xlane.f32.xlu0 %v1965_v48  ;;  %v13099_v48 = vld [vmem:[#allocation11_spill] sm:$0xff] }
 0x8ab   : > { %v2345_v3 = vpop.xlane.xlu1 %2344 }
 0x8ac   : > { %v2347_v17 = vrot.slane %v2345_v3, 1  ;;  %v2348_v59 = vrot.slane %v2345_v3, 2  ;;  %v2349_v23 = vrot.slane %v2345_v3, 3  ;;  %v2350_v22 = vrot.slane %v2345_v3, 4 }
 0x8ad   : > { %v2351_v0 = vrot.slane %v2345_v3, 5  ;;  %v2352_v40 = vrot.slane %v2345_v3, 6  ;;  %v2353_v60 = vrot.slane %v2345_v3, 7  ;;  %v9067_v46 = vadd.f32 %v2345_v3, %v13083_v30 }
 0x8ae   : > { %v9055_v52 = vadd.f32 %v2347_v17, %v13079_v31  ;;  %v9058_v15 = vadd.f32 %v2348_v59, %v13080_v21  ;;  %v9061_v4 = vadd.f32 %v2349_v23, %v13081_v47  ;;  %v9064_v38 = vadd.f32 %v2350_v22, %v13082_v35  ;;  %v13100_v17 = vld [vmem:[#allocation16_spill] sm:$0xff] }
 0x8af   : > { %v9070_v45 = vadd.f32 %v2351_v0, %v13084_v13  ;;  %v9075_v44 = vadd.f32 %v2352_v40, %v13085_v2  ;;  %v9078_v62 = vadd.f32 %v2353_v60, %v13086_v50  ;;  %v13101_v0 = vld [vmem:[#allocation17_spill] sm:$0xff]  ;;  %v13102_v60 = vld [vmem:[#allocation18_spill] sm:$0xff] }
 0x8b0   : > { %v2378_v57 = vrot.slane %v9055_v52, 7  ;;  %v2380_v55 = vrot.slane %v9058_v15, 6  ;;  %v2382_v33 = vrot.slane %v9061_v4, 5  ;;  %v2384_v41 = vrot.slane %v9064_v38, 4 }
 0x8b1   : > { %v2386_v39 = vrot.slane %v9070_v45, 3  ;;  %v2388_v36 = vrot.slane %v9075_v44, 2  ;;  %v2390_v24 = vrot.slane %v9078_v62, 1 }
 0x8b2   : > { %v2379_v63 = vsel %vm13087_vm12, %v2378_v57, %v9067_v46  ;;  %vm13110_vm12 = vmmov %vm13094_vm2 }
 0x8b3   : > { %v2381_v20 = vsel %vm13088_vm14, %v2380_v55, %v2379_v63  ;;  %vm13111_vm14 = vmmov %vm13103_vm9 }
 0x8b4   : > { %v2383_v54 = vsel %vm13089_vm4, %v2382_v33, %v2381_v20  ;;  %vm13112_vm4 = vmmov %vm13104_vm13 }
 0x8b5   : > { %v2385_v6 = vsel %vm13090_vm8, %v2384_v41, %v2383_v54  ;;  %vm13113_vm8 = vmmov %vm13105_vm1 }
 0x8b6   : > { %v2387_v9 = vsel %vm13091_vm11, %v2386_v39, %v2385_v6  ;;  %vm13114_vm11 = vmmov %vm13106_vm0 }
 0x8b7   : > { %v2389_v51 = vsel %vm13092_vm5, %v2388_v36, %v2387_v9  ;;  %vm13115_vm5 = vmmov %vm13107_vm3 }
 0x8b8   : > { %v2391_v10 = vsel %vm13093_vm10, %v2390_v24, %v2389_v51  ;;  %vm13116_vm10 = vmmov %vm13108_vm15 }
 0x8b9   : > { %v2393_v42 = vsel %vm13094_vm2, %v2391_v10, -inf  ;;  %vm13117_vm2 = vmmov %vm13109_vm6 }
 0x8ba   : > { %2394 = vmax.xlane.f32.xlu0 %v2393_v42 }
 0x8bf   : > { %v1967_v58 = vpop.xlane.xlu0 %1966 }
 0x8c0   : > { %v1969_v56 = vrot.slane %v1967_v58, 1  ;;  %v1970_v18 = vrot.slane %v1967_v58, 2  ;;  %v1971_v16 = vrot.slane %v1967_v58, 3  ;;  %v1972_v61 = vrot.slane %v1967_v58, 4 }
 0x8c1   : > { %v1973_v32 = vrot.slane %v1967_v58, 5  ;;  %v1974_v19 = vrot.slane %v1967_v58, 6  ;;  %v1975_v1 = vrot.slane %v1967_v58, 7  ;;  %v9107_v3 = vadd.f32 %v1967_v58, %v13099_v48 }
 0x8c2   : > { %v9095_v43 = vadd.f32 %v1969_v56, %v13095_v14  ;;  %v9098_v8 = vadd.f32 %v1970_v18, %v13096_v27  ;;  %v9101_v37 = vadd.f32 %v1971_v16, %v13097_v26  ;;  %v9104_v53 = vadd.f32 %v1972_v61, %v13098_v25 }
 0x8c3   : > { %v9110_v59 = vadd.f32 %v1973_v32, %v13100_v17  ;;  %v9115_v40 = vadd.f32 %v1974_v19, %v13101_v0  ;;  %v9118_v57 = vadd.f32 %v1975_v1, %v13102_v60 }
 0x8c4   : > { %v2000_v23 = vrot.slane %v9095_v43, 7  ;;  %v2002_v22 = vrot.slane %v9098_v8, 6  ;;  %v2004_v63 = vrot.slane %v9101_v37, 5  ;;  %v2006_v20 = vrot.slane %v9104_v53, 4 }
 0x8c5   : > { %v2008_v54 = vrot.slane %v9110_v59, 3  ;;  %v2010_v6 = vrot.slane %v9115_v40, 2  ;;  %v2012_v9 = vrot.slane %v9118_v57, 1 }
 0x8c6   : > { %v2001_v55 = vsel %vm13103_vm9, %v2000_v23, %v9107_v3  ;;  %vm13118_vm9 = vmmov %vm13110_vm12 }
 0x8c7   : > { %v2003_v33 = vsel %vm13104_vm13, %v2002_v22, %v2001_v55  ;;  %vm13119_vm13 = vmmov %vm13111_vm14 }
 0x8c8   : > { %v2005_v41 = vsel %vm13105_vm1, %v2004_v63, %v2003_v33  ;;  %vm13120_vm1 = vmmov %vm13112_vm4 }
 0x8c9   : > { %v2007_v39 = vsel %vm13106_vm0, %v2006_v20, %v2005_v41  ;;  %vm13121_vm0 = vmmov %vm13113_vm8 }
 0x8ca   : > { %v2009_v36 = vsel %vm13107_vm3, %v2008_v54, %v2007_v39  ;;  %vm13122_vm3 = vmmov %vm13114_vm11 }
 0x8cb   : > { %v2011_v24 = vsel %vm13108_vm15, %v2010_v6, %v2009_v36  ;;  %vm13123_vm15 = vmmov %vm13115_vm5 }
 0x8cc   : > { %v2013_v51 = vsel %vm13109_vm6, %v2012_v9, %v2011_v24  ;;  %vm13124_vm6 = vmmov %vm13116_vm10 }
 0x8cd   : > { %v2015_v10 = vsel %vm13110_vm12, %v2013_v51, -inf  ;;  %vm13125_vm12 = vmmov %vm13117_vm2 }
 0x8ce   : > { %2016 = vmax.xlane.f32.xlu2 %v2015_v10  ;;  %2268 = vrot.lane.b32.xlu0 %v9042_v49, %s7539_s20 }
 0x92d   : > { %v2395_v42 = vpop.xlane.xlu0 %2394 }
 0x92e   : > { %v2397_v58 = vrot.slane %v2395_v42, 1  ;;  %v2398_v56 = vrot.slane %v2395_v42, 2  ;;  %v2399_v18 = vrot.slane %v2395_v42, 3  ;;  %v2400_v16 = vrot.slane %v2395_v42, 4 }
 0x92f   : > { %v2401_v61 = vrot.slane %v2395_v42, 5  ;;  %v2412_v32 = vsub.f32 %v9067_v46, %v2395_v42  ;;  %v2402_v19 = vrot.slane %v2395_v42, 6  ;;  %v2403_v1 = vrot.slane %v2395_v42, 7 }
 0x930   : > { %v2413_v23 = vsub.f32 %v9055_v52, %v2397_v58  ;;  %v2414_v22 = vsub.f32 %v9058_v15, %v2398_v56  ;;  %v2415_v55 = vsub.f32 %v9061_v4, %v2399_v18  ;;  %v2416_v63 = vsub.f32 %v9064_v38, %v2400_v16 }
 0x931   : > { %v2420_v33 = vmul.f32 1.442695, %v2412_v32  ;;  %v2417_v20 = vsub.f32 %v9070_v45, %v2401_v61  ;;  %v2418_v41 = vsub.f32 %v9075_v44, %v2402_v19  ;;  %v2419_v46 = vsub.f32 %v9078_v62, %v2403_v1 }
 0x932   : > { %v2422_v54 = vmul.f32 1.442695, %v2413_v23  ;;  %v2424_v39 = vmul.f32 1.442695, %v2414_v22  ;;  %v2426_v6 = vmul.f32 1.442695, %v2415_v55 }
 0x933   : > { %6924 = vpow2.f32 %v2420_v33  ;;  %v2428_v36 = vmul.f32 1.442695, %v2416_v63  ;;  %v2430_v52 = vmul.f32 1.442695, %v2417_v20  ;;  %v2432_v15 = vmul.f32 1.442695, %v2418_v41 }
 0x934   : > { %6926 = vpow2.f32 %v2422_v54  ;;  %v2434_v4 = vmul.f32 1.442695, %v2419_v46 }
 0x935   : > { %6928 = vpow2.f32 %v2424_v39 }
 0x936   : > { %6930 = vpow2.f32 %v2426_v6 }
 0x937   : > { %6932 = vpow2.f32 %v2428_v36 }
 0x938   : > { %6934 = vpow2.f32 %v2430_v52 }
 0x939   : > { %v9144_v38 = vpop.eup %6924  ;;  %6936 = vpow2.f32 %v2432_v15 }
 0x93a   : > { %v9146_v45 = vpop.eup %6926  ;;  %6938 = vpow2.f32 %v2434_v4 }
 0x93b   : > { %v9148_v44 = vpop.eup %6928  ;;  %v2444_v62 = vrot.slane %v9146_v45, 7 }
 0x93c   : > { %v9151_v9 = vpop.eup %6930  ;;  %v2446_v24 = vrot.slane %v9148_v44, 6 }
 0x93d   : > { %v9154_v51 = vpop.eup %6932  ;;  %v2445_v10 = vsel %vm13111_vm14, %v2444_v62, %v9144_v38  ;;  %v2448_v42 = vrot.slane %v9151_v9, 5  ;;  %vm13126_vm14 = vmmov %vm13118_vm9 }
 0x93e   : > { %v9159_v58 = vpop.eup %6934  ;;  %v2447_v56 = vsel %vm13112_vm4, %v2446_v24, %v2445_v10  ;;  %v2450_v18 = vrot.slane %v9154_v51, 4 }
 0x93f   : > { %v9163_v16 = vpop.eup %6936  ;;  %v2449_v61 = vsel %vm13113_vm8, %v2448_v42, %v2447_v56  ;;  %v2452_v32 = vrot.slane %v9159_v58, 3 }
 0x940   : > { %v9167_v19 = vpop.eup %6938  ;;  %v2451_v1 = vsel %vm13114_vm11, %v2450_v18, %v2449_v61  ;;  %v2454_v55 = vrot.slane %v9163_v16, 2 }
 0x941   : > { %v2017_v23 = vpop.xlane.xlu2 %2016  ;;  %v2453_v22 = vsel %vm13115_vm5, %v2452_v32, %v2451_v1  ;;  %v2456_v63 = vrot.slane %v9167_v19, 1 }
 0x942   : > { %v2019_v33 = vrot.slane %v2017_v23, 1  ;;  %v2020_v20 = vrot.slane %v2017_v23, 2  ;;  %v2021_v41 = vrot.slane %v2017_v23, 3  ;;  %v2022_v54 = vrot.slane %v2017_v23, 4 }
 0x943   : > { %v2023_v39 = vrot.slane %v2017_v23, 5  ;;  %v2034_v6 = vsub.f32 %v9107_v3, %v2017_v23  ;;  %v2455_v46 = vsel %vm13116_vm10, %v2454_v55, %v2453_v22  ;;  %v2024_v36 = vrot.slane %v2017_v23, 6 }
 0x944   : > { %v2035_v52 = vsub.f32 %v9095_v43, %v2019_v33  ;;  %v2036_v15 = vsub.f32 %v9098_v8, %v2020_v20  ;;  %v2037_v4 = vsub.f32 %v9101_v37, %v2021_v41  ;;  %v2457_v62 = vsel %vm13117_vm2, %v2456_v63, %v2455_v46 }
 0x945   : > { %v2042_v24 = vmul.f32 1.442695, %v2034_v6  ;;  %v2459_v10 = vsel %vm13118_vm9, %v2457_v62, 0.0  ;;  %v2025_v42 = vrot.slane %v2017_v23, 7  ;;  %v2038_v56 = vsub.f32 %v9104_v53, %v2022_v54 }
 0x946   : > { %v2044_v18 = vmul.f32 1.442695, %v2035_v52  ;;  %v2046_v61 = vmul.f32 1.442695, %v2036_v15  ;;  %v2048_v3 = vmul.f32 1.442695, %v2037_v4  ;;  %2460 = vadd.xlane.f32.xlu2 %v2459_v10  ;;  %v2039_v32 = vsub.f32 %v9110_v59, %v2023_v39 }
 0x947   : > { %6940 = vpow2.f32 %v2042_v24  ;;  %v2040_v43 = vsub.f32 %v9115_v40, %v2024_v36  ;;  %v2041_v8 = vsub.f32 %v9118_v57, %v2025_v42  ;;  %v2050_v37 = vmul.f32 1.442695, %v2038_v56 }
 0x948   : > { %6942 = vpow2.f32 %v2044_v18  ;;  %v2052_v1 = vmul.f32 1.442695, %v2039_v32 }
 0x949   : > { %6944 = vpow2.f32 %v2046_v61  ;;  %v2054_v22 = vmul.f32 1.442695, %v2040_v43  ;;  %v2056_v23 = vmul.f32 1.442695, %v2041_v8  ;;  %v9231_v8 = vld [vmem:[%s7614_s18 + $0x40] sm:$0xff] }
 0x94a   : > { %6946 = vpow2.f32 %v2048_v3 }
 0x94b   : > { %6948 = vpow2.f32 %v2050_v37 }
 0x94c   : > { %6950 = vpow2.f32 %v2052_v1  ;;  %v9235_v1 = vld [vmem:[%s7614_s18 + $0x48] sm:$0xff] }
 0x94d   : > { %v9184_v53 = vpop.eup %6940  ;;  %6952 = vpow2.f32 %v2054_v22 }
 0x94e   : > { %v9186_v55 = vpop.eup %6942  ;;  %6954 = vpow2.f32 %v2056_v23  ;;  %v9240_v23 = vld [vmem:[%s7614_s18 + $0x50] sm:$0xff] }
 0x94f   : > { %v9188_v59 = vpop.eup %6944  ;;  %v2066_v40 = vrot.slane %v9186_v55, 7 }
 0x950   : > { %v9191_v57 = vpop.eup %6946  ;;  %v2068_v63 = vrot.slane %v9188_v59, 6 }
 0x951   : > { %v9194_v33 = vpop.eup %6948  ;;  %v2067_v20 = vsel %vm13119_vm13, %v2066_v40, %v9184_v53  ;;  %v2070_v41 = vrot.slane %v9191_v57, 5 }
 0x952   : > { %v9199_v54 = vpop.eup %6950  ;;  %v2069_v39 = vsel %vm13120_vm1, %v2068_v63, %v2067_v20  ;;  %v2072_v6 = vrot.slane %v9194_v33, 4  ;;  %v9244_v63 = vld [vmem:[%s7614_s18 + $0x58] sm:$0xff] }
 0x953   : > { %v9203_v46 = vpop.eup %6952  ;;  %v2071_v36 = vsel %vm13121_vm0, %v2070_v41, %v2069_v39  ;;  %v2074_v52 = vrot.slane %v9199_v54, 3  ;;  %v9252_v39 = vld [vmem:[%s7614_s18 + $0x60] sm:$0xff] }
 0x954   : > { %v9207_v15 = vpop.eup %6954  ;;  %v2073_v4 = vsel %vm13122_vm3, %v2072_v6, %v2071_v36  ;;  %v2076_v62 = vrot.slane %v9203_v46, 2  ;;  %v9256_v36 = vld [vmem:[%s7614_s18 + $0x68] sm:$0xff] }
 0x955   : > { %v2075_v24 = vsel %vm13123_vm15, %v2074_v52, %v2073_v4  ;;  %v2078_v10 = vrot.slane %v9207_v15, 1 }
 0x956   : > { %v2077_v42 = vsel %vm13124_vm6, %v2076_v62, %v2075_v24 }
 0x957   : > { %v2079_v56 = vsel %vm13125_vm12, %v2078_v10, %v2077_v42 }
 0x958   : > { %v2081_v18 = vsel %vm13126_vm14, %v2079_v56, 0.0 }
 0x959   : > { %2082 = vadd.xlane.f32.xlu1 %v2081_v18 }
 0x972   : > { %2646 = vrot.lane.b32.xlu1 %v9044_v12, %s7539_s20 }
 0x9b9   : > { %v9218_v61 = vpop.xlane.xlu2 %2460 }
 0x9ba   : > { %6956 = vrcp.f32 %v9218_v61  ;;  %v9222_v3 = vrot.slane %v9218_v61, 1  ;;  %v9225_v32 = vrot.slane %v9218_v61, 2  ;;  %v9228_v43 = vrot.slane %v9218_v61, 3 }
 0x9bb   : > { %v9248_v41 = vrot.slane %v9218_v61, 4  ;;  %v9260_v4 = vrot.slane %v9218_v61, 5  ;;  %v2489_v62 = vand.u32 2147483648, %v9218_v61  ;;  %v9264_v24 = vrot.slane %v9218_v61, 6 }
 0x9bc   : > { %6958 = vrcp.f32 %v9222_v3  ;;  %v2487_v10 = vand.u32 2147483647, %v9218_v61  ;;  %v2504_v42 = vand.u32 2147483648, %v9222_v3  ;;  %v9272_v18 = vrot.slane %v9218_v61, 7 }
 0x9bd   : > { %6960 = vrcp.f32 %v9225_v32  ;;  %v2502_v52 = vand.u32 2147483647, %v9222_v3  ;;  %v2517_v6 = vand.u32 2147483647, %v9225_v32  ;;  %v2519_v20 = vand.u32 2147483648, %v9225_v32 }
 0x9be   : > { %6962 = vrcp.f32 %v9228_v43  ;;  %vm2483_vm4 = vweird.f32 %v9218_v61  ;;  %v2534_v40 = vand.u32 2147483648, %v9228_v43  ;;  %v2490_v29 = vor.u32 1.1754944e-38, %v2489_v62 }
 0x9bf   : > { %6964 = vrcp.f32 %v9248_v41  ;;  %vm2498_vm8 = vweird.f32 %v9222_v3  ;;  %vm2513_vm11 = vweird.f32 %v9225_v32  ;;  %v2532_v12 = vand.u32 2147483647, %v9228_v43 }
 0x9c0   : > { %v9269_v56 = vpop.eup %6956  ;;  %v2505_v2 = vor.u32 1.1754944e-38, %v2504_v42  ;;  %vm9290_vm10 = vcmp.eq.f32.partialorder %v2487_v10, 8.507059e+37  ;;  %vm9294_vm2 = vcmp.eq.f32.partialorder %v2502_v52, 8.507059e+37  ;;  %vm9299_vm9 = vcmp.eq.f32.partialorder %v2517_v6, 8.507059e+37 }
 0x9c1   : > { %v2479_v37 = vmul.f32 %v9269_v56, %v9218_v61  ;;  %vm2484_vm5 = vweird.f32 %v9269_v56  ;;  %vm2528_vm13 = vweird.f32 %v9228_v43  ;;  %v2547_v47 = vand.u32 2147483647, %v9248_v41 }
 0x9c2   : > { %v9282_v22 = vpop.eup %6958  ;;  %6966 = vrcp.f32 %v9260_v4  ;;  %v2535_v21 = vor.u32 1.1754944e-38, %v2534_v40  ;;  %v2549_v31 = vand.u32 2147483648, %v9248_v41  ;;  %vm9310_vm0 = vcmp.eq.f32.partialorder %v2532_v12, 8.507059e+37  ;;  %vm9328_vm12 = vmor %vm2483_vm4, %vm2484_vm5 }
 0x9c3   : > { %v6961_v49 = vpop.eup %6960  ;;  %v2480_v7 = vsub.f32 1.0, %v2479_v37  ;;  %v2494_v50 = vmul.f32 %v9282_v22, %v9222_v3  ;;  %v2520_v37 = vor.u32 1.1754944e-38, %v2519_v20  ;;  %vm2499_vm1 = vweird.f32 %v9282_v22 }
 0x9c4   : > { %v2509_v35 = vmul.f32 %v6961_v49, %v9225_v32  ;;  %v6963_v10 = vpop.eup %6962  ;;  %vm2543_vm3 = vweird.f32 %v9248_v41  ;;  %vm2514_vm15 = vweird.f32 %v6961_v49  ;;  %6968 = vrcp.f32 %v9264_v24  ;;  %vm9341_vm7 = vmor %vm2498_vm8, %vm2499_vm1 }
 0x9c5   : > { %v2481_v42 = vmul.f32 %v9269_v56, %v2480_v7  ;;  %v2495_v52 = vsub.f32 1.0, %v2494_v50  ;;  %v2524_v60 = vmul.f32 %v6963_v10, %v9228_v43  ;;  %v6965_v0 = vpop.eup %6964  ;;  %vm9319_vm6 = vcmp.eq.f32.partialorder %v2547_v47, 8.507059e+37  ;;  %vm2515_vm4 = vmor %vm2513_vm11, %vm2514_vm15 }
 0x9c6   : > { %v2510_v6 = vsub.f32 1.0, %v2509_v35  ;;  %v2539_v35 = vmul.f32 %v6965_v0, %v9248_v41  ;;  %v2562_v12 = vand.u32 2147483647, %v9260_v4  ;;  %vm2529_vm14 = vweird.f32 %v6963_v10 }
 0x9c7   : > { %v2482_v17 = vadd.f32 %v9269_v56, %v2481_v42  ;;  %v2496_v7 = vmul.f32 %v9282_v22, %v2495_v52  ;;  %v2525_v40 = vsub.f32 1.0, %v2524_v60  ;;  %v2550_v60 = vor.u32 1.1754944e-38, %v2549_v31 }
 0x9c8   : > { %v2511_v50 = vmul.f32 %v6961_v49, %v2510_v6  ;;  %v2564_v6 = vand.u32 2147483648, %v9260_v4  ;;  %v6967_v47 = vpop.eup %6966  ;;  %vm2544_vm5 = vweird.f32 %v6965_v0  ;;  %vm9355_vm8 = vcmp.eq.f32.partialorder %v2562_v12, 8.507059e+37 }
 0x9c9   : > { %v2497_v52 = vadd.f32 %v9282_v22, %v2496_v7  ;;  %v2486_v25 = vsel %vm9328_vm12, %v9269_v56, %v2482_v17  ;;  %v2526_v27 = vmul.f32 %v6963_v10, %v2525_v40  ;;  %v2540_v7 = vsub.f32 1.0, %v2539_v35 }
 0x9ca   : > { %v2512_v26 = vadd.f32 %v6961_v49, %v2511_v50  ;;  %v2554_v17 = vmul.f32 %v6967_v47, %v9260_v4  ;;  %vm2558_vm12 = vweird.f32 %v9260_v4  ;;  %v6969_v35 = vpop.eup %6968  ;;  %vm2559_vm11 = vweird.f32 %v6967_v47 }
 0x9cb   : > { %v2501_v31 = vsel %vm9341_vm7, %v9282_v22, %v2497_v52  ;;  %v2527_v42 = vadd.f32 %v6963_v10, %v2526_v27  ;;  %v2541_v50 = vmul.f32 %v6965_v0, %v2540_v7  ;;  %v2491_v22 = vsel %vm9290_vm10, %v2490_v29, %v2486_v25  ;;  %vm2530_vm7 = vmor %vm2528_vm13, %vm2529_vm14 }
 0x9cc   : > { %v9353_v3 = vpop.xlane.xlu1 %2082  ;;  %v2516_v56 = vsel %vm2515_vm4, %v6961_v49, %v2512_v26  ;;  %v2506_v32 = vsel %vm9294_vm2, %v2505_v2, %v2501_v31  ;;  %v2565_v49 = vor.u32 1.1754944e-38, %v2564_v6  ;;  %v2555_v12 = vsub.f32 1.0, %v2554_v17  ;;  %vm2545_vm10 = vmor %vm2543_vm3, %vm2544_vm5 }
 0x9cd   : > { %v2521_v52 = vsel %vm9299_vm9, %v2520_v37, %v2516_v56  ;;  %v2531_v27 = vsel %vm2530_vm7, %v6963_v10, %v2527_v42  ;;  %v2542_v26 = vadd.f32 %v6965_v0, %v2541_v50  ;;  %v9369_v61 = vrot.slane %v9353_v3, 1  ;;  %vm2560_vm2 = vmor %vm2558_vm12, %vm2559_vm11 }
 0x9ce   : > { %6970 = vrcp.f32 %v9353_v3  ;;  %v2536_v29 = vsel %vm9310_vm0, %v2535_v21, %v2531_v27  ;;  %v2569_v30 = vmul.f32 %v6969_v35, %v9264_v24  ;;  %v2507_v13 = vmul.f32 %v9146_v45, %v2506_v32  ;;  %v7435_v27 = vld [vmem:[%s7614_s18 + $0x70] sm:$0xff] }
 0x9cf   : > { %v2522_v2 = vmul.f32 %v9148_v44, %v2521_v52  ;;  %v2546_v25 = vsel %vm2545_vm10, %v6965_v0, %v2542_v26  ;;  %v2556_v43 = vmul.f32 %v6967_v47, %v2555_v12  ;;  %v2577_v10 = vand.u32 2147483647, %v9264_v24 }
 0x9d0   : > { %v2551_v62 = vsel %vm9319_vm6, %v2550_v60, %v2546_v25  ;;  %v2570_v37 = vsub.f32 1.0, %v2569_v30  ;;  %v2579_v21 = vand.u32 2147483648, %v9264_v24  ;;  %v2492_v20 = vmul.f32 %v9144_v38, %v2491_v22 }
 0x9d1   : > { %v2537_v41 = vmul.f32 %v9151_v9, %v2536_v29  ;;  %v2557_v6 = vadd.f32 %v6967_v47, %v2556_v43  ;;  %6972 = vrcp.f32 %v9272_v18  ;;  %v2552_v0 = vmul.f32 %v9154_v51, %v2551_v62 }
 0x9d2   : > { %6974 = vrcp.f32 %v9369_v61  ;;  %v2571_v48 = vmul.f32 %v6969_v35, %v2570_v37  ;;  %vm2574_vm9 = vweird.f32 %v6969_v35  ;;  %vm2573_vm13 = vweird.f32 %v9264_v24 }
 0x9d3   : > { %v2561_v45 = vsel %vm2560_vm2, %v6967_v47, %v2557_v6  ;;  %vm9393_vm1 = vcmp.eq.f32.partialorder %v2577_v10, 8.507059e+37  ;;  %v13145_v44 = vrot.slane %v9235_v1, 2  ;;  %v2580_v7 = vor.u32 1.1754944e-38, %v2579_v21  ;;  %vm2575_vm0 = vmor %vm2573_vm13, %vm2574_vm9 }
 0x9d4   : > { %v9399_v60 = vpop.eup %6970  ;;  %v2566_v51 = vsel %vm9355_vm8, %v2565_v49, %v2561_v45  ;;  %v2572_v4 = vadd.f32 %v6969_v35, %v2571_v48  ;;  %v13146_v31 = vrot.slane %v9240_v23, 2  ;;  %v2592_v17 = vand.u32 2147483647, %v9272_v18 }
 0x9d5   : > { %v2615_v9 = vmul.f32 %v13145_v44, %v2507_v13  ;;  %v2567_v24 = vmul.f32 %v9159_v58, %v2566_v51  ;;  %v13147_v56 = vrot.slane %v9231_v8, 2  ;;  %v13148_v42 = vrot.slane %v9244_v63, 2 }
 0x9d6   : > { %v2616_v47 = vmul.f32 %v13146_v31, %v2522_v2  ;;  %v2576_v22 = vsel %vm2575_vm0, %v6969_v35, %v2572_v4  ;;  %v13149_v40 = vrot.slane %v9252_v39, 2  ;;  %v2604_v26 = vrot.slane %v7435_v27, 2  ;;  %v7436_v2 = vld [vmem:[%s7614_s18 + $0x78] sm:$0xff] }
 0x9d7   : > { %v2614_v1 = vmul.f32 %v13147_v56, %v2492_v20  ;;  %v2617_v50 = vmul.f32 %v13148_v42, %v2537_v41  ;;  %v2630_v52 = vrot.slane %v2615_v9, 7  ;;  %v6973_v23 = vpop.eup %6972  ;;  %v2581_v58 = vsel %vm9393_vm1, %v2580_v7, %v2576_v22 }
 0x9d8   : > { %v2618_v32 = vmul.f32 %v13149_v40, %v2552_v0  ;;  %v2632_v49 = vrot.slane %v2616_v47, 6  ;;  %v2594_v12 = vand.u32 2147483648, %v9272_v18  ;;  %v13150_v8 = vrot.slane %v9256_v36, 2  ;;  %v9419_v63 = vpop.eup %6974 }
 0x9d9   : > { %v2582_v35 = vmul.f32 %v9163_v16, %v2581_v58  ;;  %v2584_v39 = vmul.f32 %v6973_v23, %v9272_v18  ;;  %vm13151_vm3 = vcmask 1041409   ;;  %v2634_v13 = vrot.slane %v2617_v50, 5 }
 0x9da   : > { %v2619_v29 = vmul.f32 %v13150_v8, %v2567_v24  ;;  %v2631_v30 = vsel %vm13151_vm3, %v2630_v52, %v2614_v1  ;;  %v2605_v25 = vrot.slane %v7436_v2, 2  ;;  %vm2588_vm15 = vweird.f32 %v9272_v18 }
 0x9db   : > { %vm13152_vm6 = vcmask 1042434   ;;  %v2585_v62 = vsub.f32 1.0, %v2584_v39  ;;  %vm9427_vm14 = vcmp.eq.f32.partialorder %v2592_v17, 8.507059e+37  ;;  %vm13155_vm4 = vcmask 1043459  }
 0x9dc   : > { %v2633_v43 = vsel %vm13152_vm6, %v2632_v49, %v2631_v30  ;;  %v2636_v10 = vrot.slane %v2618_v32, 4  ;;  %vm2589_vm5 = vweird.f32 %v6973_v23  ;;  %v2595_v16 = vor.u32 1.1754944e-38, %v2594_v12 }
 0x9dd   : > { %v2635_v36 = vsel %vm13155_vm4, %v2634_v13, %v2633_v43  ;;  %v9433_v21 = vrot.slane %v9353_v3, 2  ;;  %v2101_v20 = vmul.f32 %v9399_v60, %v9353_v3  ;;  %v2586_v41 = vmul.f32 %v6973_v23, %v2585_v62  ;;  %vm2590_vm8 = vmor %vm2588_vm15, %vm2589_vm5 }
 0x9de   : > { %v2620_v6 = vmul.f32 %v2604_v26, %v2582_v35  ;;  %vm13156_vm12 = vcmask 1044484   ;;  %v2638_v48 = vrot.slane %v2619_v29, 3  ;;  %v9439_v45 = vrot.slane %v9353_v3, 3 }
 0x9df   : > { %v2637_v0 = vsel %vm13156_vm12, %v2636_v10, %v2635_v36  ;;  %v9442_v38 = vrot.slane %v9353_v3, 4  ;;  %v9445_v44 = vrot.slane %v9353_v3, 5  ;;  %v2102_v9 = vsub.f32 1.0, %v2101_v20 }
 0x9e0   : > { %v2587_v51 = vadd.f32 %v6973_v23, %v2586_v41  ;;  %v9448_v4 = vrot.slane %v9353_v3, 6  ;;  %v2111_v7 = vand.u32 2147483648, %v9353_v3  ;;  %v2116_v31 = vmul.f32 %v9419_v63, %v9369_v61 }
 0x9e1   : > { %vm13157_vm7 = vcmask 1045509   ;;  %v2103_v24 = vmul.f32 %v9399_v60, %v2102_v9  ;;  %vm2106_vm11 = vweird.f32 %v9399_v60  ;;  %v2109_v17 = vand.u32 2147483647, %v9353_v3  ;;  %v9521_v9 = vld [vmem:[%s12744_s5 + $0x28] sm:$0xff] }
 0x9e2   : > { %v2639_v47 = vsel %vm13157_vm7, %v2638_v48, %v2637_v0  ;;  %v2591_v56 = vsel %vm2590_vm8, %v6973_v23, %v2587_v51  ;;  %v2640_v1 = vrot.slane %v2620_v6, 2  ;;  %vm2105_vm10 = vweird.f32 %v9353_v3 }
 0x9e3   : > { %v2117_v42 = vsub.f32 1.0, %v2116_v31  ;;  %v2596_v50 = vsel %vm9427_vm14, %v2595_v16, %v2591_v56  ;;  %v2104_v22 = vadd.f32 %v9399_v60, %v2103_v24  ;;  %v2126_v18 = vand.u32 2147483648, %v9369_v61  ;;  %vm2107_vm2 = vmor %vm2105_vm10, %vm2106_vm11 }
 0x9e4   : > { %6976 = vrcp.f32 %v9433_v21  ;;  %v2597_v40 = vmul.f32 %v9167_v19, %v2596_v50  ;;  %v2112_v32 = vor.u32 1.1754944e-38, %v2111_v7  ;;  %vm2121_vm9 = vweird.f32 %v9419_v63  ;;  %v2647_v35 = vpop.permute.xlu1 %2646 }
 0x9e5   : > { %v2118_v52 = vmul.f32 %v9419_v63, %v2117_v42  ;;  %v2108_v49 = vsel %vm2107_vm2, %v9399_v60, %v2104_v22  ;;  %vm2110_vm13 = vcmp.eq.f32.partialorder %v2109_v17, 8.507059e+37  ;;  %v2124_v23 = vand.u32 2147483647, %v9369_v61 }
 0x9e6   : > { %6978 = vrcp.f32 %v9439_v45  ;;  %v2621_v27 = vmul.f32 %v2605_v25, %v2597_v40  ;;  %v2113_v26 = vsel %vm2110_vm13, %v2112_v32, %v2108_v49  ;;  %vm2120_vm1 = vweird.f32 %v9369_v61 }
 0x9e7   : > { %v2119_v58 = vadd.f32 %v9419_v63, %v2118_v52  ;;  %vm13158_vm0 = vcmask 1046534   ;;  %vm9475_vm3 = vmor %vm2120_vm1, %vm2121_vm9  ;;  %v2127_v8 = vor.u32 1.1754944e-38, %v2126_v18  ;;  %v2139_v60 = vand.u32 2147483647, %v9433_v21  ;;  %v9550_v52 = vld [vmem:[%s12744_s5 + $0x18] sm:$0xff] }
 0x9e8   : > { %v2641_v19 = vsel %vm13158_vm0, %v2640_v1, %v2639_v47  ;;  %v2141_v29 = vand.u32 2147483648, %v9433_v21  ;;  %v2642_v39 = vrot.slane %v2621_v27, 1  ;;  %v2154_v13 = vand.u32 2147483647, %v9439_v45  ;;  %v9538_v1 = vld [vmem:[%s12744_s5 + $0x20] sm:$0xff] }
 0x9e9   : > { %v2123_v30 = vsel %vm9475_vm3, %v9419_v63, %v2119_v58  ;;  %6980 = vrcp.f32 %v9442_v38  ;;  %v9487_v2 = vrot.slane %v9353_v3, 7  ;;  %v9490_v25 = vmul.f32 %v9184_v53, %v2113_v26 }
 0x9ea   : > { %v6977_v61 = vpop.eup %6976  ;;  %vm2125_vm15 = vcmp.eq.f32.partialorder %v2124_v23, 8.507059e+37  ;;  %vm2135_vm6 = vweird.f32 %v9433_v21  ;;  %vm13161_vm14 = vcmask 1047559   ;;  %vm2150_vm4 = vweird.f32 %v9439_v45 }
 0x9eb   : > { %v9494_v43 = vsel %vm13161_vm14, %v2642_v39, %v2641_v19  ;;  %v2128_v62 = vsel %vm2125_vm15, %v2127_v8, %v2123_v30  ;;  %v2131_v63 = vmul.f32 %v6977_v61, %v9433_v21  ;;  %v2156_v37 = vand.u32 2147483648, %v9439_v45  ;;  %v9573_v8 = vld [vmem:[%s12744_s5 + $0x10] sm:$0xff] }
 0x9ec   : > { %13162 = vst [vmem:[#allocation28_spill] sm:$0xff] %v9494_v43  ;;  %v6979_v36 = vpop.eup %6978  ;;  %vm13163_vm5 = vcmask 130048   ;;  %vm9501_vm12 = vcmp.eq.f32.partialorder %v2139_v60, 8.507059e+37  ;;  %v2142_v10 = vor.u32 1.1754944e-38, %v2141_v29  ;;  %v2169_v16 = vand.u32 2147483647, %v9442_v38 }
 0x9ed   : > { %v2649_v3 = vsel %vm13163_vm5, %v9494_v43, %v2647_v35  ;;  %vm13166_vm8 = vcmask 392192   ;;  %v2132_v20 = vsub.f32 1.0, %v2131_v63  ;;  %v2146_v41 = vmul.f32 %v6979_v36, %v9439_v45  ;;  %v9589_v63 = vld [vmem:[%s12744_s5 + $0x8] sm:$0xff] }
 0x9ee   : > { %6718 = vmatmul.msk.f32.vlgmr.msrb.gmra.mxu1 %vm13166_vm8, %v2649_v3  ;;  %vm9508_vm7 = vcmp.eq.f32.partialorder %v2154_v13, 8.507059e+37  ;;  %6982 = vrcp.f32 %v9445_v44  ;;  %v9514_v0 = vmul.f32 %v9186_v55, %v2128_v62  ;;  %vm2136_vm11 = vweird.f32 %v6977_v61 }
 0x9ef   : > { %vm2165_vm10 = vweird.f32 %v9442_v38  ;;  %v2171_v48 = vand.u32 2147483648, %v9442_v38  ;;  %5687 = vmatpush.msrb.mxu1 %v9521_v9  ;;  %v9524_v51 = vpop.eup %6980  ;;  %v2133_v7 = vmul.f32 %v6977_v61, %v2132_v20  ;;  %v2147_v31 = vsub.f32 1.0, %v2146_v41  ;;  %vm2137_vm13 = vmor %vm2135_vm6, %vm2136_vm11  ;;  %v9603_v20 = vld [vmem:[%s7614_s18] sm:$0xff] }
 0x9f0   : > { %v2157_v47 = vor.u32 1.1754944e-38, %v2156_v37  ;;  %6984 = vrcp.f32 %v9448_v4  ;;  %v2161_v55 = vmul.f32 %v9524_v51, %v9442_v38  ;;  %vm9529_vm2 = vcmp.eq.f32.partialorder %v2169_v16, 8.507059e+37  ;;  %v9609_v38 = vld [vmem:[%s12744_s5] sm:$0xff] }
 0x9f1   : > { %v2184_v17 = vand.u32 2147483647, %v9445_v44  ;;  %v2186_v56 = vand.u32 2147483648, %v9445_v44  ;;  %5688 = vmatpush.msrb.mxu1 %v9538_v1  ;;  %v2134_v42 = vadd.f32 %v6977_v61, %v2133_v7  ;;  %v2148_v50 = vmul.f32 %v6979_v36, %v2147_v31  ;;  %v9620_v7 = vld [vmem:[%s7614_s18 + $0x10] sm:$0xff] }
 0x9f2   : > { %vm2151_vm9 = vweird.f32 %v6979_v36  ;;  %v2201_v22 = vand.u32 2147483648, %v9448_v4  ;;  %v2162_v18 = vsub.f32 1.0, %v2161_v55  ;;  %v2172_v40 = vor.u32 1.1754944e-38, %v2171_v48  ;;  %v9616_v48 = vld [vmem:[%s7614_s18 + $0x8] sm:$0xff] }
 0x9f3   : > { %v2199_v32 = vand.u32 2147483647, %v9448_v4  ;;  %6986 = vrcp.f32 %v9487_v2  ;;  %5689 = vmatpush.msrb.mxu1 %v9550_v52  ;;  %v2138_v23 = vsel %vm2137_vm13, %v6977_v61, %v2134_v42  ;;  %v2149_v27 = vadd.f32 %v6979_v36, %v2148_v50  ;;  %vm2152_vm3 = vmor %vm2150_vm4, %vm2151_vm9  ;;  %v9634_v50 = vld [vmem:[%s7614_s18 + $0x20] sm:$0xff] }
 0x9f4   : > { %v9553_v49 = vpop.eup %6982  ;;  %vm2166_vm1 = vweird.f32 %v9524_v51  ;;  %vm2180_vm0 = vweird.f32 %v9445_v44  ;;  %v2143_v21 = vsel %vm9501_vm12, %v2142_v10, %v2138_v23  ;;  %v2163_v26 = vmul.f32 %v9524_v51, %v2162_v18  ;;  %v9638_v18 = vld [vmem:[%s7614_s18 + $0x28] sm:$0xff]  ;;  %v9643_v23 = vld [vmem:[%s7614_s18 + $0x30] sm:$0xff] }
 0x9f5   : > { %v2176_v58 = vmul.f32 %v9553_v49, %v9445_v44  ;;  %vm9565_vm15 = vcmp.eq.f32.partialorder %v2184_v17, 8.507059e+37  ;;  %v2187_v12 = vor.u32 1.1754944e-38, %v2186_v56  ;;  %vm2195_vm6 = vweird.f32 %v9448_v4  ;;  %5690 = vmatpush.msrb.mxu1 %v9573_v8  ;;  %vm2167_vm5 = vmor %vm2165_vm10, %vm2166_vm1  ;;  %v9626_v56 = vld [vmem:[%s7614_s18 + $0x18] sm:$0xff] }
 0x9f6   : > { %v6985_v45 = vpop.eup %6984  ;;  %v2153_v60 = vsel %vm2152_vm3, %v6979_v36, %v2149_v27  ;;  %vm2181_vm14 = vweird.f32 %v9553_v49  ;;  %v2202_v29 = vor.u32 1.1754944e-38, %v2201_v22  ;;  %v2214_v35 = vand.u32 2147483647, %v9487_v2 }
 0x9f7   : > { %v2158_v39 = vsel %vm9508_vm7, %v2157_v47, %v2153_v60  ;;  %v2164_v30 = vadd.f32 %v9524_v51, %v2163_v26  ;;  %v2177_v13 = vsub.f32 1.0, %v2176_v58  ;;  %v2191_v61 = vmul.f32 %v6985_v45, %v9448_v4  ;;  %5691 = vmatpush.msrb.mxu1 %v9589_v63  ;;  %vm2182_vm7 = vmor %vm2180_vm0, %vm2181_vm14 }
 0x9f8   : > { %vm9582_vm4 = vcmp.eq.f32.partialorder %v2199_v32, 8.507059e+37  ;;  %v2144_v37 = vmul.f32 %v9188_v59, %v2143_v21  ;;  %v2159_v36 = vmul.f32 %v9191_v57, %v2158_v39  ;;  %vm2196_vm12 = vweird.f32 %v6985_v45 }
 0x9f9   : > { %vm2210_vm8 = vweird.f32 %v9487_v2  ;;  %v2216_v3 = vand.u32 2147483648, %v9487_v2  ;;  %v6987_v53 = vpop.eup %6986  ;;  %v2168_v10 = vsel %vm2167_vm5, %v9524_v51, %v2164_v30  ;;  %v2178_v59 = vmul.f32 %v9553_v49, %v2177_v13  ;;  %5692 = vmatpush.msrb.mxu1 %v9609_v38  ;;  %vm2197_vm10 = vmor %vm2195_vm6, %vm2196_vm12 }
 0x9fa   : > { %v2192_v16 = vsub.f32 1.0, %v2191_v61  ;;  %v2220_v57 = vrot.slane %v9603_v20, 2  ;;  %v2173_v41 = vsel %vm9529_vm2, %v2172_v40, %v2168_v10  ;;  %v2206_v6 = vmul.f32 %v6987_v53, %v9487_v2 }
 0x9fb   : > { %v2221_v51 = vrot.slane %v9616_v48, 2  ;;  %v2222_v31 = vrot.slane %v9620_v7, 2  ;;  %v2174_v47 = vmul.f32 %v9194_v33, %v2173_v41  ;;  %v2179_v55 = vadd.f32 %v9553_v49, %v2178_v59 }
 0x9fc   : > { %v2193_v17 = vmul.f32 %v6985_v45, %v2192_v16  ;;  %v2223_v24 = vrot.slane %v9626_v56, 2  ;;  %v2207_v42 = vsub.f32 1.0, %v2206_v6  ;;  %vm2211_vm11 = vweird.f32 %v6987_v53 }
 0x9fd   : > { %v2224_v22 = vrot.slane %v9634_v50, 2  ;;  %v2225_v33 = vrot.slane %v9638_v18, 2  ;;  %v2183_v40 = vsel %vm2182_vm7, %v9553_v49, %v2179_v55  ;;  %v2226_v27 = vrot.slane %v9643_v23, 2  ;;  %vm2212_vm2 = vmor %vm2210_vm8, %vm2211_vm11 }
 0x9fe   : > { %v2194_v32 = vadd.f32 %v6985_v45, %v2193_v17  ;;  %v2236_v44 = vmul.f32 %v2220_v57, %v9490_v25  ;;  %v2188_v21 = vsel %vm9565_vm15, %v2187_v12, %v2183_v40  ;;  %v2208_v26 = vmul.f32 %v6987_v53, %v2207_v42 }
 0x9ff   : > { %v2237_v58 = vmul.f32 %v2221_v51, %v9514_v0  ;;  %v2238_v60 = vmul.f32 %v2222_v31, %v2144_v37  ;;  %v2189_v49 = vmul.f32 %v9199_v54, %v2188_v21  ;;  %v2239_v30 = vmul.f32 %v2223_v24, %v2159_v36  ;;  %v9661_v54 = vld [vmem:[%s7614_s18 + $0x38] sm:$0xff]  ;;  %v7451_v24 = vld [vmem:[%s12745_s6] ss:$0 sm:$0xff] }
 0xa00   : > { %v2198_v39 = vsel %vm2197_vm10, %v6985_v45, %v2194_v32  ;;  %v2240_v13 = vmul.f32 %v2224_v22, %v2174_v47  ;;  %v2209_v61 = vadd.f32 %v6987_v53, %v2208_v26  ;;  %vm2215_vm9 = vcmp.eq.f32.partialorder %v2214_v35, 8.507059e+37  ;;  %v2269_v47 = vpop.permute.xlu0 %2268 }
 0xa01   : > { %v2203_v25 = vsel %vm9582_vm4, %v2202_v29, %v2198_v39  ;;  %v2252_v19 = vrot.slane %v2237_v58, 7  ;;  %v2254_v12 = vrot.slane %v2238_v60, 6  ;;  %v2217_v4 = vor.u32 1.1754944e-38, %v2216_v3 }
 0xa02   : > { %v2204_v10 = vmul.f32 %v9203_v46, %v2203_v25  ;;  %v2241_v0 = vmul.f32 %v2225_v33, %v2189_v49  ;;  %v2213_v37 = vsel %vm2212_vm2, %v6987_v53, %v2209_v61  ;;  %v2227_v45 = vrot.slane %v9661_v54, 2 }
 0xa03   : > { %vm13175_vm13 = vcmask 1041409   ;;  %v2256_v29 = vrot.slane %v2239_v30, 5  ;;  %v2218_v36 = vsel %vm2215_vm9, %v2217_v4, %v2213_v37  ;;  %vm13176_vm1 = vcmask 1042434  }
 0xa04   : > { %v2253_v62 = vsel %vm13175_vm13, %v2252_v19, %v2236_v44  ;;  %v2242_v59 = vmul.f32 %v2226_v27, %v2204_v10  ;;  %v2258_v46 = vrot.slane %v2240_v13, 4  ;;  %v2219_v57 = vmul.f32 %v9207_v15, %v2218_v36 }
 0xa05   : > { %v2255_v16 = vsel %vm13176_vm1, %v2254_v12, %v2253_v62  ;;  %vm13177_vm0 = vcmask 1043459   ;;  %v2260_v35 = vrot.slane %v2241_v0, 3  ;;  %vm13178_vm3 = vcmask 1044484  }
 0xa06   : > { %v2257_v2 = vsel %vm13177_vm0, %v2256_v29, %v2255_v16  ;;  %v2262_v53 = vrot.slane %v2242_v59, 2  ;;  %v2243_v41 = vmul.f32 %v2227_v45, %v2219_v57  ;;  %vm13179_vm15 = vcmask 1045509  }
 0xa07   : > { %v2259_v3 = vsel %vm13178_vm3, %v2258_v46, %v2257_v2  ;;  %vm13180_vm6 = vcmask 1046534   ;;  %vm13181_vm14 = vcmask 1047559   ;;  %vm13183_vm4 = vcmask 130048  }
 0xa08   : > { %v2261_v6 = vsel %vm13179_vm15, %v2260_v35, %v2259_v3  ;;  %v2264_v31 = vrot.slane %v2243_v41, 1  ;;  %vm13184_vm5 = vcmask 392192   ;;  %vm13187_vm1 = vcmask 261120  }
 0xa09   : > { %v2263_v51 = vsel %vm13180_vm6, %v2262_v53, %v2261_v6  ;;  %vm13188_vm0 = vmmov %vm13187_vm1  ;;  %vm13196_vm3 = vcmask 1041409   ;;  %vm13197_vm15 = vcmask 1042434   ;;  %vm13198_vm6 = vcmask 1043459  }
 0xa0a   : > { %v9672_v55 = vsel %vm13181_vm14, %v2264_v31, %v2263_v51  ;;  %vm13202_vm14 = vcmask 1044484  }
 0xa0b   : > { %13182 = vst [vmem:[#allocation29_spill] sm:$0xff] %v9672_v55  ;;  %v2271_v17 = vsel %vm13183_vm4, %v9672_v55, %v2269_v47  ;;  %vm13205_vm4 = vcmask 1045509  }
 0xa0c   : > { %6716 = vmatmul.msk.f32.vlgmr.msrb.gmra.mxu0 %vm13184_vm5, %v2271_v17  ;;  %vm13207_vm5 = vcmask 1046534  }
 0xa0d   : > { %5309 = vmatpush.msrb.mxu0 %v9521_v9 }
 0xa0f   : > { %5310 = vmatpush.msrb.mxu0 %v9538_v1 }
 0xa11   : > { %5311 = vmatpush.msrb.mxu0 %v9550_v52 }
 0xa13   : > { %5312 = vmatpush.msrb.mxu0 %v9573_v8 }
 0xa15   : > { %5313 = vmatpush.msrb.mxu0 %v9589_v63 }
 0xa17   : > { %5314 = vmatpush.msrb.mxu0 %v9609_v38 }
 0xa6b   : > { %v2670_v15 = vpop.f32.mrf.mxu1 }
 0xa6c   : > { %v2671_v42 = vadd.f32 %v7451_v24, %v2670_v15 }
 0xa6e   : > { %6988 = vtanh.f32 %v2671_v42  ;;  %v6719_v8 = vmul.f32 -1.442695, %v2671_v42 }
 0xa74   : > { %v6989_v22 = vpop.eup %6988 }
 0xa75   : > { %2695 = vrot.lane.b32.xlu0 %v6989_v22, %s7536_s12 }
 0xa89   : > { %v2292_v9 = vpop.f32.mrf.mxu0 }
 0xa8a   : > { %v2293_v1 = vadd.f32 %v7451_v24, %v2292_v9 }
 0xa8c   : > { %6990 = vtanh.f32 %v2293_v1  ;;  %v6717_v63 = vmul.f32 -1.442695, %v2293_v1 }
 0xa8d   : > { %6992 = vpow2.f32 %v6719_v8 }
 0xa8e   : > { %6994 = vpow2.f32 %v6717_v63 }
 0xa92   : > { %v6991_v52 = vpop.eup %6990 }
 0xa93   : > { %2317 = vrot.lane.b32.xlu2 %v6991_v52, %s7536_s12  ;;  %v6993_v38 = vpop.eup %6992 }
 0xa94   : > { %v2676_v33 = vadd.f32 1.0, %v6993_v38  ;;  %v6995_v40 = vpop.eup %6994 }
 0xa95   : > { %v2298_v32 = vadd.f32 1.0, %v6995_v40 }
 0xa96   : > { %6996 = vrcp.f32 %v2676_v33  ;;  %v2688_v30 = vand.u32 2147483648, %v2676_v33  ;;  %vm2682_vm8 = vweird.f32 %v2676_v33  ;;  %v2686_v25 = vand.u32 2147483647, %v2676_v33 }
 0xa97   : > { %6998 = vrcp.f32 %v2298_v32  ;;  %v2310_v10 = vand.u32 2147483648, %v2298_v32  ;;  %vm2304_vm2 = vweird.f32 %v2298_v32  ;;  %v2308_v37 = vand.u32 2147483647, %v2298_v32 }
 0xa98   : > { %v2689_v19 = vor.u32 1.1754944e-38, %v2688_v30  ;;  %vm2687_vm10 = vcmp.eq.f32.partialorder %v2686_v25, 8.507059e+37  ;;  %v13190_v30 = vld [vmem:[#allocation14_spill] sm:$0xff]  ;;  %v13191_v25 = vld [vmem:[#allocation15_spill] sm:$0xff] }
 0xa99   : > { %v2311_v29 = vor.u32 1.1754944e-38, %v2310_v10  ;;  %vm2309_vm13 = vcmp.eq.f32.partialorder %v2308_v37, 8.507059e+37  ;;  %v13194_v37 = vld [vmem:[#allocation17_spill] sm:$0xff] }
 0xa9c   : > { %v6997_v27 = vpop.eup %6996 }
 0xa9d   : > { %v2678_v44 = vmul.f32 %v6997_v27, %v2676_v33  ;;  %v6999_v21 = vpop.eup %6998  ;;  %vm2683_vm12 = vweird.f32 %v6997_v27 }
 0xa9e   : > { %v2300_v58 = vmul.f32 %v6999_v21, %v2298_v32  ;;  %vm2684_vm7 = vmor %vm2682_vm8, %vm2683_vm12  ;;  %vm2305_vm11 = vweird.f32 %v6999_v21  ;;  %vm13209_vm12 = vcmask 1047559  }
 0xa9f   : > { %v2679_v26 = vsub.f32 1.0, %v2678_v44  ;;  %vm2306_vm9 = vmor %vm2304_vm2, %vm2305_vm11 }
 0xaa0   : > { %v2301_v49 = vsub.f32 1.0, %v2300_v58  ;;  %vm13211_vm8 = vmmov %vm13196_vm3 }
 0xaa1   : > { %v2680_v60 = vmul.f32 %v6997_v27, %v2679_v26  ;;  %vm13213_vm11 = vmmov %vm13197_vm15 }
 0xaa2   : > { %v2302_v13 = vmul.f32 %v6999_v21, %v2301_v49  ;;  %v13189_v49 = vld [vmem:[#allocation13_spill] sm:$0xff]  ;;  %vm13215_vm2 = vmmov %vm13202_vm14 }
 0xaa3   : > { %v2681_v39 = vadd.f32 %v6997_v27, %v2680_v60 }
 0xaa4   : > { %v2303_v12 = vadd.f32 %v6999_v21, %v2302_v13 }
 0xaa5   : > { %v2685_v61 = vsel %vm2684_vm7, %v6997_v27, %v2681_v39  ;;  %vm13212_vm7 = vcmask 130048  }
 0xaa6   : > { %v2690_v0 = vsel %vm2687_vm10, %v2689_v19, %v2685_v61  ;;  %v2307_v62 = vsel %vm2306_vm9, %v6999_v21, %v2303_v12  ;;  %v13192_v12 = vld [vmem:[#allocation11_spill] sm:$0xff]  ;;  %vm13214_vm10 = vmmov %vm13198_vm6 }
 0xaa7   : > { %v2312_v36 = vsel %vm2309_vm13, %v2311_v29, %v2307_v62  ;;  %v2693_v46 = vmul.f32 %v2690_v0, %v9027_v28  ;;  %v13195_v62 = vld [vmem:[#allocation18_spill] sm:$0xff]  ;;  %vm13216_vm9 = vmmov %vm13205_vm4 }
 0xaa8   : > { %v2315_v35 = vmul.f32 %v2312_v36, %v9032_v34  ;;  %vm13217_vm13 = vmmov %vm13207_vm5 }
 0xae7   : > { %v2696_v4 = vpop.permute.xlu0 %2695 }
 0xae8   : > { %v2698_v45 = vmul.f32 %v2696_v4, %v2690_v0  ;;  %v13193_v4 = vld [vmem:[#allocation16_spill] sm:$0xff] }
 0xaea   : > { %2700 = vrot.lane.b32.xlu0 %v2698_v45, %s7537_s13 }
 0xaed   : > { %v2318_v59 = vpop.permute.xlu2 %2317 }
 0xaee   : > { %v2320_v16 = vmul.f32 %v2318_v59, %v2312_v36 }
 0xaf0   : > { %2322 = vrot.lane.b32.xlu1 %v2320_v16, %s7537_s13 }
 0xb5c   : > { %v2701_v57 = vpop.permute.xlu0 %2700 }
 0xb5d   : > { %v9691_v2 = vadd.f32 %v2701_v57, %v2693_v46 }
 0xb5f   : > { %7000 = vtanh.f32 %v9691_v2  ;;  %v3089_v51 = vmul.f32 %v9691_v2, %v13073_v5 }
 0xb62   : > { %v2323_v3 = vpop.permute.xlu1 %2322 }
 0xb63   : > { %v9695_v53 = vadd.f32 %v2323_v3, %v2315_v35 }
 0xb65   : > { %v7001_v41 = vpop.eup %7000  ;;  %7002 = vtanh.f32 %v9695_v53  ;;  %v2711_v6 = vmul.f32 %v9695_v53, %v13073_v5 }
 0xb66   : > { %2706 = vrot.lane.b32.xlu1 %v7001_v41, %s7536_s12 }
 0xb67   : > { %2713 = vrot.lane.b32.xlu0 %v2711_v6, %s7536_s12 }
 0xb6b   : > { %v7003_v28 = vpop.eup %7002 }
 0xb6c   : > { %2328 = vrot.lane.b32.xlu2 %v7003_v28, %s7536_s12 }
 0xb74   : > { %3091 = vrot.lane.b32.xlu2 %v3089_v51, %s7536_s12 }
 0xbc6   : > { %v2329_v34 = vpop.permute.xlu2 %2328 }
 0xbc7   : > { %v9706_v31 = vmul.f32 %v2329_v34, %v2312_v36 }
 0xbc9   : > { %13185 = vst [vmem:[#allocation23_spill] sm:$0xff] %v9706_v31  ;;  %v2710_v47 = vmul.f32 %v9706_v31, %v13076_v11 }
 0xbce   : > { %v3092_v9 = vpop.permute.xlu2 %3091 }
 0xbd8   : > { %v2707_v17 = vpop.permute.xlu1 %2706 }
 0xbd9   : > { %v2714_v15 = vpop.permute.xlu0 %2713  ;;  %v9710_v24 = vmul.f32 %v2707_v17, %v2690_v0 }
 0xbda   : > { %v2716_v42 = vadd.f32 %v2714_v15, %v2710_v47 }
 0xbdb   : > { %13186 = vst [vmem:[#allocation30_spill] sm:$0xff] %v9710_v24  ;;  %v3088_v22 = vmul.f32 %v9710_v24, %v13076_v11 }
 0xbdc   : > { %2718 = vrot.lane.b32.xlu1 %v2716_v42, %s7537_s13 }
 0xbdd   : > { %v3094_v1 = vadd.f32 %v3092_v9, %v3088_v22  ;;  %v13199_v22 = vld [vmem:[#allocation4_spill] sm:$0xff] }
 0xbdf   : > { %3096 = vrot.lane.b32.xlu0 %v3094_v1, %s7537_s13  ;;  %v13200_v1 = vld [vmem:[#allocation5_spill] sm:$0xff] }
 0xc4e   : > { %v2719_v52 = vpop.permute.xlu1 %2718 }
 0xc4f   : > { %v2721_v8 = vsel %vm13187_vm1, %v2719_v52, 0.0  ;;  %vm13218_vm1 = vmmov %vm13209_vm12 }
 0xc50   : > { %2722 = vadd.xlane.f32.xlu2 %v2721_v8  ;;  %v13201_v8 = vld [vmem:[#allocation6_spill] sm:$0xff] }
 0xc51   : > { %v3097_v63 = vpop.permute.xlu0 %3096 }
 0xc52   : > { %v3099_v38 = vsel %vm13188_vm0, %v3097_v63, 0.0  ;;  %vm13219_vm0 = vmmov %vm13212_vm7 }
 0xc53   : > { %3100 = vadd.xlane.f32.xlu1 %v3099_v38 }
 0xcc3   : > { %v2723_v33 = vpop.xlane.xlu2 %2722 }
 0xcc4   : > { %v2725_v40 = vrot.slane %v2723_v33, 1  ;;  %v2726_v32 = vrot.slane %v2723_v33, 2  ;;  %v2727_v27 = vrot.slane %v2723_v33, 3  ;;  %v2728_v44 = vrot.slane %v2723_v33, 4 }
 0xcc5   : > { %v2729_v21 = vrot.slane %v2723_v33, 5  ;;  %v2730_v26 = vrot.slane %v2723_v33, 6  ;;  %v2731_v58 = vrot.slane %v2723_v33, 7  ;;  %v9731_v10 = vadd.f32 %v2723_v33, %v13192_v12 }
 0xcc6   : > { %v9719_v60 = vadd.f32 %v2725_v40, %v13095_v14  ;;  %v9722_v39 = vadd.f32 %v2726_v32, %v13189_v49  ;;  %v9725_v13 = vadd.f32 %v2727_v27, %v13190_v30  ;;  %v9728_v61 = vadd.f32 %v2728_v44, %v13191_v25  ;;  %v3101_v19 = vpop.xlane.xlu1 %3100  ;;  %v13203_v40 = vld [vmem:[#allocation3_spill] sm:$0xff] }
 0xcc7   : > { %v9734_v0 = vadd.f32 %v2729_v21, %v13193_v4  ;;  %v9737_v45 = vadd.f32 %v2730_v26, %v13194_v37  ;;  %v9740_v29 = vadd.f32 %v2731_v58, %v13195_v62  ;;  %v3103_v16 = vrot.slane %v3101_v19, 1  ;;  %v13204_v27 = vld [vmem:[#allocation7_spill] sm:$0xff]  ;;  %v13206_v26 = vld [vmem:[#allocation8_spill] sm:$0xff] }
 0xcc8   : > { %v2756_v36 = vrot.slane %v9719_v60, 7  ;;  %v2758_v59 = vrot.slane %v9722_v39, 6  ;;  %v2760_v46 = vrot.slane %v9725_v13, 5  ;;  %v2762_v57 = vrot.slane %v9728_v61, 4 }
 0xcc9   : > { %v2764_v35 = vrot.slane %v9734_v0, 3  ;;  %v3104_v3 = vrot.slane %v3101_v19, 2  ;;  %v3105_v6 = vrot.slane %v3101_v19, 3  ;;  %v3106_v28 = vrot.slane %v3101_v19, 4 }
 0xcca   : > { %v2757_v41 = vsel %vm13196_vm3, %v2756_v36, %v9731_v10  ;;  %v3107_v51 = vrot.slane %v3101_v19, 5  ;;  %v2766_v47 = vrot.slane %v9737_v45, 2  ;;  %v3108_v17 = vrot.slane %v3101_v19, 6 }
 0xccb   : > { %v2759_v34 = vsel %vm13197_vm15, %v2758_v59, %v2757_v41  ;;  %v3109_v15 = vrot.slane %v3101_v19, 7  ;;  %v9753_v9 = vadd.f32 %v3103_v16, %v13199_v22  ;;  %v9756_v52 = vadd.f32 %v3104_v3, %v13200_v1  ;;  %v13210_v3 = vld [vmem:[#allocation10_spill] sm:$0xff]  ;;  %vm13220_vm15 = vmmov %vm13213_vm11 }
 0xccc   : > { %v2761_v42 = vsel %vm13198_vm6, %v2760_v46, %v2759_v34  ;;  %v9759_v63 = vadd.f32 %v3105_v6, %v13201_v8  ;;  %v2768_v33 = vrot.slane %v9740_v29, 1  ;;  %v9764_v32 = vadd.f32 %v3101_v19, %v13203_v40  ;;  %v13208_v46 = vld [vmem:[#allocation9_spill] sm:$0xff] }
 0xccd   : > { %v2763_v38 = vsel %vm13202_vm14, %v2762_v57, %v2761_v42  ;;  %v9767_v44 = vadd.f32 %v3106_v28, %v13204_v27  ;;  %v9771_v58 = vadd.f32 %v3107_v51, %v13206_v26  ;;  %v3134_v36 = vrot.slane %v9753_v9, 7  ;;  %vm13221_vm14 = vmmov %vm13215_vm2 }
 0xcce   : > { %v2765_v21 = vsel %vm13205_vm4, %v2764_v35, %v2763_v38  ;;  %v3136_v59 = vrot.slane %v9756_v52, 6  ;;  %v9777_v57 = vadd.f32 %v3108_v17, %v13208_v46  ;;  %v9781_v41 = vadd.f32 %v3109_v15, %v13210_v3 }
 0xccf   : > { %v2767_v16 = vsel %vm13207_vm5, %v2766_v47, %v2765_v21  ;;  %v3135_v35 = vsel %vm13211_vm8, %v3134_v36, %v9764_v32  ;;  %v3138_v6 = vrot.slane %v9759_v63, 5  ;;  %v3140_v34 = vrot.slane %v9767_v44, 4  ;;  %vm13223_vm8 = vmmov %vm13219_vm0 }
 0xcd0   : > { %v2769_v19 = vsel %vm13209_vm12, %v2768_v33, %v2767_v16  ;;  %v3137_v51 = vsel %vm13213_vm11, %v3136_v59, %v3135_v35  ;;  %v3142_v17 = vrot.slane %v9771_v58, 3  ;;  %v3144_v15 = vrot.slane %v9777_v57, 2  ;;  %vm13222_vm12 = vmmov %vm13218_vm1 }
 0xcd1   : > { %v2771_v28 = vsel %vm13212_vm7, %v2769_v19, -inf  ;;  %v3139_v47 = vsel %vm13214_vm10, %v3138_v6, %v3137_v51  ;;  %v3146_v33 = vrot.slane %v9781_v41, 1  ;;  %vm13224_vm7 = vmmov %vm13196_vm3 }
 0xcd2   : > { %2772 = vmax.xlane.f32.xlu0 %v2771_v28  ;;  %v3141_v42 = vsel %vm13215_vm2, %v3140_v34, %v3139_v47  ;;  %vm13225_vm10 = vmmov %vm13198_vm6 }
 0xcd3   : > { %v3143_v38 = vsel %vm13216_vm9, %v3142_v17, %v3141_v42  ;;  %vm13226_vm9 = vmmov %vm13205_vm4 }
 0xcd4   : > { %v3145_v21 = vsel %vm13217_vm13, %v3144_v15, %v3143_v38  ;;  %vm13227_vm13 = vmmov %vm13207_vm5 }
 0xcd5   : > { %v3147_v36 = vsel %vm13218_vm1, %v3146_v33, %v3145_v21 }
 0xcd6   : > { %v3149_v59 = vsel %vm13219_vm0, %v3147_v36, -inf }
 0xcd7   : > { %3150 = vmax.xlane.f32.xlu2 %v3149_v59 }
 0xce6   : > { %3024 = vrot.lane.b32.xlu0 %v9706_v31, %s7539_s20 }
 0xd45   : > { %v2773_v16 = vpop.xlane.xlu0 %2772 }
 0xd46   : > { %v2775_v19 = vrot.slane %v2773_v16, 1  ;;  %v2776_v35 = vrot.slane %v2773_v16, 2  ;;  %v2777_v6 = vrot.slane %v2773_v16, 3  ;;  %v2778_v28 = vrot.slane %v2773_v16, 4 }
 0xd47   : > { %v2779_v51 = vrot.slane %v2773_v16, 5  ;;  %v2790_v34 = vsub.f32 %v9731_v10, %v2773_v16  ;;  %v2780_v47 = vrot.slane %v2773_v16, 6  ;;  %v2781_v17 = vrot.slane %v2773_v16, 7 }
 0xd48   : > { %v2791_v42 = vsub.f32 %v9719_v60, %v2775_v19  ;;  %v2792_v15 = vsub.f32 %v9722_v39, %v2776_v35  ;;  %v2793_v38 = vsub.f32 %v9725_v13, %v2777_v6  ;;  %v2794_v33 = vsub.f32 %v9728_v61, %v2778_v28 }
 0xd49   : > { %v2798_v21 = vmul.f32 1.442695, %v2790_v34  ;;  %v2795_v36 = vsub.f32 %v9734_v0, %v2779_v51  ;;  %v2796_v59 = vsub.f32 %v9737_v45, %v2780_v47  ;;  %v2797_v31 = vsub.f32 %v9740_v29, %v2781_v17 }
 0xd4a   : > { %v2800_v43 = vmul.f32 1.442695, %v2791_v42  ;;  %v2802_v55 = vmul.f32 1.442695, %v2792_v15  ;;  %v2804_v10 = vmul.f32 1.442695, %v2793_v38  ;;  %v3151_v19 = vpop.xlane.xlu2 %3150 }
 0xd4b   : > { %7004 = vpow2.f32 %v2798_v21  ;;  %v2806_v16 = vmul.f32 1.442695, %v2794_v33  ;;  %v2808_v3 = vmul.f32 1.442695, %v2795_v36  ;;  %v2810_v60 = vmul.f32 1.442695, %v2796_v59 }
 0xd4c   : > { %7006 = vpow2.f32 %v2800_v43  ;;  %v2812_v39 = vmul.f32 1.442695, %v2797_v31  ;;  %v3153_v13 = vrot.slane %v3151_v19, 1  ;;  %v3154_v35 = vrot.slane %v3151_v19, 2 }
 0xd4d   : > { %7008 = vpow2.f32 %v2802_v55  ;;  %v3155_v61 = vrot.slane %v3151_v19, 3  ;;  %v3156_v6 = vrot.slane %v3151_v19, 4  ;;  %v3157_v0 = vrot.slane %v3151_v19, 5 }
 0xd4e   : > { %7010 = vpow2.f32 %v2804_v10  ;;  %v3168_v45 = vsub.f32 %v9764_v32, %v3151_v19  ;;  %v3169_v29 = vsub.f32 %v9753_v9, %v3153_v13  ;;  %v3170_v28 = vsub.f32 %v9756_v52, %v3154_v35 }
 0xd4f   : > { %7012 = vpow2.f32 %v2806_v16  ;;  %v3171_v51 = vsub.f32 %v9759_v63, %v3155_v61  ;;  %v3158_v34 = vrot.slane %v3151_v19, 6  ;;  %v3159_v47 = vrot.slane %v3151_v19, 7 }
 0xd50   : > { %7014 = vpow2.f32 %v2808_v3  ;;  %v3176_v43 = vmul.f32 1.442695, %v3168_v45  ;;  %v3178_v31 = vmul.f32 1.442695, %v3169_v29  ;;  %v3180_v55 = vmul.f32 1.442695, %v3170_v28 }
 0xd51   : > { %v9812_v17 = vpop.eup %7004  ;;  %7016 = vpow2.f32 %v2810_v60  ;;  %v3172_v42 = vsub.f32 %v9767_v44, %v3156_v6  ;;  %v3173_v32 = vsub.f32 %v9771_v58, %v3157_v0  ;;  %v3182_v9 = vmul.f32 1.442695, %v3171_v51 }
 0xd52   : > { %v9816_v15 = vpop.eup %7006  ;;  %7018 = vpow2.f32 %v2812_v39  ;;  %v3174_v52 = vsub.f32 %v9777_v57, %v3158_v34  ;;  %v3175_v63 = vsub.f32 %v9781_v41, %v3159_v47 }
 0xd53   : > { %v9820_v38 = vpop.eup %7008  ;;  %v2822_v3 = vrot.slane %v9816_v15, 7  ;;  %7020 = vpow2.f32 %v3176_v43  ;;  %v3184_v33 = vmul.f32 1.442695, %v3172_v42  ;;  %v3186_v58 = vmul.f32 1.442695, %v3173_v32 }
 0xd54   : > { %v9823_v21 = vpop.eup %7010  ;;  %v2824_v44 = vrot.slane %v9820_v38, 6  ;;  %7022 = vpow2.f32 %v3178_v31  ;;  %v3188_v41 = vmul.f32 1.442695, %v3174_v52  ;;  %v3190_v19 = vmul.f32 1.442695, %v3175_v63 }
 0xd55   : > { %v9826_v36 = vpop.eup %7012  ;;  %v2823_v59 = vsel %vm13196_vm3, %v2822_v3, %v9812_v17  ;;  %v2826_v57 = vrot.slane %v9823_v21, 5  ;;  %7024 = vpow2.f32 %v3180_v55 }
 0xd56   : > { %v9831_v10 = vpop.eup %7014  ;;  %v2825_v16 = vsel %vm13220_vm15, %v2824_v44, %v2823_v59  ;;  %v2828_v60 = vrot.slane %v9826_v36, 4  ;;  %7026 = vpow2.f32 %v3182_v9 }
 0xd57   : > { %v9835_v39 = vpop.eup %7016  ;;  %v2827_v13 = vsel %vm13198_vm6, %v2826_v57, %v2825_v16  ;;  %v2830_v35 = vrot.slane %v9831_v10, 3  ;;  %7028 = vpow2.f32 %v3184_v33 }
 0xd58   : > { %v9839_v61 = vpop.eup %7018  ;;  %v2829_v6 = vsel %vm13221_vm14, %v2828_v60, %v2827_v13  ;;  %v2832_v0 = vrot.slane %v9835_v39, 2  ;;  %7030 = vpow2.f32 %v3186_v58 }
 0xd59   : > { %v9843_v45 = vpop.eup %7020  ;;  %v2831_v29 = vsel %vm13205_vm4, %v2830_v35, %v2829_v6  ;;  %v2834_v28 = vrot.slane %v9839_v61, 1  ;;  %7032 = vpow2.f32 %v3188_v41 }
 0xd5a   : > { %v9847_v51 = vpop.eup %7022  ;;  %v2833_v34 = vsel %vm13207_vm5, %v2832_v0, %v2831_v29  ;;  %7034 = vpow2.f32 %v3190_v19 }
 0xd5b   : > { %v9850_v47 = vpop.eup %7024  ;;  %v2835_v43 = vsel %vm13222_vm12, %v2834_v28, %v2833_v34  ;;  %v3200_v31 = vrot.slane %v9847_v51, 7 }
 0xd5c   : > { %v9854_v55 = vpop.eup %7026  ;;  %v2837_v42 = vsel %vm13223_vm8, %v2835_v43, 0.0  ;;  %v3202_v32 = vrot.slane %v9850_v47, 6 }
 0xd5d   : > { %v9858_v9 = vpop.eup %7028  ;;  %2838 = vadd.xlane.f32.xlu1 %v2837_v42  ;;  %v3201_v52 = vsel %vm13224_vm7, %v3200_v31, %v9843_v45  ;;  %v3204_v63 = vrot.slane %v9854_v55, 5 }
 0xd5e   : > { %v9863_v3 = vpop.eup %7030  ;;  %v3203_v33 = vsel %vm13213_vm11, %v3202_v32, %v3201_v52  ;;  %v3206_v44 = vrot.slane %v9858_v9, 4 }
 0xd5f   : > { %v9867_v58 = vpop.eup %7032  ;;  %v3205_v59 = vsel %vm13225_vm10, %v3204_v63, %v3203_v33  ;;  %v3208_v57 = vrot.slane %v9863_v3, 3 }
 0xd60   : > { %v9871_v41 = vpop.eup %7034  ;;  %v3207_v16 = vsel %vm13215_vm2, %v3206_v44, %v3205_v59  ;;  %v3210_v60 = vrot.slane %v9867_v58, 2 }
 0xd61   : > { %v3209_v19 = vsel %vm13226_vm9, %v3208_v57, %v3207_v16  ;;  %v3212_v13 = vrot.slane %v9871_v41, 1 }
 0xd62   : > { %v3211_v35 = vsel %vm13227_vm13, %v3210_v60, %v3209_v19 }
 0xd63   : > { %v3213_v6 = vsel %vm13218_vm1, %v3212_v13, %v3211_v35 }
 0xd64   : > { %v3215_v0 = vsel %vm13219_vm0, %v3213_v6, 0.0 }
 0xd65   : > { %3216 = vadd.xlane.f32.xlu2 %v3215_v0 }
 0xd76   : > { %3402 = vrot.lane.b32.xlu1 %v9710_v24, %s7539_s20 }
 0xdd0   : > { %v2839_v29 = vpop.xlane.xlu1 %2838 }
 0xdd1   : > { %v9882_v28 = vrot.slane %v2839_v29, 1  ;;  %7036 = vrcp.f32 %v2839_v29  ;;  %v9884_v34 = vrot.slane %v2839_v29, 2  ;;  %v9886_v43 = vrot.slane %v2839_v29, 3 }
 0xdd2   : > { %v9889_v31 = vrot.slane %v2839_v29, 4  ;;  %v2867_v42 = vand.u32 2147483648, %v2839_v29  ;;  %v2865_v32 = vand.u32 2147483647, %v2839_v29  ;;  %v9894_v33 = vrot.slane %v2839_v29, 5 }
 0xdd3   : > { %7038 = vrcp.f32 %v9882_v28  ;;  %v2882_v52 = vand.u32 2147483648, %v9882_v28  ;;  %v9896_v44 = vrot.slane %v2839_v29, 6  ;;  %v9898_v59 = vrot.slane %v2839_v29, 7 }
 0xdd4   : > { %7040 = vrcp.f32 %v9884_v34  ;;  %vm2861_vm3 = vweird.f32 %v2839_v29  ;;  %v2868_v60 = vor.u32 1.1754944e-38, %v2867_v42  ;;  %vm2876_vm15 = vweird.f32 %v9882_v28 }
 0xdd5   : > { %7042 = vrcp.f32 %v9886_v43  ;;  %v2880_v19 = vand.u32 2147483647, %v9882_v28  ;;  %v2897_v13 = vand.u32 2147483648, %v9884_v34  ;;  %vm9910_vm6 = vcmp.eq.f32.partialorder %v2865_v32, 8.507059e+37 }
 0xdd6   : > { %7044 = vrcp.f32 %v9889_v31  ;;  %v9916_v26 = vor.u32 1.1754944e-38, %v2882_v52  ;;  %vm2891_vm14 = vweird.f32 %v9884_v34  ;;  %v2895_v42 = vand.u32 2147483647, %v9884_v34 }
 0xdd7   : > { %v7037_v63 = vpop.eup %7036  ;;  %vm2906_vm4 = vweird.f32 %v9886_v43  ;;  %v2912_v32 = vand.u32 2147483648, %v9886_v43  ;;  %7046 = vrcp.f32 %v9894_v33  ;;  %v2898_v62 = vor.u32 1.1754944e-38, %v2897_v13 }
 0xdd8   : > { %v2857_v57 = vmul.f32 %v7037_v63, %v2839_v29  ;;  %v9908_v6 = vpop.xlane.xlu2 %3216  ;;  %vm2862_vm5 = vweird.f32 %v7037_v63  ;;  %vm9935_vm12 = vcmp.eq.f32.partialorder %v2880_v19, 8.507059e+37  ;;  %vm9939_vm8 = vcmp.eq.f32.partialorder %v2895_v42, 8.507059e+37 }
 0xdd9   : > { %v9901_v16 = vpop.eup %7038  ;;  %v9929_v52 = vrot.slane %v9908_v6, 1  ;;  %7048 = vrcp.f32 %v9908_v6  ;;  %vm9945_vm7 = vmor %vm2861_vm3, %vm2862_vm5  ;;  %v2913_v49 = vor.u32 1.1754944e-38, %v2912_v32  ;;  %vm2921_vm1 = vweird.f32 %v9889_v31 }
 0xdda   : > { %v9906_v35 = vpop.eup %7040  ;;  %v2858_v0 = vsub.f32 1.0, %v2857_v57  ;;  %v2872_v46 = vmul.f32 %v9901_v16, %v9882_v28  ;;  %v2910_v57 = vand.u32 2147483647, %v9886_v43  ;;  %vm2877_vm11 = vweird.f32 %v9901_v16 }
 0xddb   : > { %v2887_v40 = vmul.f32 %v9906_v35, %v9884_v34  ;;  %v9925_v27 = vpop.eup %7042  ;;  %vm2892_vm2 = vweird.f32 %v9906_v35  ;;  %7050 = vrcp.f32 %v9929_v52  ;;  %vm9968_vm13 = vmor %vm2876_vm15, %vm2877_vm11  ;;  %v2940_v34 = vand.u32 2147483647, %v9894_v33 }
 0xddc   : > { %v2859_v8 = vmul.f32 %v7037_v63, %v2858_v0  ;;  %v2873_v1 = vsub.f32 1.0, %v2872_v46  ;;  %v2902_v37 = vmul.f32 %v9925_v27, %v9886_v43  ;;  %v7045_v4 = vpop.eup %7044  ;;  %vm9951_vm10 = vcmp.eq.f32.partialorder %v2910_v57, 8.507059e+37  ;;  %vm9982_vm3 = vmor %vm2891_vm14, %vm2892_vm2 }
 0xddd   : > { %v2888_v22 = vsub.f32 1.0, %v2887_v40  ;;  %v2925_v40 = vand.u32 2147483647, %v9889_v31  ;;  %v2917_v42 = vmul.f32 %v7045_v4, %v9889_v31  ;;  %vm2907_vm9 = vweird.f32 %v9925_v27 }
 0xdde   : > { %v2860_v12 = vadd.f32 %v7037_v63, %v2859_v8  ;;  %v2874_v25 = vmul.f32 %v9901_v16, %v2873_v1  ;;  %v2903_v1 = vsub.f32 1.0, %v2902_v37  ;;  %vm2922_vm15 = vweird.f32 %v7045_v4 }
 0xddf   : > { %v2889_v8 = vmul.f32 %v9906_v35, %v2888_v22  ;;  %v2918_v37 = vsub.f32 1.0, %v2917_v42  ;;  %v7047_v22 = vpop.eup %7046  ;;  %vm9973_vm0 = vcmp.eq.f32.partialorder %v2925_v40, 8.507059e+37  ;;  %7052 = vrcp.f32 %v9896_v44  ;;  %vm2923_vm14 = vmor %vm2921_vm1, %vm2922_vm15 }
 0xde0   : > { %v2864_v30 = vsel %vm9945_vm7, %v7037_v63, %v2860_v12  ;;  %v2875_v29 = vadd.f32 %v9901_v16, %v2874_v25  ;;  %v2904_v11 = vmul.f32 %v9925_v27, %v2903_v1  ;;  %v2927_v63 = vand.u32 2147483648, %v9889_v31 }
 0xde1   : > { %v2890_v14 = vadd.f32 %v9906_v35, %v2889_v8  ;;  %v2869_v57 = vsel %vm9910_vm6, %v2868_v60, %v2864_v30  ;;  %v2919_v13 = vmul.f32 %v7045_v4, %v2918_v37  ;;  %v9987_v8 = vpop.eup %7048  ;;  %vm9999_vm6 = vmor %vm2906_vm4, %vm2907_vm9  ;;  %v2942_v1 = vand.u32 2147483648, %v9894_v33 }
 0xde2   : > { %v2905_v28 = vadd.f32 %v9925_v27, %v2904_v11  ;;  %v2879_v40 = vsel %vm9968_vm13, %v9901_v16, %v2875_v29  ;;  %v2932_v11 = vmul.f32 %v7047_v22, %v9894_v33  ;;  %v2928_v43 = vor.u32 1.1754944e-38, %v2927_v63  ;;  %v10020_v37 = vpop.eup %7050 }
 0xde3   : > { %v2894_v24 = vsel %vm9982_vm3, %v9906_v35, %v2890_v14  ;;  %v2920_v60 = vadd.f32 %v7045_v4, %v2919_v13  ;;  %v2870_v14 = vmul.f32 %v9812_v17, %v2869_v57  ;;  %vm2936_vm4 = vweird.f32 %v9894_v33 }
 0xde4   : > { %v2909_v16 = vsel %vm9999_vm6, %v9925_v27, %v2905_v28  ;;  %v2933_v35 = vsub.f32 1.0, %v2932_v11  ;;  %v2884_v42 = vsel %vm9935_vm12, %v9916_v26, %v2879_v40  ;;  %v2899_v27 = vsel %vm9939_vm8, %v2898_v62, %v2894_v24 }
 0xde5   : > { %v2924_v29 = vsel %vm2923_vm14, %v7045_v4, %v2920_v60  ;;  %7054 = vrcp.f32 %v9898_v59  ;;  %v2914_v17 = vsel %vm9951_vm10, %v2913_v49, %v2909_v16  ;;  %vm2937_vm5 = vweird.f32 %v7047_v22  ;;  %v7053_v49 = vpop.eup %7052 }
 0xde6   : > { %v2934_v31 = vmul.f32 %v7047_v22, %v2933_v35  ;;  %v2955_v12 = vand.u32 2147483647, %v9896_v44  ;;  %v2929_v63 = vsel %vm9973_vm0, %v2928_v43, %v2924_v29  ;;  %vm10027_vm7 = vcmp.eq.f32.partialorder %v2940_v34, 8.507059e+37  ;;  %vm2938_vm8 = vmor %vm2936_vm4, %vm2937_vm5 }
 0xde7   : > { %v2943_v62 = vor.u32 1.1754944e-38, %v2942_v1  ;;  %v2957_v4 = vand.u32 2147483648, %v9896_v44  ;;  %v2885_v0 = vmul.f32 %v9816_v15, %v2884_v42  ;;  %v2900_v46 = vmul.f32 %v9820_v38, %v2899_v27 }
 0xde8   : > { %v2935_v19 = vadd.f32 %v7047_v22, %v2934_v31  ;;  %vm2951_vm12 = vweird.f32 %v9896_v44  ;;  %v2915_v57 = vmul.f32 %v9823_v21, %v2914_v17  ;;  %v2977_v25 = vrot.slane %v9616_v48, 3 }
 0xde9   : > { %v2978_v32 = vrot.slane %v9620_v7, 3  ;;  %v2979_v28 = vrot.slane %v9626_v56, 3  ;;  %v2930_v13 = vmul.f32 %v9826_v36, %v2929_v63  ;;  %v2947_v38 = vmul.f32 %v7053_v49, %v9896_v44 }
 0xdea   : > { %v2939_v15 = vsel %vm2938_vm8, %v7047_v22, %v2935_v19  ;;  %vm10043_vm11 = vcmp.eq.f32.partialorder %v2955_v12, 8.507059e+37  ;;  %vm2966_vm10 = vweird.f32 %v9898_v59  ;;  %v2980_v21 = vrot.slane %v9634_v50, 3 }
 0xdeb   : > { %v7055_v33 = vpop.eup %7054  ;;  %v2944_v48 = vsel %vm10027_vm7, %v2943_v62, %v2939_v15  ;;  %v2958_v7 = vor.u32 1.1754944e-38, %v2957_v4  ;;  %v2970_v56 = vand.u32 2147483647, %v9898_v59  ;;  %v2976_v36 = vrot.slane %v9603_v20, 3 }
 0xdec   : > { %v2948_v22 = vsub.f32 1.0, %v2947_v38  ;;  %v2962_v24 = vmul.f32 %v7055_v33, %v9898_v59  ;;  %v2972_v30 = vand.u32 2147483648, %v9898_v59  ;;  %v2981_v11 = vrot.slane %v9638_v18, 3 }
 0xded   : > { %v2945_v34 = vmul.f32 %v9831_v10, %v2944_v48  ;;  %v2993_v16 = vmul.f32 %v2977_v25, %v2885_v0  ;;  %v2994_v50 = vmul.f32 %v2978_v32, %v2900_v46  ;;  %v2995_v60 = vmul.f32 %v2979_v28, %v2915_v57 }
 0xdee   : > { %v2949_v1 = vmul.f32 %v7053_v49, %v2948_v22  ;;  %vm2952_vm2 = vweird.f32 %v7053_v49  ;;  %v2963_v43 = vsub.f32 1.0, %v2962_v24  ;;  %v2996_v35 = vmul.f32 %v2980_v21, %v2930_v13 }
 0xdef   : > { %vm10057_vm9 = vcmp.eq.f32.partialorder %v2970_v56, 8.507059e+37  ;;  %v2992_v20 = vmul.f32 %v2976_v36, %v2870_v14  ;;  %v3008_v27 = vrot.slane %v2993_v16, 7  ;;  %v3010_v29 = vrot.slane %v2994_v50, 6  ;;  %vm2953_vm1 = vmor %vm2951_vm12, %vm2952_vm2 }
 0xdf0   : > { %v2950_v17 = vadd.f32 %v7053_v49, %v2949_v1  ;;  %v2964_v31 = vmul.f32 %v7055_v33, %v2963_v43  ;;  %vm2967_vm13 = vweird.f32 %v7055_v33  ;;  %v2973_v18 = vor.u32 1.1754944e-38, %v2972_v30  ;;  %v3025_v43 = vpop.permute.xlu0 %3024 }
 0xdf1   : > { %v2982_v10 = vrot.slane %v9643_v23, 3  ;;  %v2997_v12 = vmul.f32 %v2981_v11, %v2945_v34  ;;  %vm13252_vm0 = vcmask 1041409   ;;  %v3012_v26 = vrot.slane %v2995_v60, 5  ;;  %vm2968_vm15 = vmor %vm2966_vm10, %vm2967_vm13 }
 0xdf2   : > { %v3009_v63 = vsel %vm13252_vm0, %v3008_v27, %v2992_v20  ;;  %v2954_v62 = vsel %vm2953_vm1, %v7053_v49, %v2950_v17  ;;  %v2965_v4 = vadd.f32 %v7055_v33, %v2964_v31  ;;  %vm13253_vm3 = vcmask 1042434  }
 0xdf3   : > { %v3011_v0 = vsel %vm13253_vm3, %v3010_v29, %v3009_v63  ;;  %v3014_v14 = vrot.slane %v2996_v35, 4  ;;  %v2959_v46 = vsel %vm10043_vm11, %v2958_v7, %v2954_v62  ;;  %v2983_v44 = vrot.slane %v9661_v54, 3  ;;  %v10138_v63 = vld [vmem:[%s12744_s5 + $0x28] sm:$0xff] }
 0xdf4   : > { %vm13254_vm6 = vcmask 1043459   ;;  %v3235_v23 = vmul.f32 %v9987_v8, %v9908_v6  ;;  %v2960_v57 = vmul.f32 %v9835_v39, %v2959_v46  ;;  %v2969_v49 = vsel %vm2968_vm15, %v7055_v33, %v2965_v4 }
 0xdf5   : > { %v3013_v19 = vsel %vm13254_vm6, %v3012_v26, %v3011_v0  ;;  %vm13255_vm14 = vcmask 1044484   ;;  %v10077_v32 = vrot.slane %v9908_v6, 2  ;;  %v2974_v28 = vsel %vm10057_vm9, %v2973_v18, %v2969_v49 }
 0xdf6   : > { %v3015_v25 = vsel %vm13255_vm14, %v3014_v14, %v3013_v19  ;;  %v3016_v59 = vrot.slane %v2997_v12, 3  ;;  %v10082_v13 = vrot.slane %v9908_v6, 3  ;;  %v3236_v54 = vsub.f32 1.0, %v3235_v23 }
 0xdf7   : > { %v2975_v15 = vmul.f32 %v9839_v61, %v2974_v28  ;;  %v2998_v38 = vmul.f32 %v2982_v10, %v2960_v57  ;;  %v10086_v40 = vrot.slane %v9908_v6, 4  ;;  %v3250_v39 = vmul.f32 %v10020_v37, %v9929_v52 }
 0xdf8   : > { %vm13256_vm4 = vcmask 1045509   ;;  %v3237_v33 = vmul.f32 %v9987_v8, %v3236_v54  ;;  %vm3240_vm5 = vweird.f32 %v9987_v8  ;;  %v3245_v48 = vand.u32 2147483648, %v9908_v6 }
 0xdf9   : > { %v3017_v21 = vsel %vm13256_vm4, %v3016_v59, %v3015_v25  ;;  %v2999_v7 = vmul.f32 %v2983_v44, %v2975_v15  ;;  %v3018_v56 = vrot.slane %v2998_v38, 2  ;;  %v3243_v36 = vand.u32 2147483647, %v9908_v6  ;;  %v10171_v25 = vld [vmem:[%s12744_s5 + $0x18] sm:$0xff] }
 0xdfa   : > { %v3251_v61 = vsub.f32 1.0, %v3250_v39  ;;  %v3238_v22 = vadd.f32 %v9987_v8, %v3237_v33  ;;  %vm3239_vm7 = vweird.f32 %v9908_v6  ;;  %vm3255_vm12 = vweird.f32 %v10020_v37  ;;  %v10189_v33 = vld [vmem:[%s12744_s5 + $0x10] sm:$0xff] }
 0xdfb   : > { %7056 = vrcp.f32 %v10077_v32  ;;  %vm13257_vm8 = vcmask 1046534   ;;  %v3020_v30 = vrot.slane %v2999_v7, 1  ;;  %vm3241_vm11 = vmor %vm3239_vm7, %vm3240_vm5  ;;  %v3260_v34 = vand.u32 2147483648, %v9929_v52 }
 0xdfc   : > { %v3019_v24 = vsel %vm13257_vm8, %v3018_v56, %v3017_v21  ;;  %v3252_v11 = vmul.f32 %v10020_v37, %v3251_v61  ;;  %v10103_v16 = vrot.slane %v9908_v6, 5  ;;  %v3242_v50 = vsel %vm3241_vm11, %v9987_v8, %v3238_v22  ;;  %v10231_v8 = vld [vmem:[%s12744_s5] sm:$0xff] }
 0xdfd   : > { %v3246_v60 = vor.u32 1.1754944e-38, %v3245_v48  ;;  %v3258_v1 = vand.u32 2147483647, %v9929_v52  ;;  %vm13258_vm10 = vcmask 1047559   ;;  %vm3244_vm2 = vcmp.eq.f32.partialorder %v3243_v36, 8.507059e+37  ;;  %v7462_v36 = vld [vmem:[%s7614_s18 + $0x60] sm:$0xff] }
 0xdfe   : > { %v10108_v35 = vsel %vm13258_vm10, %v3020_v30, %v3019_v24  ;;  %v3253_v42 = vadd.f32 %v10020_v37, %v3252_v11  ;;  %vm3254_vm9 = vweird.f32 %v9929_v52  ;;  %vm13260_vm13 = vcmask 130048   ;;  %v10211_v11 = vld [vmem:[%s12744_s5 + $0x8] sm:$0xff] }
 0xdff   : > { %13259 = vst [vmem:[#allocation31_spill] sm:$0xff] %v10108_v35  ;;  %v3027_v20 = vsel %vm13260_vm13, %v10108_v35, %v3025_v43  ;;  %v3247_v27 = vsel %vm3244_vm2, %v3246_v60, %v3242_v50  ;;  %vm10116_vm1 = vmor %vm3254_vm9, %vm3255_vm12  ;;  %v3273_v29 = vand.u32 2147483647, %v10077_v32  ;;  %7058 = vrcp.f32 %v10082_v13 }
 0xe00   : > { %vm13263_vm0 = vcmask 392192   ;;  %v10124_v17 = vrot.slane %v9908_v6, 6  ;;  %v3257_v52 = vsel %vm10116_vm1, %v10020_v37, %v3253_v42  ;;  %v3261_v31 = vor.u32 1.1754944e-38, %v3260_v34 }
 0xe01   : > { %6720 = vmatmul.msk.f32.vlgmr.msrb.gmra.mxu2 %vm13263_vm0, %v3027_v20  ;;  %v3275_v18 = vand.u32 2147483648, %v10077_v32  ;;  %v7057_v10 = vpop.eup %7056  ;;  %v10131_v12 = vrot.slane %v9908_v6, 7  ;;  %vm3259_vm3 = vcmp.eq.f32.partialorder %v3258_v1, 8.507059e+37  ;;  %vm3269_vm15 = vweird.f32 %v10077_v32 }
 0xe02   : > { %7060 = vrcp.f32 %v10086_v40  ;;  %6065 = vmatpush.msrb.mxu2 %v10138_v63  ;;  %v10142_v37 = vmul.f32 %v9843_v45, %v3247_v27  ;;  %v3262_v26 = vsel %vm3259_vm3, %v3261_v31, %v3257_v52  ;;  %v3265_v62 = vmul.f32 %v7057_v10, %v10077_v32  ;;  %v10156_v45 = vld [vmem:[%s12744_s5 + $0x20] sm:$0xff] }
 0xe03   : > { %v3288_v6 = vand.u32 2147483647, %v10082_v13  ;;  %vm10146_vm6 = vcmp.eq.f32.partialorder %v3273_v29, 8.507059e+37  ;;  %v3290_v0 = vand.u32 2147483648, %v10082_v13  ;;  %v3305_v14 = vand.u32 2147483648, %v10086_v40 }
 0xe04   : > { %7062 = vrcp.f32 %v10103_v16  ;;  %6066 = vmatpush.msrb.mxu2 %v10156_v45  ;;  %v3266_v46 = vsub.f32 1.0, %v3265_v62  ;;  %v3276_v44 = vor.u32 1.1754944e-38, %v3275_v18  ;;  %vm3284_vm14 = vweird.f32 %v10082_v13 }
 0xe05   : > { %v3303_v19 = vand.u32 2147483647, %v10086_v40  ;;  %v10161_v23 = vpop.eup %7058  ;;  %v10164_v57 = vmul.f32 %v9847_v51, %v3262_v26  ;;  %vm3270_vm4 = vweird.f32 %v7057_v10  ;;  %v3320_v49 = vand.u32 2147483648, %v10103_v16 }
 0xe06   : > { %7064 = vrcp.f32 %v10124_v17  ;;  %6067 = vmatpush.msrb.mxu2 %v10171_v25  ;;  %v3267_v28 = vmul.f32 %v7057_v10, %v3266_v46  ;;  %v3280_v59 = vmul.f32 %v10161_v23, %v10082_v13  ;;  %vm10176_vm5 = vcmp.eq.f32.partialorder %v3288_v6, 8.507059e+37  ;;  %vm3271_vm10 = vmor %vm3269_vm15, %vm3270_vm4  ;;  %v7458_v6 = vld [vmem:[%s7614_s18 + $0x40] sm:$0xff] }
 0xe07   : > { %vm3299_vm7 = vweird.f32 %v10086_v40  ;;  %v3318_v51 = vand.u32 2147483647, %v10103_v16  ;;  %v3291_v38 = vor.u32 1.1754944e-38, %v3290_v0  ;;  %v3306_v39 = vor.u32 1.1754944e-38, %v3305_v14 }
 0xe08   : > { %v10182_v15 = vpop.eup %7060  ;;  %v3335_v21 = vand.u32 2147483648, %v10124_v17  ;;  %7066 = vrcp.f32 %v10131_v12  ;;  %6068 = vmatpush.msrb.mxu2 %v10189_v33  ;;  %v3268_v48 = vadd.f32 %v7057_v10, %v3267_v28  ;;  %v3281_v7 = vsub.f32 1.0, %v3280_v59 }
 0xe09   : > { %vm3285_vm12 = vweird.f32 %v10161_v23  ;;  %v3295_v56 = vmul.f32 %v10182_v15, %v10086_v40  ;;  %vm10195_vm8 = vcmp.eq.f32.partialorder %v3303_v19, 8.507059e+37  ;;  %vm3314_vm11 = vweird.f32 %v10103_v16 }
 0xe0a   : > { %v10200_v61 = vpop.eup %7062  ;;  %vm3300_vm2 = vweird.f32 %v10182_v15  ;;  %v3321_v22 = vor.u32 1.1754944e-38, %v3320_v49  ;;  %v3333_v24 = vand.u32 2147483647, %v10124_v17  ;;  %v3348_v30 = vand.u32 2147483647, %v10131_v12  ;;  %6069 = vmatpush.msrb.mxu2 %v10211_v11  ;;  %vm3286_vm3 = vmor %vm3284_vm14, %vm3285_vm12  ;;  %v7459_v49 = vld [vmem:[%s7614_s18 + $0x48] sm:$0xff] }
 0xe0b   : > { %v3272_v34 = vsel %vm3271_vm10, %v7057_v10, %v3268_v48  ;;  %v3282_v50 = vmul.f32 %v10161_v23, %v3281_v7  ;;  %v3296_v60 = vsub.f32 1.0, %v3295_v56  ;;  %v3310_v32 = vmul.f32 %v10200_v61, %v10103_v16  ;;  %vm3301_vm4 = vmor %vm3299_vm7, %vm3300_vm2  ;;  %v7460_v48 = vld [vmem:[%s7614_s18 + $0x50] sm:$0xff] }
 0xe0c   : > { %vm10217_vm9 = vcmp.eq.f32.partialorder %v3318_v51, 8.507059e+37  ;;  %v10221_v43 = vpop.eup %7064  ;;  %v3277_v42 = vsel %vm10146_vm6, %v3276_v44, %v3272_v34  ;;  %vm3315_vm13 = vweird.f32 %v10200_v61  ;;  %vm3329_vm1 = vweird.f32 %v10124_v17  ;;  %6070 = vmatpush.msrb.mxu2 %v10231_v8 }
 0xe0d   : > { %v3336_v20 = vor.u32 1.1754944e-38, %v3335_v21  ;;  %v3350_v27 = vand.u32 2147483648, %v10131_v12  ;;  %v3278_v29 = vmul.f32 %v9850_v47, %v3277_v42  ;;  %v3283_v52 = vadd.f32 %v10161_v23, %v3282_v50  ;;  %v7463_v50 = vld [vmem:[%s7614_s18 + $0x68] sm:$0xff] }
 0xe0e   : > { %v3297_v31 = vmul.f32 %v10182_v15, %v3296_v60  ;;  %v3311_v18 = vsub.f32 1.0, %v3310_v32  ;;  %vm3344_vm0 = vweird.f32 %v10131_v12  ;;  %v7067_v10 = vpop.eup %7066  ;;  %v3325_v26 = vmul.f32 %v10221_v43, %v10124_v17  ;;  %v7464_v32 = vld [vmem:[%s7614_s18 + $0x70] sm:$0xff] }
 0xe0f   : > { %vm3330_vm15 = vweird.f32 %v10221_v43  ;;  %vm10245_vm6 = vcmp.eq.f32.partialorder %v3333_v24, 8.507059e+37  ;;  %v3351_v62 = vor.u32 1.1754944e-38, %v3350_v27  ;;  %v3354_v4 = vrot.slane %v7458_v6, 3 }
 0xe10   : > { %v3287_v0 = vsel %vm3286_vm3, %v10161_v23, %v3283_v52  ;;  %v3298_v14 = vadd.f32 %v10182_v15, %v3297_v31  ;;  %v3312_v13 = vmul.f32 %v10200_v61, %v3311_v18  ;;  %v3340_v46 = vmul.f32 %v7067_v10, %v10131_v12  ;;  %vm3331_vm7 = vmor %vm3329_vm1, %vm3330_vm15 }
 0xe11   : > { %vm10254_vm14 = vcmp.eq.f32.partialorder %v3348_v30, 8.507059e+37  ;;  %v3292_v19 = vsel %vm10176_vm5, %v3291_v38, %v3287_v0  ;;  %v3326_v23 = vsub.f32 1.0, %v3325_v26  ;;  %vm3345_vm12 = vweird.f32 %v7067_v10  ;;  %vm3316_vm5 = vmor %vm3314_vm11, %vm3315_vm13 }
 0xe12   : > { %v3355_v28 = vrot.slane %v7459_v49, 3  ;;  %v3293_v59 = vmul.f32 %v9854_v55, %v3292_v19  ;;  %v3302_v51 = vsel %vm3301_vm4, %v10182_v15, %v3298_v14  ;;  %v3313_v21 = vadd.f32 %v10200_v61, %v3312_v13  ;;  %v7461_v55 = vld [vmem:[%s7614_s18 + $0x58] sm:$0xff] }
 0xe13   : > { %v3341_v54 = vsub.f32 1.0, %v3340_v46  ;;  %v3307_v38 = vsel %vm10195_vm8, %v3306_v39, %v3302_v51  ;;  %v3327_v40 = vmul.f32 %v10221_v43, %v3326_v23  ;;  %v3356_v7 = vrot.slane %v7460_v48, 3  ;;  %vm3346_vm8 = vmor %vm3344_vm0, %vm3345_vm12 }
 0xe14   : > { %v3357_v15 = vrot.slane %v7461_v55, 3  ;;  %v3308_v56 = vmul.f32 %v9858_v9, %v3307_v38  ;;  %v3317_v24 = vsel %vm3316_vm5, %v10200_v61, %v3313_v21  ;;  %v3358_v39 = vrot.slane %v7462_v36, 3  ;;  %v7465_v61 = vld [vmem:[%s7614_s18 + $0x78] sm:$0xff]  ;;  %v7466_v21 = vld [vmem:[%s12745_s6] ss:$0 sm:$0xff] }
 0xe15   : > { %v3342_v30 = vmul.f32 %v7067_v10, %v3341_v54  ;;  %v3322_v34 = vsel %vm10217_vm9, %v3321_v22, %v3317_v24  ;;  %v3328_v16 = vadd.f32 %v10221_v43, %v3327_v40  ;;  %v3359_v60 = vrot.slane %v7463_v50, 3 }
 0xe16   : > { %v3360_v42 = vrot.slane %v7464_v32, 3  ;;  %v3323_v27 = vmul.f32 %v9863_v3, %v3322_v34  ;;  %v3361_v52 = vrot.slane %v7465_v61, 3  ;;  %v3370_v31 = vmul.f32 %v3354_v4, %v10142_v37 }
 0xe17   : > { %v3343_v9 = vadd.f32 %v7067_v10, %v3342_v30  ;;  %v3332_v22 = vsel %vm3331_vm7, %v10221_v43, %v3328_v16  ;;  %v3371_v1 = vmul.f32 %v3355_v28, %v10164_v57  ;;  %v3372_v18 = vmul.f32 %v3356_v7, %v3278_v29 }
 0xe18   : > { %v3373_v3 = vmul.f32 %v3357_v15, %v3293_v59  ;;  %v3337_v26 = vsel %vm10245_vm6, %v3336_v20, %v3332_v22  ;;  %v3374_v6 = vmul.f32 %v3358_v39, %v3308_v56  ;;  %v3375_v0 = vmul.f32 %v3359_v60, %v3323_v27 }
 0xe19   : > { %v3347_v17 = vsel %vm3346_vm8, %v7067_v10, %v3343_v9  ;;  %v3338_v14 = vmul.f32 %v9867_v58, %v3337_v26  ;;  %v3386_v43 = vrot.slane %v3371_v1, 7  ;;  %v3388_v4 = vrot.slane %v3372_v18, 6 }
 0xe1a   : > { %v3352_v37 = vsel %vm10254_vm14, %v3351_v62, %v3347_v17  ;;  %vm13276_vm11 = vcmask 1041409   ;;  %v3390_v29 = vrot.slane %v3373_v3, 5  ;;  %vm13277_vm10 = vcmask 1042434  }
 0xe1b   : > { %v3353_v12 = vmul.f32 %v9871_v41, %v3352_v37  ;;  %v3376_v13 = vmul.f32 %v3360_v42, %v3338_v14  ;;  %v3387_v57 = vsel %vm13276_vm11, %v3386_v43, %v3370_v31  ;;  %v3392_v20 = vrot.slane %v3374_v6, 4  ;;  %v3403_v41 = vpop.permute.xlu1 %3402 }
 0xe1c   : > { %v3389_v47 = vsel %vm13277_vm10, %v3388_v4, %v3387_v57  ;;  %vm13278_vm2 = vcmask 1043459   ;;  %v3394_v19 = vrot.slane %v3375_v0, 3  ;;  %vm13279_vm9 = vcmask 1044484  }
 0xe1d   : > { %v3377_v46 = vmul.f32 %v3361_v52, %v3353_v12  ;;  %v3391_v10 = vsel %vm13278_vm2, %v3390_v29, %v3389_v47  ;;  %v3396_v23 = vrot.slane %v3376_v13, 2  ;;  %vm13280_vm13 = vcmask 1045509   ;;  %v13287_v47 = vld [vmem:[#allocation34_spill] sm:$0xff] }
 0xe1e   : > { %v3393_v58 = vsel %vm13279_vm9, %v3392_v20, %v3391_v10  ;;  %vm13281_vm1 = vcmask 1046534   ;;  %vm13282_vm0 = vcmask 1047559   ;;  %vm13284_vm3 = vcmask 130048  }
 0xe1f   : > { %v3395_v62 = vsel %vm13280_vm13, %v3394_v19, %v3393_v58  ;;  %v3398_v44 = vrot.slane %v3377_v46, 1  ;;  %vm13285_vm15 = vcmask 392192   ;;  %vm13289_vm10 = vcmask 261120  }
 0xe20   : > { %v3397_v49 = vsel %vm13281_vm1, %v3396_v23, %v3395_v62  ;;  %vm13290_vm2 = vmmov %vm13289_vm10  ;;  %vm13299_vm9 = vcmask 1041409   ;;  %vm13300_vm13 = vcmask 1042434   ;;  %vm13301_vm1 = vcmask 1043459  }
 0xe21   : > { %v10310_v28 = vsel %vm13282_vm0, %v3398_v44, %v3397_v49  ;;  %vm13302_vm0 = vcmask 1044484  }
 0xe22   : > { %13283 = vst [vmem:[#allocation32_spill] sm:$0xff] %v10310_v28  ;;  %v3405_v59 = vsel %vm13284_vm3, %v10310_v28, %v3403_v41  ;;  %vm13303_vm3 = vcmask 1045509  }
 0xe23   : > { %6722 = vmatmul.msk.f32.vlgmr.msrb.gmra.mxu3 %vm13285_vm15, %v3405_v59  ;;  %vm13304_vm15 = vcmask 1046534  }
 0xe24   : > { %6443 = vmatpush.msrb.mxu3 %v10138_v63 }
 0xe26   : > { %6444 = vmatpush.msrb.mxu3 %v10156_v45 }
 0xe28   : > { %6445 = vmatpush.msrb.mxu3 %v10171_v25 }
 0xe2a   : > { %6446 = vmatpush.msrb.mxu3 %v10189_v33 }
 0xe2c   : > { %6447 = vmatpush.msrb.mxu3 %v10211_v11 }
 0xe2e   : > { %6448 = vmatpush.msrb.mxu3 %v10231_v8 }
 0xe84   : > { %v3048_v51 = vpop.f32.mrf.mxu2 }
 0xe85   : > { %v3049_v54 = vadd.f32 %v7466_v21, %v3048_v51 }
 0xe87   : > { %7068 = vtanh.f32 %v3049_v54  ;;  %v6721_v33 = vmul.f32 -1.442695, %v3049_v54 }
 0xe8d   : > { %v7069_v38 = vpop.eup %7068 }
 0xe8e   : > { %3073 = vrot.lane.b32.xlu2 %v7069_v38, %s7536_s12 }
 0xea6   : > { %v3426_v63 = vpop.f32.mrf.mxu3 }
 0xea7   : > { %v3427_v45 = vadd.f32 %v7466_v21, %v3426_v63 }
 0xea9   : > { %7070 = vtanh.f32 %v3427_v45  ;;  %v6723_v50 = vmul.f32 -1.442695, %v3427_v45 }
 0xeaa   : > { %7072 = vpow2.f32 %v6721_v33 }
 0xeaf   : > { %v7071_v25 = vpop.eup %7070 }
 0xeb0   : > { %3451 = vrot.lane.b32.xlu0 %v7071_v25, %s7536_s12  ;;  %v7073_v11 = vpop.eup %7072 }
 0xeb1   : > { %v3054_v8 = vadd.f32 1.0, %v7073_v11 }
 0xeb3   : > { %7074 = vrcp.f32 %v3054_v8  ;;  %v3066_v56 = vand.u32 2147483648, %v3054_v8  ;;  %vm3060_vm14 = vweird.f32 %v3054_v8  ;;  %v3064_v24 = vand.u32 2147483647, %v3054_v8 }
 0xeb4   : > { %7076 = vpow2.f32 %v6723_v50 }
 0xeb5   : > { %v3067_v36 = vor.u32 1.1754944e-38, %v3066_v56  ;;  %vm3065_vm12 = vcmp.eq.f32.partialorder %v3064_v24, 8.507059e+37  ;;  %v13294_v56 = vld [vmem:[#allocation15_spill] sm:$0xff] }
 0xeb9   : > { %v7075_v40 = vpop.eup %7074 }
 0xeba   : > { %v3056_v48 = vmul.f32 %v7075_v40, %v3054_v8  ;;  %vm3061_vm6 = vweird.f32 %v7075_v40  ;;  %v7077_v60 = vpop.eup %7076  ;;  %v13291_v8 = vld [vmem:[#allocation12_spill] sm:$0xff] }
 0xebb   : > { %vm3062_vm4 = vmor %vm3060_vm14, %vm3061_vm6  ;;  %v3432_v32 = vadd.f32 1.0, %v7077_v60  ;;  %v13297_v60 = vld [vmem:[#allocation17_spill] sm:$0xff]  ;;  %vm13305_vm6 = vcmask 1047559   ;;  %vm13306_vm14 = vcmask 130048  }
 0xebc   : > { %v3057_v7 = vsub.f32 1.0, %v3056_v48  ;;  %v13292_v48 = vld [vmem:[#allocation13_spill] sm:$0xff] }
 0xebd   : > { %7078 = vrcp.f32 %v3432_v32  ;;  %v3444_v31 = vand.u32 2147483648, %v3432_v32  ;;  %vm3438_vm7 = vweird.f32 %v3432_v32  ;;  %v3442_v22 = vand.u32 2147483647, %v3432_v32 }
 0xebe   : > { %v3058_v55 = vmul.f32 %v7075_v40, %v3057_v7 }
 0xebf   : > { %v3445_v18 = vor.u32 1.1754944e-38, %v3444_v31  ;;  %vm3443_vm11 = vcmp.eq.f32.partialorder %v3442_v22, 8.507059e+37 }
 0xec0   : > { %v3059_v15 = vadd.f32 %v7075_v40, %v3058_v55  ;;  %v13293_v55 = vld [vmem:[#allocation14_spill] sm:$0xff] }
 0xec2   : > { %v3063_v30 = vsel %vm3062_vm4, %v7075_v40, %v3059_v15  ;;  %vm13315_vm4 = vmmov %vm13299_vm9 }
 0xec3   : > { %v3068_v34 = vsel %vm3065_vm12, %v3067_v36, %v3063_v30  ;;  %v7079_v42 = vpop.eup %7078  ;;  %v13295_v30 = vld [vmem:[#allocation11_spill] sm:$0xff]  ;;  %vm13316_vm12 = vmmov %vm13300_vm13 }
 0xec4   : > { %v3434_v27 = vmul.f32 %v7079_v42, %v3432_v32  ;;  %vm3439_vm5 = vweird.f32 %v7079_v42  ;;  %v3071_v6 = vmul.f32 %v3068_v34, %v9695_v53 }
 0xec5   : > { %vm3440_vm8 = vmor %vm3438_vm7, %vm3439_vm5 }
 0xec6   : > { %v3435_v9 = vsub.f32 1.0, %v3434_v27  ;;  %vm13317_vm5 = vmmov %vm13301_vm1 }
 0xec7   : > { %vm13318_vm7 = vmmov %vm13302_vm0 }
 0xec8   : > { %v3436_v61 = vmul.f32 %v7079_v42, %v3435_v9 }
 0xeca   : > { %v3437_v52 = vadd.f32 %v7079_v42, %v3436_v61 }
 0xecc   : > { %v3441_v1 = vsel %vm3440_vm8, %v7079_v42, %v3437_v52  ;;  %v13298_v42 = vld [vmem:[#allocation18_spill] sm:$0xff]  ;;  %vm13319_vm8 = vmmov %vm13303_vm3 }
 0xecd   : > { %v3446_v26 = vsel %vm3443_vm11, %v3445_v18, %v3441_v1  ;;  %vm13320_vm11 = vmmov %vm13304_vm15 }
 0xece   : > { %v3449_v4 = vmul.f32 %v3446_v26, %v9691_v2 }
 0xee8   : > { %v3074_v39 = vpop.permute.xlu2 %3073 }
 0xee9   : > { %v3076_v16 = vmul.f32 %v3074_v39, %v3068_v34  ;;  %v13296_v39 = vld [vmem:[#allocation16_spill] sm:$0xff] }
 0xeeb   : > { %3078 = vrot.lane.b32.xlu0 %v3076_v16, %s7537_s13 }
 0xf22   : > { %v3452_v3 = vpop.permute.xlu0 %3451 }
 0xf23   : > { %v3454_v17 = vmul.f32 %v3452_v3, %v3446_v26 }
 0xf25   : > { %3456 = vrot.lane.b32.xlu1 %v3454_v17, %s7537_s13 }
 0xf5d   : > { %v3079_v0 = vpop.permute.xlu0 %3078 }
 0xf5e   : > { %v10329_v14 = vadd.f32 %v3079_v0, %v3071_v6 }
 0xf60   : > { %7080 = vtanh.f32 %v10329_v14  ;;  %v3467_v37 = vmul.f32 %v10329_v14, %v13073_v5 }
 0xf62   : > { %3469 = vrot.lane.b32.xlu1 %v3467_v37, %s7536_s12 }
 0xf66   : > { %v7081_v43 = vpop.eup %7080 }
 0xf67   : > { %3084 = vrot.lane.b32.xlu2 %v7081_v43, %s7536_s12 }
 0xf97   : > { %v3457_v12 = vpop.permute.xlu1 %3456 }
 0xf98   : > { %v10337_v13 = vadd.f32 %v3457_v12, %v3449_v4 }
 0xf9a   : > { %7082 = vtanh.f32 %v10337_v13  ;;  %v3845_v53 = vmul.f32 %v10337_v13, %v13073_v5 }
 0xf9c   : > { %3847 = vrot.lane.b32.xlu2 %v3845_v53, %s7536_s12 }
 0xfa0   : > { %v7083_v57 = vpop.eup %7082 }
 0xfa1   : > { %3462 = vrot.lane.b32.xlu0 %v7083_v57, %s7536_s12 }
 0xfc1   : > { %v3085_v29 = vpop.permute.xlu2 %3084 }
 0xfc2   : > { %v10344_v46 = vmul.f32 %v3085_v29, %v3068_v34 }
 0xfc4   : > { %13286 = vst [vmem:[#allocation24_spill] sm:$0xff] %v10344_v46  ;;  %v3466_v20 = vmul.f32 %v10344_v46, %v13287_v47 }
 0xfd4   : > { %v3470_v2 = vpop.permute.xlu1 %3469 }
 0xfd5   : > { %v3472_v10 = vadd.f32 %v3470_v2, %v3466_v20 }
 0xfd7   : > { %3474 = vrot.lane.b32.xlu0 %v3472_v10, %s7537_s13  ;;  %v13307_v10 = vld [vmem:[#allocation4_spill] sm:$0xff] }
 0xff6   : > { %v3848_v62 = vpop.permute.xlu2 %3847 }
0x1013   : > { %v3463_v19 = vpop.permute.xlu0 %3462 }
0x1014   : > { %v10349_v58 = vmul.f32 %v3463_v19, %v3446_v26 }
0x1016   : > { %13288 = vst [vmem:[#allocation25_spill] sm:$0xff] %v10349_v58  ;;  %v3844_v23 = vmul.f32 %v10349_v58, %v13287_v47 }
0x1018   : > { %v3850_v44 = vadd.f32 %v3848_v62, %v3844_v23  ;;  %v13308_v23 = vld [vmem:[#allocation5_spill] sm:$0xff] }
0x101a   : > { %3852 = vrot.lane.b32.xlu1 %v3850_v44, %s7537_s13  ;;  %v13309_v44 = vld [vmem:[#allocation6_spill] sm:$0xff] }
0x1049   : > { %v3475_v49 = vpop.permute.xlu0 %3474 }
0x104a   : > { %v3477_v41 = vsel %vm13289_vm10, %v3475_v49, 0.0  ;;  %vm13321_vm10 = vmmov %vm13305_vm6 }
0x104b   : > { %3478 = vadd.xlane.f32.xlu2 %v3477_v41  ;;  %v13310_v41 = vld [vmem:[#allocation7_spill] sm:$0xff] }
0x108c   : > { %v3853_v59 = vpop.permute.xlu1 %3852 }
0x108d   : > { %v3855_v51 = vsel %vm13290_vm2, %v3853_v59, 0.0  ;;  %vm13322_vm2 = vmmov %vm13306_vm14 }
0x108e   : > { %3856 = vadd.xlane.f32.xlu0 %v3855_v51  ;;  %v13311_v51 = vld [vmem:[#allocation3_spill] sm:$0xff] }
0x10be   : > { %v3479_v21 = vpop.xlane.xlu2 %3478 }
0x10bf   : > { %v3481_v54 = vrot.slane %v3479_v21, 1  ;;  %v3482_v38 = vrot.slane %v3479_v21, 2  ;;  %v3483_v63 = vrot.slane %v3479_v21, 3  ;;  %v3484_v45 = vrot.slane %v3479_v21, 4 }
0x10c0   : > { %v3485_v25 = vrot.slane %v3479_v21, 5  ;;  %v3486_v33 = vrot.slane %v3479_v21, 6  ;;  %v3487_v11 = vrot.slane %v3479_v21, 7  ;;  %v10369_v36 = vadd.f32 %v3479_v21, %v13295_v30 }
0x10c1   : > { %v10357_v40 = vadd.f32 %v3481_v54, %v13291_v8  ;;  %v10360_v7 = vadd.f32 %v3482_v38, %v13292_v48  ;;  %v10363_v15 = vadd.f32 %v3483_v63, %v13293_v55  ;;  %v10366_v24 = vadd.f32 %v3484_v45, %v13294_v56  ;;  %v13312_v54 = vld [vmem:[#allocation8_spill] sm:$0xff] }
0x10c2   : > { %v10372_v34 = vadd.f32 %v3485_v25, %v13296_v39  ;;  %v10377_v32 = vadd.f32 %v3486_v33, %v13297_v60  ;;  %v10380_v27 = vadd.f32 %v3487_v11, %v13298_v42  ;;  %v13313_v25 = vld [vmem:[#allocation9_spill] sm:$0xff]  ;;  %v13314_v11 = vld [vmem:[#allocation10_spill] sm:$0xff] }
0x10c3   : > { %v3512_v16 = vrot.slane %v10357_v40, 7  ;;  %v3514_v50 = vrot.slane %v10360_v7, 6  ;;  %v3516_v61 = vrot.slane %v10363_v15, 5  ;;  %v3518_v31 = vrot.slane %v10366_v24, 4 }
0x10c4   : > { %v3520_v1 = vrot.slane %v10372_v34, 3  ;;  %v3522_v3 = vrot.slane %v10377_v32, 2  ;;  %v3524_v17 = vrot.slane %v10380_v27, 1 }
0x10c5   : > { %v3513_v9 = vsel %vm13299_vm9, %v3512_v16, %v10369_v36  ;;  %vm13323_vm9 = vmmov %vm13315_vm4 }
0x10c6   : > { %v3515_v52 = vsel %vm13300_vm13, %v3514_v50, %v3513_v9  ;;  %vm13324_vm13 = vmmov %vm13316_vm12 }
0x10c7   : > { %v3517_v22 = vsel %vm13301_vm1, %v3516_v61, %v3515_v52 }
0x10c8   : > { %v3519_v18 = vsel %vm13302_vm0, %v3518_v31, %v3517_v22 }
0x10c9   : > { %v3521_v26 = vsel %vm13303_vm3, %v3520_v1, %v3519_v18 }
0x10ca   : > { %v3523_v6 = vsel %vm13304_vm15, %v3522_v3, %v3521_v26  ;;  %vm13325_vm15 = vmmov %vm13320_vm11 }
0x10cb   : > { %v3525_v0 = vsel %vm13305_vm6, %v3524_v17, %v3523_v6 }
0x10cc   : > { %v3527_v37 = vsel %vm13306_vm14, %v3525_v0, -inf  ;;  %vm13326_vm14 = vmmov %vm13322_vm2 }
0x10cd   : > { %3528 = vmax.xlane.f32.xlu1 %v3527_v37 }
0x1101   : > { %v3857_v43 = vpop.xlane.xlu0 %3856 }
0x1102   : > { %v3859_v4 = vrot.slane %v3857_v43, 1  ;;  %v3860_v12 = vrot.slane %v3857_v43, 2  ;;  %v3861_v53 = vrot.slane %v3857_v43, 3  ;;  %v3862_v57 = vrot.slane %v3857_v43, 4 }
0x1103   : > { %v3863_v29 = vrot.slane %v3857_v43, 5  ;;  %v3864_v20 = vrot.slane %v3857_v43, 6  ;;  %v3865_v2 = vrot.slane %v3857_v43, 7  ;;  %v10409_v21 = vadd.f32 %v3857_v43, %v13311_v51 }
0x1104   : > { %v10397_v19 = vadd.f32 %v3859_v4, %v13307_v10  ;;  %v10400_v62 = vadd.f32 %v3860_v12, %v13308_v23  ;;  %v10403_v49 = vadd.f32 %v3861_v53, %v13309_v44  ;;  %v10406_v59 = vadd.f32 %v3862_v57, %v13310_v41 }
0x1105   : > { %v10412_v38 = vadd.f32 %v3863_v29, %v13312_v54  ;;  %v10417_v33 = vadd.f32 %v3864_v20, %v13313_v25  ;;  %v10420_v16 = vadd.f32 %v3865_v2, %v13314_v11 }
0x1106   : > { %v3890_v63 = vrot.slane %v10397_v19, 7  ;;  %v3892_v45 = vrot.slane %v10400_v62, 6  ;;  %v3894_v9 = vrot.slane %v10403_v49, 5  ;;  %v3896_v52 = vrot.slane %v10406_v59, 4 }
0x1107   : > { %v3898_v22 = vrot.slane %v10412_v38, 3  ;;  %v3900_v18 = vrot.slane %v10417_v33, 2  ;;  %v3902_v26 = vrot.slane %v10420_v16, 1 }
0x1108   : > { %v3891_v50 = vsel %vm13315_vm4, %v3890_v63, %v10409_v21 }
0x1109   : > { %v3893_v61 = vsel %vm13316_vm12, %v3892_v45, %v3891_v50 }
0x110a   : > { %v3895_v31 = vsel %vm13317_vm5, %v3894_v9, %v3893_v61  ;;  %vm13327_vm5 = vmmov %vm13301_vm1 }
0x110b   : > { %v3897_v1 = vsel %vm13318_vm7, %v3896_v52, %v3895_v31  ;;  %vm13328_vm7 = vmmov %vm13302_vm0 }
0x110c   : > { %v3899_v3 = vsel %vm13319_vm8, %v3898_v22, %v3897_v1  ;;  %vm13329_vm8 = vmmov %vm13303_vm3 }
0x110d   : > { %v3901_v17 = vsel %vm13320_vm11, %v3900_v18, %v3899_v3 }
0x110e   : > { %v3903_v6 = vsel %vm13321_vm10, %v3902_v26, %v3901_v17  ;;  %vm13330_vm10 = vmmov %vm13305_vm6 }
0x110f   : > { %v3905_v0 = vsel %vm13322_vm2, %v3903_v6, -inf }
0x1110   : > { %3906 = vmax.xlane.f32.xlu2 %v3905_v0 }
0x1128   : > { %3780 = vrot.lane.b32.xlu2 %v10344_v46, %s7539_s20 }
0x1140   : > { %v3529_v37 = vpop.xlane.xlu1 %3528 }
0x1141   : > { %v3531_v43 = vrot.slane %v3529_v37, 1  ;;  %v3532_v4 = vrot.slane %v3529_v37, 2  ;;  %v3533_v12 = vrot.slane %v3529_v37, 3  ;;  %v3534_v53 = vrot.slane %v3529_v37, 4 }
0x1142   : > { %v3535_v57 = vrot.slane %v3529_v37, 5  ;;  %v3546_v29 = vsub.f32 %v10369_v36, %v3529_v37  ;;  %v3536_v20 = vrot.slane %v3529_v37, 6  ;;  %v3537_v2 = vrot.slane %v3529_v37, 7 }
0x1143   : > { %v3547_v63 = vsub.f32 %v10357_v40, %v3531_v43  ;;  %v3548_v45 = vsub.f32 %v10360_v7, %v3532_v4  ;;  %v3549_v50 = vsub.f32 %v10363_v15, %v3533_v12  ;;  %v3550_v9 = vsub.f32 %v10366_v24, %v3534_v53 }
0x1144   : > { %v3554_v61 = vmul.f32 1.442695, %v3546_v29  ;;  %v3551_v52 = vsub.f32 %v10372_v34, %v3535_v57  ;;  %v3552_v31 = vsub.f32 %v10377_v32, %v3536_v20  ;;  %v3553_v36 = vsub.f32 %v10380_v27, %v3537_v2 }
0x1145   : > { %v3556_v22 = vmul.f32 1.442695, %v3547_v63  ;;  %v3558_v1 = vmul.f32 1.442695, %v3548_v45  ;;  %v3560_v18 = vmul.f32 1.442695, %v3549_v50 }
0x1146   : > { %7084 = vpow2.f32 %v3554_v61  ;;  %v3562_v3 = vmul.f32 1.442695, %v3550_v9  ;;  %v3564_v40 = vmul.f32 1.442695, %v3551_v52  ;;  %v3566_v7 = vmul.f32 1.442695, %v3552_v31 }
0x1147   : > { %7086 = vpow2.f32 %v3556_v22  ;;  %v3568_v15 = vmul.f32 1.442695, %v3553_v36 }
0x1148   : > { %7088 = vpow2.f32 %v3558_v1 }
0x1149   : > { %7090 = vpow2.f32 %v3560_v18 }
0x114a   : > { %7092 = vpow2.f32 %v3562_v3 }
0x114b   : > { %7094 = vpow2.f32 %v3564_v40 }
0x114c   : > { %v10446_v24 = vpop.eup %7084  ;;  %7096 = vpow2.f32 %v3566_v7 }
0x114d   : > { %v10448_v34 = vpop.eup %7086  ;;  %7098 = vpow2.f32 %v3568_v15 }
0x114e   : > { %v10450_v32 = vpop.eup %7088  ;;  %v3578_v27 = vrot.slane %v10448_v34, 7 }
0x114f   : > { %v10453_v26 = vpop.eup %7090  ;;  %v3580_v17 = vrot.slane %v10450_v32, 6 }
0x1150   : > { %v10456_v6 = vpop.eup %7092  ;;  %v3579_v0 = vsel %vm13323_vm9, %v3578_v27, %v10446_v24  ;;  %v3582_v37 = vrot.slane %v10453_v26, 5 }
0x1151   : > { %v10461_v43 = vpop.eup %7094  ;;  %v3581_v4 = vsel %vm13324_vm13, %v3580_v17, %v3579_v0  ;;  %v3584_v12 = vrot.slane %v10456_v6, 4 }
0x1152   : > { %v10465_v53 = vpop.eup %7096  ;;  %v3583_v57 = vsel %vm13301_vm1, %v3582_v37, %v3581_v4  ;;  %v3586_v29 = vrot.slane %v10461_v43, 3 }
0x1153   : > { %v10469_v20 = vpop.eup %7098  ;;  %v3585_v2 = vsel %vm13302_vm0, %v3584_v12, %v3583_v57  ;;  %v3588_v63 = vrot.slane %v10465_v53, 2 }
0x1154   : > { %v3587_v45 = vsel %vm13303_vm3, %v3586_v29, %v3585_v2  ;;  %v3590_v50 = vrot.slane %v10469_v20, 1 }
0x1155   : > { %v3589_v9 = vsel %vm13325_vm15, %v3588_v63, %v3587_v45 }
0x1156   : > { %v3591_v61 = vsel %vm13305_vm6, %v3590_v50, %v3589_v9 }
0x1157   : > { %v3593_v52 = vsel %vm13326_vm14, %v3591_v61, 0.0 }
0x1158   : > { %3594 = vadd.xlane.f32.xlu0 %v3593_v52 }
0x116c   : > { %4158 = vrot.lane.b32.xlu0 %v10349_v58, %s7539_s20 }
0x1183   : > { %v3907_v31 = vpop.xlane.xlu2 %3906 }
0x1184   : > { %v3909_v22 = vrot.slane %v3907_v31, 1  ;;  %v3910_v1 = vrot.slane %v3907_v31, 2  ;;  %v3911_v18 = vrot.slane %v3907_v31, 3  ;;  %v3912_v36 = vrot.slane %v3907_v31, 4 }
0x1185   : > { %v3913_v3 = vrot.slane %v3907_v31, 5  ;;  %v3924_v40 = vsub.f32 %v10409_v21, %v3907_v31  ;;  %v3914_v7 = vrot.slane %v3907_v31, 6  ;;  %v3915_v15 = vrot.slane %v3907_v31, 7 }
0x1186   : > { %v3925_v27 = vsub.f32 %v10397_v19, %v3909_v22  ;;  %v3926_v17 = vsub.f32 %v10400_v62, %v3910_v1  ;;  %v3927_v0 = vsub.f32 %v10403_v49, %v3911_v18  ;;  %v3928_v37 = vsub.f32 %v10406_v59, %v3912_v36 }
0x1187   : > { %v3932_v4 = vmul.f32 1.442695, %v3924_v40  ;;  %v3929_v12 = vsub.f32 %v10412_v38, %v3913_v3  ;;  %v3930_v57 = vsub.f32 %v10417_v33, %v3914_v7  ;;  %v3931_v21 = vsub.f32 %v10420_v16, %v3915_v15 }
0x1188   : > { %v3934_v29 = vmul.f32 1.442695, %v3925_v27  ;;  %v3936_v2 = vmul.f32 1.442695, %v3926_v17  ;;  %v3938_v63 = vmul.f32 1.442695, %v3927_v0 }
0x1189   : > { %7100 = vpow2.f32 %v3932_v4  ;;  %v3940_v45 = vmul.f32 1.442695, %v3928_v37  ;;  %v3942_v19 = vmul.f32 1.442695, %v3929_v12  ;;  %v3944_v62 = vmul.f32 1.442695, %v3930_v57 }
0x118a   : > { %7102 = vpow2.f32 %v3934_v29  ;;  %v3946_v49 = vmul.f32 1.442695, %v3931_v21 }
0x118b   : > { %7104 = vpow2.f32 %v3936_v2 }
0x118c   : > { %7106 = vpow2.f32 %v3938_v63 }
0x118d   : > { %7108 = vpow2.f32 %v3940_v45 }
0x118e   : > { %7110 = vpow2.f32 %v3942_v19 }
0x118f   : > { %v10488_v59 = vpop.eup %7100  ;;  %7112 = vpow2.f32 %v3944_v62 }
0x1190   : > { %v10490_v38 = vpop.eup %7102  ;;  %7114 = vpow2.f32 %v3946_v49 }
0x1191   : > { %v10492_v33 = vpop.eup %7104  ;;  %v3956_v16 = vrot.slane %v10490_v38, 7 }
0x1192   : > { %v10495_v50 = vpop.eup %7106  ;;  %v3958_v9 = vrot.slane %v10492_v33, 6 }
0x1193   : > { %v10498_v61 = vpop.eup %7108  ;;  %v3957_v52 = vsel %vm13315_vm4, %v3956_v16, %v10488_v59  ;;  %v3960_v31 = vrot.slane %v10495_v50, 5 }
0x1194   : > { %v10503_v22 = vpop.eup %7110  ;;  %v3959_v1 = vsel %vm13316_vm12, %v3958_v9, %v3957_v52  ;;  %v3962_v18 = vrot.slane %v10498_v61, 4 }
0x1195   : > { %v10507_v36 = vpop.eup %7112  ;;  %v3961_v3 = vsel %vm13327_vm5, %v3960_v31, %v3959_v1  ;;  %v3964_v40 = vrot.slane %v10503_v22, 3 }
0x1196   : > { %v10511_v7 = vpop.eup %7114  ;;  %v3963_v15 = vsel %vm13328_vm7, %v3962_v18, %v3961_v3  ;;  %v3966_v27 = vrot.slane %v10507_v36, 2 }
0x1197   : > { %v3965_v17 = vsel %vm13329_vm8, %v3964_v40, %v3963_v15  ;;  %v3968_v0 = vrot.slane %v10511_v7, 1 }
0x1198   : > { %v3967_v37 = vsel %vm13320_vm11, %v3966_v27, %v3965_v17 }
0x1199   : > { %v3969_v4 = vsel %vm13330_vm10, %v3968_v0, %v3967_v37 }
0x119a   : > { %v3971_v12 = vsel %vm13322_vm2, %v3969_v4, 0.0 }
0x119b   : > { %3972 = vadd.xlane.f32.xlu1 %v3971_v12 }
0x11cb   : > { %v3595_v57 = vpop.xlane.xlu0 %3594 }
0x11cc   : > { %v10520_v29 = vrot.slane %v3595_v57, 1  ;;  %v10522_v2 = vrot.slane %v3595_v57, 2  ;;  %7116 = vrcp.f32 %v3595_v57  ;;  %v10524_v63 = vrot.slane %v3595_v57, 3 }
0x11cd   : > { %v10528_v21 = vrot.slane %v3595_v57, 4  ;;  %v3623_v45 = vand.u32 2147483648, %v3595_v57  ;;  %v10534_v49 = vrot.slane %v3595_v57, 5  ;;  %v10536_v16 = vrot.slane %v3595_v57, 6 }
0x11ce   : > { %7118 = vrcp.f32 %v10520_v29  ;;  %v3638_v19 = vand.u32 2147483648, %v10520_v29  ;;  %v10538_v9 = vrot.slane %v3595_v57, 7  ;;  %v3621_v52 = vand.u32 2147483647, %v3595_v57 }
0x11cf   : > { %7120 = vrcp.f32 %v10522_v2  ;;  %v3636_v1 = vand.u32 2147483647, %v10520_v29  ;;  %v3653_v18 = vand.u32 2147483648, %v10522_v2  ;;  %vm3617_vm9 = vweird.f32 %v3595_v57 }
0x11d0   : > { %7122 = vrcp.f32 %v10524_v63  ;;  %v3624_v40 = vor.u32 1.1754944e-38, %v3623_v45  ;;  %vm3632_vm13 = vweird.f32 %v10520_v29  ;;  %v3668_v15 = vand.u32 2147483648, %v10524_v63 }
0x11d1   : > { %7124 = vrcp.f32 %v10528_v21  ;;  %v3639_v37 = vor.u32 1.1754944e-38, %v3638_v19  ;;  %vm3647_vm1 = vweird.f32 %v10522_v2  ;;  %v3651_v4 = vand.u32 2147483647, %v10522_v2 }
0x11d2   : > { %v10532_v62 = vpop.eup %7116  ;;  %vm10555_vm3 = vcmp.eq.f32.partialorder %v3621_v52, 8.507059e+37  ;;  %vm3662_vm15 = vweird.f32 %v10524_v63  ;;  %7126 = vrcp.f32 %v10534_v49  ;;  %vm10567_vm6 = vcmp.eq.f32.partialorder %v3636_v1, 8.507059e+37 }
0x11d3   : > { %v3613_v31 = vmul.f32 %v10532_v62, %v3595_v57  ;;  %vm3618_vm0 = vweird.f32 %v10532_v62  ;;  %v3654_v52 = vor.u32 1.1754944e-38, %v3653_v18  ;;  %v3681_v35 = vand.u32 2147483647, %v10528_v21 }
0x11d4   : > { %v10544_v3 = vpop.eup %7118  ;;  %v3669_v39 = vor.u32 1.1754944e-38, %v3668_v15  ;;  %vm3677_vm14 = vweird.f32 %v10528_v21  ;;  %vm10578_vm12 = vcmp.eq.f32.partialorder %v3651_v4, 8.507059e+37  ;;  %7128 = vrcp.f32 %v10536_v16  ;;  %vm10593_vm7 = vmor %vm3617_vm9, %vm3618_vm0 }
0x11d5   : > { %v10548_v27 = vpop.eup %7120  ;;  %v3614_v17 = vsub.f32 1.0, %v3613_v31  ;;  %v3628_v0 = vmul.f32 %v10544_v3, %v10520_v29  ;;  %v3666_v31 = vand.u32 2147483647, %v10524_v63  ;;  %vm3633_vm4 = vweird.f32 %v10544_v3 }
0x11d6   : > { %v3643_v45 = vmul.f32 %v10548_v27, %v10522_v2  ;;  %v10564_v19 = vpop.eup %7122  ;;  %vm3648_vm8 = vweird.f32 %v10548_v27  ;;  %vm10600_vm10 = vcmp.eq.f32.partialorder %v3681_v35, 8.507059e+37  ;;  %vm10611_vm2 = vmor %vm3632_vm13, %vm3633_vm4  ;;  %vm3692_vm0 = vweird.f32 %v10534_v49 }
0x11d7   : > { %v3615_v58 = vmul.f32 %v10532_v62, %v3614_v17  ;;  %v3629_v46 = vsub.f32 1.0, %v3628_v0  ;;  %v3658_v60 = vmul.f32 %v10564_v19, %v10524_v63  ;;  %v7125_v56 = vpop.eup %7124  ;;  %vm10584_vm5 = vcmp.eq.f32.partialorder %v3666_v31, 8.507059e+37  ;;  %vm10625_vm9 = vmor %vm3647_vm1, %vm3648_vm8 }
0x11d8   : > { %v3644_v42 = vsub.f32 1.0, %v3643_v45  ;;  %v3673_v45 = vmul.f32 %v7125_v56, %v10528_v21  ;;  %vm3663_vm11 = vweird.f32 %v10564_v19  ;;  %vm3678_vm13 = vweird.f32 %v7125_v56 }
0x11d9   : > { %v3616_v30 = vadd.f32 %v10532_v62, %v3615_v58  ;;  %v3630_v17 = vmul.f32 %v10544_v3, %v3629_v46  ;;  %v3659_v0 = vsub.f32 1.0, %v3658_v60  ;;  %v3683_v58 = vand.u32 2147483648, %v10528_v21  ;;  %vm10639_vm1 = vmor %vm3662_vm15, %vm3663_vm11 }
0x11da   : > { %v3645_v18 = vmul.f32 %v10548_v27, %v3644_v42  ;;  %v7127_v42 = vpop.eup %7126  ;;  %v3674_v55 = vsub.f32 1.0, %v3673_v45  ;;  %7130 = vrcp.f32 %v10538_v9  ;;  %vm13351_vm8 = vcmask 1041409  }
0x11db   : > { %v3631_v4 = vadd.f32 %v10544_v3, %v3630_v17  ;;  %v3620_v31 = vsel %vm10593_vm7, %v10532_v62, %v3616_v30  ;;  %v3660_v35 = vmul.f32 %v10564_v19, %v3659_v0  ;;  %v3688_v46 = vmul.f32 %v7127_v42, %v10534_v49  ;;  %v7129_v8 = vpop.eup %7128 }
0x11dc   : > { %v3646_v17 = vadd.f32 %v10548_v27, %v3645_v18  ;;  %v3696_v30 = vand.u32 2147483647, %v10534_v49  ;;  %v3698_v62 = vand.u32 2147483648, %v10534_v49  ;;  %v3675_v0 = vmul.f32 %v7125_v56, %v3674_v55  ;;  %v7467_v49 = vld [vmem:[%s7614_s18 + $0x8] sm:$0xff] }
0x11dd   : > { %v3635_v48 = vsel %vm10611_vm2, %v10544_v3, %v3631_v4  ;;  %v3661_v18 = vadd.f32 %v10564_v19, %v3660_v35  ;;  %v3684_v45 = vor.u32 1.1754944e-38, %v3683_v58  ;;  %v3625_v3 = vsel %vm10555_vm3, %v3624_v40, %v3620_v31  ;;  %vm3679_vm3 = vmor %vm3677_vm14, %vm3678_vm13 }
0x11de   : > { %v3650_v4 = vsel %vm10625_vm9, %v10548_v27, %v3646_v17  ;;  %v3689_v57 = vsub.f32 1.0, %v3688_v46  ;;  %v3640_v55 = vsel %vm10567_vm6, %v3639_v37, %v3635_v48  ;;  %v3676_v12 = vadd.f32 %v7125_v56, %v3675_v0  ;;  %v7470_v0 = vld [vmem:[%s7614_s18 + $0x18] sm:$0xff] }
0x11df   : > { %v3665_v40 = vsel %vm10639_vm1, %v10564_v19, %v3661_v18  ;;  %v3703_v27 = vmul.f32 %v7129_v8, %v10536_v16  ;;  %vm3693_vm15 = vweird.f32 %v7127_v42  ;;  %vm10652_vm4 = vcmp.eq.f32.partialorder %v3696_v30, 8.507059e+37  ;;  %v7468_v30 = vld [vmem:[%s7614_s18 + $0x10] sm:$0xff] }
0x11e0   : > { %v3690_v63 = vmul.f32 %v7127_v42, %v3689_v57  ;;  %v3699_v31 = vor.u32 1.1754944e-38, %v3698_v62  ;;  %v3626_v28 = vmul.f32 %v10446_v24, %v3625_v3  ;;  %v3655_v48 = vsel %vm10578_vm12, %v3654_v52, %v3650_v4  ;;  %vm3694_vm6 = vmor %vm3692_vm0, %vm3693_vm15  ;;  %v7471_v4 = vld [vmem:[%s7614_s18 + $0x20] sm:$0xff]  ;;  %v7131_v57 = vpop.eup %7130 }
0x11e1   : > { %v3680_v37 = vsel %vm3679_vm3, %v7125_v56, %v3676_v12  ;;  %v3704_v19 = vsub.f32 1.0, %v3703_v27  ;;  %v3641_v17 = vmul.f32 %v10448_v34, %v3640_v55  ;;  %v3670_v21 = vsel %vm10584_vm5, %v3669_v39, %v3665_v40 }
0x11e2   : > { %v3691_v35 = vadd.f32 %v7127_v42, %v3690_v63  ;;  %v3685_v46 = vsel %vm10600_vm10, %v3684_v45, %v3680_v37  ;;  %vm3708_vm14 = vweird.f32 %v7129_v8  ;;  %v3713_v56 = vand.u32 2147483648, %v10536_v16 }
0x11e3   : > { %v3705_v24 = vmul.f32 %v7129_v8, %v3704_v19  ;;  %v3656_v34 = vmul.f32 %v10450_v32, %v3655_v48  ;;  %vm3707_vm12 = vweird.f32 %v10536_v16  ;;  %v3711_v39 = vand.u32 2147483647, %v10536_v16  ;;  %v7469_v32 = vld [vmem:[%s7614_s18] sm:$0xff] }
0x11e4   : > { %v3695_v52 = vsel %vm3694_vm6, %v7127_v42, %v3691_v35  ;;  %v3733_v60 = vrot.slane %v7467_v49, 4  ;;  %v3734_v62 = vrot.slane %v7468_v30, 4  ;;  %v3671_v29 = vmul.f32 %v10453_v26, %v3670_v21  ;;  %vm3709_vm5 = vmor %vm3707_vm12, %vm3708_vm14 }
0x11e5   : > { %v3700_v1 = vsel %vm10652_vm4, %v3699_v31, %v3695_v52  ;;  %v3706_v15 = vadd.f32 %v7129_v8, %v3705_v24  ;;  %v3686_v18 = vmul.f32 %v10456_v6, %v3685_v46  ;;  %v3732_v42 = vrot.slane %v7469_v32, 4  ;;  %v7472_v6 = vld [vmem:[%s7614_s18 + $0x28] sm:$0xff]  ;;  %v7473_v46 = vld [vmem:[%s7614_s18 + $0x30] sm:$0xff] }
0x11e6   : > { %v3735_v45 = vrot.slane %v7470_v0, 4  ;;  %v3714_v3 = vor.u32 1.1754944e-38, %v3713_v56  ;;  %v3736_v2 = vrot.slane %v7471_v4, 4  ;;  %v3701_v55 = vmul.f32 %v10461_v43, %v3700_v1  ;;  %v3781_v4 = vpop.permute.xlu2 %3780 }
0x11e7   : > { %v3710_v16 = vsel %vm3709_vm5, %v7129_v8, %v3706_v15  ;;  %vm3712_vm7 = vcmp.eq.f32.partialorder %v3711_v39, 8.507059e+37  ;;  %v3749_v40 = vmul.f32 %v3733_v60, %v3641_v17  ;;  %v3718_v26 = vmul.f32 %v7131_v57, %v10538_v9 }
0x11e8   : > { %v3715_v12 = vsel %vm3712_vm7, %v3714_v3, %v3710_v16  ;;  %v3737_v27 = vrot.slane %v7472_v6, 4  ;;  %v3750_v63 = vmul.f32 %v3734_v62, %v3656_v34  ;;  %v3748_v58 = vmul.f32 %v3732_v42, %v3626_v28  ;;  %v7474_v62 = vld [vmem:[%s7614_s18 + $0x38] sm:$0xff] }
0x11e9   : > { %v3751_v31 = vmul.f32 %v3735_v45, %v3671_v29  ;;  %v3752_v48 = vmul.f32 %v3736_v2, %v3686_v18  ;;  %v3764_v37 = vrot.slane %v3749_v40, 7  ;;  %v3719_v8 = vsub.f32 1.0, %v3718_v26 }
0x11ea   : > { %v3726_v19 = vand.u32 2147483647, %v10538_v9  ;;  %v3728_v21 = vand.u32 2147483648, %v10538_v9  ;;  %v3766_v35 = vrot.slane %v3750_v63, 6  ;;  %v3716_v43 = vmul.f32 %v10465_v53, %v3715_v12 }
0x11eb   : > { %v3738_v17 = vrot.slane %v7473_v46, 4  ;;  %v3765_v24 = vsel %vm13351_vm8, %v3764_v37, %v3748_v58  ;;  %v3768_v56 = vrot.slane %v3751_v31, 5  ;;  %v3720_v52 = vmul.f32 %v7131_v57, %v3719_v8 }
0x11ec   : > { %vm3723_vm11 = vweird.f32 %v7131_v57  ;;  %v3753_v28 = vmul.f32 %v3737_v27, %v3701_v55  ;;  %vm13352_vm10 = vcmask 1042434   ;;  %vm13353_vm2 = vcmask 1043459  }
0x11ed   : > { %v3767_v34 = vsel %vm13352_vm10, %v3766_v35, %v3765_v24  ;;  %v3770_v1 = vrot.slane %v3752_v48, 4  ;;  %v3721_v15 = vadd.f32 %v7131_v57, %v3720_v52  ;;  %vm3722_vm9 = vweird.f32 %v10538_v9 }
0x11ee   : > { %v3769_v39 = vsel %vm13353_vm2, %v3768_v56, %v3767_v34  ;;  %vm3724_vm13 = vmor %vm3722_vm9, %vm3723_vm11  ;;  %v3729_v49 = vor.u32 1.1754944e-38, %v3728_v21  ;;  %v3754_v53 = vmul.f32 %v3738_v17, %v3716_v43  ;;  %vm13354_vm1 = vcmask 1044484  }
0x11ef   : > { %v3771_v60 = vsel %vm13354_vm1, %v3770_v1, %v3769_v39  ;;  %v3725_v30 = vsel %vm3724_vm13, %v7131_v57, %v3721_v15  ;;  %vm3727_vm0 = vcmp.eq.f32.partialorder %v3726_v19, 8.507059e+37  ;;  %v3739_v29 = vrot.slane %v7474_v62, 4 }
0x11f0   : > { %v3772_v18 = vrot.slane %v3753_v28, 3  ;;  %v3730_v32 = vsel %vm3727_vm0, %v3729_v49, %v3725_v30  ;;  %vm13355_vm3 = vcmask 1045509   ;;  %v3774_v45 = vrot.slane %v3754_v53, 2 }
0x11f1   : > { %v3731_v42 = vmul.f32 %v10469_v20, %v3730_v32  ;;  %vm13356_vm15 = vcmask 1046534   ;;  %vm13357_vm4 = vcmask 1047559   ;;  %vm13359_vm6 = vcmask 130048  }
0x11f2   : > { %v3773_v0 = vsel %vm13355_vm3, %v3772_v18, %v3771_v60  ;;  %vm13360_vm14 = vcmask 392192  }
0x11f3   : > { %v3755_v16 = vmul.f32 %v3739_v29, %v3731_v42  ;;  %v3775_v3 = vsel %vm13356_vm15, %v3774_v45, %v3773_v0 }
0x11f5   : > { %v3776_v9 = vrot.slane %v3755_v16, 1 }
0x11f7   : > { %v10697_v2 = vsel %vm13357_vm4, %v3776_v9, %v3775_v3 }
0x11f8   : > { %13358 = vst [vmem:[#allocation26_spill] sm:$0xff] %v10697_v2  ;;  %v3783_v57 = vsel %vm13359_vm6, %v10697_v2, %v3781_v4 }
0x11f9   : > { %6724 = vmatmul.msk.f32.vlgmr.msra.gmra.mxu0 %vm13360_vm14, %v3783_v57 }
0x120e   : > { %v3973_v55 = vpop.xlane.xlu1 %3972 }
0x120f   : > { %v10702_v40 = vrot.slane %v3973_v55, 1  ;;  %v10704_v20 = vrot.slane %v3973_v55, 2  ;;  %7132 = vrcp.f32 %v3973_v55  ;;  %v10706_v12 = vrot.slane %v3973_v55, 3 }
0x1210   : > { %v10710_v26 = vrot.slane %v3973_v55, 4  ;;  %v4001_v6 = vand.u32 2147483648, %v3973_v55  ;;  %v10716_v58 = vrot.slane %v3973_v55, 5  ;;  %v10718_v31 = vrot.slane %v3973_v55, 6 }
0x1211   : > { %7134 = vrcp.f32 %v10702_v40  ;;  %v4016_v27 = vand.u32 2147483648, %v10702_v40  ;;  %v10720_v48 = vrot.slane %v3973_v55, 7  ;;  %v3999_v37 = vand.u32 2147483647, %v3973_v55 }
0x1212   : > { %7136 = vrcp.f32 %v10704_v20  ;;  %v4014_v19 = vand.u32 2147483647, %v10702_v40  ;;  %v4031_v21 = vand.u32 2147483648, %v10704_v20  ;;  %vm3995_vm12 = vweird.f32 %v3973_v55 }
0x1213   : > { %7138 = vrcp.f32 %v10706_v12  ;;  %v4002_v43 = vor.u32 1.1754944e-38, %v4001_v6  ;;  %vm4010_vm5 = vweird.f32 %v10702_v40  ;;  %v4046_v46 = vand.u32 2147483648, %v10706_v12 }
0x1214   : > { %7140 = vrcp.f32 %v10710_v26  ;;  %v4017_v52 = vor.u32 1.1754944e-38, %v4016_v27  ;;  %vm4025_vm7 = vweird.f32 %v10704_v20  ;;  %v4029_v28 = vand.u32 2147483647, %v10704_v20 }
0x1215   : > { %v10714_v63 = vpop.eup %7132  ;;  %vm10737_vm11 = vcmp.eq.f32.partialorder %v3999_v37, 8.507059e+37  ;;  %vm4040_vm10 = vweird.f32 %v10706_v12  ;;  %v4044_v1 = vand.u32 2147483647, %v10706_v12  ;;  %7142 = vrcp.f32 %v10716_v58 }
0x1216   : > { %v3991_v8 = vmul.f32 %v10714_v63, %v3973_v55  ;;  %vm3996_vm8 = vweird.f32 %v10714_v63  ;;  %vm10749_vm2 = vcmp.eq.f32.partialorder %v4014_v19, 8.507059e+37  ;;  %v4032_v30 = vor.u32 1.1754944e-38, %v4031_v21 }
0x1217   : > { %v10726_v35 = vpop.eup %7134  ;;  %v4059_v62 = vand.u32 2147483647, %v10710_v26  ;;  %v4047_v32 = vor.u32 1.1754944e-38, %v4046_v46  ;;  %vm4055_vm9 = vweird.f32 %v10710_v26  ;;  %vm10760_vm1 = vcmp.eq.f32.partialorder %v4029_v28, 8.507059e+37  ;;  %vm10775_vm3 = vmor %vm3995_vm12, %vm3996_vm8 }
0x1218   : > { %v10730_v17 = vpop.eup %7136  ;;  %v3992_v24 = vsub.f32 1.0, %v3991_v8  ;;  %v4006_v56 = vmul.f32 %v10726_v35, %v10702_v40  ;;  %vm4011_vm13 = vweird.f32 %v10726_v35  ;;  %7144 = vrcp.f32 %v10718_v31 }
0x1219   : > { %v4021_v39 = vmul.f32 %v10730_v17, %v10704_v20  ;;  %v10746_v15 = vpop.eup %7138  ;;  %vm10766_vm0 = vcmp.eq.f32.partialorder %v4044_v1, 8.507059e+37  ;;  %v4061_v6 = vand.u32 2147483648, %v10710_v26  ;;  %vm4026_vm15 = vweird.f32 %v10730_v17  ;;  %vm10793_vm14 = vmor %vm4010_vm5, %vm4011_vm13 }
0x121a   : > { %v3993_v49 = vmul.f32 %v10714_v63, %v3992_v24  ;;  %v4007_v53 = vsub.f32 1.0, %v4006_v56  ;;  %v4036_v18 = vmul.f32 %v10746_v15, %v10706_v12  ;;  %v7141_v42 = vpop.eup %7140  ;;  %vm4041_vm4 = vweird.f32 %v10746_v15  ;;  %vm10807_vm12 = vmor %vm4025_vm7, %vm4026_vm15 }
0x121b   : > { %v4022_v29 = vsub.f32 1.0, %v4021_v39  ;;  %v4051_v57 = vmul.f32 %v7141_v42, %v10710_v26  ;;  %vm10782_vm6 = vcmp.eq.f32.partialorder %v4059_v62, 8.507059e+37  ;;  %v7143_v19 = vpop.eup %7142  ;;  %v4076_v1 = vand.u32 2147483648, %v10716_v58  ;;  %vm10821_vm7 = vmor %vm4040_vm10, %vm4041_vm4 }
0x121c   : > { %v3994_v0 = vadd.f32 %v10714_v63, %v3993_v49  ;;  %v4008_v45 = vmul.f32 %v10726_v35, %v4007_v53  ;;  %v4037_v9 = vsub.f32 1.0, %v4036_v18  ;;  %v4066_v39 = vmul.f32 %v7143_v19, %v10716_v58 }
0x121d   : > { %v4023_v3 = vmul.f32 %v10730_v17, %v4022_v29  ;;  %v4052_v56 = vsub.f32 1.0, %v4051_v57  ;;  %vm4056_vm5 = vweird.f32 %v7141_v42  ;;  %v4062_v62 = vor.u32 1.1754944e-38, %v4061_v6 }
0x121e   : > { %v4009_v37 = vadd.f32 %v10726_v35, %v4008_v45  ;;  %v3998_v21 = vsel %vm10775_vm3, %v10714_v63, %v3994_v0  ;;  %v4038_v24 = vmul.f32 %v10746_v15, %v4037_v9  ;;  %v4074_v63 = vand.u32 2147483647, %v10716_v58  ;;  %v7145_v29 = vpop.eup %7144 }
0x121f   : > { %v4024_v46 = vadd.f32 %v10730_v17, %v4023_v3  ;;  %v4053_v53 = vmul.f32 %v7141_v42, %v4052_v56  ;;  %v4067_v0 = vsub.f32 1.0, %v4066_v39  ;;  %vm4070_vm8 = vweird.f32 %v10716_v58  ;;  %v10856_v58 = vld [vmem:[%s7614_s18 + $0x48] sm:$0xff]  ;;  %v10887_v3 = vld [vmem:[%s7614_s18 + $0x70] sm:$0xff] }
0x1220   : > { %v4013_v28 = vsel %vm10793_vm14, %v10726_v35, %v4009_v37  ;;  %v4039_v49 = vadd.f32 %v10746_v15, %v4038_v24  ;;  %v4003_v35 = vsel %vm10737_vm11, %v4002_v43, %v3998_v21  ;;  %vm4057_vm11 = vmor %vm4055_vm9, %vm4056_vm5  ;;  %vm4071_vm10 = vweird.f32 %v7143_v19  ;;  %v10860_v21 = vld [vmem:[%s7614_s18 + $0x50] sm:$0xff]  ;;  %v10870_v24 = vld [vmem:[%s7614_s18 + $0x58] sm:$0xff] }
0x1221   : > { %v4028_v18 = vsel %vm10807_vm12, %v10730_v17, %v4024_v46  ;;  %v4018_v45 = vsel %vm10749_vm2, %v4017_v52, %v4013_v28  ;;  %v4054_v34 = vadd.f32 %v7141_v42, %v4053_v53  ;;  %v4081_v17 = vmul.f32 %v7145_v29, %v10718_v31  ;;  %vm4072_vm2 = vmor %vm4070_vm8, %vm4071_vm10 }
0x1222   : > { %v4043_v43 = vsel %vm10821_vm7, %v10746_v15, %v4039_v49  ;;  %v4068_v12 = vmul.f32 %v7143_v19, %v4067_v0  ;;  %vm10834_vm13 = vcmp.eq.f32.partialorder %v4074_v63, 8.507059e+37  ;;  %v4077_v9 = vor.u32 1.1754944e-38, %v4076_v1  ;;  %v10874_v63 = vld [vmem:[%s7614_s18 + $0x60] sm:$0xff] }
0x1223   : > { %v4004_v60 = vmul.f32 %v10488_v59, %v4003_v35  ;;  %v4033_v52 = vsel %vm10760_vm1, %v4032_v30, %v4028_v18  ;;  %v4058_v57 = vsel %vm4057_vm11, %v7141_v42, %v4054_v34  ;;  %v4082_v15 = vsub.f32 1.0, %v4081_v17 }
0x1224   : > { %v4019_v6 = vmul.f32 %v10490_v38, %v4018_v45  ;;  %v4048_v26 = vsel %vm10766_vm0, %v4047_v32, %v4043_v43  ;;  %v4069_v27 = vadd.f32 %v7143_v19, %v4068_v12  ;;  %7146 = vrcp.f32 %v10720_v48 }
0x1225   : > { %v4063_v37 = vsel %vm10782_vm6, %v4062_v62, %v4058_v57  ;;  %v4083_v59 = vmul.f32 %v7145_v29, %v4082_v15  ;;  %vm4086_vm9 = vweird.f32 %v7145_v29  ;;  %v4091_v30 = vand.u32 2147483648, %v10718_v31  ;;  %v10880_v62 = vld [vmem:[%s7614_s18 + $0x68] sm:$0xff] }
0x1226   : > { %v4034_v38 = vmul.f32 %v10492_v33, %v4033_v52  ;;  %v4073_v42 = vsel %vm4072_vm2, %v7143_v19, %v4069_v27  ;;  %vm4085_vm1 = vweird.f32 %v10718_v31  ;;  %v4089_v32 = vand.u32 2147483647, %v10718_v31  ;;  %v10866_v31 = vld [vmem:[%s7614_s18 + $0x40] sm:$0xff] }
0x1227   : > { %v4078_v16 = vsel %vm10834_vm13, %v4077_v9, %v4073_v42  ;;  %v4084_v4 = vadd.f32 %v7145_v29, %v4083_v59  ;;  %v4111_v8 = vrot.slane %v10856_v58, 4  ;;  %v4112_v55 = vrot.slane %v10860_v21, 4  ;;  %vm4087_vm0 = vmor %vm4085_vm1, %vm4086_vm9  ;;  %v10896_v42 = vld [vmem:[%s7614_s18 + $0x78] sm:$0xff] }
0x1228   : > { %v4049_v33 = vmul.f32 %v10495_v50, %v4048_v26  ;;  %v4064_v19 = vmul.f32 %v10498_v61, %v4063_v37  ;;  %v4110_v46 = vrot.slane %v10866_v31, 4  ;;  %v4113_v56 = vrot.slane %v10870_v24, 4 }
0x1229   : > { %v4088_v28 = vsel %vm4087_vm0, %v7145_v29, %v4084_v4  ;;  %v4092_v39 = vor.u32 1.1754944e-38, %v4091_v30  ;;  %v4114_v1 = vrot.slane %v10874_v63, 4  ;;  %v4079_v50 = vmul.f32 %v10503_v22, %v4078_v16 }
0x122a   : > { %v7147_v40 = vpop.eup %7146  ;;  %vm4090_vm3 = vcmp.eq.f32.partialorder %v4089_v32, 8.507059e+37  ;;  %v4127_v61 = vmul.f32 %v4111_v8, %v4019_v6  ;;  %v4115_v35 = vrot.slane %v10880_v62, 4  ;;  %v4128_v18 = vmul.f32 %v4112_v55, %v4034_v38 }
0x122b   : > { %v4093_v49 = vsel %vm4090_vm3, %v4092_v39, %v4088_v28  ;;  %v4096_v53 = vmul.f32 %v7147_v40, %v10720_v48  ;;  %v4126_v29 = vmul.f32 %v4110_v46, %v4004_v60  ;;  %v4129_v20 = vmul.f32 %v4113_v56, %v4049_v33  ;;  %v4159_v56 = vpop.permute.xlu0 %4158 }
0x122c   : > { %v4130_v0 = vmul.f32 %v4114_v1, %v4064_v19  ;;  %v4142_v45 = vrot.slane %v4127_v61, 7  ;;  %v4104_v34 = vand.u32 2147483647, %v10720_v48  ;;  %v4106_v22 = vand.u32 2147483648, %v10720_v48 }
0x122d   : > { %v4097_v43 = vsub.f32 1.0, %v4096_v53  ;;  %v4144_v17 = vrot.slane %v4128_v18, 6  ;;  %v4094_v12 = vmul.f32 %v10507_v36, %v4093_v49  ;;  %v4116_v9 = vrot.slane %v10887_v3, 4 }
0x122e   : > { %vm13381_vm15 = vcmask 1041409   ;;  %v4146_v57 = vrot.slane %v4129_v20, 5  ;;  %vm4101_vm4 = vweird.f32 %v7147_v40  ;;  %v4131_v15 = vmul.f32 %v4115_v35, %v4079_v50 }
0x122f   : > { %v4143_v52 = vsel %vm13381_vm15, %v4142_v45, %v4126_v29  ;;  %v4098_v60 = vmul.f32 %v7147_v40, %v4097_v43  ;;  %vm13382_vm6 = vcmask 1042434   ;;  %vm13383_vm14 = vcmask 1043459  }
0x1230   : > { %v4145_v6 = vsel %vm13382_vm6, %v4144_v17, %v4143_v52  ;;  %v4148_v27 = vrot.slane %v4130_v0, 4  ;;  %vm4100_vm12 = vweird.f32 %v10720_v48  ;;  %v4107_v36 = vor.u32 1.1754944e-38, %v4106_v22 }
0x1231   : > { %v4147_v26 = vsel %vm13383_vm14, %v4146_v57, %v4145_v6  ;;  %v4099_v37 = vadd.f32 %v7147_v40, %v4098_v60  ;;  %vm4102_vm5 = vmor %vm4100_vm12, %vm4101_vm4  ;;  %v4132_v59 = vmul.f32 %v4116_v9, %v4094_v12  ;;  %vm13384_vm7 = vcmask 1044484  }
0x1232   : > { %v4149_v30 = vsel %vm13384_vm7, %v4148_v27, %v4147_v26  ;;  %vm4105_vm8 = vcmp.eq.f32.partialorder %v4104_v34, 8.507059e+37  ;;  %v4117_v32 = vrot.slane %v10896_v42, 4  ;;  %v4150_v16 = vrot.slane %v4131_v15, 3 }
0x1233   : > { %v4103_v38 = vsel %vm4102_vm5, %v7147_v40, %v4099_v37  ;;  %vm13385_vm11 = vcmask 1045509   ;;  %v4152_v33 = vrot.slane %v4132_v59, 2  ;;  %vm13386_vm10 = vcmask 1046534  }
0x1234   : > { %v4108_v4 = vsel %vm4105_vm8, %v4107_v36, %v4103_v38  ;;  %v4151_v55 = vsel %vm13385_vm11, %v4150_v16, %v4149_v30  ;;  %vm13387_vm13 = vcmask 1047559   ;;  %vm13389_vm2 = vcmask 130048  }
0x1235   : > { %v4109_v8 = vmul.f32 %v10511_v7, %v4108_v4  ;;  %v4153_v48 = vsel %vm13386_vm10, %v4152_v33, %v4151_v55  ;;  %vm13390_vm9 = vcmask 392192   ;;  %v7483_v7 = vld [vmem:[%s12745_s6] ss:$0 sm:$0xff]  ;;  %vm13394_vm5 = vcmask 261120  }
0x1236   : > { %vm13395_vm7 = vmmov %vm13394_vm5  ;;  %vm13396_vm8 = vcmask 1041409   ;;  %vm13397_vm11 = vcmask 1042434   ;;  %vm13398_vm10 = vcmask 1043459  }
0x1237   : > { %v4133_v19 = vmul.f32 %v4117_v32, %v4109_v8 }
0x1239   : > { %v4154_v46 = vrot.slane %v4133_v19, 1 }
0x123b   : > { %v10903_v28 = vsel %vm13387_vm13, %v4154_v46, %v4153_v48  ;;  %vm13400_vm13 = vcmask 1044484  }
0x123c   : > { %13388 = vst [vmem:[#allocation38_spill] sm:$0xff] %v10903_v28  ;;  %v4161_v39 = vsel %vm13389_vm2, %v10903_v28, %v4159_v56  ;;  %vm13403_vm2 = vcmask 1045509  }
0x123d   : > { %6726 = vmatmul.msk.f32.vlgmr.msra.gmra.mxu1 %vm13390_vm9, %v4161_v39  ;;  %vm13406_vm9 = vcmask 1046534  }
0x1276   : > { %v3804_v1 = vpop.f32.mrf.mxu0 }
0x1277   : > { %v3805_v40 = vadd.f32 %v7483_v7, %v3804_v1 }
0x1279   : > { %7148 = vtanh.f32 %v3805_v40  ;;  %v6725_v35 = vmul.f32 -1.442695, %v3805_v40 }
0x127f   : > { %v7149_v50 = vpop.eup %7148 }
0x1280   : > { %3829 = vrot.lane.b32.xlu1 %v7149_v50, %s7536_s12 }
0x12ba   : > { %v4182_v61 = vpop.f32.mrf.mxu1 }
0x12bb   : > { %v4183_v49 = vadd.f32 %v7483_v7, %v4182_v61 }
0x12bd   : > { %7150 = vtanh.f32 %v4183_v49  ;;  %v6727_v12 = vmul.f32 -1.442695, %v4183_v49 }
0x12be   : > { %7152 = vpow2.f32 %v6725_v35 }
0x12c3   : > { %v7151_v53 = vpop.eup %7150 }
0x12c4   : > { %4207 = vrot.lane.b32.xlu2 %v7151_v53, %s7536_s12  ;;  %v7153_v18 = vpop.eup %7152 }
0x12c5   : > { %v3810_v29 = vadd.f32 1.0, %v7153_v18 }
0x12c7   : > { %7154 = vrcp.f32 %v3810_v29  ;;  %v3822_v22 = vand.u32 2147483648, %v3810_v29  ;;  %vm3816_vm0 = vweird.f32 %v3810_v29  ;;  %v3820_v17 = vand.u32 2147483647, %v3810_v29 }
0x12c8   : > { %7156 = vpow2.f32 %v6727_v12 }
0x12c9   : > { %v3823_v52 = vor.u32 1.1754944e-38, %v3822_v22  ;;  %vm3821_vm15 = vcmp.eq.f32.partialorder %v3820_v17, 8.507059e+37 }
0x12cd   : > { %v7155_v20 = vpop.eup %7154 }
0x12ce   : > { %v3812_v0 = vmul.f32 %v7155_v20, %v3810_v29  ;;  %vm3817_vm1 = vweird.f32 %v7155_v20  ;;  %v7157_v6 = vpop.eup %7156 }
0x12cf   : > { %vm3818_vm3 = vmor %vm3816_vm0, %vm3817_vm1  ;;  %v4188_v26 = vadd.f32 1.0, %v7157_v6  ;;  %vm13408_vm1 = vcmask 1047559   ;;  %vm13410_vm0 = vcmask 130048  }
0x12d0   : > { %v3813_v45 = vsub.f32 1.0, %v3812_v0 }
0x12d1   : > { %7158 = vrcp.f32 %v4188_v26  ;;  %v4200_v38 = vand.u32 2147483648, %v4188_v26  ;;  %vm4194_vm6 = vweird.f32 %v4188_v26  ;;  %v4198_v32 = vand.u32 2147483647, %v4188_v26 }
0x12d2   : > { %v3814_v43 = vmul.f32 %v7155_v20, %v3813_v45 }
0x12d3   : > { %v4201_v4 = vor.u32 1.1754944e-38, %v4200_v38  ;;  %vm4199_vm12 = vcmp.eq.f32.partialorder %v4198_v32, 8.507059e+37 }
0x12d4   : > { %v3815_v34 = vadd.f32 %v7155_v20, %v3814_v43 }
0x12d6   : > { %v3819_v9 = vsel %vm3818_vm3, %v7155_v20, %v3815_v34  ;;  %vm13412_vm3 = vmmov %vm13396_vm8 }
0x12d7   : > { %v3824_v60 = vsel %vm3821_vm15, %v3823_v52, %v3819_v9  ;;  %v7159_v27 = vpop.eup %7158  ;;  %vm13413_vm15 = vmmov %vm13397_vm11 }
0x12d8   : > { %v4190_v37 = vmul.f32 %v7159_v27, %v4188_v26  ;;  %vm4195_vm4 = vweird.f32 %v7159_v27  ;;  %v3827_v19 = vmul.f32 %v3824_v60, %v10329_v14 }
0x12d9   : > { %vm4196_vm14 = vmor %vm4194_vm6, %vm4195_vm4 }
0x12da   : > { %v4191_v36 = vsub.f32 1.0, %v4190_v37  ;;  %vm13414_vm4 = vmmov %vm13398_vm10 }
0x12db   : > { %vm13415_vm6 = vmmov %vm13400_vm13 }
0x12dc   : > { %v4192_v59 = vmul.f32 %v7159_v27, %v4191_v36 }
0x12de   : > { %v4193_v30 = vadd.f32 %v7159_v27, %v4192_v59 }
0x12e0   : > { %v4197_v16 = vsel %vm4196_vm14, %v7159_v27, %v4193_v30  ;;  %vm13416_vm14 = vmmov %vm13403_vm2 }
0x12e1   : > { %v4202_v55 = vsel %vm4199_vm12, %v4201_v4, %v4197_v16  ;;  %vm13417_vm12 = vmmov %vm13406_vm9 }
0x12e2   : > { %v4205_v1 = vmul.f32 %v4202_v55, %v10337_v13 }
0x12f2   : > { %v3830_v57 = vpop.permute.xlu1 %3829 }
0x12f3   : > { %v3832_v15 = vmul.f32 %v3830_v57, %v3824_v60 }
0x12f5   : > { %3834 = vrot.lane.b32.xlu0 %v3832_v15, %s7537_s13 }
0x131e   : > { %v4208_v8 = vpop.permute.xlu2 %4207 }
0x131f   : > { %v4210_v33 = vmul.f32 %v4208_v8, %v4202_v55 }
0x1321   : > { %4212 = vrot.lane.b32.xlu2 %v4210_v33, %s7537_s13 }
0x1367   : > { %v3835_v48 = vpop.permute.xlu0 %3834 }
0x1368   : > { %v10916_v46 = vadd.f32 %v3835_v48, %v3827_v19 }
0x136a   : > { %13391 = vst [vmem:[#allocation39_spill] sm:$0xff] %v10916_v46  ;;  %7160 = vtanh.f32 %v10916_v46  ;;  %v4223_v56 = vmul.f32 %v10916_v46, %v13073_v5 }
0x136c   : > { %4225 = vrot.lane.b32.xlu2 %v4223_v56, %s7536_s12 }
0x1370   : > { %v7161_v39 = vpop.eup %7160 }
0x1371   : > { %3840 = vrot.lane.b32.xlu1 %v7161_v39, %s7536_s12 }
0x137b   : > { %v4213_v7 = vpop.permute.xlu2 %4212 }
0x137c   : > { %v10924_v40 = vadd.f32 %v4213_v7, %v4205_v1 }
0x137e   : > { %7162 = vtanh.f32 %v10924_v40  ;;  %v4601_v14 = vmul.f32 %v10924_v40, %v13073_v5 }
0x1380   : > { %4603 = vrot.lane.b32.xlu1 %v4601_v14, %s7536_s12 }
0x1384   : > { %v7163_v50 = vpop.eup %7162 }
0x1385   : > { %4218 = vrot.lane.b32.xlu0 %v7163_v50, %s7536_s12 }
0x13c6   : > { %v4226_v13 = vpop.permute.xlu2 %4225 }
0x13e3   : > { %v3841_v61 = vpop.permute.xlu1 %3840 }
0x13e4   : > { %v10931_v49 = vmul.f32 %v3841_v61, %v3824_v60 }
0x13e6   : > { %13392 = vst [vmem:[#allocation40_spill] sm:$0xff] %v10931_v49  ;;  %v4222_v53 = vmul.f32 %v10931_v49, %v13287_v47 }
0x13e8   : > { %v4228_v35 = vadd.f32 %v4226_v13, %v4222_v53 }
0x13ea   : > { %4230 = vrot.lane.b32.xlu0 %v4228_v35, %s7537_s13 }
0x13f2   : > { %v4604_v0 = vpop.permute.xlu1 %4603 }
0x13f7   : > { %v4219_v18 = vpop.permute.xlu0 %4218 }
0x13f8   : > { %v10936_v29 = vmul.f32 %v4219_v18, %v4202_v55  ;;  %v13399_v18 = vld [vmem:[#allocation12_spill] sm:$0xff] }
0x13fa   : > { %13393 = vst [vmem:[#allocation41_spill] sm:$0xff] %v10936_v29  ;;  %v4600_v20 = vmul.f32 %v10936_v29, %v13287_v47 }
0x13fc   : > { %v4606_v45 = vadd.f32 %v4604_v0, %v4600_v20 }
0x13fe   : > { %4608 = vrot.lane.b32.xlu2 %v4606_v45, %s7537_s13 }
0x1458   : > { %v4609_v43 = vpop.permute.xlu2 %4608 }
0x1459   : > { %v4611_v34 = vsel %vm13394_vm5, %v4609_v43, 0.0  ;;  %v13401_v43 = vld [vmem:[#allocation13_spill] sm:$0xff]  ;;  %vm13418_vm5 = vmmov %vm13408_vm1 }
0x145a   : > { %4612 = vadd.xlane.f32.xlu0 %v4611_v34 }
0x145c   : > { %v4231_v22 = vpop.permute.xlu0 %4230 }
0x145d   : > { %v4233_v17 = vsel %vm13395_vm7, %v4231_v22, 0.0  ;;  %v13402_v22 = vld [vmem:[#allocation14_spill] sm:$0xff]  ;;  %vm13419_vm7 = vmmov %vm13410_vm0 }
0x145e   : > { %4234 = vadd.xlane.f32.xlu1 %v4233_v17 }
0x14cd   : > { %v4613_v12 = vpop.xlane.xlu0 %4612 }
0x14ce   : > { %v4615_v9 = vrot.slane %v4613_v12, 1  ;;  %v4616_v52 = vrot.slane %v4613_v12, 2  ;;  %v4617_v57 = vrot.slane %v4613_v12, 3  ;;  %v4618_v60 = vrot.slane %v4613_v12, 4 }
0x14cf   : > { %v4619_v15 = vrot.slane %v4613_v12, 5  ;;  %v4620_v6 = vrot.slane %v4613_v12, 6  ;;  %v4621_v26 = vrot.slane %v4613_v12, 7  ;;  %v10959_v38 = vadd.f32 %v4613_v12, %v13311_v51 }
0x14d0   : > { %v10944_v27 = vadd.f32 %v4615_v9, %v13307_v10  ;;  %v10947_v37 = vadd.f32 %v4616_v52, %v13308_v23  ;;  %v10950_v36 = vadd.f32 %v4617_v57, %v13309_v44  ;;  %v10953_v59 = vadd.f32 %v4618_v60, %v13310_v41  ;;  %v13404_v52 = vld [vmem:[#allocation11_spill] sm:$0xff] }
0x14d1   : > { %v10956_v30 = vadd.f32 %v4619_v15, %v13312_v54  ;;  %v10962_v32 = vadd.f32 %v4620_v6, %v13313_v25  ;;  %v4235_v8 = vpop.xlane.xlu1 %4234  ;;  %v10967_v55 = vadd.f32 %v4621_v26, %v13314_v11  ;;  %v13405_v60 = vld [vmem:[#allocation15_spill] sm:$0xff]  ;;  %v13407_v26 = vld [vmem:[#allocation16_spill] sm:$0xff] }
0x14d2   : > { %v4646_v16 = vrot.slane %v10944_v27, 7  ;;  %v4648_v4 = vrot.slane %v10947_v37, 6  ;;  %v4650_v33 = vrot.slane %v10950_v36, 5  ;;  %v4652_v19 = vrot.slane %v10953_v59, 4 }
0x14d3   : > { %v4237_v48 = vrot.slane %v4235_v8, 1  ;;  %v4238_v56 = vrot.slane %v4235_v8, 2  ;;  %v4239_v1 = vrot.slane %v4235_v8, 3  ;;  %v4654_v14 = vrot.slane %v10956_v30, 3 }
0x14d4   : > { %v4647_v39 = vsel %vm13396_vm8, %v4646_v16, %v10959_v38  ;;  %v4240_v50 = vrot.slane %v4235_v8, 4  ;;  %v4241_v61 = vrot.slane %v4235_v8, 5  ;;  %v4656_v13 = vrot.slane %v10962_v32, 2  ;;  %vm13420_vm8 = vmmov %vm13412_vm3 }
0x14d5   : > { %v4649_v7 = vsel %vm13397_vm11, %v4648_v4, %v4647_v39  ;;  %v4242_v35 = vrot.slane %v4235_v8, 6  ;;  %v10978_v20 = vadd.f32 %v4237_v48, %v13399_v18  ;;  %v4243_v45 = vrot.slane %v4235_v8, 7  ;;  %v13409_v48 = vld [vmem:[#allocation17_spill] sm:$0xff]  ;;  %v13411_v39 = vld [vmem:[#allocation18_spill] sm:$0xff] }
0x14d6   : > { %v4651_v53 = vsel %vm13398_vm10, %v4650_v33, %v4649_v7  ;;  %v10982_v34 = vadd.f32 %v4238_v56, %v13401_v43  ;;  %v10985_v17 = vadd.f32 %v4239_v1, %v13402_v22  ;;  %v4658_v9 = vrot.slane %v10967_v55, 1  ;;  %vm13421_vm10 = vmmov %vm13414_vm4 }
0x14d7   : > { %v4653_v0 = vsel %vm13400_vm13, %v4652_v19, %v4651_v53  ;;  %v10990_v57 = vadd.f32 %v4235_v8, %v13404_v52  ;;  %v10993_v15 = vadd.f32 %v4240_v50, %v13405_v60  ;;  %v10997_v16 = vadd.f32 %v4241_v61, %v13407_v26  ;;  %vm13422_vm13 = vmmov %vm13415_vm6 }
0x14d8   : > { %v4655_v12 = vsel %vm13403_vm2, %v4654_v14, %v4653_v0  ;;  %v4268_v4 = vrot.slane %v10978_v20, 7  ;;  %v4270_v33 = vrot.slane %v10982_v34, 6  ;;  %v11003_v56 = vadd.f32 %v4242_v35, %v13409_v48 }
0x14d9   : > { %v4657_v6 = vsel %vm13406_vm9, %v4656_v13, %v4655_v12  ;;  %v11007_v1 = vadd.f32 %v4243_v45, %v13411_v39  ;;  %v4272_v14 = vrot.slane %v10985_v17, 5  ;;  %v4274_v61 = vrot.slane %v10993_v15, 4 }
0x14da   : > { %v4659_v19 = vsel %vm13408_vm1, %v4658_v9, %v4657_v6  ;;  %v4269_v7 = vsel %vm13412_vm3, %v4268_v4, %v10990_v57  ;;  %v4276_v13 = vrot.slane %v10997_v16, 3  ;;  %v4278_v0 = vrot.slane %v11003_v56, 2  ;;  %vm13423_vm1 = vmmov %vm13412_vm3 }
0x14db   : > { %v4661_v8 = vsel %vm13410_vm0, %v4659_v19, -inf  ;;  %v4271_v50 = vsel %vm13413_vm15, %v4270_v33, %v4269_v7  ;;  %v4280_v12 = vrot.slane %v11007_v1, 1  ;;  %vm13424_vm0 = vmmov %vm13397_vm11 }
0x14dc   : > { %4662 = vmax.xlane.f32.xlu1 %v4661_v8  ;;  %v4273_v53 = vsel %vm13414_vm4, %v4272_v14, %v4271_v50  ;;  %vm13425_vm3 = vmmov %vm13418_vm5 }
0x14dd   : > { %v4275_v35 = vsel %vm13415_vm6, %v4274_v61, %v4273_v53  ;;  %vm13426_vm15 = vmmov %vm13419_vm7 }
0x14de   : > { %v4277_v45 = vsel %vm13416_vm14, %v4276_v13, %v4275_v35  ;;  %vm13427_vm14 = vmmov %vm13403_vm2 }
0x14df   : > { %v4279_v9 = vsel %vm13417_vm12, %v4278_v0, %v4277_v45  ;;  %vm13428_vm12 = vmmov %vm13406_vm9 }
0x14e0   : > { %v4281_v6 = vsel %vm13418_vm5, %v4280_v12, %v4279_v9  ;;  %vm13429_vm5 = vmmov %vm13425_vm3 }
0x14e1   : > { %v4283_v4 = vsel %vm13419_vm7, %v4281_v6, -inf }
0x14e2   : > { %4284 = vmax.xlane.f32.xlu2 %v4283_v4 }
0x14f5   : > { %4536 = vrot.lane.b32.xlu1 %v10931_v49, %s7539_s20 }
0x154f   : > { %v4663_v33 = vpop.xlane.xlu1 %4662 }
0x1550   : > { %v4665_v19 = vrot.slane %v4663_v33, 1  ;;  %v4666_v8 = vrot.slane %v4663_v33, 2  ;;  %v4667_v7 = vrot.slane %v4663_v33, 3  ;;  %v4668_v14 = vrot.slane %v4663_v33, 4 }
0x1551   : > { %v4669_v50 = vrot.slane %v4663_v33, 5  ;;  %v4680_v61 = vsub.f32 %v10959_v38, %v4663_v33  ;;  %v4670_v53 = vrot.slane %v4663_v33, 6  ;;  %v4671_v13 = vrot.slane %v4663_v33, 7 }
0x1552   : > { %v4681_v35 = vsub.f32 %v10944_v27, %v4665_v19  ;;  %v4682_v0 = vsub.f32 %v10947_v37, %v4666_v8  ;;  %v4683_v45 = vsub.f32 %v10950_v36, %v4667_v7  ;;  %v4684_v12 = vsub.f32 %v10953_v59, %v4668_v14 }
0x1553   : > { %v4688_v9 = vmul.f32 1.442695, %v4680_v61  ;;  %v4685_v6 = vsub.f32 %v10956_v30, %v4669_v50  ;;  %v4686_v4 = vsub.f32 %v10962_v32, %v4670_v53  ;;  %v4687_v28 = vsub.f32 %v10967_v55, %v4671_v13 }
0x1554   : > { %v4690_v2 = vmul.f32 1.442695, %v4681_v35  ;;  %v4692_v49 = vmul.f32 1.442695, %v4682_v0  ;;  %v4694_v38 = vmul.f32 1.442695, %v4683_v45 }
0x1555   : > { %7164 = vpow2.f32 %v4688_v9  ;;  %v4696_v33 = vmul.f32 1.442695, %v4684_v12  ;;  %v4285_v27 = vpop.xlane.xlu2 %4284  ;;  %v4698_v19 = vmul.f32 1.442695, %v4685_v6  ;;  %v4700_v37 = vmul.f32 1.442695, %v4686_v4 }
0x1556   : > { %7166 = vpow2.f32 %v4690_v2  ;;  %v4702_v8 = vmul.f32 1.442695, %v4687_v28  ;;  %v4287_v36 = vrot.slane %v4285_v27, 1  ;;  %v4288_v59 = vrot.slane %v4285_v27, 2 }
0x1557   : > { %7168 = vpow2.f32 %v4692_v49  ;;  %v4289_v7 = vrot.slane %v4285_v27, 3  ;;  %v4290_v14 = vrot.slane %v4285_v27, 4  ;;  %v4291_v30 = vrot.slane %v4285_v27, 5 }
0x1558   : > { %v4302_v32 = vsub.f32 %v10990_v57, %v4285_v27  ;;  %7170 = vpow2.f32 %v4694_v38  ;;  %v4303_v55 = vsub.f32 %v10978_v20, %v4287_v36  ;;  %v4304_v50 = vsub.f32 %v10982_v34, %v4288_v59 }
0x1559   : > { %v4305_v61 = vsub.f32 %v10985_v17, %v4289_v7  ;;  %7172 = vpow2.f32 %v4696_v33  ;;  %v4292_v53 = vrot.slane %v4285_v27, 6  ;;  %v4293_v28 = vrot.slane %v4285_v27, 7 }
0x155a   : > { %v4310_v2 = vmul.f32 1.442695, %v4302_v32  ;;  %7174 = vpow2.f32 %v4698_v19  ;;  %v4312_v13 = vmul.f32 1.442695, %v4303_v55  ;;  %v4314_v35 = vmul.f32 1.442695, %v4304_v50 }
0x155b   : > { %v11037_v49 = vpop.eup %7164  ;;  %v4316_v0 = vmul.f32 1.442695, %v4305_v61  ;;  %7176 = vpow2.f32 %v4700_v37  ;;  %v4306_v20 = vsub.f32 %v10993_v15, %v4290_v14  ;;  %v4307_v34 = vsub.f32 %v10997_v16, %v4291_v30 }
0x155c   : > { %v11039_v45 = vpop.eup %7166  ;;  %7178 = vpow2.f32 %v4310_v2  ;;  %v4308_v17 = vsub.f32 %v11003_v56, %v4292_v53  ;;  %v4309_v9 = vsub.f32 %v11007_v1, %v4293_v28 }
0x155d   : > { %v11044_v57 = vpop.eup %7168  ;;  %7180 = vpow2.f32 %v4312_v13  ;;  %v4712_v12 = vrot.slane %v11039_v45, 7  ;;  %v4318_v38 = vmul.f32 1.442695, %v4306_v20  ;;  %v4320_v33 = vmul.f32 1.442695, %v4307_v34 }
0x155e   : > { %v11048_v6 = vpop.eup %7170  ;;  %7182 = vpow2.f32 %v4314_v35  ;;  %v4714_v4 = vrot.slane %v11044_v57, 6  ;;  %v4322_v56 = vmul.f32 1.442695, %v4308_v17  ;;  %v4324_v36 = vmul.f32 1.442695, %v4309_v9 }
0x155f   : > { %v11051_v27 = vpop.eup %7172  ;;  %7184 = vpow2.f32 %v4702_v8  ;;  %v4713_v15 = vsel %vm13420_vm8, %v4712_v12, %v11037_v49  ;;  %v4716_v16 = vrot.slane %v11048_v6, 5 }
0x1560   : > { %v11056_v19 = vpop.eup %7174  ;;  %v4715_v1 = vsel %vm13397_vm11, %v4714_v4, %v4713_v15  ;;  %v4718_v37 = vrot.slane %v11051_v27, 4  ;;  %7186 = vpow2.f32 %v4316_v0 }
0x1561   : > { %v11060_v59 = vpop.eup %7176  ;;  %v4717_v7 = vsel %vm13421_vm10, %v4716_v16, %v4715_v1  ;;  %v4720_v8 = vrot.slane %v11056_v19, 3  ;;  %7188 = vpow2.f32 %v4318_v38 }
0x1562   : > { %v11064_v14 = vpop.eup %7178  ;;  %v4719_v30 = vsel %vm13422_vm13, %v4718_v37, %v4717_v7  ;;  %7190 = vpow2.f32 %v4320_v33  ;;  %v4722_v50 = vrot.slane %v11060_v59, 2 }
0x1563   : > { %v11067_v32 = vpop.eup %7180  ;;  %v4721_v55 = vsel %vm13403_vm2, %v4720_v8, %v4719_v30  ;;  %7192 = vpow2.f32 %v4322_v56 }
0x1564   : > { %v11071_v61 = vpop.eup %7182  ;;  %7194 = vpow2.f32 %v4324_v36  ;;  %v4334_v2 = vrot.slane %v11067_v32, 7  ;;  %v4723_v28 = vsel %vm13406_vm9, %v4722_v50, %v4721_v55 }
0x1565   : > { %v11074_v53 = vpop.eup %7184  ;;  %v4336_v13 = vrot.slane %v11071_v61, 6 }
0x1566   : > { %v11078_v35 = vpop.eup %7186  ;;  %v4724_v0 = vrot.slane %v11074_v53, 1  ;;  %v4335_v20 = vsel %vm13423_vm1, %v4334_v2, %v11064_v14 }
0x1567   : > { %v11083_v34 = vpop.eup %7188  ;;  %v4337_v17 = vsel %vm13424_vm0, %v4336_v13, %v4335_v20  ;;  %v4338_v12 = vrot.slane %v11078_v35, 5 }
0x1568   : > { %v11087_v9 = vpop.eup %7190  ;;  %v4725_v4 = vsel %vm13425_vm3, %v4724_v0, %v4723_v28  ;;  %v4340_v38 = vrot.slane %v11083_v34, 4 }
0x1569   : > { %v11091_v33 = vpop.eup %7192  ;;  %v4727_v15 = vsel %vm13426_vm15, %v4725_v4, 0.0  ;;  %v4339_v16 = vsel %vm13414_vm4, %v4338_v12, %v4337_v17  ;;  %v4342_v56 = vrot.slane %v11087_v9, 3 }
0x156a   : > { %v11096_v1 = vpop.eup %7194  ;;  %4728 = vadd.xlane.f32.xlu2 %v4727_v15  ;;  %v4341_v37 = vsel %vm13415_vm6, %v4340_v38, %v4339_v16  ;;  %v4344_v36 = vrot.slane %v11091_v33, 2 }
0x156b   : > { %v4343_v7 = vsel %vm13427_vm14, %v4342_v56, %v4341_v37  ;;  %v4346_v8 = vrot.slane %v11096_v1, 1 }
0x156c   : > { %v4345_v30 = vsel %vm13428_vm12, %v4344_v36, %v4343_v7 }
0x156d   : > { %v4347_v55 = vsel %vm13429_vm5, %v4346_v8, %v4345_v30 }
0x156e   : > { %v4349_v50 = vsel %vm13419_vm7, %v4347_v55, 0.0 }
0x156f   : > { %4350 = vadd.xlane.f32.xlu0 %v4349_v50 }
0x1583   : > { %4914 = vrot.lane.b32.xlu0 %v10936_v29, %s7539_s20 }
0x15dd   : > { %v4729_v2 = vpop.xlane.xlu2 %4728 }
0x15de   : > { %7196 = vrcp.f32 %v4729_v2  ;;  %v11107_v28 = vrot.slane %v4729_v2, 1  ;;  %v11109_v13 = vrot.slane %v4729_v2, 2  ;;  %v11111_v0 = vrot.slane %v4729_v2, 3 }
0x15df   : > { %v4757_v17 = vand.u32 2147483648, %v4729_v2  ;;  %v11117_v12 = vrot.slane %v4729_v2, 4  ;;  %v11119_v4 = vrot.slane %v4729_v2, 5  ;;  %v4755_v38 = vand.u32 2147483647, %v4729_v2 }
0x15e0   : > { %7198 = vrcp.f32 %v11107_v28  ;;  %v11126_v56 = vrot.slane %v4729_v2, 6  ;;  %v4772_v37 = vand.u32 2147483648, %v11107_v28  ;;  %v11133_v7 = vrot.slane %v4729_v2, 7 }
0x15e1   : > { %7200 = vrcp.f32 %v11109_v13  ;;  %vm4751_vm8 = vweird.f32 %v4729_v2  ;;  %v4758_v55 = vor.u32 1.1754944e-38, %v4757_v17  ;;  %vm4766_vm11 = vweird.f32 %v11107_v28 }
0x15e2   : > { %v11115_v20 = vpop.xlane.xlu0 %4350  ;;  %7202 = vrcp.f32 %v11111_v0  ;;  %v4770_v50 = vand.u32 2147483647, %v11107_v28  ;;  %v4785_v29 = vand.u32 2147483647, %v11109_v13  ;;  %vm11144_vm10 = vcmp.eq.f32.partialorder %v4755_v38, 8.507059e+37 }
0x15e3   : > { %v11124_v16 = vrot.slane %v11115_v20, 1  ;;  %v11131_v36 = vrot.slane %v11115_v20, 2  ;;  %7204 = vrcp.f32 %v11115_v20  ;;  %vm4781_vm13 = vweird.f32 %v11109_v13 }
0x15e4   : > { %v11121_v15 = vpop.eup %7196  ;;  %v4787_v17 = vand.u32 2147483648, %v11109_v13  ;;  %7206 = vrcp.f32 %v11117_v12  ;;  %v4773_v51 = vor.u32 1.1754944e-38, %v4772_v37  ;;  %v4800_v23 = vand.u32 2147483647, %v11111_v0 }
0x15e5   : > { %v4747_v8 = vmul.f32 %v11121_v15, %v4729_v2  ;;  %7208 = vrcp.f32 %v11124_v16  ;;  %vm4752_vm2 = vweird.f32 %v11121_v15  ;;  %vm4796_vm9 = vweird.f32 %v11111_v0 }
0x15e6   : > { %v11136_v30 = vpop.eup %7198  ;;  %7210 = vrcp.f32 %v11131_v36  ;;  %v4802_v48 = vand.u32 2147483648, %v11111_v0  ;;  %vm11165_vm1 = vcmp.eq.f32.partialorder %v4770_v50, 8.507059e+37  ;;  %vm11169_vm0 = vcmp.eq.f32.partialorder %v4785_v29, 8.507059e+37  ;;  %vm11179_vm3 = vmor %vm4751_vm8, %vm4752_vm2 }
0x15e7   : > { %v11142_v11 = vpop.eup %7200  ;;  %v4748_v25 = vsub.f32 1.0, %v4747_v8  ;;  %v4762_v41 = vmul.f32 %v11136_v30, %v11107_v28  ;;  %7212 = vrcp.f32 %v11119_v4  ;;  %vm4767_vm15 = vweird.f32 %v11136_v30 }
0x15e8   : > { %v4777_v38 = vmul.f32 %v11142_v11, %v11109_v13  ;;  %v7203_v10 = vpop.eup %7202  ;;  %vm4782_vm4 = vweird.f32 %v11142_v11  ;;  %v4815_v29 = vand.u32 2147483647, %v11117_v12  ;;  %vm11191_vm6 = vcmp.eq.f32.partialorder %v4800_v23, 8.507059e+37  ;;  %vm11206_vm12 = vmor %vm4766_vm11, %vm4767_vm15 }
0x15e9   : > { %v4749_v8 = vmul.f32 %v11121_v15, %v4748_v25  ;;  %v4763_v44 = vsub.f32 1.0, %v4762_v41  ;;  %v4788_v25 = vor.u32 1.1754944e-38, %v4787_v17  ;;  %v11174_v60 = vpop.eup %7204  ;;  %v4803_v47 = vor.u32 1.1754944e-38, %v4802_v48  ;;  %vm11218_vm8 = vmor %vm4781_vm13, %vm4782_vm4 }
0x15ea   : > { %v4778_v39 = vsub.f32 1.0, %v4777_v38  ;;  %v4792_v38 = vmul.f32 %v7203_v10, %v11111_v0  ;;  %v7207_v50 = vpop.eup %7206  ;;  %vm4811_vm14 = vweird.f32 %v11117_v12  ;;  %vm4797_vm5 = vweird.f32 %v7203_v10 }
0x15eb   : > { %v4750_v37 = vadd.f32 %v11121_v15, %v4749_v8  ;;  %v4764_v52 = vmul.f32 %v11136_v30, %v4763_v44  ;;  %v11195_v18 = vpop.eup %7208  ;;  %v4807_v5 = vmul.f32 %v7207_v50, %v11117_v12  ;;  %vm4826_vm7 = vweird.f32 %v11119_v4 }
0x15ec   : > { %v4779_v44 = vmul.f32 %v11142_v11, %v4778_v39  ;;  %v4793_v2 = vsub.f32 1.0, %v4792_v38  ;;  %v11200_v46 = vpop.eup %7210  ;;  %vm11222_vm11 = vcmp.eq.f32.partialorder %v4815_v29, 8.507059e+37  ;;  %vm4812_vm13 = vweird.f32 %v7207_v50 }
0x15ed   : > { %v4754_v17 = vsel %vm11179_vm3, %v11121_v15, %v4750_v37  ;;  %v4765_v22 = vadd.f32 %v11136_v30, %v4764_v52  ;;  %v4817_v15 = vand.u32 2147483648, %v11117_v12  ;;  %v7213_v48 = vpop.eup %7212  ;;  %v4808_v38 = vsub.f32 1.0, %v4807_v5  ;;  %vm4813_vm2 = vmor %vm4811_vm14, %vm4812_vm13 }
0x15ee   : > { %v4780_v39 = vadd.f32 %v11142_v11, %v4779_v44  ;;  %v4794_v52 = vmul.f32 %v7203_v10, %v4793_v2  ;;  %v4759_v37 = vsel %vm11144_vm10, %v4758_v55, %v4754_v17  ;;  %v4830_v44 = vand.u32 2147483647, %v11119_v4  ;;  %vm4798_vm10 = vmor %vm4796_vm9, %vm4797_vm5 }
0x15ef   : > { %v4769_v54 = vsel %vm11206_vm12, %v11136_v30, %v4765_v22  ;;  %v4822_v17 = vmul.f32 %v7213_v48, %v11119_v4  ;;  %v4809_v5 = vmul.f32 %v7207_v50, %v4808_v38  ;;  %v4832_v29 = vand.u32 2147483648, %v11119_v4 }
0x15f0   : > { %v4784_v55 = vsel %vm11218_vm8, %v11142_v11, %v4780_v39  ;;  %v4795_v13 = vadd.f32 %v7203_v10, %v4794_v52  ;;  %7214 = vrcp.f32 %v11126_v56  ;;  %v4760_v2 = vmul.f32 %v11037_v49, %v4759_v37 }
0x15f1   : > { %v4818_v22 = vor.u32 1.1754944e-38, %v4817_v15  ;;  %v4823_v30 = vsub.f32 1.0, %v4822_v17  ;;  %v4774_v11 = vsel %vm11165_vm1, %v4773_v51, %v4769_v54  ;;  %v4789_v39 = vsel %vm11169_vm0, %v4788_v25, %v4784_v55 }
0x15f2   : > { %v4799_v23 = vsel %vm4798_vm10, %v7203_v10, %v4795_v13  ;;  %v4810_v52 = vadd.f32 %v7207_v50, %v4809_v5  ;;  %7216 = vrcp.f32 %v11133_v7  ;;  %vm4827_vm9 = vweird.f32 %v7213_v48 }
0x15f3   : > { %v4804_v0 = vsel %vm11191_vm6, %v4803_v47, %v4799_v23  ;;  %v4824_v28 = vmul.f32 %v7213_v48, %v4823_v30  ;;  %v4845_v10 = vand.u32 2147483647, %v11126_v56  ;;  %vm11249_vm3 = vcmp.eq.f32.partialorder %v4830_v44, 8.507059e+37  ;;  %vm4828_vm1 = vmor %vm4826_vm7, %vm4827_vm9 }
0x15f4   : > { %v4814_v49 = vsel %vm4813_vm2, %v7207_v50, %v4810_v52  ;;  %v4833_v51 = vor.u32 1.1754944e-38, %v4832_v29  ;;  %v4847_v41 = vand.u32 2147483648, %v11126_v56  ;;  %v4775_v25 = vmul.f32 %v11039_v45, %v4774_v11 }
0x15f5   : > { %v4790_v43 = vmul.f32 %v11044_v57, %v4789_v39  ;;  %v4819_v47 = vsel %vm11222_vm11, %v4818_v22, %v4814_v49  ;;  %v4825_v12 = vadd.f32 %v7213_v48, %v4824_v28  ;;  %v4805_v37 = vmul.f32 %v11048_v6, %v4804_v0 }
0x15f6   : > { %v7215_v15 = vpop.eup %7214  ;;  %vm4841_vm0 = vweird.f32 %v11126_v56  ;;  %v4867_v50 = vrot.slane %v10856_v58, 5  ;;  %v4868_v38 = vrot.slane %v10860_v21, 5  ;;  %v4820_v45 = vmul.f32 %v11051_v27, %v4819_v47 }
0x15f7   : > { %v4829_v44 = vsel %vm4828_vm1, %v7213_v48, %v4825_v12  ;;  %v4837_v57 = vmul.f32 %v7215_v15, %v11126_v56  ;;  %vm11266_vm15 = vcmp.eq.f32.partialorder %v4845_v10, 8.507059e+37  ;;  %vm4856_vm4 = vweird.f32 %v11133_v7 }
0x15f8   : > { %v4869_v6 = vrot.slane %v10870_v24, 5  ;;  %v7217_v4 = vpop.eup %7216  ;;  %v4834_v54 = vsel %vm11249_vm3, %v4833_v51, %v4829_v44  ;;  %v4848_v58 = vor.u32 1.1754944e-38, %v4847_v41  ;;  %v4866_v21 = vrot.slane %v10866_v31, 5 }
0x15f9   : > { %v4870_v27 = vrot.slane %v10874_v63, 5  ;;  %v4838_v48 = vsub.f32 1.0, %v4837_v57  ;;  %vm4842_vm6 = vweird.f32 %v7215_v15  ;;  %v4852_v55 = vmul.f32 %v7217_v4, %v11133_v7 }
0x15fa   : > { %v4860_v13 = vand.u32 2147483647, %v11133_v7  ;;  %v4835_v17 = vmul.f32 %v11056_v19, %v4834_v54  ;;  %v4871_v5 = vrot.slane %v10880_v62, 5  ;;  %v4883_v24 = vmul.f32 %v4867_v50, %v4775_v25  ;;  %vm4843_vm5 = vmor %vm4841_vm0, %vm4842_vm6 }
0x15fb   : > { %v4884_v29 = vmul.f32 %v4868_v38, %v4790_v43  ;;  %v4839_v23 = vmul.f32 %v7215_v15, %v4838_v48  ;;  %v4853_v22 = vsub.f32 1.0, %v4852_v55  ;;  %v4885_v30 = vmul.f32 %v4869_v6, %v4805_v37 }
0x15fc   : > { %v4886_v11 = vmul.f32 %v4870_v27, %v4820_v45  ;;  %v4862_v31 = vand.u32 2147483648, %v11133_v7  ;;  %v4882_v39 = vmul.f32 %v4866_v21, %v4760_v2  ;;  %v4898_v63 = vrot.slane %v4883_v24, 7 }
0x15fd   : > { %v4900_v52 = vrot.slane %v4884_v29, 6  ;;  %v4840_v0 = vadd.f32 %v7215_v15, %v4839_v23  ;;  %v4854_v28 = vmul.f32 %v7217_v4, %v4853_v22  ;;  %vm4857_vm14 = vweird.f32 %v7217_v4 }
0x15fe   : > { %vm11281_vm12 = vcmp.eq.f32.partialorder %v4860_v13, 8.507059e+37  ;;  %v4872_v62 = vrot.slane %v10887_v3, 5  ;;  %v4887_v19 = vmul.f32 %v4871_v5, %v4835_v17  ;;  %vm13452_vm7 = vcmask 1041409   ;;  %vm4858_vm11 = vmor %vm4856_vm4, %vm4857_vm14  ;;  %v4915_v5 = vpop.permute.xlu0 %4914 }
0x15ff   : > { %v4899_v49 = vsel %vm13452_vm7, %v4898_v63, %v4882_v39  ;;  %v4902_v26 = vrot.slane %v4885_v30, 5  ;;  %v4844_v2 = vsel %vm4843_vm5, %v7215_v15, %v4840_v0  ;;  %v4855_v51 = vadd.f32 %v7217_v4, %v4854_v28 }
0x1600   : > { %vm13453_vm8 = vcmask 1042434   ;;  %v4904_v25 = vrot.slane %v4886_v11, 4  ;;  %v4849_v43 = vsel %vm11266_vm15, %v4848_v58, %v4844_v2  ;;  %v4863_v47 = vor.u32 1.1754944e-38, %v4862_v31 }
0x1601   : > { %v4901_v41 = vsel %vm13453_vm8, %v4900_v52, %v4899_v49  ;;  %vm13454_vm10 = vcmask 1043459   ;;  %v4369_v3 = vmul.f32 %v11174_v60, %v11115_v20  ;;  %v4850_v12 = vmul.f32 %v11060_v59, %v4849_v43 }
0x1602   : > { %v4903_v56 = vsel %vm13454_vm10, %v4902_v26, %v4901_v41  ;;  %v4859_v37 = vsel %vm4858_vm11, %v7217_v4, %v4855_v51  ;;  %v4873_v15 = vrot.slane %v10896_v42, 5  ;;  %vm13455_vm13 = vcmask 1044484  }
0x1603   : > { %v4905_v50 = vsel %vm13455_vm13, %v4904_v25, %v4903_v56  ;;  %v4864_v38 = vsel %vm11281_vm12, %v4863_v47, %v4859_v37  ;;  %v4906_v45 = vrot.slane %v4887_v19, 3  ;;  %v4370_v44 = vsub.f32 1.0, %v4369_v3 }
0x1604   : > { %v4865_v7 = vmul.f32 %v11074_v53, %v4864_v38  ;;  %v4888_v57 = vmul.f32 %v4872_v62, %v4850_v12  ;;  %v11305_v8 = vrot.slane %v11115_v20, 3  ;;  %v11308_v6 = vrot.slane %v11115_v20, 4 }
0x1605   : > { %vm13456_vm2 = vcmask 1045509   ;;  %v11312_v42 = vrot.slane %v11115_v20, 5  ;;  %v4371_v4 = vmul.f32 %v11174_v60, %v4370_v44  ;;  %v4384_v54 = vmul.f32 %v11195_v18, %v11124_v16 }
0x1606   : > { %v4907_v59 = vsel %vm13456_vm2, %v4906_v45, %v4905_v50  ;;  %v4889_v58 = vmul.f32 %v4873_v15, %v4865_v7  ;;  %v4908_v21 = vrot.slane %v4888_v57, 2  ;;  %v11318_v53 = vrot.slane %v11115_v20, 6 }
0x1607   : > { %v4379_v27 = vand.u32 2147483648, %v11115_v20  ;;  %v4372_v48 = vadd.f32 %v11174_v60, %v4371_v4  ;;  %vm4373_vm9 = vweird.f32 %v11115_v20  ;;  %vm4374_vm3 = vweird.f32 %v11174_v60 }
0x1608   : > { %v4385_v55 = vsub.f32 1.0, %v4384_v54  ;;  %vm13457_vm1 = vcmask 1046534   ;;  %v4910_v17 = vrot.slane %v4889_v58, 1  ;;  %v4377_v24 = vand.u32 2147483647, %v11115_v20  ;;  %vm11335_vm6 = vmor %vm4373_vm9, %vm4374_vm3 }
0x1609   : > { %v4909_v13 = vsel %vm13457_vm1, %v4908_v21, %v4907_v59  ;;  %v4399_v29 = vmul.f32 %v11200_v46, %v11131_v36  ;;  %vm4388_vm0 = vweird.f32 %v11124_v16  ;;  %vm4389_vm15 = vweird.f32 %v11195_v18 }
0x160a   : > { %v4386_v23 = vmul.f32 %v11195_v18, %v4385_v55  ;;  %v4394_v22 = vand.u32 2147483648, %v11124_v16  ;;  %vm13458_vm4 = vcmask 1047559   ;;  %v4380_v31 = vor.u32 1.1754944e-38, %v4379_v27  ;;  %vm4390_vm7 = vmor %vm4388_vm0, %vm4389_vm15 }
0x160b   : > { %v11333_v30 = vsel %vm13458_vm4, %v4910_v17, %v4909_v13  ;;  %v4392_v39 = vand.u32 2147483647, %v11124_v16  ;;  %v4400_v63 = vsub.f32 1.0, %v4399_v29  ;;  %vm13462_vm14 = vcmask 130048  }
0x160c   : > { %13459 = vst [vmem:[#allocation42_spill] sm:$0xff] %v11333_v30  ;;  %v4917_v52 = vsel %vm13462_vm14, %v11333_v30, %v4915_v5  ;;  %v4376_v0 = vsel %vm11335_vm6, %v11174_v60, %v4372_v48  ;;  %v4387_v28 = vadd.f32 %v11195_v18, %v4386_v23  ;;  %vm4404_vm12 = vweird.f32 %v11200_v46 }
0x160d   : > { %vm13463_vm5 = vcmask 392192   ;;  %v4401_v10 = vmul.f32 %v11200_v46, %v4400_v63  ;;  %v4407_v62 = vand.u32 2147483647, %v11131_v36  ;;  %v4409_v16 = vand.u32 2147483648, %v11131_v36 }
0x160e   : > { %6730 = vmatmul.msk.f32.vlgmr.msra.gmra.mxu3 %vm13463_vm5, %v4917_v52  ;;  %7218 = vrcp.f32 %v11305_v8  ;;  %vm4378_vm8 = vcmp.eq.f32.partialorder %v4377_v24, 8.507059e+37  ;;  %v4391_v19 = vsel %vm4390_vm7, %v11195_v18, %v4387_v28  ;;  %v4395_v49 = vor.u32 1.1754944e-38, %v4394_v22  ;;  %v7484_v24 = vld [vmem:[%s7614_s18] sm:$0xff]  ;;  %v7485_v52 = vld [vmem:[%s7614_s18 + $0x8] sm:$0xff]  ;;  %v7486_v28 = vld [vmem:[%s7614_s18 + $0x10] sm:$0xff] }
0x160f   : > { %vm4403_vm11 = vweird.f32 %v11131_v36  ;;  %v4381_v60 = vsel %vm4378_vm8, %v4380_v31, %v4376_v0  ;;  %vm4393_vm10 = vcmp.eq.f32.partialorder %v4392_v39, 8.507059e+37  ;;  %v4402_v26 = vadd.f32 %v11200_v46, %v4401_v10 }
0x1610   : > { %7220 = vrcp.f32 %v11308_v6  ;;  %v4396_v2 = vsel %vm4393_vm10, %v4395_v49, %v4391_v19  ;;  %vm4405_vm13 = vmor %vm4403_vm11, %vm4404_vm12  ;;  %v4410_v51 = vor.u32 1.1754944e-38, %v4409_v16  ;;  %v4422_v41 = vand.u32 2147483647, %v11305_v8 }
0x1611   : > { %v4424_v25 = vand.u32 2147483648, %v11305_v8  ;;  %v11361_v18 = vrot.slane %v11115_v20, 7  ;;  %v4406_v36 = vsel %vm4405_vm13, %v11200_v46, %v4402_v26  ;;  %vm4408_vm2 = vcmp.eq.f32.partialorder %v4407_v62, 8.507059e+37  ;;  %v7487_v62 = vld [vmem:[%s7614_s18 + $0x18] sm:$0xff] }
0x1612   : > { %7222 = vrcp.f32 %v11312_v42  ;;  %v11366_v43 = vmul.f32 %v11064_v14, %v4381_v60  ;;  %v4411_v47 = vsel %vm4408_vm2, %v4410_v51, %v4406_v36  ;;  %vm4418_vm9 = vweird.f32 %v11305_v8  ;;  %v7488_v51 = vld [vmem:[%s7614_s18 + $0x20] sm:$0xff] }
0x1613   : > { %v4437_v56 = vand.u32 2147483647, %v11308_v6  ;;  %v11371_v12 = vmul.f32 %v11067_v32, %v4396_v2  ;;  %v4439_v20 = vand.u32 2147483648, %v11308_v6  ;;  %v4454_v37 = vand.u32 2147483648, %v11312_v42 }
0x1614   : > { %v7219_v3 = vpop.eup %7218  ;;  %7224 = vrcp.f32 %v11318_v53  ;;  %vm11377_vm3 = vcmp.eq.f32.partialorder %v4422_v41, 8.507059e+37  ;;  %v4425_v15 = vor.u32 1.1754944e-38, %v4424_v25  ;;  %v4452_v50 = vand.u32 2147483647, %v11312_v42 }
0x1615   : > { %v4414_v46 = vmul.f32 %v7219_v3, %v11305_v8  ;;  %v11383_v45 = vmul.f32 %v11071_v61, %v4411_v47  ;;  %vm4433_vm1 = vweird.f32 %v11308_v6  ;;  %v4469_v32 = vand.u32 2147483648, %v11318_v53 }
0x1616   : > { %v7221_v38 = vpop.eup %7220  ;;  %7226 = vrcp.f32 %v11361_v18  ;;  %vm11389_vm0 = vcmp.eq.f32.partialorder %v4437_v56, 8.507059e+37  ;;  %vm4448_vm15 = vweird.f32 %v11312_v42  ;;  %v4467_v59 = vand.u32 2147483647, %v11318_v53 }
0x1617   : > { %v4415_v44 = vsub.f32 1.0, %v4414_v46  ;;  %v4429_v7 = vmul.f32 %v7221_v38, %v11308_v6  ;;  %vm4419_vm4 = vweird.f32 %v7219_v3  ;;  %vm4434_vm6 = vweird.f32 %v7221_v38  ;;  %v7489_v6 = vld [vmem:[%s7614_s18 + $0x28] sm:$0xff]  ;;  %v7490_v46 = vld [vmem:[%s7614_s18 + $0x30] sm:$0xff] }
0x1618   : > { %v7223_v61 = vpop.eup %7222  ;;  %v4440_v4 = vor.u32 1.1754944e-38, %v4439_v20  ;;  %v4455_v54 = vor.u32 1.1754944e-38, %v4454_v37  ;;  %vm11396_vm14 = vcmp.eq.f32.partialorder %v4452_v50, 8.507059e+37  ;;  %vm4463_vm12 = vweird.f32 %v11318_v53  ;;  %vm4420_vm8 = vmor %vm4418_vm9, %vm4419_vm4 }
0x1619   : > { %v4416_v58 = vmul.f32 %v7219_v3, %v4415_v44  ;;  %v4430_v21 = vsub.f32 1.0, %v4429_v7  ;;  %v4444_v27 = vmul.f32 %v7223_v61, %v11312_v42  ;;  %v4470_v55 = vor.u32 1.1754944e-38, %v4469_v32  ;;  %vm4435_vm13 = vmor %vm4433_vm1, %vm4434_vm6 }
0x161a   : > { %v7225_v13 = vpop.eup %7224  ;;  %vm4449_vm5 = vweird.f32 %v7223_v61  ;;  %v4482_v17 = vand.u32 2147483647, %v11361_v18  ;;  %v4484_v5 = vand.u32 2147483648, %v11361_v18  ;;  %v4488_v29 = vrot.slane %v7484_v24, 5 }
0x161b   : > { %v4417_v23 = vadd.f32 %v7219_v3, %v4416_v58  ;;  %v4431_v22 = vmul.f32 %v7221_v38, %v4430_v21  ;;  %v4445_v11 = vsub.f32 1.0, %v4444_v27  ;;  %v4459_v31 = vmul.f32 %v7225_v13, %v11318_v53  ;;  %vm4450_vm9 = vmor %vm4448_vm15, %vm4449_vm5 }
0x161c   : > { %vm11405_vm7 = vcmp.eq.f32.partialorder %v4467_v59, 8.507059e+37  ;;  %v7227_v63 = vpop.eup %7226  ;;  %vm4464_vm11 = vweird.f32 %v7225_v13  ;;  %vm4478_vm10 = vweird.f32 %v11361_v18  ;;  %v4489_v0 = vrot.slane %v7485_v52, 5  ;;  %v4537_v52 = vpop.permute.xlu1 %4536 }
0x161d   : > { %v4490_v10 = vrot.slane %v7486_v28, 5  ;;  %v4491_v16 = vrot.slane %v7487_v62, 5  ;;  %v4421_v19 = vsel %vm4420_vm8, %v7219_v3, %v4417_v23  ;;  %v4432_v49 = vadd.f32 %v7221_v38, %v4431_v22 }
0x161e   : > { %v4446_v60 = vmul.f32 %v7223_v61, %v4445_v11  ;;  %v4460_v26 = vsub.f32 1.0, %v4459_v31  ;;  %v4426_v8 = vsel %vm11377_vm3, %v4425_v15, %v4421_v19  ;;  %v4474_v2 = vmul.f32 %v7227_v63, %v11361_v18  ;;  %vm4465_vm3 = vmor %vm4463_vm12, %vm4464_vm11 }
0x161f   : > { %vm4479_vm2 = vweird.f32 %v7227_v63  ;;  %v4492_v41 = vrot.slane %v7488_v51, 5  ;;  %v4427_v25 = vmul.f32 %v11078_v35, %v4426_v8  ;;  %v4436_v36 = vsel %vm4435_vm13, %v7221_v38, %v4432_v49 }
0x1620   : > { %v4447_v47 = vadd.f32 %v7223_v61, %v4446_v60  ;;  %v4461_v56 = vmul.f32 %v7225_v13, %v4460_v26  ;;  %v4441_v3 = vsel %vm11389_vm0, %v4440_v4, %v4436_v36  ;;  %v4475_v20 = vsub.f32 1.0, %v4474_v2  ;;  %vm4480_vm1 = vmor %vm4478_vm10, %vm4479_vm2 }
0x1621   : > { %v4493_v37 = vrot.slane %v7489_v6, 5  ;;  %v4494_v14 = vrot.slane %v7490_v46, 5  ;;  %v4442_v15 = vmul.f32 %v11083_v34, %v4441_v3  ;;  %v4504_v35 = vmul.f32 %v4488_v29, %v11366_v43 }
0x1622   : > { %v4451_v50 = vsel %vm4450_vm9, %v7223_v61, %v4447_v47  ;;  %v4462_v32 = vadd.f32 %v7225_v13, %v4461_v56  ;;  %v4476_v42 = vmul.f32 %v7227_v63, %v4475_v20  ;;  %v4505_v44 = vmul.f32 %v4489_v0, %v11371_v12 }
0x1623   : > { %v4456_v38 = vsel %vm11396_vm14, %v4455_v54, %v4451_v50  ;;  %v4506_v7 = vmul.f32 %v4490_v10, %v11383_v45  ;;  %v4507_v59 = vmul.f32 %v4491_v16, %v4427_v25  ;;  %v4508_v61 = vmul.f32 %v4492_v41, %v4442_v15  ;;  %v7492_v10 = vld [vmem:[%s12745_s6] ss:$0 sm:$0xff] }
0x1624   : > { %v4457_v57 = vmul.f32 %v11087_v9, %v4456_v38  ;;  %v4466_v34 = vsel %vm4465_vm3, %v7225_v13, %v4462_v32  ;;  %v4477_v4 = vadd.f32 %v7227_v63, %v4476_v42  ;;  %v4520_v54 = vrot.slane %v4505_v44, 7  ;;  %v7491_v9 = vld [vmem:[%s7614_s18 + $0x38] sm:$0xff] }
0x1625   : > { %v4471_v43 = vsel %vm11405_vm7, %v4470_v55, %v4466_v34  ;;  %v4522_v58 = vrot.slane %v4506_v7, 6  ;;  %vm4483_vm0 = vcmp.eq.f32.partialorder %v4482_v17, 8.507059e+37  ;;  %v4485_v12 = vor.u32 1.1754944e-38, %v4484_v5 }
0x1626   : > { %v4472_v53 = vmul.f32 %v11091_v33, %v4471_v43  ;;  %v4509_v45 = vmul.f32 %v4493_v37, %v4457_v57  ;;  %v4481_v21 = vsel %vm4480_vm1, %v7227_v63, %v4477_v4  ;;  %v4495_v27 = vrot.slane %v7491_v9, 5 }
0x1627   : > { %vm13472_vm15 = vcmask 1041409   ;;  %v4524_v13 = vrot.slane %v4507_v59, 5  ;;  %v4486_v24 = vsel %vm4483_vm0, %v4485_v12, %v4481_v21  ;;  %vm13473_vm4 = vcmask 1042434   ;;  %v13482_v21 = vld [vmem:[#allocation39_spill] sm:$0xff] }
0x1628   : > { %v4521_v48 = vsel %vm13472_vm15, %v4520_v54, %v4504_v35  ;;  %v4510_v55 = vmul.f32 %v4494_v14, %v4472_v53  ;;  %v4526_v23 = vrot.slane %v4508_v61, 4  ;;  %v4487_v33 = vmul.f32 %v11096_v1, %v4486_v24 }
0x1629   : > { %v4523_v29 = vsel %vm13473_vm4, %v4522_v58, %v4521_v48  ;;  %vm13474_vm6 = vcmask 1043459   ;;  %v4528_v18 = vrot.slane %v4509_v45, 3  ;;  %vm13475_vm14 = vcmask 1044484  }
0x162a   : > { %v4525_v22 = vsel %vm13474_vm6, %v4524_v13, %v4523_v29  ;;  %v4530_v5 = vrot.slane %v4510_v55, 2  ;;  %v4511_v11 = vmul.f32 %v4495_v27, %v4487_v33  ;;  %vm13476_vm12 = vcmask 1045509   ;;  %v13483_v13 = vld [vmem:[#allocation36_spill] sm:$0xff] }
0x162b   : > { %v4527_v17 = vsel %vm13475_vm14, %v4526_v23, %v4525_v22  ;;  %vm13477_vm5 = vcmask 1046534   ;;  %vm13478_vm7 = vcmask 1047559   ;;  %vm13480_vm8 = vcmask 130048  }
0x162c   : > { %v4529_v31 = vsel %vm13476_vm12, %v4528_v18, %v4527_v17  ;;  %v4532_v63 = vrot.slane %v4511_v11, 1  ;;  %vm13481_vm11 = vcmask 392192   ;;  %v13486_v18 = vld [vmem:[#allocation34_spill] sm:$0xff]  ;;  %vm13487_vm4 = vcmask 261120  }
0x162d   : > { %v4531_v39 = vsel %vm13477_vm5, %v4530_v5, %v4529_v31  ;;  %vm13488_vm6 = vmmov %vm13487_vm4  ;;  %vm13497_vm14 = vcmask 1041409   ;;  %vm13499_vm12 = vcmask 1042434   ;;  %vm13502_vm5 = vcmask 1043459  }
0x162e   : > { %v11456_v0 = vsel %vm13478_vm7, %v4532_v63, %v4531_v39  ;;  %vm13505_vm7 = vcmask 1044484  }
0x162f   : > { %13479 = vst [vmem:[#allocation43_spill] sm:$0xff] %v11456_v0  ;;  %v4539_v28 = vsel %vm13480_vm8, %v11456_v0, %v4537_v52  ;;  %vm13507_vm8 = vcmask 1045509  }
0x1630   : > { %6728 = vmatmul.msk.f32.vlgmr.msra.gmra.mxu2 %vm13481_vm11, %v4539_v28  ;;  %vm13509_vm11 = vcmask 1046534  }
0x1691   : > { %v4938_v1 = vpop.f32.mrf.mxu3 }
0x1692   : > { %v4939_v62 = vadd.f32 %v7492_v10, %v4938_v1 }
0x1694   : > { %7228 = vtanh.f32 %v4939_v62  ;;  %v6731_v26 = vmul.f32 -1.442695, %v4939_v62 }
0x169a   : > { %v7229_v16 = vpop.eup %7228 }
0x169b   : > { %4963 = vrot.lane.b32.xlu0 %v7229_v16, %s7536_s12 }
0x16b3   : > { %v4560_v19 = vpop.f32.mrf.mxu2 }
0x16b4   : > { %v4561_v49 = vadd.f32 %v7492_v10, %v4560_v19 }
0x16b6   : > { %7230 = vtanh.f32 %v4561_v49  ;;  %v6729_v2 = vmul.f32 -1.442695, %v4561_v49 }
0x16b7   : > { %7232 = vpow2.f32 %v6731_v26 }
0x16b8   : > { %7234 = vpow2.f32 %v6729_v2 }
0x16bc   : > { %v7231_v60 = vpop.eup %7230 }
0x16bd   : > { %4585 = vrot.lane.b32.xlu2 %v7231_v60, %s7536_s12  ;;  %v7233_v8 = vpop.eup %7232 }
0x16be   : > { %v4944_v51 = vadd.f32 1.0, %v7233_v8  ;;  %v7235_v41 = vpop.eup %7234 }
0x16bf   : > { %v4566_v36 = vadd.f32 1.0, %v7235_v41 }
0x16c0   : > { %7236 = vrcp.f32 %v4944_v51  ;;  %v4956_v46 = vand.u32 2147483648, %v4944_v51  ;;  %vm4950_vm13 = vweird.f32 %v4944_v51  ;;  %v4954_v15 = vand.u32 2147483647, %v4944_v51 }
0x16c1   : > { %7238 = vrcp.f32 %v4566_v36  ;;  %v4578_v57 = vand.u32 2147483648, %v4566_v36  ;;  %vm4572_vm1 = vweird.f32 %v4566_v36  ;;  %v4576_v34 = vand.u32 2147483647, %v4566_v36 }
0x16c2   : > { %v4957_v32 = vor.u32 1.1754944e-38, %v4956_v46  ;;  %vm4955_vm9 = vcmp.eq.f32.partialorder %v4954_v15, 8.507059e+37  ;;  %v13493_v46 = vld [vmem:[#allocation16_spill] sm:$0xff] }
0x16c3   : > { %v4579_v61 = vor.u32 1.1754944e-38, %v4578_v57  ;;  %vm4577_vm15 = vcmp.eq.f32.partialorder %v4576_v34, 8.507059e+37  ;;  %v13496_v34 = vld [vmem:[#allocation18_spill] sm:$0xff] }
0x16c6   : > { %v7237_v25 = vpop.eup %7236 }
0x16c7   : > { %v4946_v47 = vmul.f32 %v7237_v25, %v4944_v51  ;;  %v7239_v3 = vpop.eup %7238  ;;  %vm4951_vm10 = vweird.f32 %v7237_v25 }
0x16c8   : > { %v4568_v6 = vmul.f32 %v7239_v3, %v4566_v36  ;;  %vm4952_vm2 = vmor %vm4950_vm13, %vm4951_vm10  ;;  %vm4573_vm3 = vweird.f32 %v7239_v3  ;;  %vm13512_vm13 = vcmask 1047559  }
0x16c9   : > { %v4947_v56 = vsub.f32 1.0, %v4946_v47  ;;  %vm4574_vm0 = vmor %vm4572_vm1, %vm4573_vm3  ;;  %v13490_v47 = vld [vmem:[#allocation13_spill] sm:$0xff] }
0x16ca   : > { %v4569_v14 = vsub.f32 1.0, %v4568_v6  ;;  %v13492_v6 = vld [vmem:[#allocation15_spill] sm:$0xff]  ;;  %vm13511_vm10 = vmmov %vm13497_vm14 }
0x16cb   : > { %v4948_v20 = vmul.f32 %v7237_v25, %v4947_v56  ;;  %vm13515_vm3 = vmmov %vm13502_vm5 }
0x16cc   : > { %v4570_v35 = vmul.f32 %v7239_v3, %v4569_v14  ;;  %vm13516_vm1 = vmmov %vm13505_vm7 }
0x16cd   : > { %v4949_v37 = vadd.f32 %v7237_v25, %v4948_v20 }
0x16ce   : > { %v4571_v7 = vadd.f32 %v7239_v3, %v4570_v35  ;;  %v13494_v35 = vld [vmem:[#allocation11_spill] sm:$0xff] }
0x16cf   : > { %v4953_v50 = vsel %vm4952_vm2, %v7237_v25, %v4949_v37  ;;  %v13489_v25 = vld [vmem:[#allocation12_spill] sm:$0xff]  ;;  %vm13513_vm2 = vmmov %vm13499_vm12 }
0x16d0   : > { %v4958_v42 = vsel %vm4955_vm9, %v4957_v32, %v4953_v50  ;;  %v4575_v59 = vsel %vm4574_vm0, %v7239_v3, %v4571_v7  ;;  %v13491_v3 = vld [vmem:[#allocation14_spill] sm:$0xff]  ;;  %vm13514_vm9 = vcmask 130048   ;;  %vm13517_vm0 = vmmov %vm13507_vm8 }
0x16d1   : > { %v4580_v4 = vsel %vm4577_vm15, %v4579_v61, %v4575_v59  ;;  %v4961_v58 = vmul.f32 %v4958_v42, %v10924_v40  ;;  %vm13518_vm15 = vmmov %vm13509_vm11 }
0x16d2   : > { %v4583_v9 = vmul.f32 %v4580_v4, %v13482_v21 }
0x170d   : > { %v4964_v38 = vpop.permute.xlu0 %4963 }
0x170e   : > { %v4966_v44 = vmul.f32 %v4964_v38, %v4958_v42 }
0x1710   : > { %4968 = vrot.lane.b32.xlu0 %v4966_v44, %s7537_s13 }
0x1717   : > { %v4586_v43 = vpop.permute.xlu2 %4585 }
0x1718   : > { %v4588_v54 = vmul.f32 %v4586_v43, %v4580_v4 }
0x171a   : > { %4590 = vrot.lane.b32.xlu1 %v4588_v54, %s7537_s13 }
0x1782   : > { %v4969_v53 = vpop.permute.xlu0 %4968 }
0x1783   : > { %v11469_v12 = vadd.f32 %v4969_v53, %v4961_v58 }
0x1785   : > { %7240 = vtanh.f32 %v11469_v12  ;;  %v5357_v55 = vmul.f32 %v11469_v12, %v13483_v13 }
0x178b   : > { %v7241_v45 = vpop.eup %7240 }
0x178c   : > { %v4591_v27 = vpop.permute.xlu1 %4590  ;;  %4974 = vrot.lane.b32.xlu1 %v7241_v45, %s7536_s12  ;;  %v13498_v45 = vld [vmem:[#allocation4_spill] sm:$0xff] }
0x178d   : > { %v11474_v48 = vadd.f32 %v4591_v27, %v4583_v9 }
0x178f   : > { %7242 = vtanh.f32 %v11474_v48  ;;  %v4979_v24 = vmul.f32 %v11474_v48, %v13483_v13 }
0x1791   : > { %4981 = vrot.lane.b32.xlu0 %v4979_v24, %s7536_s12  ;;  %v13500_v24 = vld [vmem:[#allocation5_spill] sm:$0xff] }
0x1795   : > { %v7243_v40 = vpop.eup %7242 }
0x1796   : > { %4596 = vrot.lane.b32.xlu2 %v7243_v40, %s7536_s12 }
0x179e   : > { %5359 = vrot.lane.b32.xlu2 %v5357_v55, %s7536_s12  ;;  %v13501_v55 = vld [vmem:[#allocation6_spill] sm:$0xff] }
0x17f0   : > { %v4597_v29 = vpop.permute.xlu2 %4596 }
0x17f1   : > { %v11484_v23 = vmul.f32 %v4597_v29, %v4580_v4 }
0x17f3   : > { %13484 = vst [vmem:[#allocation39_spill] sm:$0xff] %v11484_v23  ;;  %v4978_v11 = vmul.f32 %v11484_v23, %v13486_v18 }
0x17f8   : > { %v5360_v5 = vpop.permute.xlu2 %5359 }
0x17fe   : > { %v4975_v33 = vpop.permute.xlu1 %4974 }
0x17ff   : > { %v11486_v22 = vmul.f32 %v4975_v33, %v4958_v42  ;;  %v13495_v42 = vld [vmem:[#allocation17_spill] sm:$0xff] }
0x1801   : > { %13485 = vst [vmem:[#allocation44_spill] sm:$0xff] %v11486_v22  ;;  %v5356_v17 = vmul.f32 %v11486_v22, %v13486_v18 }
0x1803   : > { %v4982_v31 = vpop.permute.xlu0 %4981  ;;  %v5362_v39 = vadd.f32 %v5360_v5, %v5356_v17  ;;  %v13503_v5 = vld [vmem:[#allocation3_spill] sm:$0xff] }
0x1804   : > { %v4984_v63 = vadd.f32 %v4982_v31, %v4978_v11  ;;  %v13504_v31 = vld [vmem:[#allocation7_spill] sm:$0xff] }
0x1805   : > { %5364 = vrot.lane.b32.xlu0 %v5362_v39, %s7537_s13 }
0x1806   : > { %4986 = vrot.lane.b32.xlu1 %v4984_v63, %s7537_s13 }
0x1877   : > { %v5365_v52 = vpop.permute.xlu0 %5364 }
0x1878   : > { %v4987_v28 = vpop.permute.xlu1 %4986  ;;  %v5367_v1 = vsel %vm13487_vm4, %v5365_v52, 0.0  ;;  %v13506_v52 = vld [vmem:[#allocation8_spill] sm:$0xff]  ;;  %vm13519_vm4 = vmmov %vm13512_vm13 }
0x1879   : > { %v4989_v10 = vsel %vm13488_vm6, %v4987_v28, 0.0  ;;  %5368 = vadd.xlane.f32.xlu1 %v5367_v1  ;;  %vm13520_vm6 = vmmov %vm13514_vm9 }
0x187a   : > { %4990 = vadd.xlane.f32.xlu2 %v4989_v10 }
0x18ec   : > { %v5369_v62 = vpop.xlane.xlu1 %5368 }
0x18ed   : > { %v4991_v16 = vpop.xlane.xlu2 %4990  ;;  %v5371_v41 = vrot.slane %v5369_v62, 1  ;;  %v5372_v15 = vrot.slane %v5369_v62, 2  ;;  %v5373_v50 = vrot.slane %v5369_v62, 3  ;;  %v5374_v32 = vrot.slane %v5369_v62, 4 }
0x18ee   : > { %v4993_v19 = vrot.slane %v4991_v16, 1  ;;  %v4994_v49 = vrot.slane %v4991_v16, 2  ;;  %v4995_v60 = vrot.slane %v4991_v16, 3  ;;  %v4996_v26 = vrot.slane %v4991_v16, 4 }
0x18ef   : > { %v4997_v8 = vrot.slane %v4991_v16, 5  ;;  %v4998_v2 = vrot.slane %v4991_v16, 6  ;;  %v4999_v51 = vrot.slane %v4991_v16, 7  ;;  %v5008_v38 = vadd.f32 %v4991_v16, %v13494_v35 }
0x18f0   : > { %v5009_v36 = vadd.f32 %v4993_v19, %v13489_v25  ;;  %v5010_v56 = vadd.f32 %v4994_v49, %v13490_v47  ;;  %v5011_v20 = vadd.f32 %v4995_v60, %v13491_v3  ;;  %v11500_v37 = vadd.f32 %v4996_v26, %v13492_v6  ;;  %v13508_v49 = vld [vmem:[#allocation9_spill] sm:$0xff]  ;;  %v13510_v26 = vld [vmem:[#allocation10_spill] sm:$0xff] }
0x18f1   : > { %v11503_v14 = vadd.f32 %v4997_v8, %v13493_v46  ;;  %v11507_v44 = vadd.f32 %v4998_v2, %v13495_v42  ;;  %v11510_v59 = vadd.f32 %v4999_v51, %v13496_v34  ;;  %v5375_v4 = vrot.slane %v5369_v62, 5 }
0x18f2   : > { %v5024_v7 = vrot.slane %v5009_v36, 7  ;;  %v5026_v57 = vrot.slane %v5010_v56, 6  ;;  %v5028_v61 = vrot.slane %v5011_v20, 5  ;;  %v5030_v43 = vrot.slane %v11500_v37, 4 }
0x18f3   : > { %v5032_v58 = vrot.slane %v11503_v14, 3  ;;  %v5376_v53 = vrot.slane %v5369_v62, 6  ;;  %v11516_v21 = vadd.f32 %v5371_v41, %v13498_v45  ;;  %v5377_v27 = vrot.slane %v5369_v62, 7 }
0x18f4   : > { %v5025_v54 = vsel %vm13497_vm14, %v5024_v7, %v5008_v38  ;;  %v11520_v40 = vadd.f32 %v5372_v15, %v13500_v24  ;;  %v11523_v29 = vadd.f32 %v5373_v50, %v13501_v55  ;;  %v5034_v17 = vrot.slane %v11507_v44, 2  ;;  %vm13521_vm14 = vmmov %vm13511_vm10 }
0x18f5   : > { %v5027_v9 = vsel %vm13499_vm12, %v5026_v57, %v5025_v54  ;;  %v5386_v11 = vadd.f32 %v5369_v62, %v13503_v5  ;;  %v11529_v39 = vadd.f32 %v5374_v32, %v13504_v31  ;;  %v11533_v28 = vadd.f32 %v5375_v4, %v13506_v52  ;;  %vm13522_vm12 = vmmov %vm13513_vm2 }
0x18f6   : > { %v5029_v33 = vsel %vm13502_vm5, %v5028_v61, %v5027_v9  ;;  %v5402_v1 = vrot.slane %v11516_v21, 7  ;;  %v5404_v10 = vrot.slane %v11520_v40, 6  ;;  %v5036_v19 = vrot.slane %v11510_v59, 1  ;;  %vm13523_vm5 = vmmov %vm13515_vm3 }
0x18f7   : > { %v5031_v63 = vsel %vm13505_vm7, %v5030_v43, %v5029_v33  ;;  %v11540_v60 = vadd.f32 %v5376_v53, %v13508_v49  ;;  %v11544_v8 = vadd.f32 %v5377_v27, %v13510_v26  ;;  %v5406_v51 = vrot.slane %v11523_v29, 5  ;;  %vm13524_vm7 = vmmov %vm13511_vm10 }
0x18f8   : > { %v5033_v16 = vsel %vm13507_vm8, %v5032_v58, %v5031_v63  ;;  %v5403_v2 = vsel %vm13511_vm10, %v5402_v1, %v5386_v11  ;;  %v5408_v50 = vrot.slane %v11529_v39, 4  ;;  %v5410_v57 = vrot.slane %v11533_v28, 3  ;;  %vm13525_vm8 = vmmov %vm13516_vm1 }
0x18f9   : > { %v5035_v62 = vsel %vm13509_vm11, %v5034_v17, %v5033_v16  ;;  %v5405_v15 = vsel %vm13513_vm2, %v5404_v10, %v5403_v2  ;;  %v5412_v43 = vrot.slane %v11540_v60, 2  ;;  %v5414_v54 = vrot.slane %v11544_v8, 1  ;;  %vm13526_vm11 = vmmov %vm13517_vm0 }
0x18fa   : > { %v5037_v41 = vsel %vm13512_vm13, %v5036_v19, %v5035_v62  ;;  %v5407_v7 = vsel %vm13515_vm3, %v5406_v51, %v5405_v15  ;;  %vm13527_vm10 = vmmov %vm13513_vm2 }
0x18fb   : > { %v5039_v32 = vsel %vm13514_vm9, %v5037_v41, -inf  ;;  %v5409_v61 = vsel %vm13516_vm1, %v5408_v50, %v5407_v7  ;;  %vm13528_vm13 = vmmov %vm13518_vm15 }
0x18fc   : > { %5040 = vmax.xlane.f32.xlu0 %v5039_v32  ;;  %v5411_v4 = vsel %vm13517_vm0, %v5410_v57, %v5409_v61  ;;  %vm13529_vm2 = vmmov %vm13519_vm4 }
0x18fd   : > { %v5413_v58 = vsel %vm13518_vm15, %v5412_v43, %v5411_v4  ;;  %vm13530_vm9 = vmmov %vm13520_vm6 }
0x18fe   : > { %v5415_v53 = vsel %vm13519_vm4, %v5414_v54, %v5413_v58  ;;  %vm13531_vm15 = vmmov %vm13528_vm13 }
0x18ff   : > { %v5417_v9 = vsel %vm13520_vm6, %v5415_v53, -inf  ;;  %vm13532_vm4 = vmmov %vm13529_vm2 }
0x1900   : > { %5418 = vmax.xlane.f32.xlu2 %v5417_v9 }
0x1918   : > { %5292 = vrot.lane.b32.xlu2 %v11484_v23, %s7539_s20 }
0x196f   : > { %v5041_v27 = vpop.xlane.xlu0 %5040 }
0x1970   : > { %v5043_v33 = vrot.slane %v5041_v27, 1  ;;  %v5044_v17 = vrot.slane %v5041_v27, 2  ;;  %v5045_v63 = vrot.slane %v5041_v27, 3  ;;  %v5046_v1 = vrot.slane %v5041_v27, 4 }
0x1971   : > { %v5047_v10 = vrot.slane %v5041_v27, 5  ;;  %v5058_v16 = vsub.f32 %v5008_v38, %v5041_v27  ;;  %v5048_v51 = vrot.slane %v5041_v27, 6  ;;  %v5049_v15 = vrot.slane %v5041_v27, 7 }
0x1972   : > { %v5059_v19 = vsub.f32 %v5009_v36, %v5043_v33  ;;  %v5060_v62 = vsub.f32 %v5010_v56, %v5044_v17  ;;  %v5061_v2 = vsub.f32 %v5011_v20, %v5045_v63  ;;  %v5062_v50 = vsub.f32 %v11500_v37, %v5046_v1 }
0x1973   : > { %v5066_v41 = vmul.f32 1.442695, %v5058_v16  ;;  %v5419_v61 = vpop.xlane.xlu2 %5418  ;;  %v5063_v43 = vsub.f32 %v11503_v14, %v5047_v10  ;;  %v5064_v56 = vsub.f32 %v11507_v44, %v5048_v51  ;;  %v5065_v27 = vsub.f32 %v11510_v59, %v5049_v15 }
0x1974   : > { %v5068_v32 = vmul.f32 1.442695, %v5059_v19  ;;  %v5070_v7 = vmul.f32 1.442695, %v5060_v62  ;;  %v5072_v57 = vmul.f32 1.442695, %v5061_v2  ;;  %v5436_v36 = vsub.f32 %v5386_v11, %v5419_v61 }
0x1975   : > { %7244 = vpow2.f32 %v5066_v41  ;;  %v5421_v4 = vrot.slane %v5419_v61, 1  ;;  %v5422_v54 = vrot.slane %v5419_v61, 2  ;;  %v5423_v58 = vrot.slane %v5419_v61, 3 }
0x1976   : > { %7246 = vpow2.f32 %v5068_v32  ;;  %v5424_v38 = vrot.slane %v5419_v61, 4  ;;  %v5425_v20 = vrot.slane %v5419_v61, 5  ;;  %v5444_v9 = vmul.f32 1.442695, %v5436_v36 }
0x1977   : > { %7248 = vpow2.f32 %v5070_v7  ;;  %v5437_v53 = vsub.f32 %v11516_v21, %v5421_v4  ;;  %v5438_v37 = vsub.f32 %v11520_v40, %v5422_v54  ;;  %v5439_v14 = vsub.f32 %v11523_v29, %v5423_v58 }
0x1978   : > { %7250 = vpow2.f32 %v5072_v57  ;;  %v5074_v63 = vmul.f32 1.442695, %v5062_v50  ;;  %v5076_v1 = vmul.f32 1.442695, %v5063_v43  ;;  %v5426_v11 = vrot.slane %v5419_v61, 6 }
0x1979   : > { %v5446_v33 = vmul.f32 1.442695, %v5437_v53  ;;  %v5448_v17 = vmul.f32 1.442695, %v5438_v37  ;;  %7252 = vpow2.f32 %v5444_v9  ;;  %v5440_v44 = vsub.f32 %v11529_v39, %v5424_v38 }
0x197a   : > { %v5078_v21 = vmul.f32 1.442695, %v5064_v56  ;;  %v5427_v16 = vrot.slane %v5419_v61, 7  ;;  %v5441_v40 = vsub.f32 %v11533_v28, %v5425_v20  ;;  %v5080_v59 = vmul.f32 1.442695, %v5065_v27 }
0x197b   : > { %v11571_v10 = vpop.eup %7244  ;;  %7254 = vpow2.f32 %v5446_v33  ;;  %v5442_v29 = vsub.f32 %v11540_v60, %v5426_v11  ;;  %v5450_v2 = vmul.f32 1.442695, %v5439_v14  ;;  %v5452_v28 = vmul.f32 1.442695, %v5440_v44 }
0x197c   : > { %v11574_v19 = vpop.eup %7246  ;;  %7256 = vpow2.f32 %v5448_v17  ;;  %v5443_v39 = vsub.f32 %v11544_v8, %v5427_v16  ;;  %v5454_v32 = vmul.f32 1.442695, %v5441_v40 }
0x197d   : > { %v11577_v62 = vpop.eup %7248  ;;  %7258 = vpow2.f32 %v5074_v63  ;;  %v5090_v51 = vrot.slane %v11574_v19, 7  ;;  %v5456_v57 = vmul.f32 1.442695, %v5442_v29 }
0x197e   : > { %v11581_v41 = vpop.eup %7250  ;;  %7260 = vpow2.f32 %v5076_v1  ;;  %v5092_v15 = vrot.slane %v11577_v62, 6  ;;  %v5458_v43 = vmul.f32 1.442695, %v5443_v39 }
0x197f   : > { %7262 = vpow2.f32 %v5078_v21  ;;  %v5091_v50 = vsel %vm13521_vm14, %v5090_v51, %v11571_v10  ;;  %v11586_v60 = vpop.eup %7252  ;;  %v5094_v8 = vrot.slane %v11581_v41, 5 }
0x1980   : > { %7264 = vpow2.f32 %v5080_v59  ;;  %v5093_v7 = vsel %vm13522_vm12, %v5092_v15, %v5091_v50 }
0x1981   : > { %v11589_v61 = vpop.eup %7254  ;;  %7266 = vpow2.f32 %v5450_v2  ;;  %v5095_v38 = vsel %vm13523_vm5, %v5094_v8, %v5093_v7 }
0x1982   : > { %v11592_v4 = vpop.eup %7256  ;;  %7268 = vpow2.f32 %v5452_v28  ;;  %v5468_v54 = vrot.slane %v11589_v61, 7 }
0x1983   : > { %v11595_v58 = vpop.eup %7258  ;;  %7270 = vpow2.f32 %v5454_v32  ;;  %v5470_v36 = vrot.slane %v11592_v4, 6 }
0x1984   : > { %v11599_v56 = vpop.eup %7260  ;;  %v5096_v20 = vrot.slane %v11595_v58, 4  ;;  %7272 = vpow2.f32 %v5456_v57  ;;  %v5469_v53 = vsel %vm13524_vm7, %v5468_v54, %v11586_v60 }
0x1985   : > { %v11604_v37 = vpop.eup %7262  ;;  %v5098_v9 = vrot.slane %v11599_v56, 3  ;;  %7274 = vpow2.f32 %v5458_v43  ;;  %v5471_v11 = vsel %vm13527_vm10, %v5470_v36, %v5469_v53 }
0x1986   : > { %v11607_v27 = vpop.eup %7264  ;;  %v5097_v14 = vsel %vm13525_vm8, %v5096_v20, %v5095_v38  ;;  %v5100_v33 = vrot.slane %v11604_v37, 2 }
0x1987   : > { %v11611_v17 = vpop.eup %7266  ;;  %v5099_v63 = vsel %vm13526_vm11, %v5098_v9, %v5097_v14  ;;  %v5102_v1 = vrot.slane %v11607_v27, 1 }
0x1988   : > { %v11616_v44 = vpop.eup %7268  ;;  %v5101_v21 = vsel %vm13528_vm13, %v5100_v33, %v5099_v63  ;;  %v5472_v16 = vrot.slane %v11611_v17, 5 }
0x1989   : > { %v11620_v40 = vpop.eup %7270  ;;  %v5103_v59 = vsel %vm13529_vm2, %v5102_v1, %v5101_v21  ;;  %v5474_v29 = vrot.slane %v11616_v44, 4 }
0x198a   : > { %v11624_v2 = vpop.eup %7272  ;;  %v5105_v51 = vsel %vm13530_vm9, %v5103_v59, 0.0  ;;  %v5473_v39 = vsel %vm13515_vm3, %v5472_v16, %v5471_v11  ;;  %v5476_v15 = vrot.slane %v11620_v40, 3 }
0x198b   : > { %v11629_v28 = vpop.eup %7274  ;;  %5106 = vadd.xlane.f32.xlu1 %v5105_v51  ;;  %v5475_v50 = vsel %vm13516_vm1, %v5474_v29, %v5473_v39  ;;  %v5478_v32 = vrot.slane %v11624_v2, 2 }
0x198c   : > { %v5477_v7 = vsel %vm13517_vm0, %v5476_v15, %v5475_v50  ;;  %v5480_v57 = vrot.slane %v11629_v28, 1 }
0x198d   : > { %v5479_v8 = vsel %vm13531_vm15, %v5478_v32, %v5477_v7 }
0x198e   : > { %v5481_v43 = vsel %vm13532_vm4, %v5480_v57, %v5479_v8 }
0x198f   : > { %v5483_v54 = vsel %vm13520_vm6, %v5481_v43, 0.0 }
0x1990   : > { %5484 = vadd.xlane.f32.xlu0 %v5483_v54 }
0x19a4   : > { %5670 = vrot.lane.b32.xlu1 %v11486_v22, %s7539_s20 }
0x19fe   : > { %v11640_v38 = vpop.xlane.xlu1 %5106 }
0x19ff   : > { %v11643_v36 = vrot.slane %v11640_v38, 1  ;;  %7276 = vrcp.f32 %v11640_v38  ;;  %v11649_v53 = vrot.slane %v11640_v38, 2  ;;  %v11664_v63 = vrot.slane %v11640_v38, 3 }
0x1a00   : > { %v11667_v1 = vrot.slane %v11640_v38, 4  ;;  %v11674_v21 = vrot.slane %v11640_v38, 5  ;;  %v11677_v16 = vrot.slane %v11640_v38, 6 }
0x1a03   : > { %v11646_v20 = vpop.xlane.xlu0 %5484 }
0x1a04   : > { %7278 = vrcp.f32 %v11646_v20  ;;  %v11653_v9 = vrot.slane %v11646_v20, 1  ;;  %v11656_v14 = vrot.slane %v11646_v20, 2  ;;  %v11660_v33 = vrot.slane %v11646_v20, 3 }
0x1a05   : > { %7280 = vrcp.f32 %v11643_v36  ;;  %v11670_v11 = vrot.slane %v11646_v20, 4  ;;  %v5513_v59 = vand.u32 2147483648, %v11646_v20  ;;  %v11683_v39 = vpop.eup %7276  ;;  %v5511_v15 = vand.u32 2147483647, %v11646_v20 }
0x1a06   : > { %7282 = vrcp.f32 %v11653_v9  ;;  %v5528_v50 = vand.u32 2147483648, %v11653_v9  ;;  %v11692_v57 = vrot.slane %v11646_v20, 5  ;;  %v11695_v8 = vrot.slane %v11646_v20, 6 }
0x1a07   : > { %7284 = vrcp.f32 %v11656_v14  ;;  %v11698_v43 = vrot.slane %v11646_v20, 7  ;;  %v5543_v54 = vand.u32 2147483648, %v11656_v14  ;;  %v5526_v32 = vand.u32 2147483647, %v11653_v9 }
0x1a08   : > { %7286 = vrcp.f32 %v11649_v53  ;;  %v5558_v22 = vand.u32 2147483648, %v11660_v33  ;;  %vm5507_vm14 = vweird.f32 %v11646_v20  ;;  %v5514_v30 = vor.u32 1.1754944e-38, %v5513_v59 }
0x1a09   : > { %7288 = vrcp.f32 %v11660_v33  ;;  %vm5522_vm12 = vweird.f32 %v11653_v9  ;;  %v5541_v0 = vand.u32 2147483647, %v11656_v14  ;;  %vm11715_vm5 = vcmp.eq.f32.partialorder %v5511_v15, 8.507059e+37 }
0x1a0a   : > { %v11689_v7 = vpop.eup %7278  ;;  %7290 = vrcp.f32 %v11670_v11  ;;  %v5529_v6 = vor.u32 1.1754944e-38, %v5528_v50  ;;  %vm5537_vm7 = vweird.f32 %v11656_v14  ;;  %v5556_v3 = vand.u32 2147483647, %v11660_v33 }
0x1a0b   : > { %v11701_v51 = vpop.eup %7280  ;;  %v5503_v29 = vmul.f32 %v11689_v7, %v11646_v20  ;;  %vm5508_vm8 = vweird.f32 %v11689_v7  ;;  %vm5552_vm11 = vweird.f32 %v11660_v33  ;;  %7292 = vrcp.f32 %v11692_v57 }
0x1a0c   : > { %v11708_v23 = vpop.eup %7282  ;;  %vm11731_vm10 = vcmp.eq.f32.partialorder %v5526_v32, 8.507059e+37  ;;  %v5559_v49 = vor.u32 1.1754944e-38, %v5558_v22  ;;  %v5571_v52 = vand.u32 2147483647, %v11670_v11  ;;  %vm5567_vm2 = vweird.f32 %v11670_v11  ;;  %vm11755_vm1 = vmor %vm5507_vm14, %vm5508_vm8  ;;  %v7493_v22 = vld [vmem:[%s7614_s18 + $0x48] sm:$0xff] }
0x1a0d   : > { %v11713_v34 = vpop.eup %7284  ;;  %v5504_v42 = vsub.f32 1.0, %v5503_v29  ;;  %v5518_v35 = vmul.f32 %v11708_v23, %v11653_v9  ;;  %v5544_v29 = vor.u32 1.1754944e-38, %v5543_v54  ;;  %vm5523_vm13 = vweird.f32 %v11708_v23 }
0x1a0e   : > { %v11723_v59 = vpop.eup %7286  ;;  %v5533_v47 = vmul.f32 %v11713_v34, %v11656_v14  ;;  %vm11741_vm9 = vcmp.eq.f32.partialorder %v5541_v0, 8.507059e+37  ;;  %vm11745_vm3 = vcmp.eq.f32.partialorder %v5556_v3, 8.507059e+37  ;;  %v5573_v32 = vand.u32 2147483648, %v11670_v11  ;;  %vm11776_vm4 = vmor %vm5522_vm12, %vm5523_vm13 }
0x1a0f   : > { %v7289_v15 = vpop.eup %7288  ;;  %v5505_v25 = vmul.f32 %v11689_v7, %v5504_v42  ;;  %v5519_v50 = vsub.f32 1.0, %v5518_v35  ;;  %7294 = vrcp.f32 %v11695_v8  ;;  %vm5538_vm0 = vweird.f32 %v11713_v34 }
0x1a10   : > { %v5534_v5 = vsub.f32 1.0, %v5533_v47  ;;  %v5548_v54 = vmul.f32 %v7289_v15, %v11660_v33  ;;  %v7291_v31 = vpop.eup %7290  ;;  %vm11766_vm15 = vcmp.eq.f32.partialorder %v5571_v52, 8.507059e+37  ;;  %v5586_v20 = vand.u32 2147483647, %v11692_v57  ;;  %vm11792_vm12 = vmor %vm5537_vm7, %vm5538_vm0 }
0x1a11   : > { %v5506_v55 = vadd.f32 %v11689_v7, %v5505_v25  ;;  %v5520_v42 = vmul.f32 %v11708_v23, %v5519_v50  ;;  %v5563_v3 = vmul.f32 %v7291_v31, %v11670_v11  ;;  %v5588_v18 = vand.u32 2147483648, %v11692_v57 }
0x1a12   : > { %v5535_v0 = vmul.f32 %v11713_v34, %v5534_v5  ;;  %v5549_v47 = vsub.f32 1.0, %v5548_v54  ;;  %v7293_v5 = vpop.eup %7292  ;;  %vm5553_vm6 = vweird.f32 %v7289_v15  ;;  %v5574_v25 = vor.u32 1.1754944e-38, %v5573_v32 }
0x1a13   : > { %v5510_v50 = vsel %vm11755_vm1, %v11689_v7, %v5506_v55  ;;  %v5521_v24 = vadd.f32 %v11708_v23, %v5520_v42  ;;  %v5564_v52 = vsub.f32 1.0, %v5563_v3  ;;  %v5578_v13 = vmul.f32 %v7293_v5, %v11692_v57  ;;  %vm5554_vm13 = vmor %vm5552_vm11, %vm5553_vm6 }
0x1a14   : > { %v5536_v55 = vadd.f32 %v11713_v34, %v5535_v0  ;;  %v5550_v7 = vmul.f32 %v7289_v15, %v5549_v47  ;;  %vm5582_vm14 = vweird.f32 %v11692_v57  ;;  %v5515_v9 = vsel %vm11715_vm5, %v5514_v30, %v5510_v50 }
0x1a15   : > { %v5525_v42 = vsel %vm11776_vm4, %v11708_v23, %v5521_v24  ;;  %v5565_v3 = vmul.f32 %v7291_v31, %v5564_v52  ;;  %vm5568_vm8 = vweird.f32 %v7291_v31  ;;  %v7295_v23 = vpop.eup %7294  ;;  %v5579_v30 = vsub.f32 1.0, %v5578_v13 }
0x1a16   : > { %v5551_v47 = vadd.f32 %v7289_v15, %v5550_v7  ;;  %v5540_v24 = vsel %vm11792_vm12, %v11713_v34, %v5536_v55  ;;  %vm11801_vm5 = vcmp.eq.f32.partialorder %v5586_v20, 8.507059e+37  ;;  %v5589_v14 = vor.u32 1.1754944e-38, %v5588_v18  ;;  %vm5569_vm7 = vmor %vm5567_vm2, %vm5568_vm8 }
0x1a17   : > { %v5530_v32 = vsel %vm11731_vm10, %v5529_v6, %v5525_v42  ;;  %v5566_v54 = vadd.f32 %v7291_v31, %v5565_v3  ;;  %v5593_v7 = vmul.f32 %v7295_v23, %v11695_v8  ;;  %v5516_v52 = vmul.f32 %v11586_v60, %v5515_v9  ;;  %v7494_v42 = vld [vmem:[%s7614_s18 + $0x50] sm:$0xff]  ;;  %v7496_v9 = vld [vmem:[%s7614_s18 + $0x58] sm:$0xff] }
0x1a18   : > { %v5555_v50 = vsel %vm5554_vm13, %v7289_v15, %v5551_v47  ;;  %v5580_v34 = vmul.f32 %v7293_v5, %v5579_v30  ;;  %vm5583_vm11 = vweird.f32 %v7293_v5  ;;  %v5601_v13 = vand.u32 2147483647, %v11695_v8 }
0x1a19   : > { %v5545_v33 = vsel %vm11741_vm9, %v5544_v29, %v5540_v24  ;;  %v5560_v18 = vsel %vm11745_vm3, %v5559_v49, %v5555_v50  ;;  %v5570_v6 = vsel %vm5569_vm7, %v7291_v31, %v5566_v54  ;;  %v5594_v26 = vsub.f32 1.0, %v5593_v7  ;;  %vm5584_vm10 = vmor %vm5582_vm14, %vm5583_vm11  ;;  %v7497_v24 = vld [vmem:[%s7614_s18 + $0x60] sm:$0xff] }
0x1a1a   : > { %v5531_v15 = vmul.f32 %v11589_v61, %v5530_v32  ;;  %v5581_v20 = vadd.f32 %v7293_v5, %v5580_v34  ;;  %v5603_v60 = vand.u32 2147483648, %v11695_v8  ;;  %7296 = vrcp.f32 %v11698_v43  ;;  %v7498_v32 = vld [vmem:[%s7614_s18 + $0x68] sm:$0xff] }
0x1a1b   : > { %v5575_v11 = vsel %vm11766_vm15, %v5574_v25, %v5570_v6  ;;  %v5595_v29 = vmul.f32 %v7295_v23, %v5594_v26  ;;  %vm5597_vm2 = vweird.f32 %v11695_v8  ;;  %vm5598_vm9 = vweird.f32 %v7295_v23 }
0x1a1c   : > { %v5546_v31 = vmul.f32 %v11592_v4, %v5545_v33  ;;  %v5561_v49 = vmul.f32 %v11611_v17, %v5560_v18  ;;  %v5585_v61 = vsel %vm5584_vm10, %v7293_v5, %v5581_v20  ;;  %vm11826_vm3 = vcmp.eq.f32.partialorder %v5601_v13, 8.507059e+37  ;;  %vm5599_vm1 = vmor %vm5597_vm2, %vm5598_vm9  ;;  %v7495_v17 = vld [vmem:[%s7614_s18 + $0x40] sm:$0xff] }
0x1a1d   : > { %v5590_v45 = vsel %vm11801_vm5, %v5589_v14, %v5585_v61  ;;  %v5596_v57 = vadd.f32 %v7295_v23, %v5595_v29  ;;  %v5623_v55 = vrot.slane %v7493_v22, 6  ;;  %v5624_v8 = vrot.slane %v7494_v42, 6 }
0x1a1e   : > { %v5576_v25 = vmul.f32 %v11616_v44, %v5575_v11  ;;  %v5604_v4 = vor.u32 1.1754944e-38, %v5603_v60  ;;  %v5622_v5 = vrot.slane %v7495_v17, 6  ;;  %v5625_v0 = vrot.slane %v7496_v9, 6 }
0x1a1f   : > { %v5600_v47 = vsel %vm5599_vm1, %v7295_v23, %v5596_v57  ;;  %vm5612_vm0 = vweird.f32 %v11698_v43  ;;  %v5616_v3 = vand.u32 2147483647, %v11698_v43  ;;  %v5626_v30 = vrot.slane %v7497_v24, 6  ;;  %v7499_v23 = vld [vmem:[%s7614_s18 + $0x70] sm:$0xff] }
0x1a20   : > { %v7297_v46 = vpop.eup %7296  ;;  %v5591_v14 = vmul.f32 %v11620_v40, %v5590_v45  ;;  %v5605_v44 = vsel %vm11826_vm3, %v5604_v4, %v5600_v47  ;;  %v5627_v50 = vrot.slane %v7498_v32, 6  ;;  %v5639_v54 = vmul.f32 %v5623_v55, %v5531_v15 }
0x1a21   : > { %v5606_v7 = vmul.f32 %v11624_v2, %v5605_v44  ;;  %v5608_v34 = vmul.f32 %v7297_v46, %v11698_v43  ;;  %v5628_v13 = vrot.slane %v7499_v23, 6  ;;  %v5640_v33 = vmul.f32 %v5624_v8, %v5546_v31 }
0x1a22   : > { %vm5129_vm15 = vweird.f32 %v11640_v38  ;;  %v5638_v18 = vmul.f32 %v5622_v5, %v5516_v52  ;;  %v5641_v6 = vmul.f32 %v5625_v0, %v5561_v49  ;;  %v5642_v26 = vmul.f32 %v5626_v30, %v5576_v25  ;;  %v7500_v5 = vld [vmem:[%s7614_s18 + $0x78] sm:$0xff] }
0x1a23   : > { %v5654_v20 = vrot.slane %v5639_v54, 7  ;;  %v5609_v40 = vsub.f32 1.0, %v5608_v34  ;;  %v5618_v60 = vand.u32 2147483648, %v11698_v43  ;;  %v5656_v11 = vrot.slane %v5640_v33, 6 }
0x1a24   : > { %v5125_v15 = vmul.f32 %v11683_v39, %v11640_v38  ;;  %vm5613_vm4 = vweird.f32 %v7297_v46  ;;  %v5643_v2 = vmul.f32 %v5627_v50, %v5591_v14  ;;  %vm13553_vm6 = vcmask 1041409  }
0x1a25   : > { %v5655_v29 = vsel %vm13553_vm6, %v5654_v20, %v5638_v18  ;;  %v5658_v61 = vrot.slane %v5641_v6, 5  ;;  %vm5144_vm14 = vweird.f32 %v11643_v36  ;;  %v5610_v31 = vmul.f32 %v7297_v46, %v5609_v40  ;;  %vm5614_vm11 = vmor %vm5612_vm0, %vm5613_vm4 }
0x1a26   : > { %v5644_v52 = vmul.f32 %v5628_v13, %v5606_v7  ;;  %vm13554_vm12 = vcmask 1042434   ;;  %v5126_v35 = vsub.f32 1.0, %v5125_v15  ;;  %vm11854_vm8 = vcmp.eq.f32.partialorder %v5616_v3, 8.507059e+37 }
0x1a27   : > { %v5657_v49 = vsel %vm13554_vm12, %v5656_v11, %v5655_v29  ;;  %vm13557_vm13 = vcmask 1043459   ;;  %v5660_v22 = vrot.slane %v5642_v26, 4  ;;  %v13558_v55 = vand.u32 2147483647, %v11640_v38 }
0x1a28   : > { %v5659_v57 = vsel %vm13557_vm13, %v5658_v61, %v5657_v49  ;;  %v5140_v8 = vmul.f32 %v11701_v51, %v11643_v36  ;;  %v5611_v25 = vadd.f32 %v7297_v46, %v5610_v31  ;;  %v5619_v4 = vor.u32 1.1754944e-38, %v5618_v60  ;;  %v5671_v49 = vpop.permute.xlu1 %5670 }
0x1a29   : > { %vm11861_vm5 = vcmp.eq.f32.partialorder %v13558_v55, 8.507059e+37  ;;  %v5127_v17 = vmul.f32 %v11683_v39, %v5126_v35  ;;  %vm5130_vm7 = vweird.f32 %v11683_v39  ;;  %v5629_v9 = vrot.slane %v7500_v5, 6 }
0x1a2a   : > { %vm13561_vm10 = vcmask 1044484   ;;  %v5141_v47 = vsub.f32 1.0, %v5140_v8  ;;  %v5155_v3 = vmul.f32 %v11723_v59, %v11649_v53  ;;  %v5615_v24 = vsel %vm5614_vm11, %v7297_v46, %v5611_v25  ;;  %vm11881_vm2 = vmor %vm5129_vm15, %vm5130_vm7 }
0x1a2b   : > { %v5661_v0 = vsel %vm13561_vm10, %v5660_v22, %v5659_v57  ;;  %v5662_v30 = vrot.slane %v5643_v2, 3  ;;  %v5664_v14 = vrot.slane %v5644_v52, 2  ;;  %v5128_v44 = vadd.f32 %v11683_v39, %v5127_v17 }
0x1a2c   : > { %v5620_v32 = vsel %vm11854_vm8, %v5619_v4, %v5615_v24  ;;  %v5142_v50 = vmul.f32 %v11701_v51, %v5141_v47  ;;  %vm5145_vm9 = vweird.f32 %v11701_v51  ;;  %v5156_v54 = vsub.f32 1.0, %v5155_v3 }
0x1a2d   : > { %v5621_v46 = vmul.f32 %v11629_v28, %v5620_v32  ;;  %vm13564_vm3 = vcmask 1045509   ;;  %v5132_v34 = vsel %vm11881_vm2, %v11683_v39, %v5128_v44  ;;  %v5150_v23 = vand.u32 2147483648, %v11643_v36  ;;  %vm11901_vm0 = vmor %vm5144_vm14, %vm5145_vm9 }
0x1a2e   : > { %v5663_v7 = vsel %vm13564_vm3, %v5662_v30, %v5661_v0  ;;  %v5143_v13 = vadd.f32 %v11701_v51, %v5142_v50  ;;  %v5157_v33 = vmul.f32 %v11723_v59, %v5156_v54  ;;  %vm5160_vm1 = vweird.f32 %v11723_v59 }
0x1a2f   : > { %v5165_v18 = vand.u32 2147483648, %v11649_v53  ;;  %v5645_v6 = vmul.f32 %v5629_v9, %v5621_v46  ;;  %v13565_v26 = vand.u32 2147483648, %v11640_v38  ;;  %v5163_v39 = vand.u32 2147483647, %v11649_v53 }
0x1a30   : > { %7298 = vrcp.f32 %v11664_v63  ;;  %vm13568_vm15 = vcmask 1046534   ;;  %v5147_v60 = vsel %vm11901_vm0, %v11701_v51, %v5143_v13  ;;  %v5158_v11 = vadd.f32 %v11723_v59, %v5157_v33 }
0x1a31   : > { %v5136_v28 = vor.u32 1.1754944e-38, %v13565_v26  ;;  %v5665_v40 = vsel %vm13568_vm15, %v5664_v14, %v5663_v7  ;;  %vm5159_vm4 = vweird.f32 %v11649_v53  ;;  %v5666_v15 = vrot.slane %v5645_v6, 1  ;;  %v7501_v7 = vld [vmem:[%s7614_s18] sm:$0xff] }
0x1a32   : > { %v13569_v29 = vand.u32 2147483647, %v11643_v36  ;;  %v5151_v61 = vor.u32 1.1754944e-38, %v5150_v23  ;;  %vm5161_vm14 = vmor %vm5159_vm4, %vm5160_vm1  ;;  %v5166_v52 = vor.u32 1.1754944e-38, %v5165_v18  ;;  %v5178_v51 = vand.u32 2147483647, %v11664_v63 }
0x1a33   : > { %v5137_v2 = vsel %vm11861_vm5, %v5136_v28, %v5132_v34  ;;  %v5162_v31 = vsel %vm5161_vm14, %v11723_v59, %v5158_v11  ;;  %7300 = vrcp.f32 %v11667_v1  ;;  %vm13570_vm12 = vcmask 1047559   ;;  %v7502_v18 = vld [vmem:[%s7614_s18 + $0x8] sm:$0xff]  ;;  %v7504_v11 = vld [vmem:[%s7614_s18 + $0x18] sm:$0xff] }
0x1a34   : > { %vm5149_vm6 = vcmp.eq.f32.partialorder %v13569_v29, 8.507059e+37  ;;  %v11923_v53 = vsel %vm13570_vm12, %v5666_v15, %v5665_v40  ;;  %vm5164_vm8 = vcmp.eq.f32.partialorder %v5163_v39, 8.507059e+37  ;;  %v5180_v36 = vand.u32 2147483648, %v11664_v63  ;;  %v7503_v40 = vld [vmem:[%s7614_s18 + $0x10] sm:$0xff] }
0x1a35   : > { %v5152_v35 = vsel %vm5149_vm6, %v5151_v61, %v5147_v60  ;;  %vm13571_vm13 = vcmask 130048   ;;  %v11929_v57 = vrot.slane %v11640_v38, 7  ;;  %v11932_v59 = vmul.f32 %v11571_v10, %v5137_v2 }
0x1a36   : > { %v5673_v45 = vsel %vm13571_vm13, %v11923_v53, %v5671_v49  ;;  %v5167_v22 = vsel %vm5164_vm8, %v5166_v52, %v5162_v31  ;;  %v7299_v55 = vpop.eup %7298  ;;  %v5193_v42 = vand.u32 2147483647, %v11667_v1  ;;  %v5195_v8 = vand.u32 2147483648, %v11667_v1  ;;  %v7505_v52 = vld [vmem:[%s7614_s18 + $0x20] sm:$0xff] }
0x1a37   : > { %7302 = vrcp.f32 %v11674_v21  ;;  %v5210_v25 = vand.u32 2147483648, %v11674_v21  ;;  %vm13572_vm5 = vcmask 392192   ;;  %v11940_v4 = vmul.f32 %v11574_v19, %v5152_v35 }
0x1a38   : > { %6734 = vmatmul.msk.f32.vlgmr.msrb.gmra.mxu1 %vm13572_vm5, %v5673_v45  ;;  %v5170_v38 = vmul.f32 %v7299_v55, %v11664_v63  ;;  %vm5174_vm7 = vweird.f32 %v11664_v63  ;;  %vm11944_vm11 = vcmp.eq.f32.partialorder %v5178_v51, 8.507059e+37  ;;  %v11949_v17 = vmul.f32 %v11577_v62, %v5167_v22 }
0x1a39   : > { %v5181_v5 = vor.u32 1.1754944e-38, %v5180_v36  ;;  %vm5189_vm10 = vweird.f32 %v11667_v1  ;;  %v5208_v9 = vand.u32 2147483647, %v11674_v21  ;;  %7304 = vrcp.f32 %v11677_v16  ;;  %v7301_v19 = vpop.eup %7300 }
0x1a3a   : > { %v5171_v0 = vsub.f32 1.0, %v5170_v38  ;;  %vm5175_vm2 = vweird.f32 %v7299_v55  ;;  %v5225_v47 = vand.u32 2147483648, %v11677_v16  ;;  %7306 = vrcp.f32 %v11929_v57  ;;  %v7506_v38 = vld [vmem:[%s7614_s18 + $0x28] sm:$0xff] }
0x1a3b   : > { %v5185_v3 = vmul.f32 %v7301_v19, %v11667_v1  ;;  %vm11957_vm9 = vcmp.eq.f32.partialorder %v5193_v42, 8.507059e+37  ;;  %v5196_v24 = vor.u32 1.1754944e-38, %v5195_v8  ;;  %v11961_v30 = vor.u32 1.1754944e-38, %v5210_v25  ;;  %vm11980_vm6 = vmor %vm5174_vm7, %vm5175_vm2 }
0x1a3c   : > { %v5172_v14 = vmul.f32 %v7299_v55, %v5171_v0  ;;  %vm5190_vm3 = vweird.f32 %v7301_v19  ;;  %vm5204_vm1 = vweird.f32 %v11674_v21  ;;  %v5223_v44 = vand.u32 2147483647, %v11677_v16 }
0x1a3d   : > { %v5240_v32 = vand.u32 2147483648, %v11929_v57  ;;  %v7303_v43 = vpop.eup %7302  ;;  %v5186_v50 = vsub.f32 1.0, %v5185_v3  ;;  %v11966_v54 = vor.u32 1.1754944e-38, %v5225_v47  ;;  %v5238_v46 = vand.u32 2147483647, %v11929_v57  ;;  %vm5191_vm5 = vmor %vm5189_vm10, %vm5190_vm3 }
0x1a3e   : > { %v5244_v34 = vrot.slane %v7501_v7, 6  ;;  %v5173_v23 = vadd.f32 %v7299_v55, %v5172_v14  ;;  %v5200_v13 = vmul.f32 %v7303_v43, %v11674_v21  ;;  %vm5205_vm0 = vweird.f32 %v7303_v43  ;;  %v7508_v14 = vld [vmem:[%s7614_s18 + $0x38] sm:$0xff] }
0x1a3f   : > { %vm11971_vm15 = vcmp.eq.f32.partialorder %v5208_v9, 8.507059e+37  ;;  %vm5219_vm4 = vweird.f32 %v11677_v16  ;;  %v5245_v6 = vrot.slane %v7502_v18, 6  ;;  %v7305_v26 = vpop.eup %7304  ;;  %v5187_v20 = vmul.f32 %v7301_v19, %v5186_v50 }
0x1a40   : > { %vm5234_vm14 = vweird.f32 %v11929_v57  ;;  %v5241_v39 = vor.u32 1.1754944e-38, %v5240_v32  ;;  %v5246_v60 = vrot.slane %v7503_v40, 6  ;;  %v5247_v15 = vrot.slane %v7504_v11, 6  ;;  %v7307_v2 = vpop.eup %7306 }
0x1a41   : > { %v5177_v29 = vsel %vm11980_vm6, %v7299_v55, %v5173_v23  ;;  %v5201_v61 = vsub.f32 1.0, %v5200_v13  ;;  %v5215_v31 = vmul.f32 %v7305_v26, %v11677_v16  ;;  %vm11990_vm12 = vcmp.eq.f32.partialorder %v5223_v44, 8.507059e+37 }
0x1a42   : > { %v5248_v51 = vrot.slane %v7505_v52, 6  ;;  %v5182_v49 = vsel %vm11944_vm11, %v5181_v5, %v5177_v29  ;;  %v5188_v35 = vadd.f32 %v7301_v19, %v5187_v20  ;;  %vm5220_vm8 = vweird.f32 %v7305_v26  ;;  %v7507_v5 = vld [vmem:[%s7614_s18 + $0x30] sm:$0xff]  ;;  %vm5206_vm11 = vmor %vm5204_vm1, %vm5205_vm0 }
0x1a43   : > { %v5230_v36 = vmul.f32 %v7307_v2, %v11929_v57  ;;  %vm11998_vm13 = vcmp.eq.f32.partialorder %v5238_v46, 8.507059e+37  ;;  %v5183_v22 = vmul.f32 %v11581_v41, %v5182_v49  ;;  %v5202_v55 = vmul.f32 %v7303_v43, %v5201_v61  ;;  %vm5221_vm10 = vmor %vm5219_vm4, %vm5220_vm8  ;;  %v7509_v61 = vld [vmem:[%s12745_s6] ss:$0 sm:$0xff] }
0x1a44   : > { %v5216_v42 = vsub.f32 1.0, %v5215_v31  ;;  %vm5235_vm7 = vweird.f32 %v7307_v2  ;;  %v5192_v8 = vsel %vm5191_vm5, %v7301_v19, %v5188_v35  ;;  %v5249_v10 = vrot.slane %v7506_v38, 6 }
0x1a45   : > { %v5231_v25 = vsub.f32 1.0, %v5230_v36  ;;  %v5250_v9 = vrot.slane %v7507_v5, 6  ;;  %v5197_v0 = vsel %vm11957_vm9, %v5196_v24, %v5192_v8  ;;  %v5203_v47 = vadd.f32 %v7303_v43, %v5202_v55  ;;  %vm5236_vm2 = vmor %vm5234_vm14, %vm5235_vm7 }
0x1a46   : > { %v5217_v3 = vmul.f32 %v7305_v26, %v5216_v42  ;;  %v5251_v41 = vrot.slane %v7508_v14, 6  ;;  %v5198_v44 = vmul.f32 %v11595_v58, %v5197_v0  ;;  %v5261_v19 = vmul.f32 %v5245_v6, %v11940_v4 }
0x1a47   : > { %v5232_v1 = vmul.f32 %v7307_v2, %v5231_v25  ;;  %v5262_v32 = vmul.f32 %v5246_v60, %v11949_v17  ;;  %v5207_v50 = vsel %vm5206_vm11, %v7303_v43, %v5203_v47  ;;  %v5260_v62 = vmul.f32 %v5244_v34, %v11932_v59 }
0x1a48   : > { %v5218_v46 = vadd.f32 %v7305_v26, %v5217_v3  ;;  %v5263_v24 = vmul.f32 %v5247_v15, %v5183_v22  ;;  %v5212_v7 = vsel %vm11971_vm15, %v11961_v30, %v5207_v50  ;;  %v5264_v21 = vmul.f32 %v5248_v51, %v5198_v44 }
0x1a49   : > { %v5233_v58 = vadd.f32 %v7307_v2, %v5232_v1  ;;  %v5276_v23 = vrot.slane %v5261_v19, 7  ;;  %v5213_v4 = vmul.f32 %v11599_v56, %v5212_v7  ;;  %v5278_v59 = vrot.slane %v5262_v32, 6 }
0x1a4a   : > { %v5222_v13 = vsel %vm5221_vm10, %v7305_v26, %v5218_v46  ;;  %v5280_v17 = vrot.slane %v5263_v24, 5  ;;  %vm13585_vm9 = vcmask 1041409   ;;  %v5282_v34 = vrot.slane %v5264_v21, 4 }
0x1a4b   : > { %v5227_v30 = vsel %vm11990_vm12, %v11966_v54, %v5222_v13  ;;  %v5237_v43 = vsel %vm5236_vm2, %v7307_v2, %v5233_v58  ;;  %v5277_v16 = vsel %vm13585_vm9, %v5276_v23, %v5260_v62  ;;  %v5265_v18 = vmul.f32 %v5249_v10, %v5213_v4  ;;  %v5293_v2 = vpop.permute.xlu2 %5292 }
0x1a4c   : > { %v5228_v33 = vmul.f32 %v11604_v37, %v5227_v30  ;;  %v5242_v56 = vsel %vm11998_vm13, %v5241_v39, %v5237_v43  ;;  %vm13586_vm3 = vcmask 1042434   ;;  %vm13587_vm1 = vcmask 1043459  }
0x1a4d   : > { %v5279_v6 = vsel %vm13586_vm3, %v5278_v59, %v5277_v16  ;;  %v5243_v57 = vmul.f32 %v11607_v27, %v5242_v56  ;;  %vm13588_vm0 = vcmask 1044484   ;;  %v5284_v54 = vrot.slane %v5265_v18, 3 }
0x1a4e   : > { %v5281_v26 = vsel %vm13587_vm1, %v5280_v17, %v5279_v6  ;;  %v5266_v28 = vmul.f32 %v5250_v9, %v5228_v33  ;;  %vm13589_vm15 = vcmask 1045509   ;;  %vm13590_vm4 = vcmask 1046534   ;;  %v13596_v33 = vld [vmem:[#allocation36_spill] sm:$0xff] }
0x1a4f   : > { %v5283_v20 = vsel %vm13588_vm0, %v5282_v34, %v5281_v26  ;;  %v5267_v40 = vmul.f32 %v5251_v41, %v5243_v57  ;;  %vm13591_vm6 = vcmask 1047559   ;;  %vm13592_vm14 = vcmask 130048   ;;  %v13598_v26 = vld [vmem:[#allocation34_spill] sm:$0xff] }
0x1a50   : > { %v5285_v60 = vsel %vm13589_vm15, %v5284_v54, %v5283_v20  ;;  %v5286_v11 = vrot.slane %v5266_v28, 2  ;;  %vm13593_vm12 = vcmask 392192   ;;  %vm13599_vm3 = vcmask 261120  }
0x1a51   : > { %v5288_v15 = vrot.slane %v5267_v40, 1  ;;  %vm13600_vm1 = vmmov %vm13599_vm3  ;;  %vm13607_vm0 = vcmask 1041409   ;;  %vm13608_vm15 = vcmask 1042434  }
0x1a52   : > { %v5287_v37 = vsel %vm13590_vm4, %v5286_v11, %v5285_v60  ;;  %vm13610_vm4 = vcmask 1043459  }
0x1a53   : > { %v12042_v39 = vsel %vm13591_vm6, %v5288_v15, %v5287_v37  ;;  %vm13611_vm6 = vcmask 1044484  }
0x1a54   : > { %v5295_v27 = vsel %vm13592_vm14, %v12042_v39, %v5293_v2  ;;  %vm13613_vm14 = vcmask 1045509  }
0x1a55   : > { %6732 = vmatmul.msk.f32.vlgmr.msrb.gmra.mxu0 %vm13593_vm12, %v5295_v27  ;;  %vm13618_vm12 = vcmask 1046534  }
0x1ab5   : > { %v5694_v29 = vpop.f32.mrf.mxu1 }
0x1ab6   : > { %v5695_v31 = vadd.f32 %v7509_v61, %v5694_v29 }
0x1ab8   : > { %7308 = vtanh.f32 %v5695_v31  ;;  %v6735_v35 = vmul.f32 -1.442695, %v5695_v31 }
0x1abe   : > { %v7309_v63 = vpop.eup %7308 }
0x1abf   : > { %5719 = vrot.lane.b32.xlu2 %v7309_v63, %s7536_s12 }
0x1ad2   : > { %v5316_v52 = vpop.f32.mrf.mxu0 }
0x1ad3   : > { %v5317_v51 = vadd.f32 %v7509_v61, %v5316_v52 }
0x1ad5   : > { %7310 = vtanh.f32 %v5317_v51  ;;  %v6733_v5 = vmul.f32 -1.442695, %v5317_v51 }
0x1ad6   : > { %7312 = vpow2.f32 %v6735_v35  ;;  %v13601_v35 = vld [vmem:[#allocation4_spill] sm:$0xff] }
0x1adb   : > { %v7311_v49 = vpop.eup %7310 }
0x1adc   : > { %5341 = vrot.lane.b32.xlu0 %v7311_v49, %s7536_s12  ;;  %v7313_v36 = vpop.eup %7312 }
0x1add   : > { %v5700_v45 = vadd.f32 1.0, %v7313_v36 }
0x1adf   : > { %7314 = vrcp.f32 %v5700_v45  ;;  %v5712_v38 = vand.u32 2147483648, %v5700_v45  ;;  %vm5706_vm13 = vweird.f32 %v5700_v45  ;;  %v5710_v10 = vand.u32 2147483647, %v5700_v45 }
0x1ae0   : > { %7316 = vpow2.f32 %v6733_v5 }
0x1ae1   : > { %v5713_v0 = vor.u32 1.1754944e-38, %v5712_v38  ;;  %vm5711_vm7 = vcmp.eq.f32.partialorder %v5710_v10, 8.507059e+37  ;;  %v13605_v10 = vld [vmem:[#allocation3_spill] sm:$0xff] }
0x1ae5   : > { %v7315_v22 = vpop.eup %7314 }
0x1ae6   : > { %v5702_v55 = vmul.f32 %v7315_v22, %v5700_v45  ;;  %vm5707_vm8 = vweird.f32 %v7315_v22  ;;  %v7317_v41 = vpop.eup %7316  ;;  %v13602_v45 = vld [vmem:[#allocation5_spill] sm:$0xff] }
0x1ae7   : > { %vm5708_vm5 = vmor %vm5706_vm13, %vm5707_vm8  ;;  %v5322_v44 = vadd.f32 1.0, %v7317_v41  ;;  %vm13622_vm8 = vcmask 1047559  }
0x1ae8   : > { %v5703_v42 = vsub.f32 1.0, %v5702_v55  ;;  %v13603_v55 = vld [vmem:[#allocation6_spill] sm:$0xff]  ;;  %vm13624_vm13 = vmmov %vm13607_vm0 }
0x1ae9   : > { %7318 = vrcp.f32 %v5322_v44  ;;  %v5334_v62 = vand.u32 2147483648, %v5322_v44  ;;  %vm5328_vm10 = vweird.f32 %v5322_v44  ;;  %v5332_v24 = vand.u32 2147483647, %v5322_v44 }
0x1aea   : > { %v5704_v8 = vmul.f32 %v7315_v22, %v5703_v42 }
0x1aeb   : > { %v5335_v58 = vor.u32 1.1754944e-38, %v5334_v62  ;;  %vm5333_vm9 = vcmp.eq.f32.partialorder %v5332_v24, 8.507059e+37 }
0x1aec   : > { %v5705_v25 = vadd.f32 %v7315_v22, %v5704_v8 }
0x1aee   : > { %v5709_v9 = vsel %vm5708_vm5, %v7315_v22, %v5705_v25  ;;  %v13604_v25 = vld [vmem:[#allocation7_spill] sm:$0xff]  ;;  %vm13625_vm5 = vcmask 130048  }
0x1aef   : > { %v5714_v3 = vsel %vm5711_vm7, %v5713_v0, %v5709_v9  ;;  %v7319_v1 = vpop.eup %7318  ;;  %v13606_v9 = vld [vmem:[#allocation8_spill] sm:$0xff]  ;;  %vm13626_vm7 = vmmov %vm13608_vm15 }
0x1af0   : > { %v5324_v19 = vmul.f32 %v7319_v1, %v5322_v44  ;;  %vm5329_vm11 = vweird.f32 %v7319_v1  ;;  %v5717_v13 = vmul.f32 %v5714_v3, %v11469_v12 }
0x1af1   : > { %vm5330_vm2 = vmor %vm5328_vm10, %vm5329_vm11 }
0x1af2   : > { %v5325_v32 = vsub.f32 1.0, %v5324_v19  ;;  %vm13627_vm11 = vmmov %vm13610_vm4 }
0x1af3   : > { %vm13628_vm10 = vmmov %vm13611_vm6 }
0x1af4   : > { %v5326_v50 = vmul.f32 %v7319_v1, %v5325_v32  ;;  %v13609_v32 = vld [vmem:[#allocation9_spill] sm:$0xff] }
0x1af6   : > { %v5327_v46 = vadd.f32 %v7319_v1, %v5326_v50 }
0x1af8   : > { %v5331_v7 = vsel %vm5330_vm2, %v7319_v1, %v5327_v46  ;;  %vm13629_vm2 = vmmov %vm13613_vm14 }
0x1af9   : > { %v5336_v23 = vsel %vm5333_vm9, %v5335_v58, %v5331_v7  ;;  %v13612_v58 = vld [vmem:[#allocation10_spill] sm:$0xff]  ;;  %vm13630_vm9 = vmmov %vm13618_vm12 }
0x1afa   : > { %v5339_v43 = vmul.f32 %v5336_v23, %v11474_v48 }
0x1b19   : > { %v5720_v47 = vpop.permute.xlu2 %5719 }
0x1b1a   : > { %v5722_v14 = vmul.f32 %v5720_v47, %v5714_v3 }
0x1b1c   : > { %5724 = vrot.lane.b32.xlu1 %v5722_v14, %s7537_s13 }
0x1b4e   : > { %v5342_v21 = vpop.permute.xlu0 %5341 }
0x1b4f   : > { %v5344_v4 = vmul.f32 %v5342_v21, %v5336_v23 }
0x1b51   : > { %5346 = vrot.lane.b32.xlu0 %v5344_v4, %s7537_s13 }
0x1b8e   : > { %v5725_v59 = vpop.permute.xlu1 %5724 }
0x1b8f   : > { %v12055_v17 = vadd.f32 %v5725_v59, %v5717_v13 }
0x1b91   : > { %13594 = vst [vmem:[#allocation45_spill] sm:$0xff] %v12055_v17  ;;  %7320 = vtanh.f32 %v12055_v17  ;;  %v6113_v18 = vmul.f32 %v12055_v17, %v13596_v33 }
0x1b97   : > { %v7321_v30 = vpop.eup %7320 }
0x1b98   : > { %5730 = vrot.lane.b32.xlu0 %v7321_v30, %s7536_s12 }
0x1bc3   : > { %v5347_v16 = vpop.permute.xlu0 %5346 }
0x1bc4   : > { %v12060_v34 = vadd.f32 %v5347_v16, %v5339_v43 }
0x1bc6   : > { %13595 = vst [vmem:[#allocation46_spill] sm:$0xff] %v12060_v34  ;;  %7322 = vtanh.f32 %v12060_v34  ;;  %v5735_v56 = vmul.f32 %v12060_v34, %v13596_v33 }
0x1bc8   : > { %5737 = vrot.lane.b32.xlu1 %v5735_v56, %s7536_s12 }
0x1bcc   : > { %v7323_v12 = vpop.eup %7322 }
0x1bcd   : > { %5352 = vrot.lane.b32.xlu2 %v7323_v12, %s7536_s12  ;;  %v13614_v12 = vld [vmem:[#allocation12_spill] sm:$0xff] }
0x1bd5   : > { %6115 = vrot.lane.b32.xlu2 %v6113_v18, %s7536_s12 }
0x1c0a   : > { %v5731_v6 = vpop.permute.xlu0 %5730 }
0x1c0b   : > { %v12070_v57 = vmul.f32 %v5731_v6, %v5714_v3  ;;  %v13615_v6 = vld [vmem:[#allocation13_spill] sm:$0xff] }
0x1c0d   : > { %13597 = vst [vmem:[#allocation36_spill] sm:$0xff] %v12070_v57  ;;  %v6112_v28 = vmul.f32 %v12070_v57, %v13598_v26 }
0x1c27   : > { %v5353_v48 = vpop.permute.xlu2 %5352 }
0x1c28   : > { %v12075_v40 = vmul.f32 %v5353_v48, %v5336_v23 }
0x1c2a   : > { %v5734_v60 = vmul.f32 %v12075_v40, %v13598_v26  ;;  %v13616_v26 = vld [vmem:[#allocation14_spill] sm:$0xff] }
0x1c2f   : > { %v6116_v20 = vpop.permute.xlu2 %6115 }
0x1c30   : > { %v6118_v54 = vadd.f32 %v6116_v20, %v6112_v28  ;;  %v13617_v20 = vld [vmem:[#allocation15_spill] sm:$0xff] }
0x1c32   : > { %6120 = vrot.lane.b32.xlu1 %v6118_v54, %s7537_s13 }
0x1c3a   : > { %v5738_v11 = vpop.permute.xlu1 %5737 }
0x1c3b   : > { %v5740_v15 = vadd.f32 %v5738_v11, %v5734_v60 }
0x1c3d   : > { %5742 = vrot.lane.b32.xlu0 %v5740_v15, %s7537_s13  ;;  %v13619_v15 = vld [vmem:[#allocation11_spill] sm:$0xff] }
0x1ca4   : > { %v6121_v37 = vpop.permute.xlu1 %6120 }
0x1ca5   : > { %v6123_v2 = vsel %vm13599_vm3, %v6121_v37, 0.0  ;;  %vm13631_vm3 = vmmov %vm13622_vm8 }
0x1ca6   : > { %6124 = vadd.xlane.f32.xlu0 %v6123_v2  ;;  %v13620_v2 = vld [vmem:[#allocation16_spill] sm:$0xff] }
0x1caf   : > { %v5743_v27 = vpop.permute.xlu0 %5742 }
0x1cb0   : > { %v5745_v29 = vsel %vm13600_vm1, %v5743_v27, 0.0  ;;  %vm13632_vm1 = vmmov %vm13625_vm5 }
0x1cb1   : > { %5746 = vadd.xlane.f32.xlu2 %v5745_v29 }
0x1d19   : > { %v6125_v61 = vpop.xlane.xlu0 %6124 }
0x1d1a   : > { %v6127_v31 = vrot.slane %v6125_v61, 1  ;;  %v6128_v63 = vrot.slane %v6125_v61, 2  ;;  %v6129_v52 = vrot.slane %v6125_v61, 3  ;;  %v6130_v51 = vrot.slane %v6125_v61, 4 }
0x1d1b   : > { %v6131_v49 = vrot.slane %v6125_v61, 5  ;;  %v6132_v8 = vrot.slane %v6125_v61, 6  ;;  %v12095_v5 = vadd.f32 %v6125_v61, %v13605_v10  ;;  %v6133_v14 = vrot.slane %v6125_v61, 7 }
0x1d1c   : > { %v12083_v36 = vadd.f32 %v6127_v31, %v13601_v35  ;;  %v12086_v22 = vadd.f32 %v6128_v63, %v13602_v45  ;;  %v12089_v42 = vadd.f32 %v6129_v52, %v13603_v55  ;;  %v12092_v38 = vadd.f32 %v6130_v51, %v13604_v25  ;;  %v13621_v31 = vld [vmem:[#allocation17_spill] sm:$0xff]  ;;  %v13623_v51 = vld [vmem:[#allocation18_spill] sm:$0xff] }
0x1d1d   : > { %v12098_v0 = vadd.f32 %v6131_v49, %v13606_v9  ;;  %v12108_v50 = vadd.f32 %v6132_v8, %v13609_v32  ;;  %v12114_v21 = vadd.f32 %v6133_v14, %v13612_v58  ;;  %v13633_v32 = vld [vmem:[#allocation29_spill] sm:$0xff] }
0x1d1e   : > { %v6158_v47 = vrot.slane %v12083_v36, 7  ;;  %v6160_v3 = vrot.slane %v12086_v22, 6  ;;  %v6162_v44 = vrot.slane %v12089_v42, 5  ;;  %v6164_v19 = vrot.slane %v12092_v38, 4 }
0x1d1f   : > { %v6166_v62 = vrot.slane %v12098_v0, 3  ;;  %v6168_v33 = vrot.slane %v12108_v50, 2  ;;  %v6170_v11 = vrot.slane %v12114_v21, 1 }
0x1d20   : > { %v6159_v41 = vsel %vm13607_vm0, %v6158_v47, %v12095_v5 }
0x1d21   : > { %v6161_v1 = vsel %vm13608_vm15, %v6160_v3, %v6159_v41  ;;  %vm13635_vm15 = vmmov %vm13626_vm7 }
0x1d22   : > { %v6163_v46 = vsel %vm13610_vm4, %v6162_v44, %v6161_v1  ;;  %vm13636_vm4 = vmmov %vm13607_vm0 }
0x1d23   : > { %v6165_v24 = vsel %vm13611_vm6, %v6164_v19, %v6163_v46  ;;  %v13634_v46 = vld [vmem:[#allocation43_spill] sm:$0xff]  ;;  %vm13637_vm6 = vmmov %vm13627_vm11 }
0x1d24   : > { %v5747_v7 = vpop.xlane.xlu2 %5746  ;;  %v6167_v23 = vsel %vm13613_vm14, %v6166_v62, %v6165_v24  ;;  %vm13638_vm14 = vmmov %vm13628_vm10 }
0x1d25   : > { %v5749_v4 = vrot.slane %v5747_v7, 1  ;;  %v5750_v13 = vrot.slane %v5747_v7, 2  ;;  %v5751_v59 = vrot.slane %v5747_v7, 3  ;;  %v5752_v30 = vrot.slane %v5747_v7, 4 }
0x1d26   : > { %v5753_v43 = vrot.slane %v5747_v7, 5  ;;  %v5754_v16 = vrot.slane %v5747_v7, 6  ;;  %v5755_v56 = vrot.slane %v5747_v7, 7  ;;  %v6169_v60 = vsel %vm13618_vm12, %v6168_v33, %v6167_v23  ;;  %vm13639_vm12 = vmmov %vm13629_vm2 }
0x1d27   : > { %v5765_v18 = vadd.f32 %v5749_v4, %v13614_v12  ;;  %v5766_v48 = vadd.f32 %v5750_v13, %v13615_v6  ;;  %v5767_v28 = vadd.f32 %v5751_v59, %v13616_v26  ;;  %v5768_v54 = vadd.f32 %v5752_v30, %v13617_v20 }
0x1d28   : > { %v5764_v37 = vadd.f32 %v5747_v7, %v13619_v15  ;;  %v5769_v27 = vadd.f32 %v5753_v43, %v13620_v2  ;;  %v5770_v63 = vadd.f32 %v5754_v16, %v13621_v31  ;;  %v6171_v52 = vsel %vm13622_vm8, %v6170_v11, %v6169_v60  ;;  %vm13640_vm8 = vmmov %vm13626_vm7 }
0x1d29   : > { %v5780_v29 = vrot.slane %v5765_v18, 7  ;;  %v5782_v61 = vrot.slane %v5766_v48, 6  ;;  %v5771_v49 = vadd.f32 %v5755_v56, %v13623_v51  ;;  %v5784_v45 = vrot.slane %v5767_v28, 5 }
0x1d2a   : > { %v6173_v55 = vsel %vm13625_vm5, %v6171_v52, -inf  ;;  %v5786_v25 = vrot.slane %v5768_v54, 4  ;;  %v5788_v9 = vrot.slane %v5769_v27, 3  ;;  %v5790_v3 = vrot.slane %v5770_v63, 2  ;;  %vm13642_vm5 = vmmov %vm13631_vm3 }
0x1d2b   : > { %v5781_v35 = vsel %vm13624_vm13, %v5780_v29, %v5764_v37  ;;  %6174 = vmax.xlane.f32.xlu2 %v6173_v55  ;;  %v5792_v41 = vrot.slane %v5771_v49, 1  ;;  %vm13641_vm13 = vmmov %vm13630_vm9 }
0x1d2c   : > { %v5783_v8 = vsel %vm13626_vm7, %v5782_v61, %v5781_v35  ;;  %vm13643_vm7 = vmmov %vm13632_vm1 }
0x1d2d   : > { %v5785_v10 = vsel %vm13627_vm11, %v5784_v45, %v5783_v8  ;;  %vm13644_vm11 = vmmov %vm13637_vm6 }
0x1d2e   : > { %v5787_v47 = vsel %vm13628_vm10, %v5786_v25, %v5785_v10 }
0x1d2f   : > { %v5789_v14 = vsel %vm13629_vm2, %v5788_v9, %v5787_v47 }
0x1d30   : > { %v5791_v44 = vsel %vm13630_vm9, %v5790_v3, %v5789_v14 }
0x1d31   : > { %v5793_v1 = vsel %vm13631_vm3, %v5792_v41, %v5791_v44 }
0x1d32   : > { %v5795_v19 = vsel %vm13632_vm1, %v5793_v1, -inf }
0x1d33   : > { %5796 = vmax.xlane.f32.xlu1 %v5795_v19 }
0x1d43   : > { %6048 = vrot.lane.b32.xlu2 %v12075_v40, %s7539_s20 }
0x1d4b   : > { %6493 = vrot.lane.b32.xlu2 %v13633_v32, %s7537_s13 }
0x1d53   : > { %6502 = vrot.lane.b32.xlu2 %v13634_v46, %s7540_s21 }
0x1d9e   : > { %v6175_v62 = vpop.xlane.xlu2 %6174 }
0x1d9f   : > { %v6177_v24 = vrot.slane %v6175_v62, 1  ;;  %v6178_v7 = vrot.slane %v6175_v62, 2  ;;  %v6192_v58 = vsub.f32 %v12095_v5, %v6175_v62  ;;  %v6179_v43 = vrot.slane %v6175_v62, 3 }
0x1da0   : > { %v6180_v33 = vrot.slane %v6175_v62, 4  ;;  %v6181_v56 = vrot.slane %v6175_v62, 5  ;;  %v6182_v12 = vrot.slane %v6175_v62, 6 }
0x1da1   : > { %v6193_v23 = vsub.f32 %v12083_v36, %v6177_v24  ;;  %v6194_v4 = vsub.f32 %v12086_v22, %v6178_v7  ;;  %v6200_v13 = vmul.f32 1.442695, %v6192_v58 }
0x1da3   : > { %v6202_v59 = vmul.f32 1.442695, %v6193_v23  ;;  %v6204_v30 = vmul.f32 1.442695, %v6194_v4  ;;  %7324 = vpow2.f32 %v6200_v13 }
0x1da5   : > { %7326 = vpow2.f32 %v6202_v59 }
0x1da6   : > { %v5797_v16 = vpop.xlane.xlu1 %5796  ;;  %7328 = vpow2.f32 %v6204_v30 }
0x1da7   : > { %v5799_v6 = vrot.slane %v5797_v16, 1  ;;  %v5800_v26 = vrot.slane %v5797_v16, 2  ;;  %v5801_v20 = vrot.slane %v5797_v16, 3  ;;  %v5802_v60 = vrot.slane %v5797_v16, 4 }
0x1da8   : > { %v5803_v11 = vrot.slane %v5797_v16, 5  ;;  %v5814_v5 = vsub.f32 %v5764_v37, %v5797_v16  ;;  %v5804_v36 = vrot.slane %v5797_v16, 6  ;;  %v5805_v29 = vrot.slane %v5797_v16, 7 }
0x1da9   : > { %v5815_v15 = vsub.f32 %v5765_v18, %v5799_v6  ;;  %v5816_v22 = vsub.f32 %v5766_v48, %v5800_v26  ;;  %v5817_v2 = vsub.f32 %v5767_v28, %v5801_v20  ;;  %v5818_v31 = vsub.f32 %v5768_v54, %v5802_v60  ;;  %v12147_v35 = vpop.eup %7324 }
0x1daa   : > { %v5822_v61 = vmul.f32 1.442695, %v5814_v5  ;;  %v5819_v52 = vsub.f32 %v5769_v27, %v5803_v11  ;;  %v5820_v51 = vsub.f32 %v5770_v63, %v5804_v36  ;;  %v5821_v25 = vsub.f32 %v5771_v49, %v5805_v29 }
0x1dab   : > { %v5824_v45 = vmul.f32 1.442695, %v5815_v15  ;;  %v5826_v55 = vmul.f32 1.442695, %v5816_v22  ;;  %v5828_v8 = vmul.f32 1.442695, %v5817_v2  ;;  %v12149_v10 = vpop.eup %7326  ;;  %v6195_v37 = vsub.f32 %v12089_v42, %v6179_v43 }
0x1dac   : > { %7330 = vpow2.f32 %v5822_v61  ;;  %v5830_v9 = vmul.f32 1.442695, %v5818_v31  ;;  %v6183_v18 = vrot.slane %v6175_v62, 7  ;;  %v5832_v48 = vmul.f32 1.442695, %v5819_v52  ;;  %v12153_v54 = vpop.eup %7328 }
0x1dad   : > { %7332 = vpow2.f32 %v5824_v45  ;;  %v6196_v28 = vsub.f32 %v12092_v38, %v6180_v33  ;;  %v5834_v27 = vmul.f32 1.442695, %v5820_v51  ;;  %v6197_v63 = vsub.f32 %v12098_v0, %v6181_v56 }
0x1dae   : > { %7334 = vpow2.f32 %v5826_v55  ;;  %v5836_v47 = vmul.f32 1.442695, %v5821_v25  ;;  %v6198_v49 = vsub.f32 %v12108_v50, %v6182_v12  ;;  %v6206_v3 = vmul.f32 1.442695, %v6195_v37 }
0x1daf   : > { %7336 = vpow2.f32 %v5828_v8  ;;  %v6199_v42 = vsub.f32 %v12114_v21, %v6183_v18  ;;  %v6208_v14 = vmul.f32 1.442695, %v6196_v28  ;;  %v6210_v38 = vmul.f32 1.442695, %v6197_v63  ;;  %v13646_v28 = vld [vmem:[#allocation28_spill] sm:$0xff]  ;;  %v13648_v63 = vld [vmem:[#allocation21_spill] sm:$0xff] }
0x1db0   : > { %7338 = vpow2.f32 %v5830_v9  ;;  %v6212_v1 = vmul.f32 1.442695, %v6198_v49  ;;  %v6224_v0 = vrot.slane %v12149_v10, 7  ;;  %v6226_v58 = vrot.slane %v12153_v54, 6  ;;  %v13650_v49 = vld [vmem:[#allocation20_spill] sm:$0xff] }
0x1db1   : > { %7340 = vpow2.f32 %v5832_v48  ;;  %v6214_v32 = vmul.f32 1.442695, %v6199_v42  ;;  %v13645_v48 = vld [vmem:[#allocation31_spill] sm:$0xff] }
0x1db2   : > { %v12158_v41 = vpop.eup %7330  ;;  %7342 = vpow2.f32 %v5834_v27  ;;  %v6225_v59 = vsel %vm13636_vm4, %v6224_v0, %v12147_v35  ;;  %v13647_v27 = vld [vmem:[#allocation42_spill] sm:$0xff] }
0x1db3   : > { %v12160_v44 = vpop.eup %7332  ;;  %7344 = vpow2.f32 %v5836_v47  ;;  %v6227_v60 = vsel %vm13640_vm8, %v6226_v58, %v6225_v59  ;;  %v13649_v47 = vld [vmem:[#allocation40_spill] sm:$0xff] }
0x1db4   : > { %v12163_v19 = vpop.eup %7334  ;;  %v5846_v50 = vrot.slane %v12160_v44, 7  ;;  %7346 = vpow2.f32 %v6206_v3 }
0x1db5   : > { %v12166_v46 = vpop.eup %7336  ;;  %v5848_v21 = vrot.slane %v12163_v19, 6  ;;  %7348 = vpow2.f32 %v6208_v14 }
0x1db6   : > { %v12169_v62 = vpop.eup %7338  ;;  %v5847_v24 = vsel %vm13607_vm0, %v5846_v50, %v12158_v41  ;;  %v5850_v7 = vrot.slane %v12166_v46, 5  ;;  %7350 = vpow2.f32 %v6210_v38 }
0x1db7   : > { %v12175_v23 = vpop.eup %7340  ;;  %v5849_v4 = vsel %vm13635_vm15, %v5848_v21, %v5847_v24  ;;  %v5852_v13 = vrot.slane %v12169_v62, 4  ;;  %7352 = vpow2.f32 %v6212_v1 }
0x1db8   : > { %v12181_v30 = vpop.eup %7342  ;;  %v5851_v43 = vsel %vm13637_vm6, %v5850_v7, %v5849_v4  ;;  %v5854_v16 = vrot.slane %v12175_v23, 3  ;;  %7354 = vpow2.f32 %v6214_v32 }
0x1db9   : > { %v12185_v33 = vpop.eup %7344  ;;  %v5853_v56 = vsel %vm13638_vm14, %v5852_v13, %v5851_v43  ;;  %v5856_v12 = vrot.slane %v12181_v30, 2 }
0x1dba   : > { %v12189_v6 = vpop.eup %7346  ;;  %v5855_v26 = vsel %vm13639_vm12, %v5854_v16, %v5853_v56  ;;  %v5858_v20 = vrot.slane %v12185_v33, 1 }
0x1dbb   : > { %v12194_v11 = vpop.eup %7348  ;;  %v5857_v5 = vsel %vm13641_vm13, %v5856_v12, %v5855_v26  ;;  %v6228_v36 = vrot.slane %v12189_v6, 5 }
0x1dbc   : > { %v12198_v15 = vpop.eup %7350  ;;  %v5859_v22 = vsel %vm13642_vm5, %v5858_v20, %v5857_v5  ;;  %v6230_v2 = vrot.slane %v12194_v11, 4 }
0x1dbd   : > { %v12202_v29 = vpop.eup %7352  ;;  %v5861_v61 = vsel %vm13643_vm7, %v5859_v22, 0.0  ;;  %v6229_v31 = vsel %vm13644_vm11, %v6228_v36, %v6227_v60  ;;  %v6232_v52 = vrot.slane %v12198_v15, 3 }
0x1dbe   : > { %v12207_v51 = vpop.eup %7354  ;;  %5862 = vadd.xlane.f32.xlu0 %v5861_v61  ;;  %v6231_v45 = vsel %vm13628_vm10, %v6230_v2, %v6229_v31  ;;  %v6234_v55 = vrot.slane %v12202_v29, 2 }
0x1dbf   : > { %v6233_v8 = vsel %vm13629_vm2, %v6232_v52, %v6231_v45  ;;  %v6236_v25 = vrot.slane %v12207_v51, 1 }
0x1dc0   : > { %v6235_v37 = vsel %vm13630_vm9, %v6234_v55, %v6233_v8 }
0x1dc1   : > { %v6237_v9 = vsel %vm13631_vm3, %v6236_v25, %v6235_v37 }
0x1dc2   : > { %v6239_v18 = vsel %vm13632_vm1, %v6237_v9, 0.0 }
0x1dc3   : > { %6240 = vadd.xlane.f32.xlu1 %v6239_v18 }
0x1dd2   : > { %6426 = vrot.lane.b32.xlu0 %v12070_v57, %s7539_s20 }
0x1dda   : > { %6496 = vrot.lane.b32.xlu0 %v13645_v48, %s7539_s20 }
0x1de2   : > { %6505 = vrot.lane.b32.xlu0 %v12042_v39, %s7538_s19 }
0x1dea   : > { %6525 = vrot.lane.b32.xlu0 %v13646_v28, %s7537_s13 }
0x1df2   : > { %6534 = vrot.lane.b32.xlu0 %v13647_v27, %s7540_s21 }
0x1dfa   : > { %6550 = vrot.lane.b32.xlu0 %v13648_v63, %s7537_s13 }
0x1e02   : > { %6559 = vrot.lane.b32.xlu0 %v13649_v47, %s7537_s13 }
0x1e0a   : > { %6574 = vrot.lane.b32.xlu0 %v13650_v49, %s7537_s13 }
0x1e31   : > { %v12232_v3 = vpop.xlane.xlu0 %5862 }
0x1e32   : > { %v12235_v42 = vrot.slane %v12232_v3, 1  ;;  %7356 = vrcp.f32 %v12232_v3  ;;  %v12241_v14 = vrot.slane %v12232_v3, 2  ;;  %v12256_v50 = vrot.slane %v12232_v3, 3 }
0x1e33   : > { %v12259_v32 = vrot.slane %v12232_v3, 4  ;;  %v12266_v24 = vrot.slane %v12232_v3, 5  ;;  %v12269_v7 = vrot.slane %v12232_v3, 6 }
0x1e36   : > { %v12238_v39 = vpop.xlane.xlu1 %6240 }
0x1e37   : > { %7358 = vrcp.f32 %v12238_v39  ;;  %v12245_v38 = vrot.slane %v12238_v39, 1  ;;  %v12248_v1 = vrot.slane %v12238_v39, 2  ;;  %v12252_v0 = vrot.slane %v12238_v39, 3 }
0x1e38   : > { %7360 = vrcp.f32 %v12235_v42  ;;  %v12262_v21 = vrot.slane %v12238_v39, 4  ;;  %v6269_v58 = vand.u32 2147483648, %v12238_v39  ;;  %v12275_v59 = vpop.eup %7356  ;;  %v6267_v43 = vand.u32 2147483647, %v12238_v39 }
0x1e39   : > { %7362 = vrcp.f32 %v12245_v38  ;;  %v6284_v16 = vand.u32 2147483648, %v12245_v38  ;;  %v12284_v26 = vrot.slane %v12238_v39, 5  ;;  %v12287_v20 = vrot.slane %v12238_v39, 6 }
0x1e3a   : > { %7364 = vrcp.f32 %v12248_v1  ;;  %v12290_v60 = vrot.slane %v12238_v39, 7  ;;  %v6299_v5 = vand.u32 2147483648, %v12248_v1  ;;  %v6282_v2 = vand.u32 2147483647, %v12245_v38 }
0x1e3b   : > { %7366 = vrcp.f32 %v12241_v14  ;;  %v6314_v61 = vand.u32 2147483648, %v12252_v0  ;;  %vm6263_vm0 = vweird.f32 %v12238_v39  ;;  %v6270_v52 = vor.u32 1.1754944e-38, %v6269_v58 }
0x1e3c   : > { %7368 = vrcp.f32 %v12252_v0  ;;  %vm6278_vm15 = vweird.f32 %v12245_v38  ;;  %v6297_v45 = vand.u32 2147483647, %v12248_v1  ;;  %vm12307_vm4 = vcmp.eq.f32.partialorder %v6267_v43, 8.507059e+37 }
0x1e3d   : > { %v12281_v12 = vpop.eup %7358  ;;  %7370 = vrcp.f32 %v12262_v21  ;;  %v6285_v9 = vor.u32 1.1754944e-38, %v6284_v16  ;;  %vm6293_vm6 = vweird.f32 %v12248_v1  ;;  %v6312_v18 = vand.u32 2147483647, %v12252_v0 }
0x1e3e   : > { %v12293_v36 = vpop.eup %7360  ;;  %v6259_v22 = vmul.f32 %v12281_v12, %v12238_v39  ;;  %vm6264_vm14 = vweird.f32 %v12281_v12  ;;  %v6300_v27 = vor.u32 1.1754944e-38, %v6299_v5  ;;  %vm6308_vm12 = vweird.f32 %v12252_v0 }
0x1e3f   : > { %v12300_v31 = vpop.eup %7362  ;;  %7372 = vrcp.f32 %v12284_v26  ;;  %vm12323_vm8 = vcmp.eq.f32.partialorder %v6282_v2, 8.507059e+37  ;;  %v6315_v43 = vor.u32 1.1754944e-38, %v6314_v61  ;;  %v6327_v16 = vand.u32 2147483647, %v12262_v21  ;;  %vm12347_vm10 = vmor %vm6263_vm0, %vm6264_vm14  ;;  %v7510_v61 = vld [vmem:[%s7614_s18 + $0x48] sm:$0xff] }
0x1e40   : > { %v12305_v55 = vpop.eup %7364  ;;  %v6260_v8 = vsub.f32 1.0, %v6259_v22  ;;  %v6274_v37 = vmul.f32 %v12300_v31, %v12245_v38  ;;  %vm6279_vm13 = vweird.f32 %v12300_v31  ;;  %vm6323_vm5 = vweird.f32 %v12262_v21 }
0x1e41   : > { %v12315_v48 = vpop.eup %7366  ;;  %v6289_v28 = vmul.f32 %v12305_v55, %v12248_v1  ;;  %vm12333_vm7 = vcmp.eq.f32.partialorder %v6297_v45, 8.507059e+37  ;;  %vm12337_vm11 = vcmp.eq.f32.partialorder %v6312_v18, 8.507059e+37  ;;  %7374 = vrcp.f32 %v12287_v20  ;;  %vm12368_vm3 = vmor %vm6278_vm15, %vm6279_vm13 }
0x1e42   : > { %v7369_v63 = vpop.eup %7368  ;;  %v6261_v47 = vmul.f32 %v12281_v12, %v6260_v8  ;;  %v6275_v49 = vsub.f32 1.0, %v6274_v37  ;;  %v6329_v37 = vand.u32 2147483648, %v12262_v21  ;;  %vm6294_vm2 = vweird.f32 %v12305_v55 }
0x1e43   : > { %v6290_v22 = vsub.f32 1.0, %v6289_v28  ;;  %v6304_v5 = vmul.f32 %v7369_v63, %v12252_v0  ;;  %v7371_v56 = vpop.eup %7370  ;;  %vm12358_vm9 = vcmp.eq.f32.partialorder %v6327_v16, 8.507059e+37  ;;  %v6342_v39 = vand.u32 2147483647, %v12284_v26  ;;  %vm12384_vm15 = vmor %vm6293_vm6, %vm6294_vm2 }
0x1e44   : > { %v6262_v13 = vadd.f32 %v12281_v12, %v6261_v47  ;;  %v6276_v8 = vmul.f32 %v12300_v31, %v6275_v49  ;;  %v6319_v47 = vmul.f32 %v7371_v56, %v12262_v21  ;;  %v6344_v34 = vand.u32 2147483648, %v12284_v26 }
0x1e45   : > { %v6291_v45 = vmul.f32 %v12305_v55, %v6290_v22  ;;  %v6305_v18 = vsub.f32 1.0, %v6304_v5  ;;  %v7373_v22 = vpop.eup %7372  ;;  %vm6309_vm1 = vweird.f32 %v7369_v63  ;;  %v6330_v28 = vor.u32 1.1754944e-38, %v6329_v37 }
0x1e46   : > { %v6266_v49 = vsel %vm12347_vm10, %v12281_v12, %v6262_v13  ;;  %v6277_v4 = vadd.f32 %v12300_v31, %v6276_v8  ;;  %v6320_v16 = vsub.f32 1.0, %v6319_v47  ;;  %v6334_v57 = vmul.f32 %v7373_v22, %v12284_v26  ;;  %vm6310_vm13 = vmor %vm6308_vm12, %vm6309_vm1 }
0x1e47   : > { %v6292_v13 = vadd.f32 %v12305_v55, %v6291_v45  ;;  %v6306_v12 = vmul.f32 %v7369_v63, %v6305_v18  ;;  %vm6338_vm0 = vweird.f32 %v12284_v26  ;;  %v6271_v38 = vsel %vm12307_vm4, %v6270_v52, %v6266_v49 }
0x1e48   : > { %v6281_v8 = vsel %vm12368_vm3, %v12300_v31, %v6277_v4  ;;  %v6321_v47 = vmul.f32 %v7371_v56, %v6320_v16  ;;  %vm6324_vm14 = vweird.f32 %v7371_v56  ;;  %v7375_v4 = vpop.eup %7374  ;;  %v6335_v52 = vsub.f32 1.0, %v6334_v57 }
0x1e49   : > { %v6307_v18 = vadd.f32 %v7369_v63, %v6306_v12  ;;  %v6296_v31 = vsel %vm12384_vm15, %v12305_v55, %v6292_v13  ;;  %vm12393_vm4 = vcmp.eq.f32.partialorder %v6342_v39, 8.507059e+37  ;;  %v6345_v1 = vor.u32 1.1754944e-38, %v6344_v34  ;;  %vm6325_vm6 = vmor %vm6323_vm5, %vm6324_vm14 }
0x1e4a   : > { %v6286_v37 = vsel %vm12323_vm8, %v6285_v9, %v6281_v8  ;;  %v6322_v5 = vadd.f32 %v7371_v56, %v6321_v47  ;;  %v6349_v12 = vmul.f32 %v7375_v4, %v12287_v20  ;;  %v6272_v16 = vmul.f32 %v12147_v35, %v6271_v38  ;;  %v7511_v8 = vld [vmem:[%s7614_s18 + $0x50] sm:$0xff]  ;;  %v7513_v38 = vld [vmem:[%s7614_s18 + $0x58] sm:$0xff] }
0x1e4b   : > { %v6311_v49 = vsel %vm6310_vm13, %v7369_v63, %v6307_v18  ;;  %v6336_v0 = vmul.f32 %v7373_v22, %v6335_v52  ;;  %vm6339_vm12 = vweird.f32 %v7373_v22  ;;  %v6357_v57 = vand.u32 2147483647, %v12287_v20 }
0x1e4c   : > { %v6301_v55 = vsel %vm12333_vm7, %v6300_v27, %v6296_v31  ;;  %v6316_v34 = vsel %vm12337_vm11, %v6315_v43, %v6311_v49  ;;  %v6326_v9 = vsel %vm6325_vm6, %v7371_v56, %v6322_v5  ;;  %v6350_v63 = vsub.f32 1.0, %v6349_v12  ;;  %vm6340_vm8 = vmor %vm6338_vm0, %vm6339_vm12  ;;  %v7514_v31 = vld [vmem:[%s7614_s18 + $0x60] sm:$0xff] }
0x1e4d   : > { %v6287_v58 = vmul.f32 %v12149_v10, %v6286_v37  ;;  %v6337_v39 = vadd.f32 %v7373_v22, %v6336_v0  ;;  %v6359_v35 = vand.u32 2147483648, %v12287_v20  ;;  %7376 = vrcp.f32 %v12290_v60  ;;  %v7515_v37 = vld [vmem:[%s7614_s18 + $0x68] sm:$0xff] }
0x1e4e   : > { %v6331_v21 = vsel %vm12358_vm9, %v6330_v28, %v6326_v9  ;;  %v6351_v27 = vmul.f32 %v7375_v4, %v6350_v63  ;;  %vm6353_vm5 = vweird.f32 %v12287_v20  ;;  %vm6354_vm7 = vweird.f32 %v7375_v4 }
0x1e4f   : > { %v6302_v10 = vmul.f32 %v12153_v54, %v6301_v55  ;;  %v6317_v56 = vmul.f32 %v12189_v6, %v6316_v34  ;;  %v6341_v43 = vsel %vm6340_vm8, %v7373_v22, %v6337_v39  ;;  %vm12418_vm11 = vcmp.eq.f32.partialorder %v6357_v57, 8.507059e+37  ;;  %vm6355_vm10 = vmor %vm6353_vm5, %vm6354_vm7  ;;  %v7512_v6 = vld [vmem:[%s7614_s18 + $0x40] sm:$0xff] }
0x1e50   : > { %v6346_v17 = vsel %vm12393_vm4, %v6345_v1, %v6341_v43  ;;  %v6352_v26 = vadd.f32 %v7375_v4, %v6351_v27  ;;  %v6379_v13 = vrot.slane %v7510_v61, 7  ;;  %v6380_v20 = vrot.slane %v7511_v8, 7 }
0x1e51   : > { %v6332_v28 = vmul.f32 %v12194_v11, %v6331_v21  ;;  %v6360_v54 = vor.u32 1.1754944e-38, %v6359_v35  ;;  %v6378_v22 = vrot.slane %v7512_v6, 7  ;;  %v6381_v45 = vrot.slane %v7513_v38, 7 }
0x1e52   : > { %v6356_v18 = vsel %vm6355_vm10, %v7375_v4, %v6352_v26  ;;  %vm6368_vm2 = vweird.f32 %v12290_v60  ;;  %v6372_v47 = vand.u32 2147483647, %v12290_v60  ;;  %v6382_v52 = vrot.slane %v7514_v31, 7  ;;  %v7516_v4 = vld [vmem:[%s7614_s18 + $0x70] sm:$0xff] }
0x1e53   : > { %v7377_v25 = vpop.eup %7376  ;;  %v6347_v1 = vmul.f32 %v12198_v15, %v6346_v17  ;;  %v6361_v11 = vsel %vm12418_vm11, %v6360_v54, %v6356_v18  ;;  %v6383_v49 = vrot.slane %v7515_v37, 7  ;;  %v6395_v5 = vmul.f32 %v6379_v13, %v6287_v58 }
0x1e54   : > { %v6362_v12 = vmul.f32 %v12202_v29, %v6361_v11  ;;  %v6364_v0 = vmul.f32 %v7377_v25, %v12290_v60  ;;  %v6384_v57 = vrot.slane %v7516_v4, 7  ;;  %v6396_v55 = vmul.f32 %v6380_v20, %v6302_v10 }
0x1e55   : > { %vm5885_vm9 = vweird.f32 %v12232_v3  ;;  %v6394_v34 = vmul.f32 %v6378_v22, %v6272_v16  ;;  %v6397_v9 = vmul.f32 %v6381_v45, %v6317_v56  ;;  %v6398_v63 = vmul.f32 %v6382_v52, %v6332_v28  ;;  %v7517_v22 = vld [vmem:[%s7614_s18 + $0x78] sm:$0xff] }
0x1e56   : > { %v6410_v39 = vrot.slane %v6395_v5, 7  ;;  %v6365_v15 = vsub.f32 1.0, %v6364_v0  ;;  %v6374_v35 = vand.u32 2147483648, %v12290_v60  ;;  %v6412_v21 = vrot.slane %v6396_v55, 6 }
0x1e57   : > { %v5881_v58 = vmul.f32 %v12275_v59, %v12232_v3  ;;  %vm6369_vm3 = vweird.f32 %v7377_v25  ;;  %v6399_v29 = vmul.f32 %v6383_v49, %v6347_v1  ;;  %vm13671_vm1 = vcmask 1041409  }
0x1e58   : > { %v6411_v27 = vsel %vm13671_vm1, %v6410_v39, %v6394_v34  ;;  %v6414_v43 = vrot.slane %v6397_v9, 5  ;;  %vm5900_vm0 = vweird.f32 %v12235_v42  ;;  %v6366_v10 = vmul.f32 %v7377_v25, %v6365_v15  ;;  %vm6370_vm12 = vmor %vm6368_vm2, %vm6369_vm3 }
0x1e59   : > { %v6400_v16 = vmul.f32 %v6384_v57, %v6362_v12  ;;  %vm13672_vm15 = vcmask 1042434   ;;  %v5882_v2 = vsub.f32 1.0, %v5881_v58  ;;  %vm12446_vm14 = vcmp.eq.f32.partialorder %v6372_v47, 8.507059e+37 }
0x1e5a   : > { %v6413_v56 = vsel %vm13672_vm15, %v6412_v21, %v6411_v27  ;;  %vm13675_vm13 = vcmask 1043459   ;;  %v6416_v61 = vrot.slane %v6398_v63, 4  ;;  %v13676_v13 = vand.u32 2147483647, %v12232_v3 }
0x1e5b   : > { %v6415_v26 = vsel %vm13675_vm13, %v6414_v43, %v6413_v56  ;;  %v5896_v20 = vmul.f32 %v12293_v36, %v12235_v42  ;;  %v6367_v28 = vadd.f32 %v7377_v25, %v6366_v10  ;;  %v6375_v54 = vor.u32 1.1754944e-38, %v6374_v35  ;;  %v6427_v56 = vpop.permute.xlu0 %6426 }
0x1e5c   : > { %vm12453_vm4 = vcmp.eq.f32.partialorder %v13676_v13, 8.507059e+37  ;;  %v5883_v6 = vmul.f32 %v12275_v59, %v5882_v2  ;;  %vm5886_vm6 = vweird.f32 %v12275_v59  ;;  %v6385_v38 = vrot.slane %v7517_v22, 7 }
0x1e5d   : > { %vm13679_vm8 = vcmask 1044484   ;;  %v5897_v18 = vsub.f32 1.0, %v5896_v20  ;;  %v5911_v47 = vmul.f32 %v12315_v48, %v12241_v14  ;;  %v6371_v31 = vsel %vm6370_vm12, %v7377_v25, %v6367_v28  ;;  %vm12473_vm5 = vmor %vm5885_vm9, %vm5886_vm6 }
0x1e5e   : > { %v6417_v45 = vsel %vm13679_vm8, %v6416_v61, %v6415_v26  ;;  %v6418_v52 = vrot.slane %v6399_v29, 3  ;;  %v6420_v1 = vrot.slane %v6400_v16, 2  ;;  %v5884_v11 = vadd.f32 %v12275_v59, %v5883_v6 }
0x1e5f   : > { %v6376_v37 = vsel %vm12446_vm14, %v6375_v54, %v6371_v31  ;;  %v5898_v49 = vmul.f32 %v12293_v36, %v5897_v18  ;;  %vm5901_vm7 = vweird.f32 %v12293_v36  ;;  %v5912_v5 = vsub.f32 1.0, %v5911_v47 }
0x1e60   : > { %v6377_v25 = vmul.f32 %v12207_v51, %v6376_v37  ;;  %vm13682_vm11 = vcmask 1045509   ;;  %v5888_v0 = vsel %vm12473_vm5, %v12275_v59, %v5884_v11  ;;  %v5906_v4 = vand.u32 2147483648, %v12235_v42  ;;  %vm12493_vm2 = vmor %vm5900_vm0, %vm5901_vm7 }
0x1e61   : > { %v6419_v12 = vsel %vm13682_vm11, %v6418_v52, %v6417_v45  ;;  %v5899_v57 = vadd.f32 %v12293_v36, %v5898_v49  ;;  %v5913_v55 = vmul.f32 %v12315_v48, %v5912_v5  ;;  %vm5916_vm10 = vweird.f32 %v12315_v48 }
0x1e62   : > { %v5921_v34 = vand.u32 2147483648, %v12241_v14  ;;  %v6401_v9 = vmul.f32 %v6385_v38, %v6377_v25  ;;  %v13683_v63 = vand.u32 2147483648, %v12232_v3  ;;  %v5919_v59 = vand.u32 2147483647, %v12241_v14 }
0x1e63   : > { %7378 = vrcp.f32 %v12256_v50  ;;  %vm13686_vm9 = vcmask 1046534   ;;  %v5903_v35 = vsel %vm12493_vm2, %v12293_v36, %v5899_v57  ;;  %v5914_v21 = vadd.f32 %v12315_v48, %v5913_v55 }
0x1e64   : > { %v5892_v51 = vor.u32 1.1754944e-38, %v13683_v63  ;;  %v6421_v15 = vsel %vm13686_vm9, %v6420_v1, %v6419_v12  ;;  %vm5915_vm3 = vweird.f32 %v12241_v14  ;;  %v6422_v58 = vrot.slane %v6401_v9, 1  ;;  %v7518_v12 = vld [vmem:[%s7614_s18] sm:$0xff] }
0x1e65   : > { %v13687_v27 = vand.u32 2147483647, %v12235_v42  ;;  %v5907_v43 = vor.u32 1.1754944e-38, %v5906_v4  ;;  %vm5917_vm0 = vmor %vm5915_vm3, %vm5916_vm10  ;;  %v5922_v16 = vor.u32 1.1754944e-38, %v5921_v34  ;;  %v5934_v36 = vand.u32 2147483647, %v12256_v50 }
0x1e66   : > { %v5893_v29 = vsel %vm12453_vm4, %v5892_v51, %v5888_v0  ;;  %v5918_v10 = vsel %vm5917_vm0, %v12315_v48, %v5914_v21  ;;  %7380 = vrcp.f32 %v12259_v32  ;;  %vm13688_vm15 = vcmask 1047559   ;;  %v7519_v34 = vld [vmem:[%s7614_s18 + $0x8] sm:$0xff]  ;;  %v7521_v21 = vld [vmem:[%s7614_s18 + $0x18] sm:$0xff] }
0x1e67   : > { %vm5905_vm1 = vcmp.eq.f32.partialorder %v13687_v27, 8.507059e+37  ;;  %v12515_v14 = vsel %vm13688_vm15, %v6422_v58, %v6421_v15  ;;  %vm5920_vm14 = vcmp.eq.f32.partialorder %v5919_v59, 8.507059e+37  ;;  %v5936_v42 = vand.u32 2147483648, %v12256_v50  ;;  %v7520_v15 = vld [vmem:[%s7614_s18 + $0x10] sm:$0xff] }
0x1e68   : > { %v5908_v2 = vsel %vm5905_vm1, %v5907_v43, %v5903_v35  ;;  %vm13689_vm13 = vcmask 130048   ;;  %v12521_v26 = vrot.slane %v12232_v3, 7  ;;  %v12524_v48 = vmul.f32 %v12158_v41, %v5893_v29 }
0x1e69   : > { %v6429_v17 = vsel %vm13689_vm13, %v12515_v14, %v6427_v56  ;;  %v5923_v61 = vsel %vm5920_vm14, %v5922_v16, %v5918_v10  ;;  %v7379_v13 = vpop.eup %7378  ;;  %v5949_v8 = vand.u32 2147483647, %v12259_v32  ;;  %v5951_v20 = vand.u32 2147483648, %v12259_v32  ;;  %v7522_v16 = vld [vmem:[%s7614_s18 + $0x20] sm:$0xff] }
0x1e6a   : > { %7382 = vrcp.f32 %v12266_v24  ;;  %v5966_v28 = vand.u32 2147483648, %v12266_v24  ;;  %vm13690_vm4 = vcmask 392192   ;;  %v12532_v54 = vmul.f32 %v12160_v44, %v5908_v2 }
0x1e6b   : > { %6738 = vmatmul.msk.f32.vlgmr.msrb.gmra.mxu3 %vm13690_vm4, %v6429_v17  ;;  %v5926_v3 = vmul.f32 %v7379_v13, %v12256_v50  ;;  %vm5930_vm6 = vweird.f32 %v12256_v50  ;;  %vm12536_vm12 = vcmp.eq.f32.partialorder %v5934_v36, 8.507059e+37  ;;  %v12541_v6 = vmul.f32 %v12163_v19, %v5923_v61  ;;  %v13714_v17 = vld [vmem:[#allocation32_spill] sm:$0xff] }
0x1e6c   : > { %v5937_v22 = vor.u32 1.1754944e-38, %v5936_v42  ;;  %vm5945_vm8 = vweird.f32 %v12259_v32  ;;  %v5964_v38 = vand.u32 2147483647, %v12266_v24  ;;  %7384 = vrcp.f32 %v12269_v7  ;;  %v7381_v44 = vpop.eup %7380 }
0x1e6d   : > { %v5927_v45 = vsub.f32 1.0, %v5926_v3  ;;  %vm5931_vm5 = vweird.f32 %v7379_v13  ;;  %v5981_v18 = vand.u32 2147483648, %v12269_v7  ;;  %7386 = vrcp.f32 %v12521_v26  ;;  %v7523_v3 = vld [vmem:[%s7614_s18 + $0x28] sm:$0xff] }
0x1e6e   : > { %v5941_v47 = vmul.f32 %v7381_v44, %v12259_v32  ;;  %vm12549_vm7 = vcmp.eq.f32.partialorder %v5949_v8, 8.507059e+37  ;;  %v5952_v31 = vor.u32 1.1754944e-38, %v5951_v20  ;;  %v12553_v52 = vor.u32 1.1754944e-38, %v5966_v28  ;;  %vm12572_vm1 = vmor %vm5930_vm6, %vm5931_vm5 }
0x1e6f   : > { %v5928_v1 = vmul.f32 %v7379_v13, %v5927_v45  ;;  %vm5946_vm11 = vweird.f32 %v7381_v44  ;;  %vm5960_vm10 = vweird.f32 %v12266_v24  ;;  %v5979_v11 = vand.u32 2147483647, %v12269_v7 }
0x1e70   : > { %v5996_v37 = vand.u32 2147483648, %v12521_v26  ;;  %v7383_v60 = vpop.eup %7382  ;;  %v5942_v49 = vsub.f32 1.0, %v5941_v47  ;;  %v12558_v5 = vor.u32 1.1754944e-38, %v5981_v18  ;;  %v5994_v25 = vand.u32 2147483647, %v12521_v26  ;;  %vm5947_vm4 = vmor %vm5945_vm8, %vm5946_vm11 }
0x1e71   : > { %v6000_v0 = vrot.slane %v7518_v12, 7  ;;  %v5929_v4 = vadd.f32 %v7379_v13, %v5928_v1  ;;  %v5956_v57 = vmul.f32 %v7383_v60, %v12266_v24  ;;  %vm5961_vm2 = vweird.f32 %v7383_v60  ;;  %v7525_v1 = vld [vmem:[%s7614_s18 + $0x38] sm:$0xff] }
0x1e72   : > { %vm12563_vm9 = vcmp.eq.f32.partialorder %v5964_v38, 8.507059e+37  ;;  %vm5975_vm3 = vweird.f32 %v12269_v7  ;;  %v6001_v9 = vrot.slane %v7519_v34, 7  ;;  %v7385_v63 = vpop.eup %7384  ;;  %v5943_v39 = vmul.f32 %v7381_v44, %v5942_v49 }
0x1e73   : > { %vm5990_vm0 = vweird.f32 %v12521_v26  ;;  %v5997_v59 = vor.u32 1.1754944e-38, %v5996_v37  ;;  %v6002_v35 = vrot.slane %v7520_v15, 7  ;;  %v6003_v58 = vrot.slane %v7521_v21, 7  ;;  %v7387_v29 = vpop.eup %7386 }
0x1e74   : > { %v5933_v27 = vsel %vm12572_vm1, %v7379_v13, %v5929_v4  ;;  %v5957_v43 = vsub.f32 1.0, %v5956_v57  ;;  %v5971_v10 = vmul.f32 %v7385_v63, %v12269_v7  ;;  %vm12582_vm15 = vcmp.eq.f32.partialorder %v5979_v11, 8.507059e+37 }
0x1e75   : > { %v6004_v36 = vrot.slane %v7522_v16, 7  ;;  %v5938_v56 = vsel %vm12536_vm12, %v5937_v22, %v5933_v27  ;;  %v5944_v2 = vadd.f32 %v7381_v44, %v5943_v39  ;;  %vm5976_vm14 = vweird.f32 %v7385_v63  ;;  %v7524_v22 = vld [vmem:[%s7614_s18 + $0x30] sm:$0xff]  ;;  %vm5962_vm12 = vmor %vm5960_vm10, %vm5961_vm2 }
0x1e76   : > { %v5986_v42 = vmul.f32 %v7387_v29, %v12521_v26  ;;  %vm12590_vm13 = vcmp.eq.f32.partialorder %v5994_v25, 8.507059e+37  ;;  %v5939_v61 = vmul.f32 %v12166_v46, %v5938_v56  ;;  %v5958_v13 = vmul.f32 %v7383_v60, %v5957_v43  ;;  %vm5977_vm8 = vmor %vm5975_vm3, %vm5976_vm14  ;;  %v7526_v43 = vld [vmem:[%s12745_s6] ss:$0 sm:$0xff] }
0x1e77   : > { %v5972_v8 = vsub.f32 1.0, %v5971_v10  ;;  %vm5991_vm6 = vweird.f32 %v7387_v29  ;;  %v5948_v20 = vsel %vm5947_vm4, %v7381_v44, %v5944_v2  ;;  %v6005_v41 = vrot.slane %v7523_v3, 7  ;;  %v13712_v2 = vld [vmem:[#allocation19_spill] sm:$0xff] }
0x1e78   : > { %v5987_v28 = vsub.f32 1.0, %v5986_v42  ;;  %v6006_v38 = vrot.slane %v7524_v22, 7  ;;  %v5953_v45 = vsel %vm12549_vm7, %v5952_v31, %v5948_v20  ;;  %v5959_v18 = vadd.f32 %v7383_v60, %v5958_v13  ;;  %vm5992_vm5 = vmor %vm5990_vm0, %vm5991_vm6  ;;  %v13713_v42 = vld [vmem:[#allocation26_spill] sm:$0xff]  ;;  %v13716_v13 = vld [vmem:[#allocation39_spill] sm:$0xff] }
0x1e79   : > { %v5973_v47 = vmul.f32 %v7385_v63, %v5972_v8  ;;  %v6007_v46 = vrot.slane %v7525_v1, 7  ;;  %v5954_v11 = vmul.f32 %v12169_v62, %v5953_v45  ;;  %v6017_v44 = vmul.f32 %v6001_v9, %v12532_v54  ;;  %v13717_v20 = vld [vmem:[#allocation22_spill] sm:$0xff] }
0x1e7a   : > { %v5988_v32 = vmul.f32 %v7387_v29, %v5987_v28  ;;  %v6018_v37 = vmul.f32 %v6002_v35, %v12541_v6  ;;  %v5963_v49 = vsel %vm5962_vm12, %v7383_v60, %v5959_v18  ;;  %v6016_v19 = vmul.f32 %v6000_v0, %v12524_v48 }
0x1e7b   : > { %v5974_v25 = vadd.f32 %v7385_v63, %v5973_v47  ;;  %v6019_v31 = vmul.f32 %v6003_v58, %v5939_v61  ;;  %v5968_v12 = vsel %vm12563_vm9, %v12553_v52, %v5963_v49  ;;  %v6020_v24 = vmul.f32 %v6004_v36, %v5954_v11  ;;  %v13715_v61 = vld [vmem:[#allocation27_spill] sm:$0xff] }
0x1e7c   : > { %v5989_v62 = vadd.f32 %v7387_v29, %v5988_v32  ;;  %v6032_v4 = vrot.slane %v6017_v44, 7  ;;  %v5969_v54 = vmul.f32 %v12175_v23, %v5968_v12  ;;  %v6034_v48 = vrot.slane %v6018_v37, 6 }
0x1e7d   : > { %v5978_v57 = vsel %vm5977_vm8, %v7385_v63, %v5974_v25  ;;  %v6036_v6 = vrot.slane %v6019_v31, 5  ;;  %vm13703_vm7 = vcmask 1041409   ;;  %v6038_v0 = vrot.slane %v6020_v24, 4 }
0x1e7e   : > { %v5983_v52 = vsel %vm12582_vm15, %v12558_v5, %v5978_v57  ;;  %v5993_v60 = vsel %vm5992_vm5, %v7387_v29, %v5989_v62  ;;  %v6033_v7 = vsel %vm13703_vm7, %v6032_v4, %v6016_v19  ;;  %v6021_v34 = vmul.f32 %v6005_v41, %v5969_v54  ;;  %v6049_v29 = vpop.permute.xlu2 %6048  ;;  %v13718_v41 = vld [vmem:[#allocation44_spill] sm:$0xff] }
0x1e7f   : > { %v5984_v55 = vmul.f32 %v12181_v30, %v5983_v52  ;;  %v5998_v23 = vsel %vm12590_vm13, %v5997_v59, %v5993_v60  ;;  %vm13704_vm11 = vcmask 1042434   ;;  %vm13705_vm10 = vcmask 1043459  }
0x1e80   : > { %v6035_v9 = vsel %vm13704_vm11, %v6034_v48, %v6033_v7  ;;  %v5999_v26 = vmul.f32 %v12185_v33, %v5998_v23  ;;  %vm13706_vm2 = vcmask 1044484   ;;  %v6040_v5 = vrot.slane %v6021_v34, 3  ;;  %v13719_v23 = vld [vmem:[#allocation37_spill] sm:$0xff] }
0x1e81   : > { %v6037_v63 = vsel %vm13705_vm10, %v6036_v6, %v6035_v9  ;;  %v6022_v51 = vmul.f32 %v6006_v38, %v5984_v55  ;;  %vm13707_vm9 = vcmask 1045509   ;;  %vm13708_vm3 = vcmask 1046534   ;;  %v13721_v9 = vld [vmem:[#allocation35_spill] sm:$0xff] }
0x1e82   : > { %v6039_v39 = vsel %vm13706_vm2, %v6038_v0, %v6037_v63  ;;  %v6023_v15 = vmul.f32 %v6007_v46, %v5999_v26  ;;  %vm13709_vm1 = vcmask 1047559   ;;  %vm13710_vm0 = vcmask 130048   ;;  %v6497_v26 = vpop.permute.xlu0 %6496 }
0x1e83   : > { %v6041_v35 = vsel %vm13707_vm9, %v6040_v5, %v6039_v39  ;;  %v6042_v21 = vrot.slane %v6022_v51, 2  ;;  %vm13711_vm15 = vcmask 392192   ;;  %vm13720_vm11 = vmmov %vm13710_vm0  ;;  %vm13722_vm10 = vcmask 261120  }
0x1e84   : > { %v6044_v58 = vrot.slane %v6023_v15, 1  ;;  %vm6514_vm2 = vcmask 523264   ;;  %vm13723_vm9 = vmmov %vm13711_vm15  ;;  %v13724_v15 = vld [vmem:[#allocation38_spill] sm:$0xff] }
0x1e85   : > { %v6043_v30 = vsel %vm13708_vm3, %v6042_v21, %v6041_v35  ;;  %vm6516_vm3 = vcmask 654336  }
0x1e86   : > { %v6045_v59 = vsel %vm13709_vm1, %v6044_v58, %v6043_v30  ;;  %v6494_v55 = vpop.permute.xlu2 %6493  ;;  %vm6518_vm1 = vcmask 785408  }
0x1e87   : > { %v6051_v27 = vsel %vm13710_vm0, %v6045_v59, %v6049_v29  ;;  %vm6520_vm0 = vcmask 916480  }
0x1e88   : > { %6736 = vmatmul.msk.f32.vlgmr.msrb.gmra.mxu2 %vm13711_vm15, %v6051_v27  ;;  %v13725_v27 = vld [vmem:[#allocation23_spill] sm:$0xff]  ;;  %vm13731_vm15 = vmmov %vm13720_vm11 }
0x1e8a   : > { %v6506_v58 = vpop.permute.xlu0 %6505 }
0x1e8e   : > { %v6503_v35 = vpop.permute.xlu2 %6502 }
0x1eee   : > { %v6450_v50 = vpop.f32.mrf.mxu3 }
0x1eef   : > { %v6451_v16 = vadd.f32 %v7526_v43, %v6450_v50 }
0x1ef1   : > { %v6739_v28 = vmul.f32 -1.442695, %v6451_v16 }
0x1f0b   : > { %v6072_v33 = vpop.f32.mrf.mxu2 }
0x1f0c   : > { %v6073_v10 = vadd.f32 %v7526_v43, %v6072_v33  ;;  %v13726_v33 = vld [vmem:[#allocation30_spill] sm:$0xff]  ;;  %v13727_v43 = vld [vmem:[#allocation36_spill] sm:$0xff] }
0x1f0e   : > { %7388 = vtanh.f32 %v6073_v10  ;;  %v6737_v8 = vmul.f32 -1.442695, %v6073_v10  ;;  %v13728_v10 = vld [vmem:[#allocation46_spill] sm:$0xff] }
0x1f0f   : > { %7390 = vtanh.f32 %v6451_v16 }
0x1f10   : > { %7392 = vpow2.f32 %v6737_v8 }
0x1f11   : > { %7394 = vpow2.f32 %v6739_v28 }
0x1f14   : > { %v7389_v36 = vpop.eup %7388 }
0x1f15   : > { %6097 = vrot.lane.b32.xlu1 %v7389_v36, %s7536_s12  ;;  %v7391_v56 = vpop.eup %7390 }
0x1f16   : > { %v7393_v3 = vpop.eup %7392 }
0x1f17   : > { %v6078_v22 = vadd.f32 1.0, %v7393_v3 }
0x1f19   : > { %7396 = vrcp.f32 %v6078_v22  ;;  %v6090_v37 = vand.u32 2147483648, %v6078_v22  ;;  %vm6084_vm13 = vweird.f32 %v6078_v22  ;;  %v6088_v49 = vand.u32 2147483647, %v6078_v22 }
0x1f1b   : > { %v6091_v31 = vor.u32 1.1754944e-38, %v6090_v37  ;;  %vm6089_vm6 = vcmp.eq.f32.partialorder %v6088_v49, 8.507059e+37 }
0x1f1d   : > { %6475 = vrot.lane.b32.xlu1 %v7391_v56, %s7536_s12  ;;  %v13729_v56 = vld [vmem:[#allocation45_spill] sm:$0xff] }
0x1f25   : > { %6490 = vrot.lane.b32.xlu1 %v13712_v2, %s7541_s23 }
0x1f2d   : > { %6499 = vrot.lane.b32.xlu1 %v13713_v42, %s7536_s12 }
0x1f35   : > { %6508 = vrot.lane.b32.xlu1 %v6045_v59, %s7542_s24 }
0x1f3d   : > { %6528 = vrot.lane.b32.xlu1 %v13714_v17, %s7539_s20  ;;  %s6703_s20 = sshll.u32 %s6696_s30, 1 }
0x1f3e   : > { %p315_p4 = scmp.lt.s32.totalorder %s6703_s20, 3 }
0x1f40   : > { %s13744_s20 = smov (!%p315_p4, %s6703_s20), 3 }
0x1f41   : > { %s6704_s30 = sshll.u32 %s13744_s20, 3 }
0x1f42   : > { %s12684_s27 = scalar_lea.vmem %s12746_s7, %s6704_s30 }
0x1f45   : > { %6537 = vrot.lane.b32.xlu1 %v11923_v53, %s7538_s19  ;;  %v7395_v53 = vpop.eup %7394 }
0x1f46   : > { %v6456_v38 = vadd.f32 1.0, %v7395_v53  ;;  %v7397_v45 = vpop.eup %7396 }
0x1f47   : > { %v6080_v18 = vmul.f32 %v7397_v45, %v6078_v22  ;;  %vm6085_vm14 = vweird.f32 %v7397_v45 }
0x1f48   : > { %7398 = vrcp.f32 %v6456_v38  ;;  %vm6086_vm4 = vmor %vm6084_vm13, %vm6085_vm14  ;;  %v6468_v54 = vand.u32 2147483648, %v6456_v38  ;;  %vm6462_vm8 = vweird.f32 %v6456_v38  ;;  %v6466_v57 = vand.u32 2147483647, %v6456_v38 }
0x1f49   : > { %v6081_v47 = vsub.f32 1.0, %v6080_v18  ;;  %vm13732_vm14 = vmmov %vm13722_vm10  ;;  %v13734_v18 = vld [vmem:[#allocation41_spill] sm:$0xff] }
0x1f4a   : > { %v6469_v6 = vor.u32 1.1754944e-38, %v6468_v54  ;;  %vm6467_vm7 = vcmp.eq.f32.partialorder %v6466_v57, 8.507059e+37  ;;  %vm13733_vm13 = vmmov %vm13723_vm9 }
0x1f4b   : > { %v6082_v46 = vmul.f32 %v7397_v45, %v6081_v47 }
0x1f4d   : > { %6553 = vrot.lane.b32.xlu1 %v13715_v61, %s7536_s12  ;;  %v6083_v32 = vadd.f32 %v7397_v45, %v6082_v46  ;;  %v6526_v61 = vpop.permute.xlu0 %6525 }
0x1f4e   : > { %v7399_v1 = vpop.eup %7398 }
0x1f4f   : > { %v6458_v11 = vmul.f32 %v7399_v1, %v6456_v38  ;;  %v6087_v25 = vsel %vm6086_vm4, %v7397_v45, %v6083_v32  ;;  %vm6463_vm12 = vweird.f32 %v7399_v1  ;;  %vm13735_vm4 = vmmov %vm13722_vm10 }
0x1f50   : > { %v12658_v62 = vsel %vm6089_vm6, %v6091_v31, %v6087_v25  ;;  %vm6464_vm5 = vmor %vm6462_vm8, %vm6463_vm12 }
0x1f51   : > { %v6459_v44 = vsub.f32 1.0, %v6458_v11  ;;  %v6095_v50 = vmul.f32 %v12658_v62, %v13728_v10  ;;  %vm13737_vm6 = vmmov %vm13735_vm4 }
0x1f52   : > { %vm13738_vm12 = vmmov %vm13735_vm4 }
0x1f53   : > { %v6460_v19 = vmul.f32 %v7399_v1, %v6459_v44  ;;  %vm13740_vm8 = vmmov %vm13735_vm4 }
0x1f55   : > { %6562 = vrot.lane.b32.xlu1 %v13716_v13, %s7536_s12  ;;  %v6461_v4 = vadd.f32 %v7399_v1, %v6460_v19  ;;  %v6535_v53 = vpop.permute.xlu0 %6534  ;;  %v13736_v19 = vld [vmem:[#allocation24_spill] sm:$0xff] }
0x1f57   : > { %v6465_v48 = vsel %vm6464_vm5, %v7399_v1, %v6461_v4 }
0x1f58   : > { %v12662_v60 = vsel %vm6467_vm7, %v6469_v6, %v6465_v48 }
0x1f5d   : > { %6577 = vrot.lane.b32.xlu1 %v13717_v20, %s7536_s12  ;;  %v13730_v20 = vld [vmem:[#allocation33_spill] sm:$0xff]  ;;  %v6551_v44 = vpop.permute.xlu0 %6550 }
0x1f65   : > { %6586 = vrot.lane.b32.xlu1 %v13718_v41, %s7536_s12 }
0x1f87   : > { %v6098_v12 = vpop.permute.xlu1 %6097 }
0x1f88   : > { %v6100_v24 = vmul.f32 %v6098_v12, %v12658_v62 }
0x1f8a   : > { %6102 = vrot.lane.b32.xlu2 %v6100_v24, %s7537_s13  ;;  %v6560_v24 = vpop.permute.xlu0 %6559 }
0x1f8f   : > { %v6476_v52 = vpop.permute.xlu1 %6475 }
0x1f90   : > { %v6478_v7 = vmul.f32 %v6476_v52, %v12662_v60 }
0x1f92   : > { %6480 = vrot.lane.b32.xlu2 %v6478_v7, %s7537_s13  ;;  %v6575_v6 = vpop.permute.xlu0 %6574 }
0x1f97   : > { %v6491_v0 = vpop.permute.xlu1 %6490 }
0x1f98   : > { %v6511_v34 = vsel %vm13720_vm11, %v13719_v23, %v6491_v0 }
0x1f99   : > { %v6512_v63 = vsel %vm13722_vm10, %v6511_v34, %v6494_v55  ;;  %v13739_v55 = vld [vmem:[#allocation25_spill] sm:$0xff] }
0x1f9a   : > { %6522 = vrot.lane.b32.xlu2 %v13721_v9, %s7541_s23  ;;  %v6513_v39 = vsel %vm13723_vm9, %v6512_v63, %v6497_v26 }
0x1f9f   : > { %v6500_v51 = vpop.permute.xlu1 %6499 }
0x1fa0   : > { %v6515_v5 = vsel %vm6514_vm2, %v6513_v39, %v6500_v51 }
0x1fa1   : > { %v6517_v21 = vsel %vm6516_vm3, %v6515_v5, %v6503_v35 }
0x1fa2   : > { %6531 = vrot.lane.b32.xlu2 %v13724_v15, %s7536_s12  ;;  %v6519_v29 = vsel %vm6518_vm1, %v6517_v21, %v6506_v58 }
0x1fa7   : > { %v6509_v30 = vpop.permute.xlu1 %6508 }
0x1fa8   : > { %v6521_v59 = vsel %vm6520_vm0, %v6519_v29, %v6509_v30 }
0x1fa9   : > { %6598 = vst [vmem:[%s12684_s27] sm:$0xff] %v6521_v59 }
0x1faa   : > { %6540 = vrot.lane.b32.xlu2 %v12515_v14, %s7542_s24  ;;  %v6473_v14 = vmul.f32 %v12662_v60, %v13729_v56 }
0x1fb2   : > { %6556 = vrot.lane.b32.xlu2 %v13725_v27, %s7538_s19 }
0x1fba   : > { %6565 = vrot.lane.b32.xlu2 %v12075_v40, %s7538_s19  ;;  %v6529_v40 = vpop.permute.xlu1 %6528 }
0x1fc2   : > { %6580 = vrot.lane.b32.xlu2 %v13726_v33, %s7538_s19  ;;  %v6538_v41 = vpop.permute.xlu1 %6537 }
0x1fca   : > { %6589 = vrot.lane.b32.xlu2 %v13727_v43, %s7538_s19  ;;  %v6554_v11 = vpop.permute.xlu1 %6553 }
0x1fcb   : > { %v6568_v37 = vsel %vm13735_vm4, %v6551_v44, %v6554_v11 }
0x1fd2   : > { %v6563_v12 = vpop.permute.xlu1 %6562 }
0x1fd3   : > { %v6571_v4 = vsel %vm13737_vm6, %v6560_v24, %v6563_v12 }
0x1fda   : > { %v6578_v48 = vpop.permute.xlu1 %6577 }
0x1fdb   : > { %v6592_v52 = vsel %vm13738_vm12, %v6575_v6, %v6578_v48 }
0x1fe2   : > { %v6587_v51 = vpop.permute.xlu1 %6586 }
0x1fe4   : > { %v6103_v16 = vpop.permute.xlu2 %6102 }
0x1fe5   : > { %v6105_v36 = vadd.f32 %v6103_v16, %v6095_v50 }
0x1fe7   : > { %7400 = vtanh.f32 %v6105_v36 }
0x1fec   : > { %v6481_v2 = vpop.permute.xlu2 %6480 }
0x1fed   : > { %v7401_v42 = vpop.eup %7400  ;;  %v6483_v17 = vadd.f32 %v6481_v2, %v6473_v14 }
0x1fee   : > { %6108 = vrot.lane.b32.xlu0 %v7401_v42, %s7536_s12 }
0x1fef   : > { %7402 = vtanh.f32 %v6483_v17 }
0x1ff4   : > { %v6523_v13 = vpop.permute.xlu2 %6522 }
0x1ff5   : > { %v7403_v8 = vpop.eup %7402  ;;  %v6543_v28 = vsel %vm13731_vm15, %v13730_v20, %v6523_v13 }
0x1ff6   : > { %6486 = vrot.lane.b32.xlu0 %v7403_v8, %s7536_s12  ;;  %v6544_v3 = vsel %vm13732_vm14, %v6543_v28, %v6526_v61  ;;  %s6742_s12 = sshll.u32 %s13744_s20, 4 }
0x1ff7   : > { %v6545_v38 = vsel %vm13733_vm13, %v6544_v3, %v6529_v40  ;;  %s325_s9 = scalar_lea.vmem %s12747_s8, %s6742_s12 }
0x1ffc   : > { %v6532_v22 = vpop.permute.xlu2 %6531 }
0x1ffd   : > { %v6546_v45 = vsel %vm6514_vm2, %v6545_v38, %v6532_v22 }
0x1ffe   : > { %6583 = vrot.lane.b32.xlu0 %v13734_v18, %s7537_s13  ;;  %v6547_v47 = vsel %vm6516_vm3, %v6546_v45, %v6535_v53 }
0x1fff   : > { %v6548_v46 = vsel %vm6518_vm1, %v6547_v47, %v6538_v41 }
0x2004   : > { %v6541_v1 = vpop.permute.xlu2 %6540 }
0x2005   : > { %v6549_v32 = vsel %vm6520_vm0, %v6548_v46, %v6541_v1 }
0x2006   : > { %6599 = vst [vmem:[%s12684_s27 + $0x8] sm:$0xff] %v6549_v32 }
0x200c   : > { %v6557_v49 = vpop.permute.xlu2 %6556 }
0x200d   : > { %v6569_v25 = vsel %vm6514_vm2, %v6568_v37, %v6557_v49 }
0x200e   : > { %v6570_v31 = vsel %vm6518_vm1, %v6569_v25, %v13736_v19 }
0x200f   : > { %6600 = vst [vmem:[%s325_s9] sm:$0xff] %v6570_v31 }
0x2014   : > { %v6566_v54 = vpop.permute.xlu2 %6565 }
0x2015   : > { %v6572_v57 = vsel %vm6514_vm2, %v6571_v4, %v6566_v54 }
0x201c   : > { %v6581_v7 = vpop.permute.xlu2 %6580 }
0x201d   : > { %v6593_v0 = vsel %vm6514_vm2, %v6592_v52, %v6581_v7 }
0x201e   : > { %v6594_v23 = vsel %vm6518_vm1, %v6593_v0, %v13739_v55 }
0x201f   : > { %6602 = vst [vmem:[%s325_s9 + $0x10] sm:$0xff] %v6594_v23 }
0x2024   : > { %v6590_v5 = vpop.permute.xlu2 %6589 }
0x2060   : > { %v6109_v34 = vpop.permute.xlu0 %6108 }
0x2061   : > { %v6111_v9 = vmul.f32 %v6109_v34, %v12658_v62 }
0x2063   : > { %v6573_v26 = vsel %vm6518_vm1, %v6572_v57, %v6111_v9 }
0x2064   : > { %6601 = vst [vmem:[%s325_s9 + $0x8] sm:$0xff] %v6573_v26 }
0x2068   : > { %v6487_v63 = vpop.permute.xlu0 %6486 }
0x2069   : > { %v6489_v15 = vmul.f32 %v6487_v63, %v12662_v60 }
0x2070   : > { %v6584_v39 = vpop.permute.xlu0 %6583 }
0x2071   : > { %v6595_v35 = vsel %vm13740_vm8, %v6584_v39, %v6587_v51 }
0x2072   : > { %v6596_v21 = vsel %vm6514_vm2, %v6595_v35, %v6590_v5 }
0x2073   : > { %v6597_v58 = vsel %vm6518_vm1, %v6596_v21, %v6489_v15 }
0x2074   : > { %6603 = vst [vmem:[%s325_s9 + $0x18] sm:$0xff] %v6597_v58 }
0x2075 PF: > { %s21_s29 = sadd.s32 1, %s7533_s29  }
0x2076   : > { %p18_p5 = scmp.ge.s32.totalorder %s21_s29, 4  }
0x2078   :  { %20 = sbr.rel (!%p18_p5) target bundleno = 3 (0x3), region = 90 }

</bundles_post_ra>
